<compile_context>
chip_gen: v6e
topology: v6e:2x2x1
jax: 0.10.0
libtpu: 0.0.40
codegen_flags: <defaults>
</compile_context>

<pallas_src>
import functools

import jax
import jax.numpy as jnp
from jax.experimental import pallas as pl
from jax.experimental.pallas import tpu as pltpu


# ----------------------------------------------------------------------------
# Kernels
# ----------------------------------------------------------------------------
def _matmul_bn_act_kernel(x_ref, w_ref, s_ref, b_ref, o_ref, *, apply_relu):
    """Fused (M, K) @ (K, C) conv matmul + folded BN + optional ReLU."""
    acc = jnp.dot(x_ref[...], w_ref[...], preferred_element_type=jnp.float32)
    y = acc * s_ref[...] + b_ref[...]          # folded BN, hoisted (1, C) bcast
    if apply_relu:
        y = jnp.maximum(y, 0.0)
    o_ref[...] = y


def _basic_block_kernel(t1_ref, w1_ref, s1_ref, b1_ref,
                        w2_ref, s2_ref, b2_ref,
                        xs_ref, wd_ref, sd_ref, bd_ref,
                        o_ref, mid_ref):
    """Fused BasicBlock (stride-2 conv1 + BN + ReLU, stride-1 conv2 + BN,
    1x1 stride-2 downsample + BN, residual add, ReLU)."""
    nb, hp, wp, cm = mid_ref.shape
    ho, wo = hp - 2, wp - 2
    mb = nb * ho * wo

    # conv1 (3x3, stride 2): taps pre-gathered wrapper-side ->
    # single (mb, 9*Cin) @ (9*Cin, Cm) matmul.
    acc1 = jnp.dot(t1_ref[...], w1_ref[...], preferred_element_type=jnp.float32)
    y = jnp.maximum(acc1 * s1_ref[...] + b1_ref[...], 0.0)

    # Re-pad the intermediate in VMEM for conv2.  Only the halo border is
    # zeroed -- the interior is overwritten every grid step (no full re-zero,
    # and correct under megacore/"parallel" sharding of the grid axis).
    mid_ref[:, 0:1, :, :] = jnp.zeros((nb, 1, wp, cm), jnp.float32)
    mid_ref[:, ho + 1:hp, :, :] = jnp.zeros((nb, 1, wp, cm), jnp.float32)
    mid_ref[:, :, 0:1, :] = jnp.zeros((nb, hp, 1, cm), jnp.float32)
    mid_ref[:, :, wo + 1:wp, :] = jnp.zeros((nb, hp, 1, cm), jnp.float32)
    mid_ref[:, 1:1 + ho, 1:1 + wo, :] = y.reshape(nb, ho, wo, cm)
    mp = mid_ref[...]

    # conv2 (3x3, stride 1): fold the 9 taps into the contraction dim and do
    # ONE matmul instead of 9 tiny ones.
    taps2 = jnp.concatenate(
        [mp[:, kh:kh + ho, kw:kw + wo, :].reshape(mb, cm)
         for kh in range(3) for kw in range(3)], axis=-1)
    acc2 = jnp.dot(taps2, w2_ref[...], preferred_element_type=jnp.float32)

    # Downsample residual branch: 1x1 stride-2 conv + BN, fused in-kernel.
    res = jnp.dot(xs_ref[...], wd_ref[...], preferred_element_type=jnp.float32)
    res = res * sd_ref[...] + bd_ref[...]

    # BN2 + residual + ReLU directly in the flat (mb, Cout) layout -- no
    # epilogue reshapes.
    o_ref[...] = jnp.maximum(acc2 * s2_ref[...] + b2_ref[...] + res, 0.0)


def _classifier_kernel(x_ref, w1_ref, b1_ref, w2_ref, b2_ref, w3_ref, b3_ref,
                       logsm_ref, sm_ref):
    """Fused classifier: three 1x1 convs (+bias, ReLU) + log_softmax/softmax."""
    h = jnp.dot(x_ref[...], w1_ref[...], preferred_element_type=jnp.float32)
    h = jnp.maximum(h + b1_ref[...], 0.0)
    h = jnp.dot(h, w2_ref[...], preferred_element_type=jnp.float32)
    h = jnp.maximum(h + b2_ref[...], 0.0)
    logits = jnp.dot(h, w3_ref[...], preferred_element_type=jnp.float32)
    logits = logits + b3_ref[...]
    m = jnp.max(logits, axis=-1, keepdims=True)
    e = jnp.exp(logits - m)
    se = jnp.sum(e, axis=-1, keepdims=True)
    logsm_ref[...] = (logits - m) - jnp.log(se)
    sm_ref[...] = e / se


# ----------------------------------------------------------------------------
# Wrappers (layout plumbing only -- all compute is inside the kernels)
# ----------------------------------------------------------------------------
def _extract_taps(x_nhwc, k, stride, pad):
    """im2col: (N, H, W, C) -> (N*Ho*Wo, k*k*C) with taps folded into the
    contraction dim (kh-major, kw, then C -- matches HWIO weight reshape)."""
    n, h, w, c = x_nhwc.shape
    ho = (h + 2 * pad - k) // stride + 1
    wo = (w + 2 * pad - k) // stride + 1
    xp = jnp.pad(x_nhwc, ((0, 0), (pad, pad), (pad, pad), (0, 0)))
    taps = jnp.concatenate(
        [xp[:, kh:kh + stride * (ho - 1) + 1:stride,
               kw:kw + stride * (wo - 1) + 1:stride, :]
         for kh in range(k) for kw in range(k)], axis=-1)
    return taps.reshape(n * ho * wo, k * k * c), ho, wo


def _grid_split(m, n, g):
    """Usable batch-block count for an (m = n*ho*wo)-row problem."""
    if g > 1 and n % g == 0 and (m // g) % 8 == 0:
        return g
    return 1


def _conv_bn_relu(x_nhwc, w_hwio, scale, bias, *, k, stride, pad, g):
    n = x_nhwc.shape[0]
    cout = w_hwio.shape[-1]
    taps, ho, wo = _extract_taps(x_nhwc, k, stride, pad)
    m, kk = taps.shape
    ge = _grid_split(m, n, g)
    mb = m // ge
    out = pl.pallas_call(
        functools.partial(_matmul_bn_act_kernel, apply_relu=True),
        out_shape=jax.ShapeDtypeStruct((m, cout), jnp.float32),
        grid=(ge,),
        in_specs=[pl.BlockSpec((mb, kk), lambda i: (i, 0)),
                  pl.BlockSpec((kk, cout), lambda i: (0, 0)),
                  pl.BlockSpec((1, cout), lambda i: (0, 0)),
                  pl.BlockSpec((1, cout), lambda i: (0, 0))],
        out_specs=pl.BlockSpec((mb, cout), lambda i: (i, 0)),
        compiler_params=pltpu.CompilerParams(
            dimension_semantics=("parallel",)),
    )(taps, w_hwio.reshape(kk, cout), scale.reshape(1, cout),
      bias.reshape(1, cout))
    return out.reshape(n, ho, wo, cout)


def _basic_block(x_nhwc, p, g):
    n, h, w, cin = x_nhwc.shape
    cmid = p["w1"].shape[-1]
    cout = p["w2"].shape[-1]
    taps1, ho, wo = _extract_taps(x_nhwc, 3, 2, 1)            # (m, 9*cin)
    xs = x_nhwc[:, ::2, ::2, :].reshape(n * ho * wo, cin)     # 1x1 s2 input
    m = n * ho * wo
    ge = _grid_split(m, n, g)
    mb, nb = m // ge, n // ge
    out = pl.pallas_call(
        _basic_block_kernel,
        out_shape=jax.ShapeDtypeStruct((m, cout), jnp.float32),
        grid=(ge,),
        in_specs=[pl.BlockSpec((mb, 9 * cin), lambda i: (i, 0)),
                  pl.BlockSpec((9 * cin, cmid), lambda i: (0, 0)),
                  pl.BlockSpec((1, cmid), lambda i: (0, 0)),
                  pl.BlockSpec((1, cmid), lambda i: (0, 0)),
                  pl.BlockSpec((9 * cmid, cout), lambda i: (0, 0)),
                  pl.BlockSpec((1, cout), lambda i: (0, 0)),
                  pl.BlockSpec((1, cout), lambda i: (0, 0)),
                  pl.BlockSpec((mb, cin), lambda i: (i, 0)),
                  pl.BlockSpec((cin, cout), lambda i: (0, 0)),
                  pl.BlockSpec((1, cout), lambda i: (0, 0)),
                  pl.BlockSpec((1, cout), lambda i: (0, 0))],
        out_specs=pl.BlockSpec((mb, cout), lambda i: (i, 0)),
        # TODO(synk): at real ResNet channel/spatial sizes add an H-tile grid
        # axis so per-step blocks stay inside v7x's 64 MiB VMEM.
        scratch_shapes=[pltpu.VMEM((nb, ho + 2, wo + 2, cmid), jnp.float32)],
        compiler_params=pltpu.CompilerParams(
            dimension_semantics=("parallel",)),
    )(taps1, p["w1"].reshape(9 * cin, cmid), p["s1"].reshape(1, cmid),
      p["b1"].reshape(1, cmid), p["w2"].reshape(9 * cmid, cout),
      p["s2"].reshape(1, cout), p["b2"].reshape(1, cout),
      xs, p["wd"].reshape(cin, cout), p["sd"].reshape(1, cout),
      p["bd"].reshape(1, cout))
    return out.reshape(n, ho, wo, cout)


def _classifier(x_nhwc, c):
    n, h, w, cin = x_nhwc.shape
    m = n * h * w
    d = c["w1"].shape[-1]
    ncls = c["w3"].shape[-1]
    xf = x_nhwc.reshape(m, cin)
    logsm, sm = pl.pallas_call(
        _classifier_kernel,
        out_shape=(jax.ShapeDtypeStruct((m, ncls), jnp.float32),
                   jax.ShapeDtypeStruct((m, ncls), jnp.float32)),
        grid=(1,),
        in_specs=[pl.BlockSpec((m, cin), lambda i: (0, 0)),
                  pl.BlockSpec((cin, d), lambda i: (0, 0)),
                  pl.BlockSpec((1, d), lambda i: (0, 0)),
                  pl.BlockSpec((d, d), lambda i: (0, 0)),
                  pl.BlockSpec((1, d), lambda i: (0, 0)),
                  pl.BlockSpec((d, ncls), lambda i: (0, 0)),
                  pl.BlockSpec((1, ncls), lambda i: (0, 0))],
        out_specs=(pl.BlockSpec((m, ncls), lambda i: (0, 0)),
                   pl.BlockSpec((m, ncls), lambda i: (0, 0))),
        compiler_params=pltpu.CompilerParams(
            dimension_semantics=("arbitrary",)),
    )(xf, c["w1"], c["b1"].reshape(1, d), c["w2"], c["b2"].reshape(1, d),
      c["w3"], c["b3"].reshape(1, ncls))
    return logsm.reshape(n, h, w, ncls), sm.reshape(n, h, w, ncls)


def _default_batch_blocks():
    """v7x has 2 TensorCores/chip -> keep a 2-way 'parallel' batch axis.
    v5e/v6e are single-TC -> collapse the batch into the matmul M dim."""
    try:
        kind = jax.devices()[0].device_kind.lower()
    except Exception:
        return 1
    return 2 if "v7" in kind else 1


@functools.partial(jax.jit, static_argnames=("g",))
def simple_rsn_forward(x_nchw, params, g=1):
    """SimpleRSN forward.  x_nchw: (N, 3, H, W) f32 with H, W divisible by 8.
    Returns {'log_softmax', 'softmax'} of shape (N, n_classes, H/8, W/8)."""
    x = jnp.transpose(x_nchw, (0, 2, 3, 1)).astype(jnp.float32)  # NCHW -> NHWC

    y = _conv_bn_relu(x, params["l0"]["w"], params["l0"]["s"],
                      params["l0"]["b"], k=7, stride=1, pad=3, g=g)
    y = _conv_bn_relu(y, params["l1"]["w"], params["l1"]["s"],
                      params["l1"]["b"], k=3, stride=1, pad=1, g=g)
    y = _basic_block(y, params["l2"], g)
    y = _basic_block(y, params["l3"], g)
    y = _basic_block(y, params["l4"], g)
    logsm, sm = _classifier(y, params["cls"])
    return {"log_softmax": jnp.transpose(logsm, (0, 3, 1, 2)),
            "softmax": jnp.transpose(sm, (0, 3, 1, 2))}


# ----------------------------------------------------------------------------
# Pure-JAX reference (lax convs) for a correctness sanity check
# ----------------------------------------------------------------------------
def _reference_forward(x_nchw, P):
    hp = jax.lax.Precision.HIGHEST

    def conv(x, w, stride, pad):
        dn = jax.lax.conv_dimension_numbers(x.shape, w.shape,
                                            ("NHWC", "HWIO", "NHWC"))
        return jax.lax.conv_general_dilated(
            x, w, (stride, stride), [(pad, pad), (pad, pad)],
            dimension_numbers=dn, precision=hp)

    x = jnp.transpose(x_nchw, (0, 2, 3, 1)).astype(jnp.float32)
    y = jnp.maximum(conv(x, P["l0"]["w"], 1, 3) * P["l0"]["s"] + P["l0"]["b"], 0.0)
    y = jnp.maximum(conv(y, P["l1"]["w"], 1, 1) * P["l1"]["s"] + P["l1"]["b"], 0.0)
    for name in ("l2", "l3", "l4"):
        p = P[name]
        h = jnp.maximum(conv(y, p["w1"], 2, 1) * p["s1"] + p["b1"], 0.0)
        h = conv(h, p["w2"], 1, 1) * p["s2"] + p["b2"]
        r = conv(y, p["wd"], 2, 0) * p["sd"] + p["bd"]
        y = jnp.maximum(h + r, 0.0)
    c = P["cls"]
    h = jnp.maximum(jnp.einsum("nhwc,cd->nhwd", y, c["w1"], precision=hp) + c["b1"], 0.0)
    h = jnp.maximum(jnp.einsum("nhwc,cd->nhwd", h, c["w2"], precision=hp) + c["b2"], 0.0)
    logits = jnp.einsum("nhwc,cd->nhwd", h, c["w3"], precision=hp) + c["b3"]
    logsm = jax.nn.log_softmax(logits, axis=-1)
    sm = jax.nn.softmax(logits, axis=-1)
    return jnp.transpose(logsm, (0, 3, 1, 2)), jnp.transpose(sm, (0, 3, 1, 2))


# ----------------------------------------------------------------------------
# Main
# ----------------------------------------------------------------------------
if __name__ == "__main__":
    CHANNELS = (16, 32, 64, 128)
    N_IN, N_CLASSES = 3, 2
    N, H, W = 2, 16, 16

    key = jax.random.PRNGKey(0)
    keys = jax.random.split(key, 16)
    x = jax.random.normal(keys[0], (N, N_IN, H, W), dtype=jnp.float32)

    def conv_w(k, ksz, cin, cout):
        std = (2.0 / (ksz * ksz * cin)) ** 0.5       # kaiming-like
        return std * jax.random.normal(k, (ksz, ksz, cin, cout), jnp.float32)

    def bn_fold(c, salt):                             # eval-mode BN folded
        ar = jnp.arange(c, dtype=jnp.float32)
        gamma = 1.0 + 0.05 * jnp.cos(ar * 0.37 + salt)
        beta = 0.02 * jnp.sin(ar * 0.23 + salt)
        mean = 0.05 * jnp.sin(ar * 0.11 + salt)
        var = 1.0 + 0.1 * jnp.cos(ar * 0.19 + salt) ** 2
        s = gamma / jnp.sqrt(var + 1e-5)
        return s, beta - mean * s

    def block_params(k1, k2, k3, cin, cout, salt):
        s1, b1 = bn_fold(cout, salt)
        s2, b2 = bn_fold(cout, salt + 0.5)
        sd, bd = bn_fold(cout, salt + 0.25)
        return {"w1": conv_w(k1, 3, cin, cout), "s1": s1, "b1": b1,
                "w2": conv_w(k2, 3, cout, cout), "s2": s2, "b2": b2,
                "wd": conv_w(k3, 1, cin, cout), "sd": sd, "bd": bd}

    P = {}
    s, b = bn_fold(CHANNELS[0], 0.0)
    P["l0"] = {"w": conv_w(keys[1], 7, N_IN, CHANNELS[0]), "s": s, "b": b}
    s, b = bn_fold(CHANNELS[1], 1.0)
    P["l1"] = {"w": conv_w(keys[2], 3, CHANNELS[0], CHANNELS[1]), "s": s, "b": b}
    P["l2"] = block_params(keys[3], keys[4], keys[5], CHANNELS[1], CHANNELS[1], 2.0)
    P["l3"] = block_params(keys[6], keys[7], keys[8], CHANNELS[1], CHANNELS[2], 3.0)
    P["l4"] = block_params(keys[9], keys[10], keys[11], CHANNELS[2], CHANNELS[3], 4.0)

    d = CHANNELS[3]
    P["cls"] = {
        "w1": (2.0 / d) ** 0.5 * jax.random.normal(keys[12], (d, d), jnp.float32),
        "b1": jnp.zeros((d,), jnp.float32),   # weights_init zeroes conv biases
        "w2": (2.0 / d) ** 0.5 * jax.random.normal(keys[13], (d, d), jnp.float32),
        "b2": jnp.zeros((d,), jnp.float32),
        "w3": (2.0 / d) ** 0.5 * jax.random.normal(keys[14], (d, N_CLASSES), jnp.float32),
        "b3": jnp.zeros((N_CLASSES,), jnp.float32),
    }

    g = _default_batch_blocks()
    out = simple_rsn_forward(x, P, g=g)
    jax.block_until_ready(out)

    ref_logsm, ref_sm = _reference_forward(x, P)
    assert out["log_softmax"].shape == (N, N_CLASSES, H // 8, W // 8)
    assert out["softmax"].shape == (N, N_CLASSES, H // 8, W // 8)
    err = max(float(jnp.max(jnp.abs(out["log_softmax"] - ref_logsm))),
              float(jnp.max(jnp.abs(out["softmax"] - ref_sm))))
    assert err < 2e-2, f"mismatch vs reference: {err}"

    print("KERNEL_OK")
</pallas_src>

<mosaic_0001>
module attributes {stable_mosaic.version = 11 : i64} {
  func.func @_matmul_bn_act_kernel(%arg0: i32, %arg1: memref<512x147xf32, #tpu.memory_space<vmem>>, %arg2: memref<147x16xf32, #tpu.memory_space<vmem>>, %arg3: memref<1x16xf32, #tpu.memory_space<vmem>>, %arg4: memref<1x16xf32, #tpu.memory_space<vmem>>, %arg5: memref<512x16xf32, #tpu.memory_space<vmem>>) attributes {dimension_semantics = [#tpu.dimension_semantics<parallel>], iteration_bounds = array<i64: 1>, scalar_prefetch = 0 : i64, scratch_operands = 0 : i64, tpu.core_type = #tpu.core_type<tc>, window_params = [{transform_indices = @transform_0, window_bounds = array<i64: 512, 147>}, {pipeline_mode = #tpu.pipeline_mode<synchronous>, transform_indices = @transform_1, window_bounds = array<i64: 147, 16>}, {pipeline_mode = #tpu.pipeline_mode<synchronous>, transform_indices = @transform_2, window_bounds = array<i64: 1, 16>}, {pipeline_mode = #tpu.pipeline_mode<synchronous>, transform_indices = @transform_3, window_bounds = array<i64: 1, 16>}, {transform_indices = @transform_4, window_bounds = array<i64: 512, 16>}]} {
    %c0 = arith.constant 0 : index
    %c0_0 = arith.constant 0 : index
    %0 = vector.load %arg1[%c0, %c0_0] : memref<512x147xf32, #tpu.memory_space<vmem>>, vector<512x147xf32>
    %c0_1 = arith.constant 0 : index
    %c0_2 = arith.constant 0 : index
    %1 = vector.load %arg2[%c0_1, %c0_2] : memref<147x16xf32, #tpu.memory_space<vmem>>, vector<147x16xf32>
    %cst = arith.constant dense<0.000000e+00> : vector<512x16xf32>
    %2 = tpu.matmul %0, %1, %cst {dimension_numbers = #tpu.dot_dimension_numbers<[1], [0], [0], [1], [0, 0, 1, 1], [], []>} : vector<512x147xf32>, vector<147x16xf32>, vector<512x16xf32> -> vector<512x16xf32>
    %c0_3 = arith.constant 0 : index
    %c0_4 = arith.constant 0 : index
    %3 = vector.load %arg3[%c0_3, %c0_4] : memref<1x16xf32, #tpu.memory_space<vmem>>, vector<1x16xf32>
    %4 = vector.broadcast %3 : vector<1x16xf32> to vector<512x16xf32>
    %5 = arith.mulf %2, %4 : vector<512x16xf32>
    %c0_5 = arith.constant 0 : index
    %c0_6 = arith.constant 0 : index
    %6 = vector.load %arg4[%c0_5, %c0_6] : memref<1x16xf32, #tpu.memory_space<vmem>>, vector<1x16xf32>
    %7 = vector.broadcast %6 : vector<1x16xf32> to vector<512x16xf32>
    %8 = arith.addf %5, %7 : vector<512x16xf32>
    %cst_7 = arith.constant 0.000000e+00 : f32
    %9 = vector.broadcast %cst_7 : f32 to vector<512x16xf32>
    %10 = arith.maximumf %8, %9 : vector<512x16xf32>
    %c0_8 = arith.constant 0 : index
    %c0_9 = arith.constant 0 : index
    %11 = vector.load %arg5[%c0_8, %c0_9] : memref<512x16xf32, #tpu.memory_space<vmem>>, vector<512x16xf32>
    tpu.vector_store %arg5[%c0_8, %c0_9], %10 {strides = array<i32>} : memref<512x16xf32, #tpu.memory_space<vmem>>, vector<512x16xf32>,
    return
  }
  func.func @transform_0(%arg0: i32) -> (i32, i32) {
    %c0_i32 = arith.constant 0 : i32
    %c0_i32_0 = arith.constant 0 : i32
    return %arg0, %c0_i32 : i32, i32
  }
  func.func @transform_1(%arg0: i32) -> (i32, i32) {
    %c0_i32 = arith.constant 0 : i32
    %c0_i32_0 = arith.constant 0 : i32
    %c0_i32_1 = arith.constant 0 : i32
    return %c0_i32, %c0_i32_0 : i32, i32
  }
  func.func @transform_2(%arg0: i32) -> (i32, i32) {
    %c0_i32 = arith.constant 0 : i32
    %c0_i32_0 = arith.constant 0 : i32
    %c0_i32_1 = arith.constant 0 : i32
    return %c0_i32, %c0_i32_0 : i32, i32
  }
  func.func @transform_3(%arg0: i32) -> (i32, i32) {
    %c0_i32 = arith.constant 0 : i32
    %c0_i32_0 = arith.constant 0 : i32
    %c0_i32_1 = arith.constant 0 : i32
    return %c0_i32, %c0_i32_0 : i32, i32
  }
  func.func @transform_4(%arg0: i32) -> (i32, i32) {
    %c0_i32 = arith.constant 0 : i32
    %c0_i32_0 = arith.constant 0 : i32
    return %arg0, %c0_i32 : i32, i32
  }
}

module attributes {stable_mosaic.version = 11 : i64} {
  func.func @_matmul_bn_act_kernel(%arg0: i32, %arg1: memref<512x144xf32, #tpu.memory_space<vmem>>, %arg2: memref<144x32xf32, #tpu.memory_space<vmem>>, %arg3: memref<1x32xf32, #tpu.memory_space<vmem>>, %arg4: memref<1x32xf32, #tpu.memory_space<vmem>>, %arg5: memref<512x32xf32, #tpu.memory_space<vmem>>) attributes {dimension_semantics = [#tpu.dimension_semantics<parallel>], iteration_bounds = array<i64: 1>, scalar_prefetch = 0 : i64, scratch_operands = 0 : i64, tpu.core_type = #tpu.core_type<tc>, window_params = [{transform_indices = @transform_0, window_bounds = array<i64: 512, 144>}, {pipeline_mode = #tpu.pipeline_mode<synchronous>, transform_indices = @transform_1, window_bounds = array<i64: 144, 32>}, {pipeline_mode = #tpu.pipeline_mode<synchronous>, transform_indices = @transform_2, window_bounds = array<i64: 1, 32>}, {pipeline_mode = #tpu.pipeline_mode<synchronous>, transform_indices = @transform_3, window_bounds = array<i64: 1, 32>}, {transform_indices = @transform_4, window_bounds = array<i64: 512, 32>}]} {
    %c0 = arith.constant 0 : index
    %c0_0 = arith.constant 0 : index
    %0 = vector.load %arg1[%c0, %c0_0] : memref<512x144xf32, #tpu.memory_space<vmem>>, vector<512x144xf32>
    %c0_1 = arith.constant 0 : index
    %c0_2 = arith.constant 0 : index
    %1 = vector.load %arg2[%c0_1, %c0_2] : memref<144x32xf32, #tpu.memory_space<vmem>>, vector<144x32xf32>
    %cst = arith.constant dense<0.000000e+00> : vector<512x32xf32>
    %2 = tpu.matmul %0, %1, %cst {dimension_numbers = #tpu.dot_dimension_numbers<[1], [0], [0], [1], [0, 0, 1, 1], [], []>} : vector<512x144xf32>, vector<144x32xf32>, vector<512x32xf32> -> vector<512x32xf32>
    %c0_3 = arith.constant 0 : index
    %c0_4 = arith.constant 0 : index
    %3 = vector.load %arg3[%c0_3, %c0_4] : memref<1x32xf32, #tpu.memory_space<vmem>>, vector<1x32xf32>
    %4 = vector.broadcast %3 : vector<1x32xf32> to vector<512x32xf32>
    %5 = arith.mulf %2, %4 : vector<512x32xf32>
    %c0_5 = arith.constant 0 : index
    %c0_6 = arith.constant 0 : index
    %6 = vector.load %arg4[%c0_5, %c0_6] : memref<1x32xf32, #tpu.memory_space<vmem>>, vector<1x32xf32>
    %7 = vector.broadcast %6 : vector<1x32xf32> to vector<512x32xf32>
    %8 = arith.addf %5, %7 : vector<512x32xf32>
    %cst_7 = arith.constant 0.000000e+00 : f32
    %9 = vector.broadcast %cst_7 : f32 to vector<512x32xf32>
    %10 = arith.maximumf %8, %9 : vector<512x32xf32>
    %c0_8 = arith.constant 0 : index
    %c0_9 = arith.constant 0 : index
    %11 = vector.load %arg5[%c0_8, %c0_9] : memref<512x32xf32, #tpu.memory_space<vmem>>, vector<512x32xf32>
    tpu.vector_store %arg5[%c0_8, %c0_9], %10 {strides = array<i32>} : memref<512x32xf32, #tpu.memory_space<vmem>>, vector<512x32xf32>,
    return
  }
  func.func @transform_0(%arg0: i32) -> (i32, i32) {
    %c0_i32 = arith.constant 0 : i32
    %c0_i32_0 = arith.constant 0 : i32
    return %arg0, %c0_i32 : i32, i32
  }
  func.func @transform_1(%arg0: i32) -> (i32, i32) {
    %c0_i32 = arith.constant 0 : i32
    %c0_i32_0 = arith.constant 0 : i32
    %c0_i32_1 = arith.constant 0 : i32
    return %c0_i32, %c0_i32_0 : i32, i32
  }
  func.func @transform_2(%arg0: i32) -> (i32, i32) {
    %c0_i32 = arith.constant 0 : i32
    %c0_i32_0 = arith.constant 0 : i32
    %c0_i32_1 = arith.constant 0 : i32
    return %c0_i32, %c0_i32_0 : i32, i32
  }
  func.func @transform_3(%arg0: i32) -> (i32, i32) {
    %c0_i32 = arith.constant 0 : i32
    %c0_i32_0 = arith.constant 0 : i32
    %c0_i32_1 = arith.constant 0 : i32
    return %c0_i32, %c0_i32_0 : i32, i32
  }
  func.func @transform_4(%arg0: i32) -> (i32, i32) {
    %c0_i32 = arith.constant 0 : i32
    %c0_i32_0 = arith.constant 0 : i32
    return %arg0, %c0_i32 : i32, i32
  }
}

module attributes {stable_mosaic.version = 11 : i64} {
  func.func @_basic_block_kernel(%arg0: i32, %arg1: memref<128x288xf32, #tpu.memory_space<vmem>>, %arg2: memref<288x32xf32, #tpu.memory_space<vmem>>, %arg3: memref<1x32xf32, #tpu.memory_space<vmem>>, %arg4: memref<1x32xf32, #tpu.memory_space<vmem>>, %arg5: memref<288x32xf32, #tpu.memory_space<vmem>>, %arg6: memref<1x32xf32, #tpu.memory_space<vmem>>, %arg7: memref<1x32xf32, #tpu.memory_space<vmem>>, %arg8: memref<128x32xf32, #tpu.memory_space<vmem>>, %arg9: memref<32x32xf32, #tpu.memory_space<vmem>>, %arg10: memref<1x32xf32, #tpu.memory_space<vmem>>, %arg11: memref<1x32xf32, #tpu.memory_space<vmem>>, %arg12: memref<128x32xf32, #tpu.memory_space<vmem>>, %arg13: memref<2x10x10x32xf32, #tpu.memory_space<vmem>>) attributes {dimension_semantics = [#tpu.dimension_semantics<parallel>], iteration_bounds = array<i64: 1>, scalar_prefetch = 0 : i64, scratch_operands = 1 : i64, tpu.core_type = #tpu.core_type<tc>, window_params = [{transform_indices = @transform_0, window_bounds = array<i64: 128, 288>}, {pipeline_mode = #tpu.pipeline_mode<synchronous>, transform_indices = @transform_1, window_bounds = array<i64: 288, 32>}, {pipeline_mode = #tpu.pipeline_mode<synchronous>, transform_indices = @transform_2, window_bounds = array<i64: 1, 32>}, {pipeline_mode = #tpu.pipeline_mode<synchronous>, transform_indices = @transform_3, window_bounds = array<i64: 1, 32>}, {pipeline_mode = #tpu.pipeline_mode<synchronous>, transform_indices = @transform_4, window_bounds = array<i64: 288, 32>}, {pipeline_mode = #tpu.pipeline_mode<synchronous>, transform_indices = @transform_5, window_bounds = array<i64: 1, 32>}, {pipeline_mode = #tpu.pipeline_mode<synchronous>, transform_indices = @transform_6, window_bounds = array<i64: 1, 32>}, {transform_indices = @transform_7, window_bounds = array<i64: 128, 32>}, {pipeline_mode = #tpu.pipeline_mode<synchronous>, transform_indices = @transform_8, window_bounds = array<i64: 32, 32>}, {pipeline_mode = #tpu.pipeline_mode<synchronous>, transform_indices = @transform_9, window_bounds = array<i64: 1, 32>}, {pipeline_mode = #tpu.pipeline_mode<synchronous>, transform_indices = @transform_10, window_bounds = array<i64: 1, 32>}, {transform_indices = @transform_11, window_bounds = array<i64: 128, 32>}]} {
    %c0 = arith.constant 0 : index
    %c0_0 = arith.constant 0 : index
    %0 = vector.load %arg1[%c0, %c0_0] : memref<128x288xf32, #tpu.memory_space<vmem>>, vector<128x288xf32>
    %c0_1 = arith.constant 0 : index
    %c0_2 = arith.constant 0 : index
    %1 = vector.load %arg2[%c0_1, %c0_2] : memref<288x32xf32, #tpu.memory_space<vmem>>, vector<288x32xf32>
    %cst = arith.constant dense<0.000000e+00> : vector<128x32xf32>
    %2 = tpu.matmul %0, %1, %cst {dimension_numbers = #tpu.dot_dimension_numbers<[1], [0], [0], [1], [0, 0, 1, 1], [], []>} : vector<128x288xf32>, vector<288x32xf32>, vector<128x32xf32> -> vector<128x32xf32>
    %c0_3 = arith.constant 0 : index
    %c0_4 = arith.constant 0 : index
    %3 = vector.load %arg3[%c0_3, %c0_4] : memref<1x32xf32, #tpu.memory_space<vmem>>, vector<1x32xf32>
    %4 = vector.broadcast %3 : vector<1x32xf32> to vector<128x32xf32>
    %5 = arith.mulf %2, %4 : vector<128x32xf32>
    %c0_5 = arith.constant 0 : index
    %c0_6 = arith.constant 0 : index
    %6 = vector.load %arg4[%c0_5, %c0_6] : memref<1x32xf32, #tpu.memory_space<vmem>>, vector<1x32xf32>
    %7 = vector.broadcast %6 : vector<1x32xf32> to vector<128x32xf32>
    %8 = arith.addf %5, %7 : vector<128x32xf32>
    %cst_7 = arith.constant 0.000000e+00 : f32
    %9 = vector.broadcast %cst_7 : f32 to vector<128x32xf32>
    %10 = arith.maximumf %8, %9 : vector<128x32xf32>
    %cst_8 = arith.constant 0.000000e+00 : f32
    %11 = vector.broadcast %cst_8 : f32 to vector<2x1x10x32xf32>
    %c0_9 = arith.constant 0 : index
    %c0_10 = arith.constant 0 : index
    %c0_11 = arith.constant 0 : index
    %c0_12 = arith.constant 0 : index
    %12 = vector.load %arg13[%c0_9, %c0_10, %c0_11, %c0_12] : memref<2x10x10x32xf32, #tpu.memory_space<vmem>>, vector<2x1x10x32xf32>
    tpu.vector_store %arg13[%c0_9, %c0_10, %c0_11, %c0_12], %11 {strides = array<i32>} : memref<2x10x10x32xf32, #tpu.memory_space<vmem>>, vector<2x1x10x32xf32>,
    %cst_13 = arith.constant 0.000000e+00 : f32
    %13 = vector.broadcast %cst_13 : f32 to vector<2x1x10x32xf32>
    %c0_14 = arith.constant 0 : index
    %c9 = arith.constant 9 : index
    %c0_15 = arith.constant 0 : index
    %c0_16 = arith.constant 0 : index
    %14 = vector.load %arg13[%c0_14, %c9, %c0_15, %c0_16] : memref<2x10x10x32xf32, #tpu.memory_space<vmem>>, vector<2x1x10x32xf32>
    tpu.vector_store %arg13[%c0_14, %c9, %c0_15, %c0_16], %13 {strides = array<i32>} : memref<2x10x10x32xf32, #tpu.memory_space<vmem>>, vector<2x1x10x32xf32>,
    %cst_17 = arith.constant 0.000000e+00 : f32
    %15 = vector.broadcast %cst_17 : f32 to vector<2x10x1x32xf32>
    %c0_18 = arith.constant 0 : index
    %c0_19 = arith.constant 0 : index
    %c0_20 = arith.constant 0 : index
    %c0_21 = arith.constant 0 : index
    %16 = vector.load %arg13[%c0_18, %c0_19, %c0_20, %c0_21] : memref<2x10x10x32xf32, #tpu.memory_space<vmem>>, vector<2x10x1x32xf32>
    tpu.vector_store %arg13[%c0_18, %c0_19, %c0_20, %c0_21], %15 {strides = array<i32>} : memref<2x10x10x32xf32, #tpu.memory_space<vmem>>, vector<2x10x1x32xf32>,
    %cst_22 = arith.constant 0.000000e+00 : f32
    %17 = vector.broadcast %cst_22 : f32 to vector<2x10x1x32xf32>
    %c0_23 = arith.constant 0 : index
    %c0_24 = arith.constant 0 : index
    %c9_25 = arith.constant 9 : index
    %c0_26 = arith.constant 0 : index
    %18 = vector.load %arg13[%c0_23, %c0_24, %c9_25, %c0_26] : memref<2x10x10x32xf32, #tpu.memory_space<vmem>>, vector<2x10x1x32xf32>
    tpu.vector_store %arg13[%c0_23, %c0_24, %c9_25, %c0_26], %17 {strides = array<i32>} : memref<2x10x10x32xf32, #tpu.memory_space<vmem>>, vector<2x10x1x32xf32>,
    %19 = vector.shape_cast %10 : vector<128x32xf32> to vector<2x8x8x32xf32>
    %c0_27 = arith.constant 0 : index
    %c1 = arith.constant 1 : index
    %c1_28 = arith.constant 1 : index
    %c0_29 = arith.constant 0 : index
    %20 = vector.load %arg13[%c0_27, %c1, %c1_28, %c0_29] : memref<2x10x10x32xf32, #tpu.memory_space<vmem>>, vector<2x8x8x32xf32>
    tpu.vector_store %arg13[%c0_27, %c1, %c1_28, %c0_29], %19 {strides = array<i32>} : memref<2x10x10x32xf32, #tpu.memory_space<vmem>>, vector<2x8x8x32xf32>,
    %c0_30 = arith.constant 0 : index
    %c0_31 = arith.constant 0 : index
    %c0_32 = arith.constant 0 : index
    %c0_33 = arith.constant 0 : index
    %21 = vector.load %arg13[%c0_30, %c0_31, %c0_32, %c0_33] : memref<2x10x10x32xf32, #tpu.memory_space<vmem>>, vector<2x10x10x32xf32>
    %22 = vector.extract_strided_slice %21 {offsets = [0, 0, 0, 0], sizes = [2, 8, 8, 32], strides = [1, 1, 1, 1]} : vector<2x10x10x32xf32> to vector<2x8x8x32xf32>
    %23 = vector.shape_cast %22 : vector<2x8x8x32xf32> to vector<128x32xf32>
    %24 = vector.extract_strided_slice %21 {offsets = [0, 0, 1, 0], sizes = [2, 8, 8, 32], strides = [1, 1, 1, 1]} : vector<2x10x10x32xf32> to vector<2x8x8x32xf32>
    %25 = vector.shape_cast %24 : vector<2x8x8x32xf32> to vector<128x32xf32>
    %26 = vector.extract_strided_slice %21 {offsets = [0, 0, 2, 0], sizes = [2, 8, 8, 32], strides = [1, 1, 1, 1]} : vector<2x10x10x32xf32> to vector<2x8x8x32xf32>
    %27 = vector.shape_cast %26 : vector<2x8x8x32xf32> to vector<128x32xf32>
    %28 = vector.extract_strided_slice %21 {offsets = [0, 1, 0, 0], sizes = [2, 8, 8, 32], strides = [1, 1, 1, 1]} : vector<2x10x10x32xf32> to vector<2x8x8x32xf32>
    %29 = vector.shape_cast %28 : vector<2x8x8x32xf32> to vector<128x32xf32>
    %30 = vector.extract_strided_slice %21 {offsets = [0, 1, 1, 0], sizes = [2, 8, 8, 32], strides = [1, 1, 1, 1]} : vector<2x10x10x32xf32> to vector<2x8x8x32xf32>
    %31 = vector.shape_cast %30 : vector<2x8x8x32xf32> to vector<128x32xf32>
    %32 = vector.extract_strided_slice %21 {offsets = [0, 1, 2, 0], sizes = [2, 8, 8, 32], strides = [1, 1, 1, 1]} : vector<2x10x10x32xf32> to vector<2x8x8x32xf32>
    %33 = vector.shape_cast %32 : vector<2x8x8x32xf32> to vector<128x32xf32>
    %34 = vector.extract_strided_slice %21 {offsets = [0, 2, 0, 0], sizes = [2, 8, 8, 32], strides = [1, 1, 1, 1]} : vector<2x10x10x32xf32> to vector<2x8x8x32xf32>
    %35 = vector.shape_cast %34 : vector<2x8x8x32xf32> to vector<128x32xf32>
    %36 = vector.extract_strided_slice %21 {offsets = [0, 2, 1, 0], sizes = [2, 8, 8, 32], strides = [1, 1, 1, 1]} : vector<2x10x10x32xf32> to vector<2x8x8x32xf32>
    %37 = vector.shape_cast %36 : vector<2x8x8x32xf32> to vector<128x32xf32>
    %38 = vector.extract_strided_slice %21 {offsets = [0, 2, 2, 0], sizes = [2, 8, 8, 32], strides = [1, 1, 1, 1]} : vector<2x10x10x32xf32> to vector<2x8x8x32xf32>
    %39 = vector.shape_cast %38 : vector<2x8x8x32xf32> to vector<128x32xf32>
    %40 = tpu.concatenate %23, %25, %27, %29, %31, %33, %35, %37, %39 in 1 : vector<128x32xf32>, vector<128x32xf32>, vector<128x32xf32>, vector<128x32xf32>, vector<128x32xf32>, vector<128x32xf32>, vector<128x32xf32>, vector<128x32xf32>, vector<128x32xf32> -> vector<128x288xf32>
    %c0_34 = arith.constant 0 : index
    %c0_35 = arith.constant 0 : index
    %41 = vector.load %arg5[%c0_34, %c0_35] : memref<288x32xf32, #tpu.memory_space<vmem>>, vector<288x32xf32>
    %cst_36 = arith.constant dense<0.000000e+00> : vector<128x32xf32>
    %42 = tpu.matmul %40, %41, %cst_36 {dimension_numbers = #tpu.dot_dimension_numbers<[1], [0], [0], [1], [0, 0, 1, 1], [], []>} : vector<128x288xf32>, vector<288x32xf32>, vector<128x32xf32> -> vector<128x32xf32>
    %c0_37 = arith.constant 0 : index
    %c0_38 = arith.constant 0 : index
    %43 = vector.load %arg8[%c0_37, %c0_38] : memref<128x32xf32, #tpu.memory_space<vmem>>, vector<128x32xf32>
    %c0_39 = arith.constant 0 : index
    %c0_40 = arith.constant 0 : index
    %44 = vector.load %arg9[%c0_39, %c0_40] : memref<32x32xf32, #tpu.memory_space<vmem>>, vector<32x32xf32>
    %cst_41 = arith.constant dense<0.000000e+00> : vector<128x32xf32>
    %45 = tpu.matmul %43, %44, %cst_41 {dimension_numbers = #tpu.dot_dimension_numbers<[1], [0], [0], [1], [0, 0, 1, 1], [], []>} : vector<128x32xf32>, vector<32x32xf32>, vector<128x32xf32> -> vector<128x32xf32>
    %c0_42 = arith.constant 0 : index
    %c0_43 = arith.constant 0 : index
    %46 = vector.load %arg10[%c0_42, %c0_43] : memref<1x32xf32, #tpu.memory_space<vmem>>, vector<1x32xf32>
    %47 = vector.broadcast %46 : vector<1x32xf32> to vector<128x32xf32>
    %48 = arith.mulf %45, %47 : vector<128x32xf32>
    %c0_44 = arith.constant 0 : index
    %c0_45 = arith.constant 0 : index
    %49 = vector.load %arg11[%c0_44, %c0_45] : memref<1x32xf32, #tpu.memory_space<vmem>>, vector<1x32xf32>
    %50 = vector.broadcast %49 : vector<1x32xf32> to vector<128x32xf32>
    %51 = arith.addf %48, %50 : vector<128x32xf32>
    %c0_46 = arith.constant 0 : index
    %c0_47 = arith.constant 0 : index
    %52 = vector.load %arg6[%c0_46, %c0_47] : memref<1x32xf32, #tpu.memory_space<vmem>>, vector<1x32xf32>
    %53 = vector.broadcast %52 : vector<1x32xf32> to vector<128x32xf32>
    %54 = arith.mulf %42, %53 : vector<128x32xf32>
    %c0_48 = arith.constant 0 : index
    %c0_49 = arith.constant 0 : index
    %55 = vector.load %arg7[%c0_48, %c0_49] : memref<1x32xf32, #tpu.memory_space<vmem>>, vector<1x32xf32>
    %56 = vector.broadcast %55 : vector<1x32xf32> to vector<128x32xf32>
    %57 = arith.addf %54, %56 : vector<128x32xf32>
    %58 = arith.addf %57, %51 : vector<128x32xf32>
    %cst_50 = arith.constant 0.000000e+00 : f32
    %59 = vector.broadcast %cst_50 : f32 to vector<128x32xf32>
    %60 = arith.maximumf %58, %59 : vector<128x32xf32>
    %c0_51 = arith.constant 0 : index
    %c0_52 = arith.constant 0 : index
    %61 = vector.load %arg12[%c0_51, %c0_52] : memref<128x32xf32, #tpu.memory_space<vmem>>, vector<128x32xf32>
    tpu.vector_store %arg12[%c0_51, %c0_52], %60 {strides = array<i32>} : memref<128x32xf32, #tpu.memory_space<vmem>>, vector<128x32xf32>,
    return
  }
  func.func @transform_0(%arg0: i32) -> (i32, i32) {
    %c0_i32 = arith.constant 0 : i32
    %c0_i32_0 = arith.constant 0 : i32
    return %arg0, %c0_i32 : i32, i32
  }
  func.func @transform_1(%arg0: i32) -> (i32, i32) {
    %c0_i32 = arith.constant 0 : i32
    %c0_i32_0 = arith.constant 0 : i32
    %c0_i32_1 = arith.constant 0 : i32
    return %c0_i32, %c0_i32_0 : i32, i32
  }
  func.func @transform_2(%arg0: i32) -> (i32, i32) {
    %c0_i32 = arith.constant 0 : i32
    %c0_i32_0 = arith.constant 0 : i32
    %c0_i32_1 = arith.constant 0 : i32
    return %c0_i32, %c0_i32_0 : i32, i32
  }
  func.func @transform_3(%arg0: i32) -> (i32, i32) {
    %c0_i32 = arith.constant 0 : i32
    %c0_i32_0 = arith.constant 0 : i32
    %c0_i32_1 = arith.constant 0 : i32
    return %c0_i32, %c0_i32_0 : i32, i32
  }
  func.func @transform_4(%arg0: i32) -> (i32, i32) {
    %c0_i32 = arith.constant 0 : i32
    %c0_i32_0 = arith.constant 0 : i32
    %c0_i32_1 = arith.constant 0 : i32
    return %c0_i32, %c0_i32_0 : i32, i32
  }
  func.func @transform_5(%arg0: i32) -> (i32, i32) {
    %c0_i32 = arith.constant 0 : i32
    %c0_i32_0 = arith.constant 0 : i32
    %c0_i32_1 = arith.constant 0 : i32
    return %c0_i32, %c0_i32_0 : i32, i32
  }
  func.func @transform_6(%arg0: i32) -> (i32, i32) {
    %c0_i32 = arith.constant 0 : i32
    %c0_i32_0 = arith.constant 0 : i32
    %c0_i32_1 = arith.constant 0 : i32
    return %c0_i32, %c0_i32_0 : i32, i32
  }
  func.func @transform_7(%arg0: i32) -> (i32, i32) {
    %c0_i32 = arith.constant 0 : i32
    %c0_i32_0 = arith.constant 0 : i32
    return %arg0, %c0_i32 : i32, i32
  }
  func.func @transform_8(%arg0: i32) -> (i32, i32) {
    %c0_i32 = arith.constant 0 : i32
    %c0_i32_0 = arith.constant 0 : i32
    %c0_i32_1 = arith.constant 0 : i32
    return %c0_i32, %c0_i32_0 : i32, i32
  }
  func.func @transform_9(%arg0: i32) -> (i32, i32) {
    %c0_i32 = arith.constant 0 : i32
    %c0_i32_0 = arith.constant 0 : i32
    %c0_i32_1 = arith.constant 0 : i32
    return %c0_i32, %c0_i32_0 : i32, i32
  }
  func.func @transform_10(%arg0: i32) -> (i32, i32) {
    %c0_i32 = arith.constant 0 : i32
    %c0_i32_0 = arith.constant 0 : i32
    %c0_i32_1 = arith.constant 0 : i32
    return %c0_i32, %c0_i32_0 : i32, i32
  }
  func.func @transform_11(%arg0: i32) -> (i32, i32) {
    %c0_i32 = arith.constant 0 : i32
    %c0_i32_0 = arith.constant 0 : i32
    return %arg0, %c0_i32 : i32, i32
  }
}

module attributes {stable_mosaic.version = 11 : i64} {
  func.func @_basic_block_kernel(%arg0: i32, %arg1: memref<32x288xf32, #tpu.memory_space<vmem>>, %arg2: memref<288x64xf32, #tpu.memory_space<vmem>>, %arg3: memref<1x64xf32, #tpu.memory_space<vmem>>, %arg4: memref<1x64xf32, #tpu.memory_space<vmem>>, %arg5: memref<576x64xf32, #tpu.memory_space<vmem>>, %arg6: memref<1x64xf32, #tpu.memory_space<vmem>>, %arg7: memref<1x64xf32, #tpu.memory_space<vmem>>, %arg8: memref<32x32xf32, #tpu.memory_space<vmem>>, %arg9: memref<32x64xf32, #tpu.memory_space<vmem>>, %arg10: memref<1x64xf32, #tpu.memory_space<vmem>>, %arg11: memref<1x64xf32, #tpu.memory_space<vmem>>, %arg12: memref<32x64xf32, #tpu.memory_space<vmem>>, %arg13: memref<2x6x6x64xf32, #tpu.memory_space<vmem>>) attributes {dimension_semantics = [#tpu.dimension_semantics<parallel>], iteration_bounds = array<i64: 1>, scalar_prefetch = 0 : i64, scratch_operands = 1 : i64, tpu.core_type = #tpu.core_type<tc>, window_params = [{transform_indices = @transform_0, window_bounds = array<i64: 32, 288>}, {pipeline_mode = #tpu.pipeline_mode<synchronous>, transform_indices = @transform_1, window_bounds = array<i64: 288, 64>}, {pipeline_mode = #tpu.pipeline_mode<synchronous>, transform_indices = @transform_2, window_bounds = array<i64: 1, 64>}, {pipeline_mode = #tpu.pipeline_mode<synchronous>, transform_indices = @transform_3, window_bounds = array<i64: 1, 64>}, {pipeline_mode = #tpu.pipeline_mode<synchronous>, transform_indices = @transform_4, window_bounds = array<i64: 576, 64>}, {pipeline_mode = #tpu.pipeline_mode<synchronous>, transform_indices = @transform_5, window_bounds = array<i64: 1, 64>}, {pipeline_mode = #tpu.pipeline_mode<synchronous>, transform_indices = @transform_6, window_bounds = array<i64: 1, 64>}, {transform_indices = @transform_7, window_bounds = array<i64: 32, 32>}, {pipeline_mode = #tpu.pipeline_mode<synchronous>, transform_indices = @transform_8, window_bounds = array<i64: 32, 64>}, {pipeline_mode = #tpu.pipeline_mode<synchronous>, transform_indices = @transform_9, window_bounds = array<i64: 1, 64>}, {pipeline_mode = #tpu.pipeline_mode<synchronous>, transform_indices = @transform_10, window_bounds = array<i64: 1, 64>}, {transform_indices = @transform_11, window_bounds = array<i64: 32, 64>}]} {
    %c0 = arith.constant 0 : index
    %c0_0 = arith.constant 0 : index
    %0 = vector.load %arg1[%c0, %c0_0] : memref<32x288xf32, #tpu.memory_space<vmem>>, vector<32x288xf32>
    %c0_1 = arith.constant 0 : index
    %c0_2 = arith.constant 0 : index
    %1 = vector.load %arg2[%c0_1, %c0_2] : memref<288x64xf32, #tpu.memory_space<vmem>>, vector<288x64xf32>
    %cst = arith.constant dense<0.000000e+00> : vector<32x64xf32>
    %2 = tpu.matmul %0, %1, %cst {dimension_numbers = #tpu.dot_dimension_numbers<[1], [0], [0], [1], [0, 0, 1, 1], [], []>} : vector<32x288xf32>, vector<288x64xf32>, vector<32x64xf32> -> vector<32x64xf32>
    %c0_3 = arith.constant 0 : index
    %c0_4 = arith.constant 0 : index
    %3 = vector.load %arg3[%c0_3, %c0_4] : memref<1x64xf32, #tpu.memory_space<vmem>>, vector<1x64xf32>
    %4 = vector.broadcast %3 : vector<1x64xf32> to vector<32x64xf32>
    %5 = arith.mulf %2, %4 : vector<32x64xf32>
    %c0_5 = arith.constant 0 : index
    %c0_6 = arith.constant 0 : index
    %6 = vector.load %arg4[%c0_5, %c0_6] : memref<1x64xf32, #tpu.memory_space<vmem>>, vector<1x64xf32>
    %7 = vector.broadcast %6 : vector<1x64xf32> to vector<32x64xf32>
    %8 = arith.addf %5, %7 : vector<32x64xf32>
    %cst_7 = arith.constant 0.000000e+00 : f32
    %9 = vector.broadcast %cst_7 : f32 to vector<32x64xf32>
    %10 = arith.maximumf %8, %9 : vector<32x64xf32>
    %cst_8 = arith.constant 0.000000e+00 : f32
    %11 = vector.broadcast %cst_8 : f32 to vector<2x1x6x64xf32>
    %c0_9 = arith.constant 0 : index
    %c0_10 = arith.constant 0 : index
    %c0_11 = arith.constant 0 : index
    %c0_12 = arith.constant 0 : index
    %12 = vector.load %arg13[%c0_9, %c0_10, %c0_11, %c0_12] : memref<2x6x6x64xf32, #tpu.memory_space<vmem>>, vector<2x1x6x64xf32>
    tpu.vector_store %arg13[%c0_9, %c0_10, %c0_11, %c0_12], %11 {strides = array<i32>} : memref<2x6x6x64xf32, #tpu.memory_space<vmem>>, vector<2x1x6x64xf32>,
    %cst_13 = arith.constant 0.000000e+00 : f32
    %13 = vector.broadcast %cst_13 : f32 to vector<2x1x6x64xf32>
    %c0_14 = arith.constant 0 : index
    %c5 = arith.constant 5 : index
    %c0_15 = arith.constant 0 : index
    %c0_16 = arith.constant 0 : index
    %14 = vector.load %arg13[%c0_14, %c5, %c0_15, %c0_16] : memref<2x6x6x64xf32, #tpu.memory_space<vmem>>, vector<2x1x6x64xf32>
    tpu.vector_store %arg13[%c0_14, %c5, %c0_15, %c0_16], %13 {strides = array<i32>} : memref<2x6x6x64xf32, #tpu.memory_space<vmem>>, vector<2x1x6x64xf32>,
    %cst_17 = arith.constant 0.000000e+00 : f32
    %15 = vector.broadcast %cst_17 : f32 to vector<2x6x1x64xf32>
    %c0_18 = arith.constant 0 : index
    %c0_19 = arith.constant 0 : index
    %c0_20 = arith.constant 0 : index
    %c0_21 = arith.constant 0 : index
    %16 = vector.load %arg13[%c0_18, %c0_19, %c0_20, %c0_21] : memref<2x6x6x64xf32, #tpu.memory_space<vmem>>, vector<2x6x1x64xf32>
    tpu.vector_store %arg13[%c0_18, %c0_19, %c0_20, %c0_21], %15 {strides = array<i32>} : memref<2x6x6x64xf32, #tpu.memory_space<vmem>>, vector<2x6x1x64xf32>,
    %cst_22 = arith.constant 0.000000e+00 : f32
    %17 = vector.broadcast %cst_22 : f32 to vector<2x6x1x64xf32>
    %c0_23 = arith.constant 0 : index
    %c0_24 = arith.constant 0 : index
    %c5_25 = arith.constant 5 : index
    %c0_26 = arith.constant 0 : index
    %18 = vector.load %arg13[%c0_23, %c0_24, %c5_25, %c0_26] : memref<2x6x6x64xf32, #tpu.memory_space<vmem>>, vector<2x6x1x64xf32>
    tpu.vector_store %arg13[%c0_23, %c0_24, %c5_25, %c0_26], %17 {strides = array<i32>} : memref<2x6x6x64xf32, #tpu.memory_space<vmem>>, vector<2x6x1x64xf32>,
    %19 = vector.shape_cast %10 : vector<32x64xf32> to vector<2x4x4x64xf32>
    %c0_27 = arith.constant 0 : index
    %c1 = arith.constant 1 : index
    %c1_28 = arith.constant 1 : index
    %c0_29 = arith.constant 0 : index
    %20 = vector.load %arg13[%c0_27, %c1, %c1_28, %c0_29] : memref<2x6x6x64xf32, #tpu.memory_space<vmem>>, vector<2x4x4x64xf32>
    tpu.vector_store %arg13[%c0_27, %c1, %c1_28, %c0_29], %19 {strides = array<i32>} : memref<2x6x6x64xf32, #tpu.memory_space<vmem>>, vector<2x4x4x64xf32>,
    %c0_30 = arith.constant 0 : index
    %c0_31 = arith.constant 0 : index
    %c0_32 = arith.constant 0 : index
    %c0_33 = arith.constant 0 : index
    %21 = vector.load %arg13[%c0_30, %c0_31, %c0_32, %c0_33] : memref<2x6x6x64xf32, #tpu.memory_space<vmem>>, vector<2x6x6x64xf32>
    %22 = vector.extract_strided_slice %21 {offsets = [0, 0, 0, 0], sizes = [2, 4, 4, 64], strides = [1, 1, 1, 1]} : vector<2x6x6x64xf32> to vector<2x4x4x64xf32>
    %23 = vector.shape_cast %22 : vector<2x4x4x64xf32> to vector<32x64xf32>
    %24 = vector.extract_strided_slice %21 {offsets = [0, 0, 1, 0], sizes = [2, 4, 4, 64], strides = [1, 1, 1, 1]} : vector<2x6x6x64xf32> to vector<2x4x4x64xf32>
    %25 = vector.shape_cast %24 : vector<2x4x4x64xf32> to vector<32x64xf32>
    %26 = vector.extract_strided_slice %21 {offsets = [0, 0, 2, 0], sizes = [2, 4, 4, 64], strides = [1, 1, 1, 1]} : vector<2x6x6x64xf32> to vector<2x4x4x64xf32>
    %27 = vector.shape_cast %26 : vector<2x4x4x64xf32> to vector<32x64xf32>
    %28 = vector.extract_strided_slice %21 {offsets = [0, 1, 0, 0], sizes = [2, 4, 4, 64], strides = [1, 1, 1, 1]} : vector<2x6x6x64xf32> to vector<2x4x4x64xf32>
    %29 = vector.shape_cast %28 : vector<2x4x4x64xf32> to vector<32x64xf32>
    %30 = vector.extract_strided_slice %21 {offsets = [0, 1, 1, 0], sizes = [2, 4, 4, 64], strides = [1, 1, 1, 1]} : vector<2x6x6x64xf32> to vector<2x4x4x64xf32>
    %31 = vector.shape_cast %30 : vector<2x4x4x64xf32> to vector<32x64xf32>
    %32 = vector.extract_strided_slice %21 {offsets = [0, 1, 2, 0], sizes = [2, 4, 4, 64], strides = [1, 1, 1, 1]} : vector<2x6x6x64xf32> to vector<2x4x4x64xf32>
    %33 = vector.shape_cast %32 : vector<2x4x4x64xf32> to vector<32x64xf32>
    %34 = vector.extract_strided_slice %21 {offsets = [0, 2, 0, 0], sizes = [2, 4, 4, 64], strides = [1, 1, 1, 1]} : vector<2x6x6x64xf32> to vector<2x4x4x64xf32>
    %35 = vector.shape_cast %34 : vector<2x4x4x64xf32> to vector<32x64xf32>
    %36 = vector.extract_strided_slice %21 {offsets = [0, 2, 1, 0], sizes = [2, 4, 4, 64], strides = [1, 1, 1, 1]} : vector<2x6x6x64xf32> to vector<2x4x4x64xf32>
    %37 = vector.shape_cast %36 : vector<2x4x4x64xf32> to vector<32x64xf32>
    %38 = vector.extract_strided_slice %21 {offsets = [0, 2, 2, 0], sizes = [2, 4, 4, 64], strides = [1, 1, 1, 1]} : vector<2x6x6x64xf32> to vector<2x4x4x64xf32>
    %39 = vector.shape_cast %38 : vector<2x4x4x64xf32> to vector<32x64xf32>
    %40 = tpu.concatenate %23, %25, %27, %29, %31, %33, %35, %37, %39 in 1 : vector<32x64xf32>, vector<32x64xf32>, vector<32x64xf32>, vector<32x64xf32>, vector<32x64xf32>, vector<32x64xf32>, vector<32x64xf32>, vector<32x64xf32>, vector<32x64xf32> -> vector<32x576xf32>
    %c0_34 = arith.constant 0 : index
    %c0_35 = arith.constant 0 : index
    %41 = vector.load %arg5[%c0_34, %c0_35] : memref<576x64xf32, #tpu.memory_space<vmem>>, vector<576x64xf32>
    %cst_36 = arith.constant dense<0.000000e+00> : vector<32x64xf32>
    %42 = tpu.matmul %40, %41, %cst_36 {dimension_numbers = #tpu.dot_dimension_numbers<[1], [0], [0], [1], [0, 0, 1, 1], [], []>} : vector<32x576xf32>, vector<576x64xf32>, vector<32x64xf32> -> vector<32x64xf32>
    %c0_37 = arith.constant 0 : index
    %c0_38 = arith.constant 0 : index
    %43 = vector.load %arg8[%c0_37, %c0_38] : memref<32x32xf32, #tpu.memory_space<vmem>>, vector<32x32xf32>
    %c0_39 = arith.constant 0 : index
    %c0_40 = arith.constant 0 : index
    %44 = vector.load %arg9[%c0_39, %c0_40] : memref<32x64xf32, #tpu.memory_space<vmem>>, vector<32x64xf32>
    %cst_41 = arith.constant dense<0.000000e+00> : vector<32x64xf32>
    %45 = tpu.matmul %43, %44, %cst_41 {dimension_numbers = #tpu.dot_dimension_numbers<[1], [0], [0], [1], [0, 0, 1, 1], [], []>} : vector<32x32xf32>, vector<32x64xf32>, vector<32x64xf32> -> vector<32x64xf32>
    %c0_42 = arith.constant 0 : index
    %c0_43 = arith.constant 0 : index
    %46 = vector.load %arg10[%c0_42, %c0_43] : memref<1x64xf32, #tpu.memory_space<vmem>>, vector<1x64xf32>
    %47 = vector.broadcast %46 : vector<1x64xf32> to vector<32x64xf32>
    %48 = arith.mulf %45, %47 : vector<32x64xf32>
    %c0_44 = arith.constant 0 : index
    %c0_45 = arith.constant 0 : index
    %49 = vector.load %arg11[%c0_44, %c0_45] : memref<1x64xf32, #tpu.memory_space<vmem>>, vector<1x64xf32>
    %50 = vector.broadcast %49 : vector<1x64xf32> to vector<32x64xf32>
    %51 = arith.addf %48, %50 : vector<32x64xf32>
    %c0_46 = arith.constant 0 : index
    %c0_47 = arith.constant 0 : index
    %52 = vector.load %arg6[%c0_46, %c0_47] : memref<1x64xf32, #tpu.memory_space<vmem>>, vector<1x64xf32>
    %53 = vector.broadcast %52 : vector<1x64xf32> to vector<32x64xf32>
    %54 = arith.mulf %42, %53 : vector<32x64xf32>
    %c0_48 = arith.constant 0 : index
    %c0_49 = arith.constant 0 : index
    %55 = vector.load %arg7[%c0_48, %c0_49] : memref<1x64xf32, #tpu.memory_space<vmem>>, vector<1x64xf32>
    %56 = vector.broadcast %55 : vector<1x64xf32> to vector<32x64xf32>
    %57 = arith.addf %54, %56 : vector<32x64xf32>
    %58 = arith.addf %57, %51 : vector<32x64xf32>
    %cst_50 = arith.constant 0.000000e+00 : f32
    %59 = vector.broadcast %cst_50 : f32 to vector<32x64xf32>
    %60 = arith.maximumf %58, %59 : vector<32x64xf32>
    %c0_51 = arith.constant 0 : index
    %c0_52 = arith.constant 0 : index
    %61 = vector.load %arg12[%c0_51, %c0_52] : memref<32x64xf32, #tpu.memory_space<vmem>>, vector<32x64xf32>
    tpu.vector_store %arg12[%c0_51, %c0_52], %60 {strides = array<i32>} : memref<32x64xf32, #tpu.memory_space<vmem>>, vector<32x64xf32>,
    return
  }
  func.func @transform_0(%arg0: i32) -> (i32, i32) {
    %c0_i32 = arith.constant 0 : i32
    %c0_i32_0 = arith.constant 0 : i32
    return %arg0, %c0_i32 : i32, i32
  }
  func.func @transform_1(%arg0: i32) -> (i32, i32) {
    %c0_i32 = arith.constant 0 : i32
    %c0_i32_0 = arith.constant 0 : i32
    %c0_i32_1 = arith.constant 0 : i32
    return %c0_i32, %c0_i32_0 : i32, i32
  }
  func.func @transform_2(%arg0: i32) -> (i32, i32) {
    %c0_i32 = arith.constant 0 : i32
    %c0_i32_0 = arith.constant 0 : i32
    %c0_i32_1 = arith.constant 0 : i32
    return %c0_i32, %c0_i32_0 : i32, i32
  }
  func.func @transform_3(%arg0: i32) -> (i32, i32) {
    %c0_i32 = arith.constant 0 : i32
    %c0_i32_0 = arith.constant 0 : i32
    %c0_i32_1 = arith.constant 0 : i32
    return %c0_i32, %c0_i32_0 : i32, i32
  }
  func.func @transform_4(%arg0: i32) -> (i32, i32) {
    %c0_i32 = arith.constant 0 : i32
    %c0_i32_0 = arith.constant 0 : i32
    %c0_i32_1 = arith.constant 0 : i32
    return %c0_i32, %c0_i32_0 : i32, i32
  }
  func.func @transform_5(%arg0: i32) -> (i32, i32) {
    %c0_i32 = arith.constant 0 : i32
    %c0_i32_0 = arith.constant 0 : i32
    %c0_i32_1 = arith.constant 0 : i32
    return %c0_i32, %c0_i32_0 : i32, i32
  }
  func.func @transform_6(%arg0: i32) -> (i32, i32) {
    %c0_i32 = arith.constant 0 : i32
    %c0_i32_0 = arith.constant 0 : i32
    %c0_i32_1 = arith.constant 0 : i32
    return %c0_i32, %c0_i32_0 : i32, i32
  }
  func.func @transform_7(%arg0: i32) -> (i32, i32) {
    %c0_i32 = arith.constant 0 : i32
    %c0_i32_0 = arith.constant 0 : i32
    return %arg0, %c0_i32 : i32, i32
  }
  func.func @transform_8(%arg0: i32) -> (i32, i32) {
    %c0_i32 = arith.constant 0 : i32
    %c0_i32_0 = arith.constant 0 : i32
    %c0_i32_1 = arith.constant 0 : i32
    return %c0_i32, %c0_i32_0 : i32, i32
  }
  func.func @transform_9(%arg0: i32) -> (i32, i32) {
    %c0_i32 = arith.constant 0 : i32
    %c0_i32_0 = arith.constant 0 : i32
    %c0_i32_1 = arith.constant 0 : i32
    return %c0_i32, %c0_i32_0 : i32, i32
  }
  func.func @transform_10(%arg0: i32) -> (i32, i32) {
    %c0_i32 = arith.constant 0 : i32
    %c0_i32_0 = arith.constant 0 : i32
    %c0_i32_1 = arith.constant 0 : i32
    return %c0_i32, %c0_i32_0 : i32, i32
  }
  func.func @transform_11(%arg0: i32) -> (i32, i32) {
    %c0_i32 = arith.constant 0 : i32
    %c0_i32_0 = arith.constant 0 : i32
    return %arg0, %c0_i32 : i32, i32
  }
}

module attributes {stable_mosaic.version = 11 : i64} {
  func.func @_basic_block_kernel(%arg0: i32, %arg1: memref<8x576xf32, #tpu.memory_space<vmem>>, %arg2: memref<576x128xf32, #tpu.memory_space<vmem>>, %arg3: memref<1x128xf32, #tpu.memory_space<vmem>>, %arg4: memref<1x128xf32, #tpu.memory_space<vmem>>, %arg5: memref<1152x128xf32, #tpu.memory_space<vmem>>, %arg6: memref<1x128xf32, #tpu.memory_space<vmem>>, %arg7: memref<1x128xf32, #tpu.memory_space<vmem>>, %arg8: memref<8x64xf32, #tpu.memory_space<vmem>>, %arg9: memref<64x128xf32, #tpu.memory_space<vmem>>, %arg10: memref<1x128xf32, #tpu.memory_space<vmem>>, %arg11: memref<1x128xf32, #tpu.memory_space<vmem>>, %arg12: memref<8x128xf32, #tpu.memory_space<vmem>>, %arg13: memref<2x4x4x128xf32, #tpu.memory_space<vmem>>) attributes {dimension_semantics = [#tpu.dimension_semantics<parallel>], iteration_bounds = array<i64: 1>, scalar_prefetch = 0 : i64, scratch_operands = 1 : i64, tpu.core_type = #tpu.core_type<tc>, window_params = [{transform_indices = @transform_0, window_bounds = array<i64: 8, 576>}, {pipeline_mode = #tpu.pipeline_mode<synchronous>, transform_indices = @transform_1, window_bounds = array<i64: 576, 128>}, {pipeline_mode = #tpu.pipeline_mode<synchronous>, transform_indices = @transform_2, window_bounds = array<i64: 1, 128>}, {pipeline_mode = #tpu.pipeline_mode<synchronous>, transform_indices = @transform_3, window_bounds = array<i64: 1, 128>}, {pipeline_mode = #tpu.pipeline_mode<synchronous>, transform_indices = @transform_4, window_bounds = array<i64: 1152, 128>}, {pipeline_mode = #tpu.pipeline_mode<synchronous>, transform_indices = @transform_5, window_bounds = array<i64: 1, 128>}, {pipeline_mode = #tpu.pipeline_mode<synchronous>, transform_indices = @transform_6, window_bounds = array<i64: 1, 128>}, {transform_indices = @transform_7, window_bounds = array<i64: 8, 64>}, {pipeline_mode = #tpu.pipeline_mode<synchronous>, transform_indices = @transform_8, window_bounds = array<i64: 64, 128>}, {pipeline_mode = #tpu.pipeline_mode<synchronous>, transform_indices = @transform_9, window_bounds = array<i64: 1, 128>}, {pipeline_mode = #tpu.pipeline_mode<synchronous>, transform_indices = @transform_10, window_bounds = array<i64: 1, 128>}, {transform_indices = @transform_11, window_bounds = array<i64: 8, 128>}]} {
    %c0 = arith.constant 0 : index
    %c0_0 = arith.constant 0 : index
    %0 = vector.load %arg1[%c0, %c0_0] : memref<8x576xf32, #tpu.memory_space<vmem>>, vector<8x576xf32>
    %c0_1 = arith.constant 0 : index
    %c0_2 = arith.constant 0 : index
    %1 = vector.load %arg2[%c0_1, %c0_2] : memref<576x128xf32, #tpu.memory_space<vmem>>, vector<576x128xf32>
    %cst = arith.constant dense<0.000000e+00> : vector<8x128xf32>
    %2 = tpu.matmul %0, %1, %cst {dimension_numbers = #tpu.dot_dimension_numbers<[1], [0], [0], [1], [0, 0, 1, 1], [], []>} : vector<8x576xf32>, vector<576x128xf32>, vector<8x128xf32> -> vector<8x128xf32>
    %c0_3 = arith.constant 0 : index
    %c0_4 = arith.constant 0 : index
    %3 = vector.load %arg3[%c0_3, %c0_4] : memref<1x128xf32, #tpu.memory_space<vmem>>, vector<1x128xf32>
    %4 = vector.broadcast %3 : vector<1x128xf32> to vector<8x128xf32>
    %5 = arith.mulf %2, %4 : vector<8x128xf32>
    %c0_5 = arith.constant 0 : index
    %c0_6 = arith.constant 0 : index
    %6 = vector.load %arg4[%c0_5, %c0_6] : memref<1x128xf32, #tpu.memory_space<vmem>>, vector<1x128xf32>
    %7 = vector.broadcast %6 : vector<1x128xf32> to vector<8x128xf32>
    %8 = arith.addf %5, %7 : vector<8x128xf32>
    %cst_7 = arith.constant 0.000000e+00 : f32
    %9 = vector.broadcast %cst_7 : f32 to vector<8x128xf32>
    %10 = arith.maximumf %8, %9 : vector<8x128xf32>
    %cst_8 = arith.constant 0.000000e+00 : f32
    %11 = vector.broadcast %cst_8 : f32 to vector<2x1x4x128xf32>
    %c0_9 = arith.constant 0 : index
    %c0_10 = arith.constant 0 : index
    %c0_11 = arith.constant 0 : index
    %c0_12 = arith.constant 0 : index
    %12 = vector.load %arg13[%c0_9, %c0_10, %c0_11, %c0_12] : memref<2x4x4x128xf32, #tpu.memory_space<vmem>>, vector<2x1x4x128xf32>
    tpu.vector_store %arg13[%c0_9, %c0_10, %c0_11, %c0_12], %11 {strides = array<i32>} : memref<2x4x4x128xf32, #tpu.memory_space<vmem>>, vector<2x1x4x128xf32>,
    %cst_13 = arith.constant 0.000000e+00 : f32
    %13 = vector.broadcast %cst_13 : f32 to vector<2x1x4x128xf32>
    %c0_14 = arith.constant 0 : index
    %c3 = arith.constant 3 : index
    %c0_15 = arith.constant 0 : index
    %c0_16 = arith.constant 0 : index
    %14 = vector.load %arg13[%c0_14, %c3, %c0_15, %c0_16] : memref<2x4x4x128xf32, #tpu.memory_space<vmem>>, vector<2x1x4x128xf32>
    tpu.vector_store %arg13[%c0_14, %c3, %c0_15, %c0_16], %13 {strides = array<i32>} : memref<2x4x4x128xf32, #tpu.memory_space<vmem>>, vector<2x1x4x128xf32>,
    %cst_17 = arith.constant 0.000000e+00 : f32
    %15 = vector.broadcast %cst_17 : f32 to vector<2x4x1x128xf32>
    %c0_18 = arith.constant 0 : index
    %c0_19 = arith.constant 0 : index
    %c0_20 = arith.constant 0 : index
    %c0_21 = arith.constant 0 : index
    %16 = vector.load %arg13[%c0_18, %c0_19, %c0_20, %c0_21] : memref<2x4x4x128xf32, #tpu.memory_space<vmem>>, vector<2x4x1x128xf32>
    tpu.vector_store %arg13[%c0_18, %c0_19, %c0_20, %c0_21], %15 {strides = array<i32>} : memref<2x4x4x128xf32, #tpu.memory_space<vmem>>, vector<2x4x1x128xf32>,
    %cst_22 = arith.constant 0.000000e+00 : f32
    %17 = vector.broadcast %cst_22 : f32 to vector<2x4x1x128xf32>
    %c0_23 = arith.constant 0 : index
    %c0_24 = arith.constant 0 : index
    %c3_25 = arith.constant 3 : index
    %c0_26 = arith.constant 0 : index
    %18 = vector.load %arg13[%c0_23, %c0_24, %c3_25, %c0_26] : memref<2x4x4x128xf32, #tpu.memory_space<vmem>>, vector<2x4x1x128xf32>
    tpu.vector_store %arg13[%c0_23, %c0_24, %c3_25, %c0_26], %17 {strides = array<i32>} : memref<2x4x4x128xf32, #tpu.memory_space<vmem>>, vector<2x4x1x128xf32>,
    %19 = vector.shape_cast %10 : vector<8x128xf32> to vector<2x2x2x128xf32>
    %c0_27 = arith.constant 0 : index
    %c1 = arith.constant 1 : index
    %c1_28 = arith.constant 1 : index
    %c0_29 = arith.constant 0 : index
    %20 = vector.load %arg13[%c0_27, %c1, %c1_28, %c0_29] : memref<2x4x4x128xf32, #tpu.memory_space<vmem>>, vector<2x2x2x128xf32>
    tpu.vector_store %arg13[%c0_27, %c1, %c1_28, %c0_29], %19 {strides = array<i32>} : memref<2x4x4x128xf32, #tpu.memory_space<vmem>>, vector<2x2x2x128xf32>,
    %c0_30 = arith.constant 0 : index
    %c0_31 = arith.constant 0 : index
    %c0_32 = arith.constant 0 : index
    %c0_33 = arith.constant 0 : index
    %21 = vector.load %arg13[%c0_30, %c0_31, %c0_32, %c0_33] : memref<2x4x4x128xf32, #tpu.memory_space<vmem>>, vector<2x4x4x128xf32>
    %22 = vector.extract_strided_slice %21 {offsets = [0, 0, 0, 0], sizes = [2, 2, 2, 128], strides = [1, 1, 1, 1]} : vector<2x4x4x128xf32> to vector<2x2x2x128xf32>
    %23 = vector.shape_cast %22 : vector<2x2x2x128xf32> to vector<8x128xf32>
    %24 = vector.extract_strided_slice %21 {offsets = [0, 0, 1, 0], sizes = [2, 2, 2, 128], strides = [1, 1, 1, 1]} : vector<2x4x4x128xf32> to vector<2x2x2x128xf32>
    %25 = vector.shape_cast %24 : vector<2x2x2x128xf32> to vector<8x128xf32>
    %26 = vector.extract_strided_slice %21 {offsets = [0, 0, 2, 0], sizes = [2, 2, 2, 128], strides = [1, 1, 1, 1]} : vector<2x4x4x128xf32> to vector<2x2x2x128xf32>
    %27 = vector.shape_cast %26 : vector<2x2x2x128xf32> to vector<8x128xf32>
    %28 = vector.extract_strided_slice %21 {offsets = [0, 1, 0, 0], sizes = [2, 2, 2, 128], strides = [1, 1, 1, 1]} : vector<2x4x4x128xf32> to vector<2x2x2x128xf32>
    %29 = vector.shape_cast %28 : vector<2x2x2x128xf32> to vector<8x128xf32>
    %30 = vector.extract_strided_slice %21 {offsets = [0, 1, 1, 0], sizes = [2, 2, 2, 128], strides = [1, 1, 1, 1]} : vector<2x4x4x128xf32> to vector<2x2x2x128xf32>
    %31 = vector.shape_cast %30 : vector<2x2x2x128xf32> to vector<8x128xf32>
    %32 = vector.extract_strided_slice %21 {offsets = [0, 1, 2, 0], sizes = [2, 2, 2, 128], strides = [1, 1, 1, 1]} : vector<2x4x4x128xf32> to vector<2x2x2x128xf32>
    %33 = vector.shape_cast %32 : vector<2x2x2x128xf32> to vector<8x128xf32>
    %34 = vector.extract_strided_slice %21 {offsets = [0, 2, 0, 0], sizes = [2, 2, 2, 128], strides = [1, 1, 1, 1]} : vector<2x4x4x128xf32> to vector<2x2x2x128xf32>
    %35 = vector.shape_cast %34 : vector<2x2x2x128xf32> to vector<8x128xf32>
    %36 = vector.extract_strided_slice %21 {offsets = [0, 2, 1, 0], sizes = [2, 2, 2, 128], strides = [1, 1, 1, 1]} : vector<2x4x4x128xf32> to vector<2x2x2x128xf32>
    %37 = vector.shape_cast %36 : vector<2x2x2x128xf32> to vector<8x128xf32>
    %38 = vector.extract_strided_slice %21 {offsets = [0, 2, 2, 0], sizes = [2, 2, 2, 128], strides = [1, 1, 1, 1]} : vector<2x4x4x128xf32> to vector<2x2x2x128xf32>
    %39 = vector.shape_cast %38 : vector<2x2x2x128xf32> to vector<8x128xf32>
    %40 = tpu.concatenate %23, %25, %27, %29, %31, %33, %35, %37, %39 in 1 : vector<8x128xf32>, vector<8x128xf32>, vector<8x128xf32>, vector<8x128xf32>, vector<8x128xf32>, vector<8x128xf32>, vector<8x128xf32>, vector<8x128xf32>, vector<8x128xf32> -> vector<8x1152xf32>
    %c0_34 = arith.constant 0 : index
    %c0_35 = arith.constant 0 : index
    %41 = vector.load %arg5[%c0_34, %c0_35] : memref<1152x128xf32, #tpu.memory_space<vmem>>, vector<1152x128xf32>
    %cst_36 = arith.constant dense<0.000000e+00> : vector<8x128xf32>
    %42 = tpu.matmul %40, %41, %cst_36 {dimension_numbers = #tpu.dot_dimension_numbers<[1], [0], [0], [1], [0, 0, 1, 1], [], []>} : vector<8x1152xf32>, vector<1152x128xf32>, vector<8x128xf32> -> vector<8x128xf32>
    %c0_37 = arith.constant 0 : index
    %c0_38 = arith.constant 0 : index
    %43 = vector.load %arg8[%c0_37, %c0_38] : memref<8x64xf32, #tpu.memory_space<vmem>>, vector<8x64xf32>
    %c0_39 = arith.constant 0 : index
    %c0_40 = arith.constant 0 : index
    %44 = vector.load %arg9[%c0_39, %c0_40] : memref<64x128xf32, #tpu.memory_space<vmem>>, vector<64x128xf32>
    %cst_41 = arith.constant dense<0.000000e+00> : vector<8x128xf32>
    %45 = tpu.matmul %43, %44, %cst_41 {dimension_numbers = #tpu.dot_dimension_numbers<[1], [0], [0], [1], [0, 0, 1, 1], [], []>} : vector<8x64xf32>, vector<64x128xf32>, vector<8x128xf32> -> vector<8x128xf32>
    %c0_42 = arith.constant 0 : index
    %c0_43 = arith.constant 0 : index
    %46 = vector.load %arg10[%c0_42, %c0_43] : memref<1x128xf32, #tpu.memory_space<vmem>>, vector<1x128xf32>
    %47 = vector.broadcast %46 : vector<1x128xf32> to vector<8x128xf32>
    %48 = arith.mulf %45, %47 : vector<8x128xf32>
    %c0_44 = arith.constant 0 : index
    %c0_45 = arith.constant 0 : index
    %49 = vector.load %arg11[%c0_44, %c0_45] : memref<1x128xf32, #tpu.memory_space<vmem>>, vector<1x128xf32>
    %50 = vector.broadcast %49 : vector<1x128xf32> to vector<8x128xf32>
    %51 = arith.addf %48, %50 : vector<8x128xf32>
    %c0_46 = arith.constant 0 : index
    %c0_47 = arith.constant 0 : index
    %52 = vector.load %arg6[%c0_46, %c0_47] : memref<1x128xf32, #tpu.memory_space<vmem>>, vector<1x128xf32>
    %53 = vector.broadcast %52 : vector<1x128xf32> to vector<8x128xf32>
    %54 = arith.mulf %42, %53 : vector<8x128xf32>
    %c0_48 = arith.constant 0 : index
    %c0_49 = arith.constant 0 : index
    %55 = vector.load %arg7[%c0_48, %c0_49] : memref<1x128xf32, #tpu.memory_space<vmem>>, vector<1x128xf32>
    %56 = vector.broadcast %55 : vector<1x128xf32> to vector<8x128xf32>
    %57 = arith.addf %54, %56 : vector<8x128xf32>
    %58 = arith.addf %57, %51 : vector<8x128xf32>
    %cst_50 = arith.constant 0.000000e+00 : f32
    %59 = vector.broadcast %cst_50 : f32 to vector<8x128xf32>
    %60 = arith.maximumf %58, %59 : vector<8x128xf32>
    %c0_51 = arith.constant 0 : index
    %c0_52 = arith.constant 0 : index
    %61 = vector.load %arg12[%c0_51, %c0_52] : memref<8x128xf32, #tpu.memory_space<vmem>>, vector<8x128xf32>
    tpu.vector_store %arg12[%c0_51, %c0_52], %60 {strides = array<i32>} : memref<8x128xf32, #tpu.memory_space<vmem>>, vector<8x128xf32>,
    return
  }
  func.func @transform_0(%arg0: i32) -> (i32, i32) {
    %c0_i32 = arith.constant 0 : i32
    %c0_i32_0 = arith.constant 0 : i32
    return %arg0, %c0_i32 : i32, i32
  }
  func.func @transform_1(%arg0: i32) -> (i32, i32) {
    %c0_i32 = arith.constant 0 : i32
    %c0_i32_0 = arith.constant 0 : i32
    %c0_i32_1 = arith.constant 0 : i32
    return %c0_i32, %c0_i32_0 : i32, i32
  }
  func.func @transform_2(%arg0: i32) -> (i32, i32) {
    %c0_i32 = arith.constant 0 : i32
    %c0_i32_0 = arith.constant 0 : i32
    %c0_i32_1 = arith.constant 0 : i32
    return %c0_i32, %c0_i32_0 : i32, i32
  }
  func.func @transform_3(%arg0: i32) -> (i32, i32) {
    %c0_i32 = arith.constant 0 : i32
    %c0_i32_0 = arith.constant 0 : i32
    %c0_i32_1 = arith.constant 0 : i32
    return %c0_i32, %c0_i32_0 : i32, i32
  }
  func.func @transform_4(%arg0: i32) -> (i32, i32) {
    %c0_i32 = arith.constant 0 : i32
    %c0_i32_0 = arith.constant 0 : i32
    %c0_i32_1 = arith.constant 0 : i32
    return %c0_i32, %c0_i32_0 : i32, i32
  }
  func.func @transform_5(%arg0: i32) -> (i32, i32) {
    %c0_i32 = arith.constant 0 : i32
    %c0_i32_0 = arith.constant 0 : i32
    %c0_i32_1 = arith.constant 0 : i32
    return %c0_i32, %c0_i32_0 : i32, i32
  }
  func.func @transform_6(%arg0: i32) -> (i32, i32) {
    %c0_i32 = arith.constant 0 : i32
    %c0_i32_0 = arith.constant 0 : i32
    %c0_i32_1 = arith.constant 0 : i32
    return %c0_i32, %c0_i32_0 : i32, i32
  }
  func.func @transform_7(%arg0: i32) -> (i32, i32) {
    %c0_i32 = arith.constant 0 : i32
    %c0_i32_0 = arith.constant 0 : i32
    return %arg0, %c0_i32 : i32, i32
  }
  func.func @transform_8(%arg0: i32) -> (i32, i32) {
    %c0_i32 = arith.constant 0 : i32
    %c0_i32_0 = arith.constant 0 : i32
    %c0_i32_1 = arith.constant 0 : i32
    return %c0_i32, %c0_i32_0 : i32, i32
  }
  func.func @transform_9(%arg0: i32) -> (i32, i32) {
    %c0_i32 = arith.constant 0 : i32
    %c0_i32_0 = arith.constant 0 : i32
    %c0_i32_1 = arith.constant 0 : i32
    return %c0_i32, %c0_i32_0 : i32, i32
  }
  func.func @transform_10(%arg0: i32) -> (i32, i32) {
    %c0_i32 = arith.constant 0 : i32
    %c0_i32_0 = arith.constant 0 : i32
    %c0_i32_1 = arith.constant 0 : i32
    return %c0_i32, %c0_i32_0 : i32, i32
  }
  func.func @transform_11(%arg0: i32) -> (i32, i32) {
    %c0_i32 = arith.constant 0 : i32
    %c0_i32_0 = arith.constant 0 : i32
    return %arg0, %c0_i32 : i32, i32
  }
}

module attributes {stable_mosaic.version = 11 : i64} {
  func.func @_classifier_kernel(%arg0: i32, %arg1: memref<8x128xf32, #tpu.memory_space<vmem>>, %arg2: memref<128x128xf32, #tpu.memory_space<vmem>>, %arg3: memref<1x128xf32, #tpu.memory_space<vmem>>, %arg4: memref<128x128xf32, #tpu.memory_space<vmem>>, %arg5: memref<1x128xf32, #tpu.memory_space<vmem>>, %arg6: memref<128x2xf32, #tpu.memory_space<vmem>>, %arg7: memref<1x2xf32, #tpu.memory_space<vmem>>, %arg8: memref<8x2xf32, #tpu.memory_space<vmem>>, %arg9: memref<8x2xf32, #tpu.memory_space<vmem>>) attributes {dimension_semantics = [#tpu.dimension_semantics<arbitrary>], iteration_bounds = array<i64: 1>, scalar_prefetch = 0 : i64, scratch_operands = 0 : i64, tpu.core_type = #tpu.core_type<tc>, window_params = [{pipeline_mode = #tpu.pipeline_mode<synchronous>, transform_indices = @transform_0, window_bounds = array<i64: 8, 128>}, {pipeline_mode = #tpu.pipeline_mode<synchronous>, transform_indices = @transform_1, window_bounds = array<i64: 128, 128>}, {pipeline_mode = #tpu.pipeline_mode<synchronous>, transform_indices = @transform_2, window_bounds = array<i64: 1, 128>}, {pipeline_mode = #tpu.pipeline_mode<synchronous>, transform_indices = @transform_3, window_bounds = array<i64: 128, 128>}, {pipeline_mode = #tpu.pipeline_mode<synchronous>, transform_indices = @transform_4, window_bounds = array<i64: 1, 128>}, {pipeline_mode = #tpu.pipeline_mode<synchronous>, transform_indices = @transform_5, window_bounds = array<i64: 128, 2>}, {pipeline_mode = #tpu.pipeline_mode<synchronous>, transform_indices = @transform_6, window_bounds = array<i64: 1, 2>}, {pipeline_mode = #tpu.pipeline_mode<synchronous>, transform_indices = @transform_7, window_bounds = array<i64: 8, 2>}, {pipeline_mode = #tpu.pipeline_mode<synchronous>, transform_indices = @transform_8, window_bounds = array<i64: 8, 2>}]} {
    %c0 = arith.constant 0 : index
    %c0_0 = arith.constant 0 : index
    %0 = vector.load %arg1[%c0, %c0_0] : memref<8x128xf32, #tpu.memory_space<vmem>>, vector<8x128xf32>
    %c0_1 = arith.constant 0 : index
    %c0_2 = arith.constant 0 : index
    %1 = vector.load %arg2[%c0_1, %c0_2] : memref<128x128xf32, #tpu.memory_space<vmem>>, vector<128x128xf32>
    %cst = arith.constant dense<0.000000e+00> : vector<8x128xf32>
    %2 = tpu.matmul %0, %1, %cst {dimension_numbers = #tpu.dot_dimension_numbers<[1], [0], [0], [1], [0, 0, 1, 1], [], []>} : vector<8x128xf32>, vector<128x128xf32>, vector<8x128xf32> -> vector<8x128xf32>
    %c0_3 = arith.constant 0 : index
    %c0_4 = arith.constant 0 : index
    %3 = vector.load %arg3[%c0_3, %c0_4] : memref<1x128xf32, #tpu.memory_space<vmem>>, vector<1x128xf32>
    %4 = vector.broadcast %3 : vector<1x128xf32> to vector<8x128xf32>
    %5 = arith.addf %2, %4 : vector<8x128xf32>
    %cst_5 = arith.constant 0.000000e+00 : f32
    %6 = vector.broadcast %cst_5 : f32 to vector<8x128xf32>
    %7 = arith.maximumf %5, %6 : vector<8x128xf32>
    %c0_6 = arith.constant 0 : index
    %c0_7 = arith.constant 0 : index
    %8 = vector.load %arg4[%c0_6, %c0_7] : memref<128x128xf32, #tpu.memory_space<vmem>>, vector<128x128xf32>
    %cst_8 = arith.constant dense<0.000000e+00> : vector<8x128xf32>
    %9 = tpu.matmul %7, %8, %cst_8 {dimension_numbers = #tpu.dot_dimension_numbers<[1], [0], [0], [1], [0, 0, 1, 1], [], []>} : vector<8x128xf32>, vector<128x128xf32>, vector<8x128xf32> -> vector<8x128xf32>
    %c0_9 = arith.constant 0 : index
    %c0_10 = arith.constant 0 : index
    %10 = vector.load %arg5[%c0_9, %c0_10] : memref<1x128xf32, #tpu.memory_space<vmem>>, vector<1x128xf32>
    %11 = vector.broadcast %10 : vector<1x128xf32> to vector<8x128xf32>
    %12 = arith.addf %9, %11 : vector<8x128xf32>
    %cst_11 = arith.constant 0.000000e+00 : f32
    %13 = vector.broadcast %cst_11 : f32 to vector<8x128xf32>
    %14 = arith.maximumf %12, %13 : vector<8x128xf32>
    %c0_12 = arith.constant 0 : index
    %c0_13 = arith.constant 0 : index
    %15 = vector.load %arg6[%c0_12, %c0_13] : memref<128x2xf32, #tpu.memory_space<vmem>>, vector<128x2xf32>
    %cst_14 = arith.constant dense<0.000000e+00> : vector<8x2xf32>
    %16 = tpu.matmul %14, %15, %cst_14 {dimension_numbers = #tpu.dot_dimension_numbers<[1], [0], [0], [1], [0, 0, 1, 1], [], []>} : vector<8x128xf32>, vector<128x2xf32>, vector<8x2xf32> -> vector<8x2xf32>
    %c0_15 = arith.constant 0 : index
    %c0_16 = arith.constant 0 : index
    %17 = vector.load %arg7[%c0_15, %c0_16] : memref<1x2xf32, #tpu.memory_space<vmem>>, vector<1x2xf32>
    %18 = vector.broadcast %17 : vector<1x2xf32> to vector<8x2xf32>
    %19 = arith.addf %16, %18 : vector<8x2xf32>
    %cst_17 = arith.constant dense<0xFF800000> : vector<8xf32>
    %20 = vector.multi_reduction <maximumf>, %19, %cst_17 [1] : vector<8x2xf32> to vector<8xf32>
    %21 = vector.shape_cast %20 : vector<8xf32> to vector<8x1xf32>
    %22 = vector.broadcast %21 : vector<8x1xf32> to vector<8x2xf32>
    %23 = arith.subf %19, %22 : vector<8x2xf32>
    %24 = math.exp %23 : vector<8x2xf32>
    %cst_18 = arith.constant dense<0.000000e+00> : vector<8xf32>
    %25 = vector.multi_reduction <add>, %24, %cst_18 [1] : vector<8x2xf32> to vector<8xf32>
    %26 = vector.shape_cast %25 : vector<8xf32> to vector<8x1xf32>
    %27 = vector.broadcast %21 : vector<8x1xf32> to vector<8x2xf32>
    %28 = arith.subf %19, %27 : vector<8x2xf32>
    %29 = math.log %26 : vector<8x1xf32>
    %30 = vector.broadcast %29 : vector<8x1xf32> to vector<8x2xf32>
    %31 = arith.subf %28, %30 : vector<8x2xf32>
    %c0_19 = arith.constant 0 : index
    %c0_20 = arith.constant 0 : index
    %32 = vector.load %arg8[%c0_19, %c0_20] : memref<8x2xf32, #tpu.memory_space<vmem>>, vector<8x2xf32>
    tpu.vector_store %arg8[%c0_19, %c0_20], %31 {strides = array<i32>} : memref<8x2xf32, #tpu.memory_space<vmem>>, vector<8x2xf32>,
    %33 = vector.broadcast %26 : vector<8x1xf32> to vector<8x2xf32>
    %34 = arith.divf %24, %33 : vector<8x2xf32>
    %c0_21 = arith.constant 0 : index
    %c0_22 = arith.constant 0 : index
    %35 = vector.load %arg9[%c0_21, %c0_22] : memref<8x2xf32, #tpu.memory_space<vmem>>, vector<8x2xf32>
    tpu.vector_store %arg9[%c0_21, %c0_22], %34 {strides = array<i32>} : memref<8x2xf32, #tpu.memory_space<vmem>>, vector<8x2xf32>,
    return
  }
  func.func @transform_0(%arg0: i32) -> (i32, i32) {
    %c0_i32 = arith.constant 0 : i32
    %c0_i32_0 = arith.constant 0 : i32
    %c0_i32_1 = arith.constant 0 : i32
    return %c0_i32, %c0_i32_0 : i32, i32
  }
  func.func @transform_1(%arg0: i32) -> (i32, i32) {
    %c0_i32 = arith.constant 0 : i32
    %c0_i32_0 = arith.constant 0 : i32
    %c0_i32_1 = arith.constant 0 : i32
    return %c0_i32, %c0_i32_0 : i32, i32
  }
  func.func @transform_2(%arg0: i32) -> (i32, i32) {
    %c0_i32 = arith.constant 0 : i32
    %c0_i32_0 = arith.constant 0 : i32
    %c0_i32_1 = arith.constant 0 : i32
    return %c0_i32, %c0_i32_0 : i32, i32
  }
  func.func @transform_3(%arg0: i32) -> (i32, i32) {
    %c0_i32 = arith.constant 0 : i32
    %c0_i32_0 = arith.constant 0 : i32
    %c0_i32_1 = arith.constant 0 : i32
    return %c0_i32, %c0_i32_0 : i32, i32
  }
  func.func @transform_4(%arg0: i32) -> (i32, i32) {
    %c0_i32 = arith.constant 0 : i32
    %c0_i32_0 = arith.constant 0 : i32
    %c0_i32_1 = arith.constant 0 : i32
    return %c0_i32, %c0_i32_0 : i32, i32
  }
  func.func @transform_5(%arg0: i32) -> (i32, i32) {
    %c0_i32 = arith.constant 0 : i32
    %c0_i32_0 = arith.constant 0 : i32
    %c0_i32_1 = arith.constant 0 : i32
    return %c0_i32, %c0_i32_0 : i32, i32
  }
  func.func @transform_6(%arg0: i32) -> (i32, i32) {
    %c0_i32 = arith.constant 0 : i32
    %c0_i32_0 = arith.constant 0 : i32
    %c0_i32_1 = arith.constant 0 : i32
    return %c0_i32, %c0_i32_0 : i32, i32
  }
  func.func @transform_7(%arg0: i32) -> (i32, i32) {
    %c0_i32 = arith.constant 0 : i32
    %c0_i32_0 = arith.constant 0 : i32
    %c0_i32_1 = arith.constant 0 : i32
    return %c0_i32, %c0_i32_0 : i32, i32
  }
  func.func @transform_8(%arg0: i32) -> (i32, i32) {
    %c0_i32 = arith.constant 0 : i32
    %c0_i32_0 = arith.constant 0 : i32
    %c0_i32_1 = arith.constant 0 : i32
    return %c0_i32, %c0_i32_0 : i32, i32
  }
}

</mosaic_0001>

<bundles_post_ra>
// kernel: simple_rsn_forward.6
= control target key start
LH: loop header
LB: loop body
LE: loop exit
PB: predicated region body
PF: predicated region fallthrough
CT: control target
= control target key end

     0   :  { %v1127_v0 = vmov 0.0   ;;  %vm357_vm0 = vcmask 1042432   ;;  %vm164_vm1 = vcmask 154624   ;;  %vm952_vm2 = vcmask 130048   ;;  %s2090_s1 = inlined_call_operand.vmem [shape: f32[147,16], index: 1, kind: input, shape index: {}]   ;;  %s2091_s0 = inlined_call_operand.vmem [shape: f32[512,147], index: 0, kind: input, shape index: {}]   ;;  %s2092_s2 = inlined_call_operand.vmem [shape: f32[1,16], index: 2, kind: input, shape index: {}]   ;;  %s2093_s3 = inlined_call_operand.vmem [shape: f32[1,16], index: 3, kind: input, shape index: {}]   ;;  %s2094_s4 = inlined_call_operand.vmem [shape: f32[512,16], index: 4, kind: output, shape index: {}]  }
   0x1   :  { %361 = vmatprep.subr.mxu0 %v1127_v0  ;;  %1088 = vmatprep.subr.mxu1 %v1127_v0  ;;  %v160_v1 = vld [vmem:[%s2090_s1 + $0x78] sm:$0xff]  ;;  %v159_v2 = vld [vmem:[%s2090_s1 + $0x70] sm:$0xff]  ;;  %v158_v3 = vld [vmem:[%s2090_s1 + $0x68] sm:$0xff] }
   0x2   :  { %362 = vmatpush1.msra.mxu0 %v160_v1  ;;  %1107 = vmatpush1.msra.mxu1 %v160_v1  ;;  %v157_v4 = vld [vmem:[%s2090_s1 + $0x60] sm:$0xff]  ;;  %v156_v5 = vld [vmem:[%s2090_s1 + $0x58] sm:$0xff]  ;;  %v155_v6 = vld [vmem:[%s2090_s1 + $0x50] sm:$0xff] }
   0x3   :  { %363 = vmatprep.subr.mxu0 %v1127_v0  ;;  %1089 = vmatprep.subr.mxu1 %v1127_v0  ;;  %v154_v7 = vld [vmem:[%s2090_s1 + $0x48] sm:$0xff]  ;;  %v153_v8 = vld [vmem:[%s2090_s1 + $0x40] sm:$0xff]  ;;  %v152_v9 = vld [vmem:[%s2090_s1 + $0x38] sm:$0xff] }
   0x4   :  { %364 = vmatpush1.msra.mxu0 %v159_v2  ;;  %1108 = vmatpush1.msra.mxu1 %v159_v2  ;;  %v151_v10 = vld [vmem:[%s2090_s1 + $0x30] sm:$0xff]  ;;  %v150_v11 = vld [vmem:[%s2090_s1 + $0x28] sm:$0xff]  ;;  %v149_v12 = vld [vmem:[%s2090_s1 + $0x20] sm:$0xff] }
   0x5   :  { %365 = vmatprep.subr.mxu0 %v1127_v0  ;;  %1090 = vmatprep.subr.mxu1 %v1127_v0  ;;  %v148_v13 = vld [vmem:[%s2090_s1 + $0x18] sm:$0xff]  ;;  %v147_v14 = vld [vmem:[%s2090_s1 + $0x10] sm:$0xff]  ;;  %v146_v15 = vld [vmem:[%s2090_s1 + $0x8] sm:$0xff] }
   0x6   :  { %366 = vmatpush1.msra.mxu0 %v158_v3  ;;  %1109 = vmatpush1.msra.mxu1 %v158_v3  ;;  %v145_v16 = vld [vmem:[%s2090_s1] sm:$0xff]  ;;  %v163_v17 = vld [vmem:[%s2090_s1 + $0x90] sm:$0x7]  ;;  %v162_v18 = vld [vmem:[%s2090_s1 + $0x88] sm:$0xff] }
   0x7   :  { %367 = vmatprep.subr.mxu0 %v1127_v0  ;;  %1091 = vmatprep.subr.mxu1 %v1127_v0  ;;  %v161_v19 = vld [vmem:[%s2090_s1 + $0x80] sm:$0xff]  ;;  %v18_v20 = vld [vmem:[%s2091_s0 + $0x8] sm:$0xff]  ;;  %v20_v24 = vld [vmem:[%s2091_s0 + $0x18] sm:$0xff] }
   0x8   :  { %368 = vmatpush1.msra.mxu0 %v157_v4  ;;  %1110 = vmatpush1.msra.mxu1 %v157_v4  ;;  %v82_v21 = vld [vmem:[%s2091_s0 + $0x208] sm:$0xff]  ;;  %v17_v22 = vld [vmem:[%s2091_s0] sm:$0xff]  ;;  %v84_v25 = vld [vmem:[%s2091_s0 + $0x218] sm:$0xff] }
   0x9   :  { %369 = vmatprep.subr.mxu0 %v1127_v0  ;;  %1092 = vmatprep.subr.mxu1 %v1127_v0  ;;  %v81_v23 = vld [vmem:[%s2091_s0 + $0x200] sm:$0xff]  ;;  %v19_v26 = vld [vmem:[%s2091_s0 + $0x10] sm:$0xff]  ;;  %v22_v28 = vld [vmem:[%s2091_s0 + $0x28] sm:$0xff] }
   0xa   :  { %370 = vmatpush1.msra.mxu0 %v156_v5  ;;  %1111 = vmatpush1.msra.mxu1 %v156_v5  ;;  %v83_v27 = vld [vmem:[%s2091_s0 + $0x210] sm:$0xff]  ;;  %v86_v29 = vld [vmem:[%s2091_s0 + $0x228] sm:$0xff]  ;;  %v21_v30 = vld [vmem:[%s2091_s0 + $0x20] sm:$0xff] }
   0xb   :  { %371 = vmatprep.subr.mxu0 %v1127_v0  ;;  %1093 = vmatprep.subr.mxu1 %v1127_v0  ;;  %v85_v31 = vld [vmem:[%s2091_s0 + $0x220] sm:$0xff]  ;;  %v24_v32 = vld [vmem:[%s2091_s0 + $0x38] sm:$0xff]  ;;  %v23_v34 = vld [vmem:[%s2091_s0 + $0x30] sm:$0xff] }
   0xc   :  { %372 = vmatpush1.msra.mxu0 %v155_v6  ;;  %1112 = vmatpush1.msra.mxu1 %v155_v6  ;;  %v88_v33 = vld [vmem:[%s2091_s0 + $0x238] sm:$0xff]  ;;  %v87_v35 = vld [vmem:[%s2091_s0 + $0x230] sm:$0xff]  ;;  %v26_v36 = vld [vmem:[%s2091_s0 + $0x48] sm:$0xff] }
   0xd   :  { %373 = vmatprep.subr.mxu0 %v1127_v0  ;;  %1094 = vmatprep.subr.mxu1 %v1127_v0  ;;  %v90_v37 = vld [vmem:[%s2091_s0 + $0x248] sm:$0xff]  ;;  %v25_v38 = vld [vmem:[%s2091_s0 + $0x40] sm:$0xff]  ;;  %v28_v40 = vld [vmem:[%s2091_s0 + $0x58] sm:$0xff] }
   0xe   :  { %374 = vmatpush1.msra.mxu0 %v154_v7  ;;  %1113 = vmatpush1.msra.mxu1 %v154_v7  ;;  %v89_v39 = vld [vmem:[%s2091_s0 + $0x240] sm:$0xff]  ;;  %v92_v41 = vld [vmem:[%s2091_s0 + $0x258] sm:$0xff]  ;;  %v27_v42 = vld [vmem:[%s2091_s0 + $0x50] sm:$0xff] }
   0xf   :  { %375 = vmatprep.subr.mxu0 %v1127_v0  ;;  %1095 = vmatprep.subr.mxu1 %v1127_v0  ;;  %v91_v43 = vld [vmem:[%s2091_s0 + $0x250] sm:$0xff]  ;;  %v30_v44 = vld [vmem:[%s2091_s0 + $0x68] sm:$0xff]  ;;  %v29_v46 = vld [vmem:[%s2091_s0 + $0x60] sm:$0xff] }
  0x10   :  { %376 = vmatpush1.msra.mxu0 %v153_v8  ;;  %1114 = vmatpush1.msra.mxu1 %v153_v8  ;;  %v94_v45 = vld [vmem:[%s2091_s0 + $0x268] sm:$0xff]  ;;  %v93_v47 = vld [vmem:[%s2091_s0 + $0x260] sm:$0xff]  ;;  %v32_v48 = vld [vmem:[%s2091_s0 + $0x78] sm:$0xff] }
  0x11   :  { %377 = vmatprep.subr.mxu0 %v1127_v0  ;;  %1096 = vmatprep.subr.mxu1 %v1127_v0  ;;  %v96_v49 = vld [vmem:[%s2091_s0 + $0x278] sm:$0xff]  ;;  %v31_v50 = vld [vmem:[%s2091_s0 + $0x70] sm:$0xff]  ;;  %v34_v52 = vld [vmem:[%s2091_s0 + $0x88] sm:$0xff] }
  0x12   :  { %378 = vmatpush1.msra.mxu0 %v152_v9  ;;  %1115 = vmatpush1.msra.mxu1 %v152_v9  ;;  %v95_v51 = vld [vmem:[%s2091_s0 + $0x270] sm:$0xff]  ;;  %v98_v53 = vld [vmem:[%s2091_s0 + $0x288] sm:$0xff]  ;;  %v33_v54 = vld [vmem:[%s2091_s0 + $0x80] sm:$0xff] }
  0x13   :  { %379 = vmatprep.subr.mxu0 %v1127_v0  ;;  %1097 = vmatprep.subr.mxu1 %v1127_v0  ;;  %v97_v55 = vld [vmem:[%s2091_s0 + $0x280] sm:$0xff]  ;;  %v36_v56 = vld [vmem:[%s2091_s0 + $0x98] sm:$0xff]  ;;  %v35_v58 = vld [vmem:[%s2091_s0 + $0x90] sm:$0xff] }
  0x14   :  { %380 = vmatpush1.msra.mxu0 %v151_v10  ;;  %1116 = vmatpush1.msra.mxu1 %v151_v10  ;;  %v100_v57 = vld [vmem:[%s2091_s0 + $0x298] sm:$0xff]  ;;  %v99_v59 = vld [vmem:[%s2091_s0 + $0x290] sm:$0xff]  ;;  %v38_v60 = vld [vmem:[%s2091_s0 + $0xa8] sm:$0xff] }
  0x15   :  { %381 = vmatprep.subr.mxu0 %v1127_v0  ;;  %1098 = vmatprep.subr.mxu1 %v1127_v0  ;;  %v102_v61 = vld [vmem:[%s2091_s0 + $0x2a8] sm:$0xff]  ;;  %v37_v62 = vld [vmem:[%s2091_s0 + $0xa0] sm:$0xff]  ;;  %v104_v1 = vld [vmem:[%s2091_s0 + $0x2b8] sm:$0xff] }
  0x16   :  { %382 = vmatpush1.msra.mxu0 %v150_v11  ;;  %1117 = vmatpush1.msra.mxu1 %v150_v11  ;;  %v101_v63 = vld [vmem:[%s2091_s0 + $0x2a0] sm:$0xff]  ;;  %v39_v2 = vld [vmem:[%s2091_s0 + $0xb0] sm:$0xff]  ;;  %v42_v4 = vld [vmem:[%s2091_s0 + $0xc8] sm:$0xff] }
  0x17   :  { %383 = vmatprep.subr.mxu0 %v1127_v0  ;;  %1099 = vmatprep.subr.mxu1 %v1127_v0  ;;  %v103_v3 = vld [vmem:[%s2091_s0 + $0x2b0] sm:$0xff]  ;;  %v106_v5 = vld [vmem:[%s2091_s0 + $0x2c8] sm:$0xff]  ;;  %v41_v6 = vld [vmem:[%s2091_s0 + $0xc0] sm:$0xff] }
  0x18   :  { %384 = vmatpush1.msra.mxu0 %v149_v12  ;;  %1118 = vmatpush1.msra.mxu1 %v149_v12  ;;  %v105_v7 = vld [vmem:[%s2091_s0 + $0x2c0] sm:$0xff]  ;;  %v44_v8 = vld [vmem:[%s2091_s0 + $0xd8] sm:$0xff]  ;;  %v43_v10 = vld [vmem:[%s2091_s0 + $0xd0] sm:$0xff] }
  0x19   :  { %385 = vmatprep.subr.mxu0 %v1127_v0  ;;  %1100 = vmatprep.subr.mxu1 %v1127_v0  ;;  %v108_v9 = vld [vmem:[%s2091_s0 + $0x2d8] sm:$0xff]  ;;  %v107_v11 = vld [vmem:[%s2091_s0 + $0x2d0] sm:$0xff]  ;;  %v46_v12 = vld [vmem:[%s2091_s0 + $0xe8] sm:$0xff] }
  0x1a   :  { %386 = vmatpush1.msra.mxu0 %v148_v13  ;;  %1119 = vmatpush1.msra.mxu1 %v148_v13  ;;  %v110_v13 = vld [vmem:[%s2091_s0 + $0x2e8] sm:$0xff] }
  0x1b   :  { %387 = vmatprep.subr.mxu0 %v1127_v0  ;;  %1101 = vmatprep.subr.mxu1 %v1127_v0 }
  0x1c   :  { %388 = vmatpush1.msra.mxu0 %v147_v14  ;;  %1120 = vmatpush1.msra.mxu1 %v147_v14  ;;  %v45_v14 = vld [vmem:[%s2091_s0 + $0xe0] sm:$0xff] }
  0x1d   :  { %389 = vmatprep.subr.mxu0 %v1127_v0  ;;  %1102 = vmatprep.subr.mxu1 %v1127_v0 }
  0x1e   :  { %390 = vmatpush1.msra.mxu0 %v146_v15  ;;  %1121 = vmatpush1.msra.mxu1 %v146_v15  ;;  %v109_v15 = vld [vmem:[%s2091_s0 + $0x2e0] sm:$0xff] }
  0x1f   :  { %391 = vmatprep.subr.mxu0 %v1127_v0  ;;  %1103 = vmatprep.subr.mxu1 %v1127_v0 }
  0x20   :  { %392 = vmatpush1.msra.mxu0 %v145_v16  ;;  %1122 = vmatpush1.msra.mxu1 %v145_v16  ;;  %v48_v16 = vld [vmem:[%s2091_s0 + $0xf8] sm:$0xff] }
  0x21   :  { %419 = vmatprep.subr.mxu0 %v1127_v0  ;;  %1104 = vmatprep.subr.mxu1 %v1127_v0 }
  0x22   :  { %1021 = vmatpush2.msk.msra.mxu0 %vm357_vm0, %v163_v17  ;;  %1123 = vmatpush2.msk.msra.mxu1 %vm357_vm0, %v163_v17  ;;  %v112_v17 = vld [vmem:[%s2091_s0 + $0x2f8] sm:$0xff] }
  0x23   :  { %421 = vmatprep.subr.mxu0 %v1127_v0  ;;  %1105 = vmatprep.subr.mxu1 %v1127_v0 }
  0x24   :  { %422 = vmatpush2.msra.mxu0 %v162_v18  ;;  %1124 = vmatpush2.msra.mxu1 %v162_v18  ;;  %v47_v18 = vld [vmem:[%s2091_s0 + $0xf0] sm:$0xff] }
  0x25   :  { %423 = vmatprep.subr.mxu0 %v1127_v0  ;;  %1106 = vmatprep.subr.mxu1 %v1127_v0  ;;  %v40_v0 = vld [vmem:[%s2091_s0 + $0xb8] sm:$0xff] }
  0x26   :  { %424 = vmatpush2.msra.mxu0 %v161_v19  ;;  %1125 = vmatpush2.msra.mxu1 %v161_v19  ;;  %v111_v19 = vld [vmem:[%s2091_s0 + $0x2f0] sm:$0xff] }
  0x27   :  { %1022 = vmatprep.mubr.msk.f32.mxu0 %vm164_vm1, %v18_v20  ;;  %1054 = vmatprep.mubr.msk.f32.mxu1 %vm164_vm1, %v82_v21  ;;  %v50_v20 = vld [vmem:[%s2091_s0 + $0x108] sm:$0xff] }
  0x28   :  { %426 = vmatmul.mubr.f32.vlgmr.msra.gmra.mxu0 %v17_v22  ;;  %586 = vmatmul.mubr.f32.vlgmr.msra.gmra.mxu1 %v81_v23  ;;  %v114_v21 = vld [vmem:[%s2091_s0 + $0x308] sm:$0xff]  ;;  %v49_v22 = vld [vmem:[%s2091_s0 + $0x100] sm:$0xff] }
  0x29   :  { %1023 = vmatprep.mubr.msk.f32.mxu0 %vm164_vm1, %v20_v24  ;;  %1055 = vmatprep.mubr.msk.f32.mxu1 %vm164_vm1, %v84_v25  ;;  %v113_v23 = vld [vmem:[%s2091_s0 + $0x300] sm:$0xff]  ;;  %v52_v24 = vld [vmem:[%s2091_s0 + $0x118] sm:$0xff] }
  0x2a   :  { %v116_v25 = vld [vmem:[%s2091_s0 + $0x318] sm:$0xff] }
  0x2c   :  { %431 = vmatmul.mubr.f32.gmra.mxu0 %v19_v26  ;;  %591 = vmatmul.mubr.f32.gmra.mxu1 %v83_v27  ;;  %v51_v26 = vld [vmem:[%s2091_s0 + $0x110] sm:$0xff] }
  0x2d   :  { %1024 = vmatprep.mubr.msk.f32.mxu0 %vm164_vm1, %v22_v28  ;;  %1056 = vmatprep.mubr.msk.f32.mxu1 %vm164_vm1, %v86_v29  ;;  %v115_v27 = vld [vmem:[%s2091_s0 + $0x310] sm:$0xff]  ;;  %v54_v28 = vld [vmem:[%s2091_s0 + $0x128] sm:$0xff] }
  0x2e   :  { %v118_v29 = vld [vmem:[%s2091_s0 + $0x328] sm:$0xff] }
  0x30   :  { %436 = vmatmul.mubr.f32.gmra.mxu0 %v21_v30  ;;  %596 = vmatmul.mubr.f32.gmra.mxu1 %v85_v31  ;;  %v53_v30 = vld [vmem:[%s2091_s0 + $0x120] sm:$0xff] }
  0x31   :  { %1025 = vmatprep.mubr.msk.f32.mxu0 %vm164_vm1, %v24_v32  ;;  %1057 = vmatprep.mubr.msk.f32.mxu1 %vm164_vm1, %v88_v33  ;;  %v117_v31 = vld [vmem:[%s2091_s0 + $0x320] sm:$0xff]  ;;  %v56_v32 = vld [vmem:[%s2091_s0 + $0x138] sm:$0xff] }
  0x32   :  { %v120_v33 = vld [vmem:[%s2091_s0 + $0x338] sm:$0xff] }
  0x34   :  { %441 = vmatmul.mubr.f32.gmra.mxu0 %v23_v34  ;;  %601 = vmatmul.mubr.f32.gmra.mxu1 %v87_v35  ;;  %v55_v34 = vld [vmem:[%s2091_s0 + $0x130] sm:$0xff] }
  0x35   :  { %1026 = vmatprep.mubr.msk.f32.mxu0 %vm164_vm1, %v26_v36  ;;  %1058 = vmatprep.mubr.msk.f32.mxu1 %vm164_vm1, %v90_v37  ;;  %v119_v35 = vld [vmem:[%s2091_s0 + $0x330] sm:$0xff]  ;;  %v58_v36 = vld [vmem:[%s2091_s0 + $0x148] sm:$0xff] }
  0x36   :  { %v122_v37 = vld [vmem:[%s2091_s0 + $0x348] sm:$0xff] }
  0x38   :  { %446 = vmatmul.mubr.f32.gmra.mxu0 %v25_v38  ;;  %606 = vmatmul.mubr.f32.gmra.mxu1 %v89_v39  ;;  %v57_v38 = vld [vmem:[%s2091_s0 + $0x140] sm:$0xff] }
  0x39   :  { %1027 = vmatprep.mubr.msk.f32.mxu0 %vm164_vm1, %v28_v40  ;;  %1059 = vmatprep.mubr.msk.f32.mxu1 %vm164_vm1, %v92_v41  ;;  %v121_v39 = vld [vmem:[%s2091_s0 + $0x340] sm:$0xff]  ;;  %v60_v40 = vld [vmem:[%s2091_s0 + $0x158] sm:$0xff] }
  0x3a   :  { %v124_v41 = vld [vmem:[%s2091_s0 + $0x358] sm:$0xff] }
  0x3c   :  { %451 = vmatmul.mubr.f32.gmra.mxu0 %v27_v42  ;;  %611 = vmatmul.mubr.f32.gmra.mxu1 %v91_v43  ;;  %v59_v42 = vld [vmem:[%s2091_s0 + $0x150] sm:$0xff] }
  0x3d   :  { %1028 = vmatprep.mubr.msk.f32.mxu0 %vm164_vm1, %v30_v44  ;;  %1060 = vmatprep.mubr.msk.f32.mxu1 %vm164_vm1, %v94_v45  ;;  %v123_v43 = vld [vmem:[%s2091_s0 + $0x350] sm:$0xff]  ;;  %v62_v44 = vld [vmem:[%s2091_s0 + $0x168] sm:$0xff] }
  0x3e   :  { %v126_v45 = vld [vmem:[%s2091_s0 + $0x368] sm:$0xff] }
  0x40   :  { %456 = vmatmul.mubr.f32.gmra.mxu0 %v29_v46  ;;  %616 = vmatmul.mubr.f32.gmra.mxu1 %v93_v47  ;;  %v61_v46 = vld [vmem:[%s2091_s0 + $0x160] sm:$0xff] }
  0x41   :  { %1029 = vmatprep.mubr.msk.f32.mxu0 %vm164_vm1, %v32_v48  ;;  %1061 = vmatprep.mubr.msk.f32.mxu1 %vm164_vm1, %v96_v49  ;;  %v125_v47 = vld [vmem:[%s2091_s0 + $0x360] sm:$0xff]  ;;  %v64_v48 = vld [vmem:[%s2091_s0 + $0x178] sm:$0xff] }
  0x42   :  { %v128_v49 = vld [vmem:[%s2091_s0 + $0x378] sm:$0xff] }
  0x44   :  { %461 = vmatmul.mubr.f32.gmra.mxu0 %v31_v50  ;;  %621 = vmatmul.mubr.f32.gmra.mxu1 %v95_v51  ;;  %v63_v50 = vld [vmem:[%s2091_s0 + $0x170] sm:$0xff] }
  0x45   :  { %1030 = vmatprep.mubr.msk.f32.mxu0 %vm164_vm1, %v34_v52  ;;  %1062 = vmatprep.mubr.msk.f32.mxu1 %vm164_vm1, %v98_v53  ;;  %v127_v51 = vld [vmem:[%s2091_s0 + $0x370] sm:$0xff]  ;;  %v66_v52 = vld [vmem:[%s2091_s0 + $0x188] sm:$0xff] }
  0x46   :  { %v130_v53 = vld [vmem:[%s2091_s0 + $0x388] sm:$0xff] }
  0x48   :  { %466 = vmatmul.mubr.f32.gmra.mxu0 %v33_v54  ;;  %626 = vmatmul.mubr.f32.gmra.mxu1 %v97_v55  ;;  %v65_v54 = vld [vmem:[%s2091_s0 + $0x180] sm:$0xff] }
  0x49   :  { %1031 = vmatprep.mubr.msk.f32.mxu0 %vm164_vm1, %v36_v56  ;;  %1063 = vmatprep.mubr.msk.f32.mxu1 %vm164_vm1, %v100_v57  ;;  %v129_v55 = vld [vmem:[%s2091_s0 + $0x380] sm:$0xff]  ;;  %v68_v56 = vld [vmem:[%s2091_s0 + $0x198] sm:$0xff] }
  0x4a   :  { %v132_v57 = vld [vmem:[%s2091_s0 + $0x398] sm:$0xff] }
  0x4c   :  { %471 = vmatmul.mubr.f32.gmra.mxu0 %v35_v58  ;;  %631 = vmatmul.mubr.f32.gmra.mxu1 %v99_v59  ;;  %v67_v58 = vld [vmem:[%s2091_s0 + $0x190] sm:$0xff] }
  0x4d   :  { %1032 = vmatprep.mubr.msk.f32.mxu0 %vm164_vm1, %v38_v60  ;;  %1064 = vmatprep.mubr.msk.f32.mxu1 %vm164_vm1, %v102_v61  ;;  %v131_v59 = vld [vmem:[%s2091_s0 + $0x390] sm:$0xff]  ;;  %v70_v60 = vld [vmem:[%s2091_s0 + $0x1a8] sm:$0xff] }
  0x4e   :  { %v134_v61 = vld [vmem:[%s2091_s0 + $0x3a8] sm:$0xff] }
  0x50   :  { %476 = vmatmul.mubr.f32.gmra.mxu0 %v37_v62  ;;  %636 = vmatmul.mubr.f32.gmra.mxu1 %v101_v63  ;;  %v69_v62 = vld [vmem:[%s2091_s0 + $0x1a0] sm:$0xff] }
  0x51   :  { %1033 = vmatprep.mubr.msk.f32.mxu0 %vm164_vm1, %v40_v0  ;;  %1065 = vmatprep.mubr.msk.f32.mxu1 %vm164_vm1, %v104_v1  ;;  %v133_v63 = vld [vmem:[%s2091_s0 + $0x3a0] sm:$0xff]  ;;  %v72_v0 = vld [vmem:[%s2091_s0 + $0x1b8] sm:$0xff] }
  0x52   :  { %v136_v1 = vld [vmem:[%s2091_s0 + $0x3b8] sm:$0xff] }
  0x54   :  { %481 = vmatmul.mubr.f32.gmra.mxu0 %v39_v2  ;;  %641 = vmatmul.mubr.f32.gmra.mxu1 %v103_v3  ;;  %v71_v2 = vld [vmem:[%s2091_s0 + $0x1b0] sm:$0xff] }
  0x55   :  { %1034 = vmatprep.mubr.msk.f32.mxu0 %vm164_vm1, %v42_v4  ;;  %1066 = vmatprep.mubr.msk.f32.mxu1 %vm164_vm1, %v106_v5  ;;  %v135_v3 = vld [vmem:[%s2091_s0 + $0x3b0] sm:$0xff]  ;;  %v74_v4 = vld [vmem:[%s2091_s0 + $0x1c8] sm:$0xff] }
  0x56   :  { %v138_v5 = vld [vmem:[%s2091_s0 + $0x3c8] sm:$0xff] }
  0x58   :  { %486 = vmatmul.mubr.f32.gmra.mxu0 %v41_v6  ;;  %646 = vmatmul.mubr.f32.gmra.mxu1 %v105_v7  ;;  %v73_v6 = vld [vmem:[%s2091_s0 + $0x1c0] sm:$0xff] }
  0x59   :  { %1035 = vmatprep.mubr.msk.f32.mxu0 %vm164_vm1, %v44_v8  ;;  %1067 = vmatprep.mubr.msk.f32.mxu1 %vm164_vm1, %v108_v9  ;;  %v137_v7 = vld [vmem:[%s2091_s0 + $0x3c0] sm:$0xff]  ;;  %v76_v8 = vld [vmem:[%s2091_s0 + $0x1d8] sm:$0xff] }
  0x5a   :  { %v140_v9 = vld [vmem:[%s2091_s0 + $0x3d8] sm:$0xff] }
  0x5c   :  { %491 = vmatmul.mubr.f32.gmra.mxu0 %v43_v10  ;;  %651 = vmatmul.mubr.f32.gmra.mxu1 %v107_v11  ;;  %v75_v10 = vld [vmem:[%s2091_s0 + $0x1d0] sm:$0xff] }
  0x5d   :  { %1036 = vmatprep.mubr.msk.f32.mxu0 %vm164_vm1, %v46_v12  ;;  %1068 = vmatprep.mubr.msk.f32.mxu1 %vm164_vm1, %v110_v13  ;;  %v139_v11 = vld [vmem:[%s2091_s0 + $0x3d0] sm:$0xff]  ;;  %v78_v12 = vld [vmem:[%s2091_s0 + $0x1e8] sm:$0xff] }
  0x5e   :  { %v142_v13 = vld [vmem:[%s2091_s0 + $0x3e8] sm:$0xff] }
  0x60   :  { %496 = vmatmul.mubr.f32.gmra.mxu0 %v45_v14  ;;  %656 = vmatmul.mubr.f32.gmra.mxu1 %v109_v15  ;;  %v77_v14 = vld [vmem:[%s2091_s0 + $0x1e0] sm:$0xff] }
  0x61   :  { %1037 = vmatprep.mubr.msk.f32.mxu0 %vm164_vm1, %v48_v16  ;;  %1069 = vmatprep.mubr.msk.f32.mxu1 %vm164_vm1, %v112_v17  ;;  %v141_v15 = vld [vmem:[%s2091_s0 + $0x3e0] sm:$0xff]  ;;  %v80_v16 = vld [vmem:[%s2091_s0 + $0x1f8] sm:$0xff] }
  0x62   :  { %v144_v17 = vld [vmem:[%s2091_s0 + $0x3f8] sm:$0xff] }
  0x64   :  { %501 = vmatmul.mubr.f32.gmra.mxu0 %v47_v18  ;;  %661 = vmatmul.mubr.f32.gmra.mxu1 %v111_v19  ;;  %v79_v18 = vld [vmem:[%s2091_s0 + $0x1f0] sm:$0xff] }
  0x65   :  { %1038 = vmatprep.mubr.msk.f32.mxu0 %vm164_vm1, %v50_v20  ;;  %1070 = vmatprep.mubr.msk.f32.mxu1 %vm164_vm1, %v114_v21  ;;  %v143_v19 = vld [vmem:[%s2091_s0 + $0x3f0] sm:$0xff]  ;;  %v1699_v20 = vld [vmem:[%s2092_s2] ss:$0 sm:$0xff] }
  0x68   :  { %506 = vmatmul.mubr.f32.gmra.mxu0 %v49_v22  ;;  %666 = vmatmul.mubr.f32.gmra.mxu1 %v113_v23  ;;  %v1704_v22 = vld [vmem:[%s2093_s3] ss:$0 sm:$0xff] }
  0x69   :  { %1039 = vmatprep.mubr.msk.f32.mxu0 %vm164_vm1, %v52_v24  ;;  %1071 = vmatprep.mubr.msk.f32.mxu1 %vm164_vm1, %v116_v25 }
  0x6c   :  { %511 = vmatmul.mubr.f32.gmra.mxu0 %v51_v26  ;;  %671 = vmatmul.mubr.f32.gmra.mxu1 %v115_v27 }
  0x6d   :  { %1040 = vmatprep.mubr.msk.f32.mxu0 %vm164_vm1, %v54_v28  ;;  %1072 = vmatprep.mubr.msk.f32.mxu1 %vm164_vm1, %v118_v29 }
  0x70   :  { %516 = vmatmul.mubr.f32.gmra.mxu0 %v53_v30  ;;  %676 = vmatmul.mubr.f32.gmra.mxu1 %v117_v31 }
  0x71   :  { %1041 = vmatprep.mubr.msk.f32.mxu0 %vm164_vm1, %v56_v32  ;;  %1073 = vmatprep.mubr.msk.f32.mxu1 %vm164_vm1, %v120_v33 }
  0x74   :  { %521 = vmatmul.mubr.f32.gmra.mxu0 %v55_v34  ;;  %681 = vmatmul.mubr.f32.gmra.mxu1 %v119_v35 }
  0x75   :  { %1042 = vmatprep.mubr.msk.f32.mxu0 %vm164_vm1, %v58_v36  ;;  %1074 = vmatprep.mubr.msk.f32.mxu1 %vm164_vm1, %v122_v37 }
  0x78   :  { %526 = vmatmul.mubr.f32.gmra.mxu0 %v57_v38  ;;  %686 = vmatmul.mubr.f32.gmra.mxu1 %v121_v39 }
  0x79   :  { %1043 = vmatprep.mubr.msk.f32.mxu0 %vm164_vm1, %v60_v40  ;;  %1075 = vmatprep.mubr.msk.f32.mxu1 %vm164_vm1, %v124_v41 }
  0x7c   :  { %531 = vmatmul.mubr.f32.gmra.mxu0 %v59_v42  ;;  %691 = vmatmul.mubr.f32.gmra.mxu1 %v123_v43 }
  0x7d   :  { %1044 = vmatprep.mubr.msk.f32.mxu0 %vm164_vm1, %v62_v44  ;;  %1076 = vmatprep.mubr.msk.f32.mxu1 %vm164_vm1, %v126_v45 }
  0x80   :  { %536 = vmatmul.mubr.f32.gmra.mxu0 %v61_v46  ;;  %696 = vmatmul.mubr.f32.gmra.mxu1 %v125_v47 }
  0x81   :  { %1045 = vmatprep.mubr.msk.f32.mxu0 %vm164_vm1, %v64_v48  ;;  %1077 = vmatprep.mubr.msk.f32.mxu1 %vm164_vm1, %v128_v49 }
  0x84   :  { %541 = vmatmul.mubr.f32.gmra.mxu0 %v63_v50  ;;  %701 = vmatmul.mubr.f32.gmra.mxu1 %v127_v51 }
  0x85   :  { %1046 = vmatprep.mubr.msk.f32.mxu0 %vm164_vm1, %v66_v52  ;;  %1078 = vmatprep.mubr.msk.f32.mxu1 %vm164_vm1, %v130_v53 }
  0x88   :  { %546 = vmatmul.mubr.f32.gmra.mxu0 %v65_v54  ;;  %706 = vmatmul.mubr.f32.gmra.mxu1 %v129_v55 }
  0x89   :  { %1047 = vmatprep.mubr.msk.f32.mxu0 %vm164_vm1, %v68_v56  ;;  %1079 = vmatprep.mubr.msk.f32.mxu1 %vm164_vm1, %v132_v57 }
  0x8c   :  { %551 = vmatmul.mubr.f32.gmra.mxu0 %v67_v58  ;;  %711 = vmatmul.mubr.f32.gmra.mxu1 %v131_v59 }
  0x8d   :  { %1048 = vmatprep.mubr.msk.f32.mxu0 %vm164_vm1, %v70_v60  ;;  %1080 = vmatprep.mubr.msk.f32.mxu1 %vm164_vm1, %v134_v61 }
  0x90   :  { %556 = vmatmul.mubr.f32.gmra.mxu0 %v69_v62  ;;  %716 = vmatmul.mubr.f32.gmra.mxu1 %v133_v63 }
  0x91   :  { %1049 = vmatprep.mubr.msk.f32.mxu0 %vm164_vm1, %v72_v0  ;;  %1081 = vmatprep.mubr.msk.f32.mxu1 %vm164_vm1, %v136_v1 }
  0x94   :  { %561 = vmatmul.mubr.f32.gmra.mxu0 %v71_v2  ;;  %721 = vmatmul.mubr.f32.gmra.mxu1 %v135_v3 }
  0x95   :  { %1050 = vmatprep.mubr.msk.f32.mxu0 %vm164_vm1, %v74_v4  ;;  %1082 = vmatprep.mubr.msk.f32.mxu1 %vm164_vm1, %v138_v5 }
  0x98   :  { %566 = vmatmul.mubr.f32.gmra.mxu0 %v73_v6  ;;  %726 = vmatmul.mubr.f32.gmra.mxu1 %v137_v7 }
  0x99   :  { %1051 = vmatprep.mubr.msk.f32.mxu0 %vm164_vm1, %v76_v8  ;;  %1083 = vmatprep.mubr.msk.f32.mxu1 %vm164_vm1, %v140_v9 }
  0x9c   :  { %571 = vmatmul.mubr.f32.gmra.mxu0 %v75_v10  ;;  %731 = vmatmul.mubr.f32.gmra.mxu1 %v139_v11 }
  0x9d   :  { %1052 = vmatprep.mubr.msk.f32.mxu0 %vm164_vm1, %v78_v12  ;;  %1084 = vmatprep.mubr.msk.f32.mxu1 %vm164_vm1, %v142_v13 }
  0xa0   :  { %576 = vmatmul.mubr.f32.gmra.mxu0 %v77_v14  ;;  %736 = vmatmul.mubr.f32.gmra.mxu1 %v141_v15 }
  0xa1   :  { %1053 = vmatprep.mubr.msk.f32.mxu0 %vm164_vm1, %v80_v16  ;;  %1085 = vmatprep.mubr.msk.f32.mxu1 %vm164_vm1, %v144_v17 }
  0xa4   :  { %581 = vmatmul.mubr.f32.gmra.mxu0 %v79_v18  ;;  %741 = vmatmul.mubr.f32.gmra.mxu1 %v143_v19 }
  0xe8   :  { %v427_v21 = vpop.f32.mrf.mxu0  ;;  %v587_v23 = vpop.f32.mrf.mxu1 }
  0xe9   :  { %v753_v24 = vmul.f32 %v1699_v20, %v427_v21  ;;  %v785_v25 = vmul.f32 %v1699_v20, %v587_v23 }
  0xea   :  { %v429_v26 = vpop.f32.mrf.mxu0  ;;  %v589_v27 = vpop.f32.mrf.mxu1 }
  0xeb   :  { %v824_v28 = vadd.f32 %v1704_v22, %v753_v24  ;;  %v856_v29 = vadd.f32 %v1704_v22, %v785_v25 }
  0xec   :  { %v432_v30 = vpop.f32.mrf.mxu0  ;;  %v592_v31 = vpop.f32.mrf.mxu1 }
  0xed   :  { %v888_v32 = vmax.f32 %v824_v28, 0.0  ;;  %v920_v33 = vmax.f32 %v856_v29, 0.0  ;;  %v754_v34 = vmul.f32 %v1699_v20, %v432_v30  ;;  %v786_v35 = vmul.f32 %v1699_v20, %v592_v31 }
  0xee   :  { %v434_v36 = vpop.f32.mrf.mxu0  ;;  %v594_v37 = vpop.f32.mrf.mxu1 }
  0xef   :  { %953 = vst.msk [vmem:[%s2094_s4] sm:$0xff] %vm952_vm2, %v888_v32  ;;  %985 = vst.msk [vmem:[%s2094_s4 + $0x100] sm:$0xff] %vm952_vm2, %v920_v33  ;;  %v825_v38 = vadd.f32 %v1704_v22, %v754_v34  ;;  %v857_v39 = vadd.f32 %v1704_v22, %v786_v35 }
  0xf0   :  { %v437_v40 = vpop.f32.mrf.mxu0  ;;  %v597_v41 = vpop.f32.mrf.mxu1 }
  0xf1   :  { %v889_v42 = vmax.f32 %v825_v38, 0.0  ;;  %v921_v43 = vmax.f32 %v857_v39, 0.0  ;;  %v755_v44 = vmul.f32 %v1699_v20, %v437_v40  ;;  %v787_v45 = vmul.f32 %v1699_v20, %v597_v41 }
  0xf2   :  { %v439_v46 = vpop.f32.mrf.mxu0  ;;  %v599_v47 = vpop.f32.mrf.mxu1 }
  0xf3   :  { %954 = vst.msk [vmem:[%s2094_s4 + $0x8] sm:$0xff] %vm952_vm2, %v889_v42  ;;  %986 = vst.msk [vmem:[%s2094_s4 + $0x108] sm:$0xff] %vm952_vm2, %v921_v43  ;;  %v826_v48 = vadd.f32 %v1704_v22, %v755_v44  ;;  %v858_v49 = vadd.f32 %v1704_v22, %v787_v45 }
  0xf4   :  { %v442_v50 = vpop.f32.mrf.mxu0  ;;  %v602_v51 = vpop.f32.mrf.mxu1 }
  0xf5   :  { %v890_v52 = vmax.f32 %v826_v48, 0.0  ;;  %v922_v53 = vmax.f32 %v858_v49, 0.0  ;;  %v756_v54 = vmul.f32 %v1699_v20, %v442_v50  ;;  %v788_v55 = vmul.f32 %v1699_v20, %v602_v51 }
  0xf6   :  { %v444_v56 = vpop.f32.mrf.mxu0  ;;  %v604_v57 = vpop.f32.mrf.mxu1 }
  0xf7   :  { %955 = vst.msk [vmem:[%s2094_s4 + $0x10] sm:$0xff] %vm952_vm2, %v890_v52  ;;  %987 = vst.msk [vmem:[%s2094_s4 + $0x110] sm:$0xff] %vm952_vm2, %v922_v53  ;;  %v827_v58 = vadd.f32 %v1704_v22, %v756_v54  ;;  %v859_v59 = vadd.f32 %v1704_v22, %v788_v55 }
  0xf8   :  { %v447_v60 = vpop.f32.mrf.mxu0  ;;  %v607_v61 = vpop.f32.mrf.mxu1 }
  0xf9   :  { %v891_v62 = vmax.f32 %v827_v58, 0.0  ;;  %v923_v63 = vmax.f32 %v859_v59, 0.0  ;;  %v757_v0 = vmul.f32 %v1699_v20, %v447_v60  ;;  %v789_v1 = vmul.f32 %v1699_v20, %v607_v61 }
  0xfa   :  { %v449_v2 = vpop.f32.mrf.mxu0  ;;  %v609_v3 = vpop.f32.mrf.mxu1 }
  0xfb   :  { %956 = vst.msk [vmem:[%s2094_s4 + $0x18] sm:$0xff] %vm952_vm2, %v891_v62  ;;  %988 = vst.msk [vmem:[%s2094_s4 + $0x118] sm:$0xff] %vm952_vm2, %v923_v63  ;;  %v828_v4 = vadd.f32 %v1704_v22, %v757_v0  ;;  %v860_v5 = vadd.f32 %v1704_v22, %v789_v1 }
  0xfc   :  { %v452_v6 = vpop.f32.mrf.mxu0  ;;  %v612_v7 = vpop.f32.mrf.mxu1 }
  0xfd   :  { %v892_v8 = vmax.f32 %v828_v4, 0.0  ;;  %v924_v9 = vmax.f32 %v860_v5, 0.0  ;;  %v758_v10 = vmul.f32 %v1699_v20, %v452_v6  ;;  %v790_v11 = vmul.f32 %v1699_v20, %v612_v7 }
  0xfe   :  { %v454_v12 = vpop.f32.mrf.mxu0  ;;  %v614_v13 = vpop.f32.mrf.mxu1 }
  0xff   :  { %957 = vst.msk [vmem:[%s2094_s4 + $0x20] sm:$0xff] %vm952_vm2, %v892_v8  ;;  %989 = vst.msk [vmem:[%s2094_s4 + $0x120] sm:$0xff] %vm952_vm2, %v924_v9  ;;  %v829_v14 = vadd.f32 %v1704_v22, %v758_v10  ;;  %v861_v15 = vadd.f32 %v1704_v22, %v790_v11 }
 0x100   :  { %v457_v16 = vpop.f32.mrf.mxu0  ;;  %v617_v17 = vpop.f32.mrf.mxu1 }
 0x101   :  { %v893_v18 = vmax.f32 %v829_v14, 0.0  ;;  %v925_v19 = vmax.f32 %v861_v15, 0.0  ;;  %v759_v21 = vmul.f32 %v1699_v20, %v457_v16  ;;  %v791_v23 = vmul.f32 %v1699_v20, %v617_v17 }
 0x102   :  { %v459_v24 = vpop.f32.mrf.mxu0  ;;  %v619_v25 = vpop.f32.mrf.mxu1 }
 0x103   :  { %958 = vst.msk [vmem:[%s2094_s4 + $0x28] sm:$0xff] %vm952_vm2, %v893_v18  ;;  %990 = vst.msk [vmem:[%s2094_s4 + $0x128] sm:$0xff] %vm952_vm2, %v925_v19  ;;  %v830_v26 = vadd.f32 %v1704_v22, %v759_v21  ;;  %v862_v27 = vadd.f32 %v1704_v22, %v791_v23 }
 0x104   :  { %v462_v28 = vpop.f32.mrf.mxu0  ;;  %v622_v29 = vpop.f32.mrf.mxu1 }
 0x105   :  { %v894_v30 = vmax.f32 %v830_v26, 0.0  ;;  %v926_v31 = vmax.f32 %v862_v27, 0.0  ;;  %v760_v32 = vmul.f32 %v1699_v20, %v462_v28  ;;  %v792_v33 = vmul.f32 %v1699_v20, %v622_v29 }
 0x106   :  { %v464_v34 = vpop.f32.mrf.mxu0  ;;  %v624_v35 = vpop.f32.mrf.mxu1 }
 0x107   :  { %959 = vst.msk [vmem:[%s2094_s4 + $0x30] sm:$0xff] %vm952_vm2, %v894_v30  ;;  %991 = vst.msk [vmem:[%s2094_s4 + $0x130] sm:$0xff] %vm952_vm2, %v926_v31  ;;  %v831_v36 = vadd.f32 %v1704_v22, %v760_v32  ;;  %v863_v37 = vadd.f32 %v1704_v22, %v792_v33 }
 0x108   :  { %v467_v38 = vpop.f32.mrf.mxu0  ;;  %v627_v39 = vpop.f32.mrf.mxu1 }
 0x109   :  { %v895_v40 = vmax.f32 %v831_v36, 0.0  ;;  %v927_v41 = vmax.f32 %v863_v37, 0.0  ;;  %v761_v42 = vmul.f32 %v1699_v20, %v467_v38  ;;  %v793_v43 = vmul.f32 %v1699_v20, %v627_v39 }
 0x10a   :  { %v469_v44 = vpop.f32.mrf.mxu0  ;;  %v629_v45 = vpop.f32.mrf.mxu1 }
 0x10b   :  { %960 = vst.msk [vmem:[%s2094_s4 + $0x38] sm:$0xff] %vm952_vm2, %v895_v40  ;;  %992 = vst.msk [vmem:[%s2094_s4 + $0x138] sm:$0xff] %vm952_vm2, %v927_v41  ;;  %v832_v46 = vadd.f32 %v1704_v22, %v761_v42  ;;  %v864_v47 = vadd.f32 %v1704_v22, %v793_v43 }
 0x10c   :  { %v472_v48 = vpop.f32.mrf.mxu0  ;;  %v632_v49 = vpop.f32.mrf.mxu1 }
 0x10d   :  { %v896_v50 = vmax.f32 %v832_v46, 0.0  ;;  %v928_v51 = vmax.f32 %v864_v47, 0.0  ;;  %v762_v52 = vmul.f32 %v1699_v20, %v472_v48  ;;  %v794_v53 = vmul.f32 %v1699_v20, %v632_v49 }
 0x10e   :  { %v474_v54 = vpop.f32.mrf.mxu0  ;;  %v634_v55 = vpop.f32.mrf.mxu1 }
 0x10f   :  { %961 = vst.msk [vmem:[%s2094_s4 + $0x40] sm:$0xff] %vm952_vm2, %v896_v50  ;;  %993 = vst.msk [vmem:[%s2094_s4 + $0x140] sm:$0xff] %vm952_vm2, %v928_v51  ;;  %v833_v56 = vadd.f32 %v1704_v22, %v762_v52  ;;  %v865_v57 = vadd.f32 %v1704_v22, %v794_v53 }
 0x110   :  { %v477_v58 = vpop.f32.mrf.mxu0  ;;  %v637_v59 = vpop.f32.mrf.mxu1 }
 0x111   :  { %v897_v60 = vmax.f32 %v833_v56, 0.0  ;;  %v929_v61 = vmax.f32 %v865_v57, 0.0  ;;  %v763_v62 = vmul.f32 %v1699_v20, %v477_v58  ;;  %v795_v63 = vmul.f32 %v1699_v20, %v637_v59 }
 0x112   :  { %v479_v0 = vpop.f32.mrf.mxu0  ;;  %v639_v1 = vpop.f32.mrf.mxu1 }
 0x113   :  { %962 = vst.msk [vmem:[%s2094_s4 + $0x48] sm:$0xff] %vm952_vm2, %v897_v60  ;;  %994 = vst.msk [vmem:[%s2094_s4 + $0x148] sm:$0xff] %vm952_vm2, %v929_v61  ;;  %v834_v2 = vadd.f32 %v1704_v22, %v763_v62  ;;  %v866_v3 = vadd.f32 %v1704_v22, %v795_v63 }
 0x114   :  { %v482_v4 = vpop.f32.mrf.mxu0  ;;  %v642_v5 = vpop.f32.mrf.mxu1 }
 0x115   :  { %v898_v6 = vmax.f32 %v834_v2, 0.0  ;;  %v930_v7 = vmax.f32 %v866_v3, 0.0  ;;  %v764_v8 = vmul.f32 %v1699_v20, %v482_v4  ;;  %v796_v9 = vmul.f32 %v1699_v20, %v642_v5 }
 0x116   :  { %v484_v10 = vpop.f32.mrf.mxu0  ;;  %v644_v11 = vpop.f32.mrf.mxu1 }
 0x117   :  { %963 = vst.msk [vmem:[%s2094_s4 + $0x50] sm:$0xff] %vm952_vm2, %v898_v6  ;;  %995 = vst.msk [vmem:[%s2094_s4 + $0x150] sm:$0xff] %vm952_vm2, %v930_v7  ;;  %v835_v12 = vadd.f32 %v1704_v22, %v764_v8  ;;  %v867_v13 = vadd.f32 %v1704_v22, %v796_v9 }
 0x118   :  { %v487_v14 = vpop.f32.mrf.mxu0  ;;  %v647_v15 = vpop.f32.mrf.mxu1 }
 0x119   :  { %v899_v16 = vmax.f32 %v835_v12, 0.0  ;;  %v931_v17 = vmax.f32 %v867_v13, 0.0  ;;  %v765_v18 = vmul.f32 %v1699_v20, %v487_v14  ;;  %v797_v19 = vmul.f32 %v1699_v20, %v647_v15 }
 0x11a   :  { %v489_v21 = vpop.f32.mrf.mxu0  ;;  %v649_v23 = vpop.f32.mrf.mxu1 }
 0x11b   :  { %964 = vst.msk [vmem:[%s2094_s4 + $0x58] sm:$0xff] %vm952_vm2, %v899_v16  ;;  %996 = vst.msk [vmem:[%s2094_s4 + $0x158] sm:$0xff] %vm952_vm2, %v931_v17  ;;  %v836_v24 = vadd.f32 %v1704_v22, %v765_v18  ;;  %v868_v25 = vadd.f32 %v1704_v22, %v797_v19 }
 0x11c   :  { %v492_v26 = vpop.f32.mrf.mxu0  ;;  %v652_v27 = vpop.f32.mrf.mxu1 }
 0x11d   :  { %v900_v28 = vmax.f32 %v836_v24, 0.0  ;;  %v932_v29 = vmax.f32 %v868_v25, 0.0  ;;  %v766_v30 = vmul.f32 %v1699_v20, %v492_v26  ;;  %v798_v31 = vmul.f32 %v1699_v20, %v652_v27 }
 0x11e   :  { %v494_v32 = vpop.f32.mrf.mxu0  ;;  %v654_v33 = vpop.f32.mrf.mxu1 }
 0x11f   :  { %965 = vst.msk [vmem:[%s2094_s4 + $0x60] sm:$0xff] %vm952_vm2, %v900_v28  ;;  %997 = vst.msk [vmem:[%s2094_s4 + $0x160] sm:$0xff] %vm952_vm2, %v932_v29  ;;  %v837_v34 = vadd.f32 %v1704_v22, %v766_v30  ;;  %v869_v35 = vadd.f32 %v1704_v22, %v798_v31 }
 0x120   :  { %v497_v36 = vpop.f32.mrf.mxu0  ;;  %v657_v37 = vpop.f32.mrf.mxu1 }
 0x121   :  { %v901_v38 = vmax.f32 %v837_v34, 0.0  ;;  %v933_v39 = vmax.f32 %v869_v35, 0.0  ;;  %v767_v40 = vmul.f32 %v1699_v20, %v497_v36  ;;  %v799_v41 = vmul.f32 %v1699_v20, %v657_v37 }
 0x122   :  { %v499_v42 = vpop.f32.mrf.mxu0  ;;  %v659_v43 = vpop.f32.mrf.mxu1 }
 0x123   :  { %966 = vst.msk [vmem:[%s2094_s4 + $0x68] sm:$0xff] %vm952_vm2, %v901_v38  ;;  %998 = vst.msk [vmem:[%s2094_s4 + $0x168] sm:$0xff] %vm952_vm2, %v933_v39  ;;  %v838_v44 = vadd.f32 %v1704_v22, %v767_v40  ;;  %v870_v45 = vadd.f32 %v1704_v22, %v799_v41 }
 0x124   :  { %v502_v46 = vpop.f32.mrf.mxu0  ;;  %v662_v47 = vpop.f32.mrf.mxu1 }
 0x125   :  { %v902_v48 = vmax.f32 %v838_v44, 0.0  ;;  %v934_v49 = vmax.f32 %v870_v45, 0.0  ;;  %v768_v50 = vmul.f32 %v1699_v20, %v502_v46  ;;  %v800_v51 = vmul.f32 %v1699_v20, %v662_v47 }
 0x126   :  { %v504_v52 = vpop.f32.mrf.mxu0  ;;  %v664_v53 = vpop.f32.mrf.mxu1 }
 0x127   :  { %967 = vst.msk [vmem:[%s2094_s4 + $0x70] sm:$0xff] %vm952_vm2, %v902_v48  ;;  %999 = vst.msk [vmem:[%s2094_s4 + $0x170] sm:$0xff] %vm952_vm2, %v934_v49  ;;  %v839_v54 = vadd.f32 %v1704_v22, %v768_v50  ;;  %v871_v55 = vadd.f32 %v1704_v22, %v800_v51 }
 0x128   :  { %v507_v56 = vpop.f32.mrf.mxu0  ;;  %v667_v57 = vpop.f32.mrf.mxu1 }
 0x129   :  { %v903_v58 = vmax.f32 %v839_v54, 0.0  ;;  %v935_v59 = vmax.f32 %v871_v55, 0.0  ;;  %v769_v60 = vmul.f32 %v1699_v20, %v507_v56  ;;  %v801_v61 = vmul.f32 %v1699_v20, %v667_v57 }
 0x12a   :  { %v509_v62 = vpop.f32.mrf.mxu0  ;;  %v669_v63 = vpop.f32.mrf.mxu1 }
 0x12b   :  { %968 = vst.msk [vmem:[%s2094_s4 + $0x78] sm:$0xff] %vm952_vm2, %v903_v58  ;;  %1000 = vst.msk [vmem:[%s2094_s4 + $0x178] sm:$0xff] %vm952_vm2, %v935_v59  ;;  %v840_v0 = vadd.f32 %v1704_v22, %v769_v60  ;;  %v872_v1 = vadd.f32 %v1704_v22, %v801_v61 }
 0x12c   :  { %v512_v2 = vpop.f32.mrf.mxu0  ;;  %v672_v3 = vpop.f32.mrf.mxu1 }
 0x12d   :  { %v904_v4 = vmax.f32 %v840_v0, 0.0  ;;  %v936_v5 = vmax.f32 %v872_v1, 0.0  ;;  %v770_v6 = vmul.f32 %v1699_v20, %v512_v2  ;;  %v802_v7 = vmul.f32 %v1699_v20, %v672_v3 }
 0x12e   :  { %v514_v8 = vpop.f32.mrf.mxu0  ;;  %v674_v9 = vpop.f32.mrf.mxu1 }
 0x12f   :  { %969 = vst.msk [vmem:[%s2094_s4 + $0x80] sm:$0xff] %vm952_vm2, %v904_v4  ;;  %1001 = vst.msk [vmem:[%s2094_s4 + $0x180] sm:$0xff] %vm952_vm2, %v936_v5  ;;  %v841_v10 = vadd.f32 %v1704_v22, %v770_v6  ;;  %v873_v11 = vadd.f32 %v1704_v22, %v802_v7 }
 0x130   :  { %v517_v12 = vpop.f32.mrf.mxu0  ;;  %v677_v13 = vpop.f32.mrf.mxu1 }
 0x131   :  { %v905_v14 = vmax.f32 %v841_v10, 0.0  ;;  %v937_v15 = vmax.f32 %v873_v11, 0.0  ;;  %v771_v16 = vmul.f32 %v1699_v20, %v517_v12  ;;  %v803_v17 = vmul.f32 %v1699_v20, %v677_v13 }
 0x132   :  { %v519_v18 = vpop.f32.mrf.mxu0  ;;  %v679_v19 = vpop.f32.mrf.mxu1 }
 0x133   :  { %970 = vst.msk [vmem:[%s2094_s4 + $0x88] sm:$0xff] %vm952_vm2, %v905_v14  ;;  %1002 = vst.msk [vmem:[%s2094_s4 + $0x188] sm:$0xff] %vm952_vm2, %v937_v15  ;;  %v842_v21 = vadd.f32 %v1704_v22, %v771_v16  ;;  %v874_v23 = vadd.f32 %v1704_v22, %v803_v17 }
 0x134   :  { %v522_v24 = vpop.f32.mrf.mxu0  ;;  %v682_v25 = vpop.f32.mrf.mxu1 }
 0x135   :  { %v906_v26 = vmax.f32 %v842_v21, 0.0  ;;  %v938_v27 = vmax.f32 %v874_v23, 0.0  ;;  %v772_v28 = vmul.f32 %v1699_v20, %v522_v24  ;;  %v804_v29 = vmul.f32 %v1699_v20, %v682_v25 }
 0x136   :  { %v524_v30 = vpop.f32.mrf.mxu0  ;;  %v684_v31 = vpop.f32.mrf.mxu1 }
 0x137   :  { %971 = vst.msk [vmem:[%s2094_s4 + $0x90] sm:$0xff] %vm952_vm2, %v906_v26  ;;  %1003 = vst.msk [vmem:[%s2094_s4 + $0x190] sm:$0xff] %vm952_vm2, %v938_v27  ;;  %v843_v32 = vadd.f32 %v1704_v22, %v772_v28  ;;  %v875_v33 = vadd.f32 %v1704_v22, %v804_v29 }
 0x138   :  { %v527_v34 = vpop.f32.mrf.mxu0  ;;  %v687_v35 = vpop.f32.mrf.mxu1 }
 0x139   :  { %v907_v36 = vmax.f32 %v843_v32, 0.0  ;;  %v939_v37 = vmax.f32 %v875_v33, 0.0  ;;  %v773_v38 = vmul.f32 %v1699_v20, %v527_v34  ;;  %v805_v39 = vmul.f32 %v1699_v20, %v687_v35 }
 0x13a   :  { %v529_v40 = vpop.f32.mrf.mxu0  ;;  %v689_v41 = vpop.f32.mrf.mxu1 }
 0x13b   :  { %972 = vst.msk [vmem:[%s2094_s4 + $0x98] sm:$0xff] %vm952_vm2, %v907_v36  ;;  %1004 = vst.msk [vmem:[%s2094_s4 + $0x198] sm:$0xff] %vm952_vm2, %v939_v37  ;;  %v844_v42 = vadd.f32 %v1704_v22, %v773_v38  ;;  %v876_v43 = vadd.f32 %v1704_v22, %v805_v39 }
 0x13c   :  { %v532_v44 = vpop.f32.mrf.mxu0  ;;  %v692_v45 = vpop.f32.mrf.mxu1 }
 0x13d   :  { %v908_v46 = vmax.f32 %v844_v42, 0.0  ;;  %v940_v47 = vmax.f32 %v876_v43, 0.0  ;;  %v774_v48 = vmul.f32 %v1699_v20, %v532_v44  ;;  %v806_v49 = vmul.f32 %v1699_v20, %v692_v45 }
 0x13e   :  { %v534_v50 = vpop.f32.mrf.mxu0  ;;  %v694_v51 = vpop.f32.mrf.mxu1 }
 0x13f   :  { %973 = vst.msk [vmem:[%s2094_s4 + $0xa0] sm:$0xff] %vm952_vm2, %v908_v46  ;;  %1005 = vst.msk [vmem:[%s2094_s4 + $0x1a0] sm:$0xff] %vm952_vm2, %v940_v47  ;;  %v845_v52 = vadd.f32 %v1704_v22, %v774_v48  ;;  %v877_v53 = vadd.f32 %v1704_v22, %v806_v49 }
 0x140   :  { %v537_v54 = vpop.f32.mrf.mxu0  ;;  %v697_v55 = vpop.f32.mrf.mxu1 }
 0x141   :  { %v909_v56 = vmax.f32 %v845_v52, 0.0  ;;  %v941_v57 = vmax.f32 %v877_v53, 0.0  ;;  %v775_v58 = vmul.f32 %v1699_v20, %v537_v54  ;;  %v807_v59 = vmul.f32 %v1699_v20, %v697_v55 }
 0x142   :  { %v539_v60 = vpop.f32.mrf.mxu0  ;;  %v699_v61 = vpop.f32.mrf.mxu1 }
 0x143   :  { %974 = vst.msk [vmem:[%s2094_s4 + $0xa8] sm:$0xff] %vm952_vm2, %v909_v56  ;;  %1006 = vst.msk [vmem:[%s2094_s4 + $0x1a8] sm:$0xff] %vm952_vm2, %v941_v57  ;;  %v846_v62 = vadd.f32 %v1704_v22, %v775_v58  ;;  %v878_v63 = vadd.f32 %v1704_v22, %v807_v59 }
 0x144   :  { %v542_v0 = vpop.f32.mrf.mxu0  ;;  %v702_v1 = vpop.f32.mrf.mxu1 }
 0x145   :  { %v910_v2 = vmax.f32 %v846_v62, 0.0  ;;  %v942_v3 = vmax.f32 %v878_v63, 0.0  ;;  %v776_v4 = vmul.f32 %v1699_v20, %v542_v0  ;;  %v808_v5 = vmul.f32 %v1699_v20, %v702_v1 }
 0x146   :  { %v544_v6 = vpop.f32.mrf.mxu0  ;;  %v704_v7 = vpop.f32.mrf.mxu1 }
 0x147   :  { %975 = vst.msk [vmem:[%s2094_s4 + $0xb0] sm:$0xff] %vm952_vm2, %v910_v2  ;;  %1007 = vst.msk [vmem:[%s2094_s4 + $0x1b0] sm:$0xff] %vm952_vm2, %v942_v3  ;;  %v847_v8 = vadd.f32 %v1704_v22, %v776_v4  ;;  %v879_v9 = vadd.f32 %v1704_v22, %v808_v5 }
 0x148   :  { %v547_v10 = vpop.f32.mrf.mxu0  ;;  %v707_v11 = vpop.f32.mrf.mxu1 }
 0x149   :  { %v911_v12 = vmax.f32 %v847_v8, 0.0  ;;  %v943_v13 = vmax.f32 %v879_v9, 0.0  ;;  %v777_v14 = vmul.f32 %v1699_v20, %v547_v10  ;;  %v809_v15 = vmul.f32 %v1699_v20, %v707_v11 }
 0x14a   :  { %v549_v16 = vpop.f32.mrf.mxu0  ;;  %v709_v17 = vpop.f32.mrf.mxu1 }
 0x14b   :  { %976 = vst.msk [vmem:[%s2094_s4 + $0xb8] sm:$0xff] %vm952_vm2, %v911_v12  ;;  %1008 = vst.msk [vmem:[%s2094_s4 + $0x1b8] sm:$0xff] %vm952_vm2, %v943_v13  ;;  %v848_v18 = vadd.f32 %v1704_v22, %v777_v14  ;;  %v880_v19 = vadd.f32 %v1704_v22, %v809_v15 }
 0x14c   :  { %v552_v21 = vpop.f32.mrf.mxu0  ;;  %v712_v23 = vpop.f32.mrf.mxu1 }
 0x14d   :  { %v912_v24 = vmax.f32 %v848_v18, 0.0  ;;  %v944_v25 = vmax.f32 %v880_v19, 0.0  ;;  %v778_v26 = vmul.f32 %v1699_v20, %v552_v21  ;;  %v810_v27 = vmul.f32 %v1699_v20, %v712_v23 }
 0x14e   :  { %v554_v28 = vpop.f32.mrf.mxu0  ;;  %v714_v29 = vpop.f32.mrf.mxu1 }
 0x14f   :  { %977 = vst.msk [vmem:[%s2094_s4 + $0xc0] sm:$0xff] %vm952_vm2, %v912_v24  ;;  %1009 = vst.msk [vmem:[%s2094_s4 + $0x1c0] sm:$0xff] %vm952_vm2, %v944_v25  ;;  %v849_v30 = vadd.f32 %v1704_v22, %v778_v26  ;;  %v881_v31 = vadd.f32 %v1704_v22, %v810_v27 }
 0x150   :  { %v557_v32 = vpop.f32.mrf.mxu0  ;;  %v717_v33 = vpop.f32.mrf.mxu1 }
 0x151   :  { %v913_v34 = vmax.f32 %v849_v30, 0.0  ;;  %v945_v35 = vmax.f32 %v881_v31, 0.0  ;;  %v779_v36 = vmul.f32 %v1699_v20, %v557_v32  ;;  %v811_v37 = vmul.f32 %v1699_v20, %v717_v33 }
 0x152   :  { %v559_v38 = vpop.f32.mrf.mxu0  ;;  %v719_v39 = vpop.f32.mrf.mxu1 }
 0x153   :  { %978 = vst.msk [vmem:[%s2094_s4 + $0xc8] sm:$0xff] %vm952_vm2, %v913_v34  ;;  %1010 = vst.msk [vmem:[%s2094_s4 + $0x1c8] sm:$0xff] %vm952_vm2, %v945_v35  ;;  %v850_v40 = vadd.f32 %v1704_v22, %v779_v36  ;;  %v882_v41 = vadd.f32 %v1704_v22, %v811_v37 }
 0x154   :  { %v562_v42 = vpop.f32.mrf.mxu0  ;;  %v722_v43 = vpop.f32.mrf.mxu1 }
 0x155   :  { %v914_v44 = vmax.f32 %v850_v40, 0.0  ;;  %v946_v45 = vmax.f32 %v882_v41, 0.0  ;;  %v780_v46 = vmul.f32 %v1699_v20, %v562_v42  ;;  %v812_v47 = vmul.f32 %v1699_v20, %v722_v43 }
 0x156   :  { %v564_v48 = vpop.f32.mrf.mxu0  ;;  %v724_v49 = vpop.f32.mrf.mxu1 }
 0x157   :  { %979 = vst.msk [vmem:[%s2094_s4 + $0xd0] sm:$0xff] %vm952_vm2, %v914_v44  ;;  %1011 = vst.msk [vmem:[%s2094_s4 + $0x1d0] sm:$0xff] %vm952_vm2, %v946_v45  ;;  %v851_v50 = vadd.f32 %v1704_v22, %v780_v46  ;;  %v883_v51 = vadd.f32 %v1704_v22, %v812_v47 }
 0x158   :  { %v567_v52 = vpop.f32.mrf.mxu0  ;;  %v727_v53 = vpop.f32.mrf.mxu1 }
 0x159   :  { %v915_v54 = vmax.f32 %v851_v50, 0.0  ;;  %v947_v55 = vmax.f32 %v883_v51, 0.0  ;;  %v781_v56 = vmul.f32 %v1699_v20, %v567_v52  ;;  %v813_v57 = vmul.f32 %v1699_v20, %v727_v53 }
 0x15a   :  { %v569_v58 = vpop.f32.mrf.mxu0  ;;  %v729_v59 = vpop.f32.mrf.mxu1 }
 0x15b   :  { %980 = vst.msk [vmem:[%s2094_s4 + $0xd8] sm:$0xff] %vm952_vm2, %v915_v54  ;;  %1012 = vst.msk [vmem:[%s2094_s4 + $0x1d8] sm:$0xff] %vm952_vm2, %v947_v55  ;;  %v852_v60 = vadd.f32 %v1704_v22, %v781_v56  ;;  %v884_v61 = vadd.f32 %v1704_v22, %v813_v57 }
 0x15c   :  { %v572_v62 = vpop.f32.mrf.mxu0  ;;  %v732_v63 = vpop.f32.mrf.mxu1 }
 0x15d   :  { %v916_v0 = vmax.f32 %v852_v60, 0.0  ;;  %v948_v1 = vmax.f32 %v884_v61, 0.0  ;;  %v782_v2 = vmul.f32 %v1699_v20, %v572_v62  ;;  %v814_v3 = vmul.f32 %v1699_v20, %v732_v63 }
 0x15e   :  { %v574_v4 = vpop.f32.mrf.mxu0  ;;  %v734_v5 = vpop.f32.mrf.mxu1 }
 0x15f   :  { %981 = vst.msk [vmem:[%s2094_s4 + $0xe0] sm:$0xff] %vm952_vm2, %v916_v0  ;;  %1013 = vst.msk [vmem:[%s2094_s4 + $0x1e0] sm:$0xff] %vm952_vm2, %v948_v1  ;;  %v853_v6 = vadd.f32 %v1704_v22, %v782_v2  ;;  %v885_v7 = vadd.f32 %v1704_v22, %v814_v3 }
 0x160   :  { %v577_v8 = vpop.f32.mrf.mxu0  ;;  %v737_v9 = vpop.f32.mrf.mxu1 }
 0x161   :  { %v917_v10 = vmax.f32 %v853_v6, 0.0  ;;  %v949_v11 = vmax.f32 %v885_v7, 0.0  ;;  %v783_v12 = vmul.f32 %v1699_v20, %v577_v8  ;;  %v815_v13 = vmul.f32 %v1699_v20, %v737_v9 }
 0x162   :  { %v579_v14 = vpop.f32.mrf.mxu0  ;;  %v739_v15 = vpop.f32.mrf.mxu1 }
 0x163   :  { %982 = vst.msk [vmem:[%s2094_s4 + $0xe8] sm:$0xff] %vm952_vm2, %v917_v10  ;;  %1014 = vst.msk [vmem:[%s2094_s4 + $0x1e8] sm:$0xff] %vm952_vm2, %v949_v11  ;;  %v854_v16 = vadd.f32 %v1704_v22, %v783_v12  ;;  %v886_v17 = vadd.f32 %v1704_v22, %v815_v13 }
 0x164   :  { %v582_v18 = vpop.f32.mrf.mxu0  ;;  %v742_v19 = vpop.f32.mrf.mxu1 }
 0x165   :  { %v918_v21 = vmax.f32 %v854_v16, 0.0  ;;  %v950_v23 = vmax.f32 %v886_v17, 0.0  ;;  %v784_v24 = vmul.f32 %v1699_v20, %v582_v18  ;;  %v816_v25 = vmul.f32 %v1699_v20, %v742_v19 }
 0x166   :  { %v584_v26 = vpop.f32.mrf.mxu0  ;;  %v744_v27 = vpop.f32.mrf.mxu1 }
 0x167   :  { %983 = vst.msk [vmem:[%s2094_s4 + $0xf0] sm:$0xff] %vm952_vm2, %v918_v21  ;;  %1015 = vst.msk [vmem:[%s2094_s4 + $0x1f0] sm:$0xff] %vm952_vm2, %v950_v23  ;;  %v855_v28 = vadd.f32 %v1704_v22, %v784_v24  ;;  %v887_v29 = vadd.f32 %v1704_v22, %v816_v25 }
 0x169   :  { %v919_v30 = vmax.f32 %v855_v28, 0.0  ;;  %v951_v31 = vmax.f32 %v887_v29, 0.0 }
 0x16b   :  { %984 = vst.msk [vmem:[%s2094_s4 + $0xf8] sm:$0xff] %vm952_vm2, %v919_v30  ;;  %1016 = vst.msk [vmem:[%s2094_s4 + $0x1f8] sm:$0xff] %vm952_vm2, %v951_v31 }

// kernel: simple_rsn_forward.7
= control target key start
LH: loop header
LB: loop body
LE: loop exit
PB: predicated region body
PF: predicated region fallthrough
CT: control target
= control target key end

     0   :  { %v1119_v0 = vmov 0.0   ;;  %vm163_vm0 = vcmask 130048   ;;  %vm947_vm1 = vcmask 261120   ;;  %s2077_s1 = inlined_call_operand.vmem [shape: f32[144,32], index: 1, kind: input, shape index: {}]   ;;  %s2078_s0 = inlined_call_operand.vmem [shape: f32[512,144], index: 0, kind: input, shape index: {}]   ;;  %s2079_s2 = inlined_call_operand.vmem [shape: f32[1,32], index: 2, kind: input, shape index: {}]   ;;  %s2080_s3 = inlined_call_operand.vmem [shape: f32[1,32], index: 3, kind: input, shape index: {}]   ;;  %s2081_s4 = inlined_call_operand.vmem [shape: f32[512,32], index: 4, kind: output, shape index: {}]  }
   0x1   :  { %356 = vmatprep.subr.mxu0 %v1119_v0  ;;  %1082 = vmatprep.subr.mxu1 %v1119_v0  ;;  %v160_v1 = vld [vmem:[%s2077_s1 + $0x78] sm:$0xff]  ;;  %v159_v2 = vld [vmem:[%s2077_s1 + $0x70] sm:$0xff]  ;;  %v158_v3 = vld [vmem:[%s2077_s1 + $0x68] sm:$0xff] }
   0x2   :  { %357 = vmatpush1.msra.mxu0 %v160_v1  ;;  %1100 = vmatpush1.msra.mxu1 %v160_v1  ;;  %v157_v4 = vld [vmem:[%s2077_s1 + $0x60] sm:$0xff]  ;;  %v156_v5 = vld [vmem:[%s2077_s1 + $0x58] sm:$0xff]  ;;  %v155_v6 = vld [vmem:[%s2077_s1 + $0x50] sm:$0xff] }
   0x3   :  { %358 = vmatprep.subr.mxu0 %v1119_v0  ;;  %1083 = vmatprep.subr.mxu1 %v1119_v0  ;;  %v154_v7 = vld [vmem:[%s2077_s1 + $0x48] sm:$0xff]  ;;  %v153_v8 = vld [vmem:[%s2077_s1 + $0x40] sm:$0xff]  ;;  %v152_v9 = vld [vmem:[%s2077_s1 + $0x38] sm:$0xff] }
   0x4   :  { %359 = vmatpush1.msra.mxu0 %v159_v2  ;;  %1101 = vmatpush1.msra.mxu1 %v159_v2  ;;  %v151_v10 = vld [vmem:[%s2077_s1 + $0x30] sm:$0xff]  ;;  %v150_v11 = vld [vmem:[%s2077_s1 + $0x28] sm:$0xff]  ;;  %v149_v12 = vld [vmem:[%s2077_s1 + $0x20] sm:$0xff] }
   0x5   :  { %360 = vmatprep.subr.mxu0 %v1119_v0  ;;  %1084 = vmatprep.subr.mxu1 %v1119_v0  ;;  %v148_v13 = vld [vmem:[%s2077_s1 + $0x18] sm:$0xff]  ;;  %v147_v14 = vld [vmem:[%s2077_s1 + $0x10] sm:$0xff]  ;;  %v146_v15 = vld [vmem:[%s2077_s1 + $0x8] sm:$0xff] }
   0x6   :  { %361 = vmatpush1.msra.mxu0 %v158_v3  ;;  %1102 = vmatpush1.msra.mxu1 %v158_v3  ;;  %v145_v16 = vld [vmem:[%s2077_s1] sm:$0xff]  ;;  %v162_v17 = vld [vmem:[%s2077_s1 + $0x88] sm:$0xff]  ;;  %v20_v23 = vld [vmem:[%s2078_s0 + $0x18] sm:$0xff] }
   0x7   :  { %362 = vmatprep.subr.mxu0 %v1119_v0  ;;  %1085 = vmatprep.subr.mxu1 %v1119_v0  ;;  %v161_v18 = vld [vmem:[%s2077_s1 + $0x80] sm:$0xff]  ;;  %v18_v19 = vld [vmem:[%s2078_s0 + $0x8] sm:$0xff]  ;;  %v84_v24 = vld [vmem:[%s2078_s0 + $0x218] sm:$0xff] }
   0x8   :  { %363 = vmatpush1.msra.mxu0 %v157_v4  ;;  %1103 = vmatpush1.msra.mxu1 %v157_v4  ;;  %v82_v20 = vld [vmem:[%s2078_s0 + $0x208] sm:$0xff]  ;;  %v17_v21 = vld [vmem:[%s2078_s0] sm:$0xff]  ;;  %v19_v25 = vld [vmem:[%s2078_s0 + $0x10] sm:$0xff] }
   0x9   :  { %364 = vmatprep.subr.mxu0 %v1119_v0  ;;  %1086 = vmatprep.subr.mxu1 %v1119_v0  ;;  %v81_v22 = vld [vmem:[%s2078_s0 + $0x200] sm:$0xff]  ;;  %v83_v26 = vld [vmem:[%s2078_s0 + $0x210] sm:$0xff]  ;;  %v22_v27 = vld [vmem:[%s2078_s0 + $0x28] sm:$0xff] }
   0xa   :  { %365 = vmatpush1.msra.mxu0 %v156_v5  ;;  %1104 = vmatpush1.msra.mxu1 %v156_v5  ;;  %v86_v28 = vld [vmem:[%s2078_s0 + $0x228] sm:$0xff]  ;;  %v21_v29 = vld [vmem:[%s2078_s0 + $0x20] sm:$0xff]  ;;  %v24_v31 = vld [vmem:[%s2078_s0 + $0x38] sm:$0xff] }
   0xb   :  { %366 = vmatprep.subr.mxu0 %v1119_v0  ;;  %1087 = vmatprep.subr.mxu1 %v1119_v0  ;;  %v85_v30 = vld [vmem:[%s2078_s0 + $0x220] sm:$0xff]  ;;  %v88_v32 = vld [vmem:[%s2078_s0 + $0x238] sm:$0xff]  ;;  %v23_v33 = vld [vmem:[%s2078_s0 + $0x30] sm:$0xff] }
   0xc   :  { %367 = vmatpush1.msra.mxu0 %v155_v6  ;;  %1105 = vmatpush1.msra.mxu1 %v155_v6  ;;  %v87_v34 = vld [vmem:[%s2078_s0 + $0x230] sm:$0xff]  ;;  %v26_v35 = vld [vmem:[%s2078_s0 + $0x48] sm:$0xff]  ;;  %v25_v37 = vld [vmem:[%s2078_s0 + $0x40] sm:$0xff] }
   0xd   :  { %368 = vmatprep.subr.mxu0 %v1119_v0  ;;  %1088 = vmatprep.subr.mxu1 %v1119_v0  ;;  %v90_v36 = vld [vmem:[%s2078_s0 + $0x248] sm:$0xff]  ;;  %v89_v38 = vld [vmem:[%s2078_s0 + $0x240] sm:$0xff]  ;;  %v28_v39 = vld [vmem:[%s2078_s0 + $0x58] sm:$0xff] }
   0xe   :  { %369 = vmatpush1.msra.mxu0 %v154_v7  ;;  %1106 = vmatpush1.msra.mxu1 %v154_v7  ;;  %v92_v40 = vld [vmem:[%s2078_s0 + $0x258] sm:$0xff]  ;;  %v27_v41 = vld [vmem:[%s2078_s0 + $0x50] sm:$0xff]  ;;  %v30_v43 = vld [vmem:[%s2078_s0 + $0x68] sm:$0xff] }
   0xf   :  { %370 = vmatprep.subr.mxu0 %v1119_v0  ;;  %1089 = vmatprep.subr.mxu1 %v1119_v0  ;;  %v91_v42 = vld [vmem:[%s2078_s0 + $0x250] sm:$0xff]  ;;  %v94_v44 = vld [vmem:[%s2078_s0 + $0x268] sm:$0xff]  ;;  %v29_v45 = vld [vmem:[%s2078_s0 + $0x60] sm:$0xff] }
  0x10   :  { %371 = vmatpush1.msra.mxu0 %v153_v8  ;;  %1107 = vmatpush1.msra.mxu1 %v153_v8  ;;  %v93_v46 = vld [vmem:[%s2078_s0 + $0x260] sm:$0xff]  ;;  %v32_v47 = vld [vmem:[%s2078_s0 + $0x78] sm:$0xff]  ;;  %v31_v49 = vld [vmem:[%s2078_s0 + $0x70] sm:$0xff] }
  0x11   :  { %372 = vmatprep.subr.mxu0 %v1119_v0  ;;  %1090 = vmatprep.subr.mxu1 %v1119_v0  ;;  %v96_v48 = vld [vmem:[%s2078_s0 + $0x278] sm:$0xff]  ;;  %v95_v50 = vld [vmem:[%s2078_s0 + $0x270] sm:$0xff]  ;;  %v34_v51 = vld [vmem:[%s2078_s0 + $0x88] sm:$0xff] }
  0x12   :  { %373 = vmatpush1.msra.mxu0 %v152_v9  ;;  %1108 = vmatpush1.msra.mxu1 %v152_v9  ;;  %v98_v52 = vld [vmem:[%s2078_s0 + $0x288] sm:$0xff]  ;;  %v33_v53 = vld [vmem:[%s2078_s0 + $0x80] sm:$0xff]  ;;  %v36_v55 = vld [vmem:[%s2078_s0 + $0x98] sm:$0xff] }
  0x13   :  { %374 = vmatprep.subr.mxu0 %v1119_v0  ;;  %1091 = vmatprep.subr.mxu1 %v1119_v0  ;;  %v97_v54 = vld [vmem:[%s2078_s0 + $0x280] sm:$0xff]  ;;  %v100_v56 = vld [vmem:[%s2078_s0 + $0x298] sm:$0xff]  ;;  %v35_v57 = vld [vmem:[%s2078_s0 + $0x90] sm:$0xff] }
  0x14   :  { %375 = vmatpush1.msra.mxu0 %v151_v10  ;;  %1109 = vmatpush1.msra.mxu1 %v151_v10  ;;  %v99_v58 = vld [vmem:[%s2078_s0 + $0x290] sm:$0xff]  ;;  %v38_v59 = vld [vmem:[%s2078_s0 + $0xa8] sm:$0xff]  ;;  %v37_v61 = vld [vmem:[%s2078_s0 + $0xa0] sm:$0xff] }
  0x15   :  { %376 = vmatprep.subr.mxu0 %v1119_v0  ;;  %1092 = vmatprep.subr.mxu1 %v1119_v0  ;;  %v102_v60 = vld [vmem:[%s2078_s0 + $0x2a8] sm:$0xff]  ;;  %v101_v62 = vld [vmem:[%s2078_s0 + $0x2a0] sm:$0xff]  ;;  %v40_v63 = vld [vmem:[%s2078_s0 + $0xb8] sm:$0xff] }
  0x16   :  { %377 = vmatpush1.msra.mxu0 %v150_v11  ;;  %1110 = vmatpush1.msra.mxu1 %v150_v11  ;;  %v39_v1 = vld [vmem:[%s2078_s0 + $0xb0] sm:$0xff]  ;;  %v42_v3 = vld [vmem:[%s2078_s0 + $0xc8] sm:$0xff]  ;;  %v41_v5 = vld [vmem:[%s2078_s0 + $0xc0] sm:$0xff] }
  0x17   :  { %378 = vmatprep.subr.mxu0 %v1119_v0  ;;  %1093 = vmatprep.subr.mxu1 %v1119_v0  ;;  %v103_v2 = vld [vmem:[%s2078_s0 + $0x2b0] sm:$0xff]  ;;  %v106_v4 = vld [vmem:[%s2078_s0 + $0x2c8] sm:$0xff]  ;;  %v105_v6 = vld [vmem:[%s2078_s0 + $0x2c0] sm:$0xff] }
  0x18   :  { %379 = vmatpush1.msra.mxu0 %v149_v12  ;;  %1111 = vmatpush1.msra.mxu1 %v149_v12  ;;  %v44_v7 = vld [vmem:[%s2078_s0 + $0xd8] sm:$0xff]  ;;  %v43_v9 = vld [vmem:[%s2078_s0 + $0xd0] sm:$0xff]  ;;  %v46_v11 = vld [vmem:[%s2078_s0 + $0xe8] sm:$0xff] }
  0x19   :  { %380 = vmatprep.subr.mxu0 %v1119_v0  ;;  %1094 = vmatprep.subr.mxu1 %v1119_v0  ;;  %v108_v8 = vld [vmem:[%s2078_s0 + $0x2d8] sm:$0xff]  ;;  %v107_v10 = vld [vmem:[%s2078_s0 + $0x2d0] sm:$0xff]  ;;  %v110_v12 = vld [vmem:[%s2078_s0 + $0x2e8] sm:$0xff] }
  0x1a   :  { %381 = vmatpush1.msra.mxu0 %v148_v13  ;;  %1112 = vmatpush1.msra.mxu1 %v148_v13  ;;  %v45_v13 = vld [vmem:[%s2078_s0 + $0xe0] sm:$0xff] }
  0x1b   :  { %382 = vmatprep.subr.mxu0 %v1119_v0  ;;  %1095 = vmatprep.subr.mxu1 %v1119_v0 }
  0x1c   :  { %383 = vmatpush1.msra.mxu0 %v147_v14  ;;  %1113 = vmatpush1.msra.mxu1 %v147_v14  ;;  %v109_v14 = vld [vmem:[%s2078_s0 + $0x2e0] sm:$0xff] }
  0x1d   :  { %384 = vmatprep.subr.mxu0 %v1119_v0  ;;  %1096 = vmatprep.subr.mxu1 %v1119_v0 }
  0x1e   :  { %385 = vmatpush1.msra.mxu0 %v146_v15  ;;  %1114 = vmatpush1.msra.mxu1 %v146_v15  ;;  %v48_v15 = vld [vmem:[%s2078_s0 + $0xf8] sm:$0xff] }
  0x1f   :  { %386 = vmatprep.subr.mxu0 %v1119_v0  ;;  %1097 = vmatprep.subr.mxu1 %v1119_v0 }
  0x20   :  { %387 = vmatpush1.msra.mxu0 %v145_v16  ;;  %1115 = vmatpush1.msra.mxu1 %v145_v16  ;;  %v112_v16 = vld [vmem:[%s2078_s0 + $0x2f8] sm:$0xff] }
  0x21   :  { %416 = vmatprep.subr.mxu0 %v1119_v0  ;;  %1098 = vmatprep.subr.mxu1 %v1119_v0 }
  0x22   :  { %417 = vmatpush2.msra.mxu0 %v162_v17  ;;  %1116 = vmatpush2.msra.mxu1 %v162_v17  ;;  %v47_v17 = vld [vmem:[%s2078_s0 + $0xf0] sm:$0xff] }
  0x23   :  { %418 = vmatprep.subr.mxu0 %v1119_v0  ;;  %1099 = vmatprep.subr.mxu1 %v1119_v0  ;;  %v104_v0 = vld [vmem:[%s2078_s0 + $0x2b8] sm:$0xff] }
  0x24   :  { %419 = vmatpush2.msra.mxu0 %v161_v18  ;;  %1117 = vmatpush2.msra.mxu1 %v161_v18  ;;  %v111_v18 = vld [vmem:[%s2078_s0 + $0x2f0] sm:$0xff] }
  0x25   :  { %1016 = vmatprep.mubr.msk.f32.mxu0 %vm163_vm0, %v18_v19  ;;  %1048 = vmatprep.mubr.msk.f32.mxu1 %vm163_vm0, %v82_v20  ;;  %v50_v19 = vld [vmem:[%s2078_s0 + $0x108] sm:$0xff] }
  0x26   :  { %421 = vmatmul.mubr.f32.vlgmr.msra.gmra.mxu0 %v17_v21  ;;  %581 = vmatmul.mubr.f32.vlgmr.msra.gmra.mxu1 %v81_v22  ;;  %v114_v20 = vld [vmem:[%s2078_s0 + $0x308] sm:$0xff]  ;;  %v49_v21 = vld [vmem:[%s2078_s0 + $0x100] sm:$0xff] }
  0x27   :  { %1017 = vmatprep.mubr.msk.f32.mxu0 %vm163_vm0, %v20_v23  ;;  %1049 = vmatprep.mubr.msk.f32.mxu1 %vm163_vm0, %v84_v24  ;;  %v113_v22 = vld [vmem:[%s2078_s0 + $0x300] sm:$0xff]  ;;  %v52_v23 = vld [vmem:[%s2078_s0 + $0x118] sm:$0xff] }
  0x28   :  { %v116_v24 = vld [vmem:[%s2078_s0 + $0x318] sm:$0xff] }
  0x2a   :  { %426 = vmatmul.mubr.f32.gmra.mxu0 %v19_v25  ;;  %586 = vmatmul.mubr.f32.gmra.mxu1 %v83_v26  ;;  %v51_v25 = vld [vmem:[%s2078_s0 + $0x110] sm:$0xff] }
  0x2b   :  { %1018 = vmatprep.mubr.msk.f32.mxu0 %vm163_vm0, %v22_v27  ;;  %1050 = vmatprep.mubr.msk.f32.mxu1 %vm163_vm0, %v86_v28  ;;  %v115_v26 = vld [vmem:[%s2078_s0 + $0x310] sm:$0xff]  ;;  %v54_v27 = vld [vmem:[%s2078_s0 + $0x128] sm:$0xff] }
  0x2c   :  { %v118_v28 = vld [vmem:[%s2078_s0 + $0x328] sm:$0xff] }
  0x2e   :  { %431 = vmatmul.mubr.f32.gmra.mxu0 %v21_v29  ;;  %591 = vmatmul.mubr.f32.gmra.mxu1 %v85_v30  ;;  %v53_v29 = vld [vmem:[%s2078_s0 + $0x120] sm:$0xff] }
  0x2f   :  { %1019 = vmatprep.mubr.msk.f32.mxu0 %vm163_vm0, %v24_v31  ;;  %1051 = vmatprep.mubr.msk.f32.mxu1 %vm163_vm0, %v88_v32  ;;  %v117_v30 = vld [vmem:[%s2078_s0 + $0x320] sm:$0xff]  ;;  %v56_v31 = vld [vmem:[%s2078_s0 + $0x138] sm:$0xff] }
  0x30   :  { %v120_v32 = vld [vmem:[%s2078_s0 + $0x338] sm:$0xff] }
  0x32   :  { %436 = vmatmul.mubr.f32.gmra.mxu0 %v23_v33  ;;  %596 = vmatmul.mubr.f32.gmra.mxu1 %v87_v34  ;;  %v55_v33 = vld [vmem:[%s2078_s0 + $0x130] sm:$0xff] }
  0x33   :  { %1020 = vmatprep.mubr.msk.f32.mxu0 %vm163_vm0, %v26_v35  ;;  %1052 = vmatprep.mubr.msk.f32.mxu1 %vm163_vm0, %v90_v36  ;;  %v119_v34 = vld [vmem:[%s2078_s0 + $0x330] sm:$0xff]  ;;  %v58_v35 = vld [vmem:[%s2078_s0 + $0x148] sm:$0xff] }
  0x34   :  { %v122_v36 = vld [vmem:[%s2078_s0 + $0x348] sm:$0xff] }
  0x36   :  { %441 = vmatmul.mubr.f32.gmra.mxu0 %v25_v37  ;;  %601 = vmatmul.mubr.f32.gmra.mxu1 %v89_v38  ;;  %v57_v37 = vld [vmem:[%s2078_s0 + $0x140] sm:$0xff] }
  0x37   :  { %1021 = vmatprep.mubr.msk.f32.mxu0 %vm163_vm0, %v28_v39  ;;  %1053 = vmatprep.mubr.msk.f32.mxu1 %vm163_vm0, %v92_v40  ;;  %v121_v38 = vld [vmem:[%s2078_s0 + $0x340] sm:$0xff]  ;;  %v60_v39 = vld [vmem:[%s2078_s0 + $0x158] sm:$0xff] }
  0x38   :  { %v124_v40 = vld [vmem:[%s2078_s0 + $0x358] sm:$0xff] }
  0x3a   :  { %446 = vmatmul.mubr.f32.gmra.mxu0 %v27_v41  ;;  %606 = vmatmul.mubr.f32.gmra.mxu1 %v91_v42  ;;  %v59_v41 = vld [vmem:[%s2078_s0 + $0x150] sm:$0xff] }
  0x3b   :  { %1022 = vmatprep.mubr.msk.f32.mxu0 %vm163_vm0, %v30_v43  ;;  %1054 = vmatprep.mubr.msk.f32.mxu1 %vm163_vm0, %v94_v44  ;;  %v123_v42 = vld [vmem:[%s2078_s0 + $0x350] sm:$0xff]  ;;  %v62_v43 = vld [vmem:[%s2078_s0 + $0x168] sm:$0xff] }
  0x3c   :  { %v126_v44 = vld [vmem:[%s2078_s0 + $0x368] sm:$0xff] }
  0x3e   :  { %451 = vmatmul.mubr.f32.gmra.mxu0 %v29_v45  ;;  %611 = vmatmul.mubr.f32.gmra.mxu1 %v93_v46  ;;  %v61_v45 = vld [vmem:[%s2078_s0 + $0x160] sm:$0xff] }
  0x3f   :  { %1023 = vmatprep.mubr.msk.f32.mxu0 %vm163_vm0, %v32_v47  ;;  %1055 = vmatprep.mubr.msk.f32.mxu1 %vm163_vm0, %v96_v48  ;;  %v125_v46 = vld [vmem:[%s2078_s0 + $0x360] sm:$0xff]  ;;  %v64_v47 = vld [vmem:[%s2078_s0 + $0x178] sm:$0xff] }
  0x40   :  { %v128_v48 = vld [vmem:[%s2078_s0 + $0x378] sm:$0xff] }
  0x42   :  { %456 = vmatmul.mubr.f32.gmra.mxu0 %v31_v49  ;;  %616 = vmatmul.mubr.f32.gmra.mxu1 %v95_v50  ;;  %v63_v49 = vld [vmem:[%s2078_s0 + $0x170] sm:$0xff] }
  0x43   :  { %1024 = vmatprep.mubr.msk.f32.mxu0 %vm163_vm0, %v34_v51  ;;  %1056 = vmatprep.mubr.msk.f32.mxu1 %vm163_vm0, %v98_v52  ;;  %v127_v50 = vld [vmem:[%s2078_s0 + $0x370] sm:$0xff]  ;;  %v66_v51 = vld [vmem:[%s2078_s0 + $0x188] sm:$0xff] }
  0x44   :  { %v130_v52 = vld [vmem:[%s2078_s0 + $0x388] sm:$0xff] }
  0x46   :  { %461 = vmatmul.mubr.f32.gmra.mxu0 %v33_v53  ;;  %621 = vmatmul.mubr.f32.gmra.mxu1 %v97_v54  ;;  %v65_v53 = vld [vmem:[%s2078_s0 + $0x180] sm:$0xff] }
  0x47   :  { %1025 = vmatprep.mubr.msk.f32.mxu0 %vm163_vm0, %v36_v55  ;;  %1057 = vmatprep.mubr.msk.f32.mxu1 %vm163_vm0, %v100_v56  ;;  %v129_v54 = vld [vmem:[%s2078_s0 + $0x380] sm:$0xff]  ;;  %v68_v55 = vld [vmem:[%s2078_s0 + $0x198] sm:$0xff] }
  0x48   :  { %v132_v56 = vld [vmem:[%s2078_s0 + $0x398] sm:$0xff] }
  0x4a   :  { %466 = vmatmul.mubr.f32.gmra.mxu0 %v35_v57  ;;  %626 = vmatmul.mubr.f32.gmra.mxu1 %v99_v58  ;;  %v67_v57 = vld [vmem:[%s2078_s0 + $0x190] sm:$0xff] }
  0x4b   :  { %1026 = vmatprep.mubr.msk.f32.mxu0 %vm163_vm0, %v38_v59  ;;  %1058 = vmatprep.mubr.msk.f32.mxu1 %vm163_vm0, %v102_v60  ;;  %v131_v58 = vld [vmem:[%s2078_s0 + $0x390] sm:$0xff]  ;;  %v70_v59 = vld [vmem:[%s2078_s0 + $0x1a8] sm:$0xff] }
  0x4c   :  { %v134_v60 = vld [vmem:[%s2078_s0 + $0x3a8] sm:$0xff] }
  0x4e   :  { %471 = vmatmul.mubr.f32.gmra.mxu0 %v37_v61  ;;  %631 = vmatmul.mubr.f32.gmra.mxu1 %v101_v62  ;;  %v69_v61 = vld [vmem:[%s2078_s0 + $0x1a0] sm:$0xff] }
  0x4f   :  { %1027 = vmatprep.mubr.msk.f32.mxu0 %vm163_vm0, %v40_v63  ;;  %1059 = vmatprep.mubr.msk.f32.mxu1 %vm163_vm0, %v104_v0  ;;  %v133_v62 = vld [vmem:[%s2078_s0 + $0x3a0] sm:$0xff]  ;;  %v72_v63 = vld [vmem:[%s2078_s0 + $0x1b8] sm:$0xff] }
  0x50   :  { %v136_v0 = vld [vmem:[%s2078_s0 + $0x3b8] sm:$0xff] }
  0x52   :  { %476 = vmatmul.mubr.f32.gmra.mxu0 %v39_v1  ;;  %636 = vmatmul.mubr.f32.gmra.mxu1 %v103_v2  ;;  %v71_v1 = vld [vmem:[%s2078_s0 + $0x1b0] sm:$0xff] }
  0x53   :  { %1028 = vmatprep.mubr.msk.f32.mxu0 %vm163_vm0, %v42_v3  ;;  %1060 = vmatprep.mubr.msk.f32.mxu1 %vm163_vm0, %v106_v4  ;;  %v135_v2 = vld [vmem:[%s2078_s0 + $0x3b0] sm:$0xff]  ;;  %v74_v3 = vld [vmem:[%s2078_s0 + $0x1c8] sm:$0xff] }
  0x54   :  { %v138_v4 = vld [vmem:[%s2078_s0 + $0x3c8] sm:$0xff] }
  0x56   :  { %481 = vmatmul.mubr.f32.gmra.mxu0 %v41_v5  ;;  %641 = vmatmul.mubr.f32.gmra.mxu1 %v105_v6  ;;  %v73_v5 = vld [vmem:[%s2078_s0 + $0x1c0] sm:$0xff] }
  0x57   :  { %1029 = vmatprep.mubr.msk.f32.mxu0 %vm163_vm0, %v44_v7  ;;  %1061 = vmatprep.mubr.msk.f32.mxu1 %vm163_vm0, %v108_v8  ;;  %v137_v6 = vld [vmem:[%s2078_s0 + $0x3c0] sm:$0xff]  ;;  %v76_v7 = vld [vmem:[%s2078_s0 + $0x1d8] sm:$0xff] }
  0x58   :  { %v140_v8 = vld [vmem:[%s2078_s0 + $0x3d8] sm:$0xff] }
  0x5a   :  { %486 = vmatmul.mubr.f32.gmra.mxu0 %v43_v9  ;;  %646 = vmatmul.mubr.f32.gmra.mxu1 %v107_v10  ;;  %v75_v9 = vld [vmem:[%s2078_s0 + $0x1d0] sm:$0xff] }
  0x5b   :  { %1030 = vmatprep.mubr.msk.f32.mxu0 %vm163_vm0, %v46_v11  ;;  %1062 = vmatprep.mubr.msk.f32.mxu1 %vm163_vm0, %v110_v12  ;;  %v139_v10 = vld [vmem:[%s2078_s0 + $0x3d0] sm:$0xff]  ;;  %v78_v11 = vld [vmem:[%s2078_s0 + $0x1e8] sm:$0xff] }
  0x5c   :  { %v142_v12 = vld [vmem:[%s2078_s0 + $0x3e8] sm:$0xff] }
  0x5e   :  { %491 = vmatmul.mubr.f32.gmra.mxu0 %v45_v13  ;;  %651 = vmatmul.mubr.f32.gmra.mxu1 %v109_v14  ;;  %v77_v13 = vld [vmem:[%s2078_s0 + $0x1e0] sm:$0xff] }
  0x5f   :  { %1031 = vmatprep.mubr.msk.f32.mxu0 %vm163_vm0, %v48_v15  ;;  %1063 = vmatprep.mubr.msk.f32.mxu1 %vm163_vm0, %v112_v16  ;;  %v141_v14 = vld [vmem:[%s2078_s0 + $0x3e0] sm:$0xff]  ;;  %v80_v15 = vld [vmem:[%s2078_s0 + $0x1f8] sm:$0xff] }
  0x60   :  { %v144_v16 = vld [vmem:[%s2078_s0 + $0x3f8] sm:$0xff] }
  0x62   :  { %496 = vmatmul.mubr.f32.gmra.mxu0 %v47_v17  ;;  %656 = vmatmul.mubr.f32.gmra.mxu1 %v111_v18  ;;  %v79_v17 = vld [vmem:[%s2078_s0 + $0x1f0] sm:$0xff] }
  0x63   :  { %1032 = vmatprep.mubr.msk.f32.mxu0 %vm163_vm0, %v50_v19  ;;  %1064 = vmatprep.mubr.msk.f32.mxu1 %vm163_vm0, %v114_v20  ;;  %v143_v18 = vld [vmem:[%s2078_s0 + $0x3f0] sm:$0xff]  ;;  %v1686_v19 = vld [vmem:[%s2079_s2] ss:$0 sm:$0xff] }
  0x66   :  { %501 = vmatmul.mubr.f32.gmra.mxu0 %v49_v21  ;;  %661 = vmatmul.mubr.f32.gmra.mxu1 %v113_v22  ;;  %v1691_v21 = vld [vmem:[%s2080_s3] ss:$0 sm:$0xff] }
  0x67   :  { %1033 = vmatprep.mubr.msk.f32.mxu0 %vm163_vm0, %v52_v23  ;;  %1065 = vmatprep.mubr.msk.f32.mxu1 %vm163_vm0, %v116_v24 }
  0x6a   :  { %506 = vmatmul.mubr.f32.gmra.mxu0 %v51_v25  ;;  %666 = vmatmul.mubr.f32.gmra.mxu1 %v115_v26 }
  0x6b   :  { %1034 = vmatprep.mubr.msk.f32.mxu0 %vm163_vm0, %v54_v27  ;;  %1066 = vmatprep.mubr.msk.f32.mxu1 %vm163_vm0, %v118_v28 }
  0x6e   :  { %511 = vmatmul.mubr.f32.gmra.mxu0 %v53_v29  ;;  %671 = vmatmul.mubr.f32.gmra.mxu1 %v117_v30 }
  0x6f   :  { %1035 = vmatprep.mubr.msk.f32.mxu0 %vm163_vm0, %v56_v31  ;;  %1067 = vmatprep.mubr.msk.f32.mxu1 %vm163_vm0, %v120_v32 }
  0x72   :  { %516 = vmatmul.mubr.f32.gmra.mxu0 %v55_v33  ;;  %676 = vmatmul.mubr.f32.gmra.mxu1 %v119_v34 }
  0x73   :  { %1036 = vmatprep.mubr.msk.f32.mxu0 %vm163_vm0, %v58_v35  ;;  %1068 = vmatprep.mubr.msk.f32.mxu1 %vm163_vm0, %v122_v36 }
  0x76   :  { %521 = vmatmul.mubr.f32.gmra.mxu0 %v57_v37  ;;  %681 = vmatmul.mubr.f32.gmra.mxu1 %v121_v38 }
  0x77   :  { %1037 = vmatprep.mubr.msk.f32.mxu0 %vm163_vm0, %v60_v39  ;;  %1069 = vmatprep.mubr.msk.f32.mxu1 %vm163_vm0, %v124_v40 }
  0x7a   :  { %526 = vmatmul.mubr.f32.gmra.mxu0 %v59_v41  ;;  %686 = vmatmul.mubr.f32.gmra.mxu1 %v123_v42 }
  0x7b   :  { %1038 = vmatprep.mubr.msk.f32.mxu0 %vm163_vm0, %v62_v43  ;;  %1070 = vmatprep.mubr.msk.f32.mxu1 %vm163_vm0, %v126_v44 }
  0x7e   :  { %531 = vmatmul.mubr.f32.gmra.mxu0 %v61_v45  ;;  %691 = vmatmul.mubr.f32.gmra.mxu1 %v125_v46 }
  0x7f   :  { %1039 = vmatprep.mubr.msk.f32.mxu0 %vm163_vm0, %v64_v47  ;;  %1071 = vmatprep.mubr.msk.f32.mxu1 %vm163_vm0, %v128_v48 }
  0x82   :  { %536 = vmatmul.mubr.f32.gmra.mxu0 %v63_v49  ;;  %696 = vmatmul.mubr.f32.gmra.mxu1 %v127_v50 }
  0x83   :  { %1040 = vmatprep.mubr.msk.f32.mxu0 %vm163_vm0, %v66_v51  ;;  %1072 = vmatprep.mubr.msk.f32.mxu1 %vm163_vm0, %v130_v52 }
  0x86   :  { %541 = vmatmul.mubr.f32.gmra.mxu0 %v65_v53  ;;  %701 = vmatmul.mubr.f32.gmra.mxu1 %v129_v54 }
  0x87   :  { %1041 = vmatprep.mubr.msk.f32.mxu0 %vm163_vm0, %v68_v55  ;;  %1073 = vmatprep.mubr.msk.f32.mxu1 %vm163_vm0, %v132_v56 }
  0x8a   :  { %546 = vmatmul.mubr.f32.gmra.mxu0 %v67_v57  ;;  %706 = vmatmul.mubr.f32.gmra.mxu1 %v131_v58 }
  0x8b   :  { %1042 = vmatprep.mubr.msk.f32.mxu0 %vm163_vm0, %v70_v59  ;;  %1074 = vmatprep.mubr.msk.f32.mxu1 %vm163_vm0, %v134_v60 }
  0x8e   :  { %551 = vmatmul.mubr.f32.gmra.mxu0 %v69_v61  ;;  %711 = vmatmul.mubr.f32.gmra.mxu1 %v133_v62 }
  0x8f   :  { %1043 = vmatprep.mubr.msk.f32.mxu0 %vm163_vm0, %v72_v63  ;;  %1075 = vmatprep.mubr.msk.f32.mxu1 %vm163_vm0, %v136_v0 }
  0x92   :  { %556 = vmatmul.mubr.f32.gmra.mxu0 %v71_v1  ;;  %716 = vmatmul.mubr.f32.gmra.mxu1 %v135_v2 }
  0x93   :  { %1044 = vmatprep.mubr.msk.f32.mxu0 %vm163_vm0, %v74_v3  ;;  %1076 = vmatprep.mubr.msk.f32.mxu1 %vm163_vm0, %v138_v4 }
  0x96   :  { %561 = vmatmul.mubr.f32.gmra.mxu0 %v73_v5  ;;  %721 = vmatmul.mubr.f32.gmra.mxu1 %v137_v6 }
  0x97   :  { %1045 = vmatprep.mubr.msk.f32.mxu0 %vm163_vm0, %v76_v7  ;;  %1077 = vmatprep.mubr.msk.f32.mxu1 %vm163_vm0, %v140_v8 }
  0x9a   :  { %566 = vmatmul.mubr.f32.gmra.mxu0 %v75_v9  ;;  %726 = vmatmul.mubr.f32.gmra.mxu1 %v139_v10 }
  0x9b   :  { %1046 = vmatprep.mubr.msk.f32.mxu0 %vm163_vm0, %v78_v11  ;;  %1078 = vmatprep.mubr.msk.f32.mxu1 %vm163_vm0, %v142_v12 }
  0x9e   :  { %571 = vmatmul.mubr.f32.gmra.mxu0 %v77_v13  ;;  %731 = vmatmul.mubr.f32.gmra.mxu1 %v141_v14 }
  0x9f   :  { %1047 = vmatprep.mubr.msk.f32.mxu0 %vm163_vm0, %v80_v15  ;;  %1079 = vmatprep.mubr.msk.f32.mxu1 %vm163_vm0, %v144_v16 }
  0xa2   :  { %576 = vmatmul.mubr.f32.gmra.mxu0 %v79_v17  ;;  %736 = vmatmul.mubr.f32.gmra.mxu1 %v143_v18 }
  0xe6   :  { %v422_v20 = vpop.f32.mrf.mxu0  ;;  %v582_v22 = vpop.f32.mrf.mxu1 }
  0xe7   :  { %v748_v23 = vmul.f32 %v1686_v19, %v422_v20  ;;  %v780_v24 = vmul.f32 %v1686_v19, %v582_v22 }
  0xe8   :  { %v424_v25 = vpop.f32.mrf.mxu0  ;;  %v584_v26 = vpop.f32.mrf.mxu1 }
  0xe9   :  { %v819_v27 = vadd.f32 %v1691_v21, %v748_v23  ;;  %v851_v28 = vadd.f32 %v1691_v21, %v780_v24 }
  0xea   :  { %v427_v29 = vpop.f32.mrf.mxu0  ;;  %v587_v30 = vpop.f32.mrf.mxu1 }
  0xeb   :  { %v883_v31 = vmax.f32 %v819_v27, 0.0  ;;  %v915_v32 = vmax.f32 %v851_v28, 0.0  ;;  %v749_v33 = vmul.f32 %v1686_v19, %v427_v29  ;;  %v781_v34 = vmul.f32 %v1686_v19, %v587_v30 }
  0xec   :  { %v429_v35 = vpop.f32.mrf.mxu0  ;;  %v589_v36 = vpop.f32.mrf.mxu1 }
  0xed   :  { %948 = vst.msk [vmem:[%s2081_s4] sm:$0xff] %vm947_vm1, %v883_v31  ;;  %980 = vst.msk [vmem:[%s2081_s4 + $0x100] sm:$0xff] %vm947_vm1, %v915_v32  ;;  %v820_v37 = vadd.f32 %v1691_v21, %v749_v33  ;;  %v852_v38 = vadd.f32 %v1691_v21, %v781_v34 }
  0xee   :  { %v432_v39 = vpop.f32.mrf.mxu0  ;;  %v592_v40 = vpop.f32.mrf.mxu1 }
  0xef   :  { %v884_v41 = vmax.f32 %v820_v37, 0.0  ;;  %v916_v42 = vmax.f32 %v852_v38, 0.0  ;;  %v750_v43 = vmul.f32 %v1686_v19, %v432_v39  ;;  %v782_v44 = vmul.f32 %v1686_v19, %v592_v40 }
  0xf0   :  { %v434_v45 = vpop.f32.mrf.mxu0  ;;  %v594_v46 = vpop.f32.mrf.mxu1 }
  0xf1   :  { %949 = vst.msk [vmem:[%s2081_s4 + $0x8] sm:$0xff] %vm947_vm1, %v884_v41  ;;  %981 = vst.msk [vmem:[%s2081_s4 + $0x108] sm:$0xff] %vm947_vm1, %v916_v42  ;;  %v821_v47 = vadd.f32 %v1691_v21, %v750_v43  ;;  %v853_v48 = vadd.f32 %v1691_v21, %v782_v44 }
  0xf2   :  { %v437_v49 = vpop.f32.mrf.mxu0  ;;  %v597_v50 = vpop.f32.mrf.mxu1 }
  0xf3   :  { %v885_v51 = vmax.f32 %v821_v47, 0.0  ;;  %v917_v52 = vmax.f32 %v853_v48, 0.0  ;;  %v751_v53 = vmul.f32 %v1686_v19, %v437_v49  ;;  %v783_v54 = vmul.f32 %v1686_v19, %v597_v50 }
  0xf4   :  { %v439_v55 = vpop.f32.mrf.mxu0  ;;  %v599_v56 = vpop.f32.mrf.mxu1 }
  0xf5   :  { %950 = vst.msk [vmem:[%s2081_s4 + $0x10] sm:$0xff] %vm947_vm1, %v885_v51  ;;  %982 = vst.msk [vmem:[%s2081_s4 + $0x110] sm:$0xff] %vm947_vm1, %v917_v52  ;;  %v822_v57 = vadd.f32 %v1691_v21, %v751_v53  ;;  %v854_v58 = vadd.f32 %v1691_v21, %v783_v54 }
  0xf6   :  { %v442_v59 = vpop.f32.mrf.mxu0  ;;  %v602_v60 = vpop.f32.mrf.mxu1 }
  0xf7   :  { %v886_v61 = vmax.f32 %v822_v57, 0.0  ;;  %v918_v62 = vmax.f32 %v854_v58, 0.0  ;;  %v752_v63 = vmul.f32 %v1686_v19, %v442_v59  ;;  %v784_v0 = vmul.f32 %v1686_v19, %v602_v60 }
  0xf8   :  { %v444_v1 = vpop.f32.mrf.mxu0  ;;  %v604_v2 = vpop.f32.mrf.mxu1 }
  0xf9   :  { %951 = vst.msk [vmem:[%s2081_s4 + $0x18] sm:$0xff] %vm947_vm1, %v886_v61  ;;  %983 = vst.msk [vmem:[%s2081_s4 + $0x118] sm:$0xff] %vm947_vm1, %v918_v62  ;;  %v823_v3 = vadd.f32 %v1691_v21, %v752_v63  ;;  %v855_v4 = vadd.f32 %v1691_v21, %v784_v0 }
  0xfa   :  { %v447_v5 = vpop.f32.mrf.mxu0  ;;  %v607_v6 = vpop.f32.mrf.mxu1 }
  0xfb   :  { %v887_v7 = vmax.f32 %v823_v3, 0.0  ;;  %v919_v8 = vmax.f32 %v855_v4, 0.0  ;;  %v753_v9 = vmul.f32 %v1686_v19, %v447_v5  ;;  %v785_v10 = vmul.f32 %v1686_v19, %v607_v6 }
  0xfc   :  { %v449_v11 = vpop.f32.mrf.mxu0  ;;  %v609_v12 = vpop.f32.mrf.mxu1 }
  0xfd   :  { %952 = vst.msk [vmem:[%s2081_s4 + $0x20] sm:$0xff] %vm947_vm1, %v887_v7  ;;  %984 = vst.msk [vmem:[%s2081_s4 + $0x120] sm:$0xff] %vm947_vm1, %v919_v8  ;;  %v824_v13 = vadd.f32 %v1691_v21, %v753_v9  ;;  %v856_v14 = vadd.f32 %v1691_v21, %v785_v10 }
  0xfe   :  { %v452_v15 = vpop.f32.mrf.mxu0  ;;  %v612_v16 = vpop.f32.mrf.mxu1 }
  0xff   :  { %v888_v17 = vmax.f32 %v824_v13, 0.0  ;;  %v920_v18 = vmax.f32 %v856_v14, 0.0  ;;  %v754_v20 = vmul.f32 %v1686_v19, %v452_v15  ;;  %v786_v22 = vmul.f32 %v1686_v19, %v612_v16 }
 0x100   :  { %v454_v23 = vpop.f32.mrf.mxu0  ;;  %v614_v24 = vpop.f32.mrf.mxu1 }
 0x101   :  { %953 = vst.msk [vmem:[%s2081_s4 + $0x28] sm:$0xff] %vm947_vm1, %v888_v17  ;;  %985 = vst.msk [vmem:[%s2081_s4 + $0x128] sm:$0xff] %vm947_vm1, %v920_v18  ;;  %v825_v25 = vadd.f32 %v1691_v21, %v754_v20  ;;  %v857_v26 = vadd.f32 %v1691_v21, %v786_v22 }
 0x102   :  { %v457_v27 = vpop.f32.mrf.mxu0  ;;  %v617_v28 = vpop.f32.mrf.mxu1 }
 0x103   :  { %v889_v29 = vmax.f32 %v825_v25, 0.0  ;;  %v921_v30 = vmax.f32 %v857_v26, 0.0  ;;  %v755_v31 = vmul.f32 %v1686_v19, %v457_v27  ;;  %v787_v32 = vmul.f32 %v1686_v19, %v617_v28 }
 0x104   :  { %v459_v33 = vpop.f32.mrf.mxu0  ;;  %v619_v34 = vpop.f32.mrf.mxu1 }
 0x105   :  { %954 = vst.msk [vmem:[%s2081_s4 + $0x30] sm:$0xff] %vm947_vm1, %v889_v29  ;;  %986 = vst.msk [vmem:[%s2081_s4 + $0x130] sm:$0xff] %vm947_vm1, %v921_v30  ;;  %v826_v35 = vadd.f32 %v1691_v21, %v755_v31  ;;  %v858_v36 = vadd.f32 %v1691_v21, %v787_v32 }
 0x106   :  { %v462_v37 = vpop.f32.mrf.mxu0  ;;  %v622_v38 = vpop.f32.mrf.mxu1 }
 0x107   :  { %v890_v39 = vmax.f32 %v826_v35, 0.0  ;;  %v922_v40 = vmax.f32 %v858_v36, 0.0  ;;  %v756_v41 = vmul.f32 %v1686_v19, %v462_v37  ;;  %v788_v42 = vmul.f32 %v1686_v19, %v622_v38 }
 0x108   :  { %v464_v43 = vpop.f32.mrf.mxu0  ;;  %v624_v44 = vpop.f32.mrf.mxu1 }
 0x109   :  { %955 = vst.msk [vmem:[%s2081_s4 + $0x38] sm:$0xff] %vm947_vm1, %v890_v39  ;;  %987 = vst.msk [vmem:[%s2081_s4 + $0x138] sm:$0xff] %vm947_vm1, %v922_v40  ;;  %v827_v45 = vadd.f32 %v1691_v21, %v756_v41  ;;  %v859_v46 = vadd.f32 %v1691_v21, %v788_v42 }
 0x10a   :  { %v467_v47 = vpop.f32.mrf.mxu0  ;;  %v627_v48 = vpop.f32.mrf.mxu1 }
 0x10b   :  { %v891_v49 = vmax.f32 %v827_v45, 0.0  ;;  %v923_v50 = vmax.f32 %v859_v46, 0.0  ;;  %v757_v51 = vmul.f32 %v1686_v19, %v467_v47  ;;  %v789_v52 = vmul.f32 %v1686_v19, %v627_v48 }
 0x10c   :  { %v469_v53 = vpop.f32.mrf.mxu0  ;;  %v629_v54 = vpop.f32.mrf.mxu1 }
 0x10d   :  { %956 = vst.msk [vmem:[%s2081_s4 + $0x40] sm:$0xff] %vm947_vm1, %v891_v49  ;;  %988 = vst.msk [vmem:[%s2081_s4 + $0x140] sm:$0xff] %vm947_vm1, %v923_v50  ;;  %v828_v55 = vadd.f32 %v1691_v21, %v757_v51  ;;  %v860_v56 = vadd.f32 %v1691_v21, %v789_v52 }
 0x10e   :  { %v472_v57 = vpop.f32.mrf.mxu0  ;;  %v632_v58 = vpop.f32.mrf.mxu1 }
 0x10f   :  { %v892_v59 = vmax.f32 %v828_v55, 0.0  ;;  %v924_v60 = vmax.f32 %v860_v56, 0.0  ;;  %v758_v61 = vmul.f32 %v1686_v19, %v472_v57  ;;  %v790_v62 = vmul.f32 %v1686_v19, %v632_v58 }
 0x110   :  { %v474_v63 = vpop.f32.mrf.mxu0  ;;  %v634_v0 = vpop.f32.mrf.mxu1 }
 0x111   :  { %957 = vst.msk [vmem:[%s2081_s4 + $0x48] sm:$0xff] %vm947_vm1, %v892_v59  ;;  %989 = vst.msk [vmem:[%s2081_s4 + $0x148] sm:$0xff] %vm947_vm1, %v924_v60  ;;  %v829_v1 = vadd.f32 %v1691_v21, %v758_v61  ;;  %v861_v2 = vadd.f32 %v1691_v21, %v790_v62 }
 0x112   :  { %v477_v3 = vpop.f32.mrf.mxu0  ;;  %v637_v4 = vpop.f32.mrf.mxu1 }
 0x113   :  { %v893_v5 = vmax.f32 %v829_v1, 0.0  ;;  %v925_v6 = vmax.f32 %v861_v2, 0.0  ;;  %v759_v7 = vmul.f32 %v1686_v19, %v477_v3  ;;  %v791_v8 = vmul.f32 %v1686_v19, %v637_v4 }
 0x114   :  { %v479_v9 = vpop.f32.mrf.mxu0  ;;  %v639_v10 = vpop.f32.mrf.mxu1 }
 0x115   :  { %958 = vst.msk [vmem:[%s2081_s4 + $0x50] sm:$0xff] %vm947_vm1, %v893_v5  ;;  %990 = vst.msk [vmem:[%s2081_s4 + $0x150] sm:$0xff] %vm947_vm1, %v925_v6  ;;  %v830_v11 = vadd.f32 %v1691_v21, %v759_v7  ;;  %v862_v12 = vadd.f32 %v1691_v21, %v791_v8 }
 0x116   :  { %v482_v13 = vpop.f32.mrf.mxu0  ;;  %v642_v14 = vpop.f32.mrf.mxu1 }
 0x117   :  { %v894_v15 = vmax.f32 %v830_v11, 0.0  ;;  %v926_v16 = vmax.f32 %v862_v12, 0.0  ;;  %v760_v17 = vmul.f32 %v1686_v19, %v482_v13  ;;  %v792_v18 = vmul.f32 %v1686_v19, %v642_v14 }
 0x118   :  { %v484_v20 = vpop.f32.mrf.mxu0  ;;  %v644_v22 = vpop.f32.mrf.mxu1 }
 0x119   :  { %959 = vst.msk [vmem:[%s2081_s4 + $0x58] sm:$0xff] %vm947_vm1, %v894_v15  ;;  %991 = vst.msk [vmem:[%s2081_s4 + $0x158] sm:$0xff] %vm947_vm1, %v926_v16  ;;  %v831_v23 = vadd.f32 %v1691_v21, %v760_v17  ;;  %v863_v24 = vadd.f32 %v1691_v21, %v792_v18 }
 0x11a   :  { %v487_v25 = vpop.f32.mrf.mxu0  ;;  %v647_v26 = vpop.f32.mrf.mxu1 }
 0x11b   :  { %v895_v27 = vmax.f32 %v831_v23, 0.0  ;;  %v927_v28 = vmax.f32 %v863_v24, 0.0  ;;  %v761_v29 = vmul.f32 %v1686_v19, %v487_v25  ;;  %v793_v30 = vmul.f32 %v1686_v19, %v647_v26 }
 0x11c   :  { %v489_v31 = vpop.f32.mrf.mxu0  ;;  %v649_v32 = vpop.f32.mrf.mxu1 }
 0x11d   :  { %960 = vst.msk [vmem:[%s2081_s4 + $0x60] sm:$0xff] %vm947_vm1, %v895_v27  ;;  %992 = vst.msk [vmem:[%s2081_s4 + $0x160] sm:$0xff] %vm947_vm1, %v927_v28  ;;  %v832_v33 = vadd.f32 %v1691_v21, %v761_v29  ;;  %v864_v34 = vadd.f32 %v1691_v21, %v793_v30 }
 0x11e   :  { %v492_v35 = vpop.f32.mrf.mxu0  ;;  %v652_v36 = vpop.f32.mrf.mxu1 }
 0x11f   :  { %v896_v37 = vmax.f32 %v832_v33, 0.0  ;;  %v928_v38 = vmax.f32 %v864_v34, 0.0  ;;  %v762_v39 = vmul.f32 %v1686_v19, %v492_v35  ;;  %v794_v40 = vmul.f32 %v1686_v19, %v652_v36 }
 0x120   :  { %v494_v41 = vpop.f32.mrf.mxu0  ;;  %v654_v42 = vpop.f32.mrf.mxu1 }
 0x121   :  { %961 = vst.msk [vmem:[%s2081_s4 + $0x68] sm:$0xff] %vm947_vm1, %v896_v37  ;;  %993 = vst.msk [vmem:[%s2081_s4 + $0x168] sm:$0xff] %vm947_vm1, %v928_v38  ;;  %v833_v43 = vadd.f32 %v1691_v21, %v762_v39  ;;  %v865_v44 = vadd.f32 %v1691_v21, %v794_v40 }
 0x122   :  { %v497_v45 = vpop.f32.mrf.mxu0  ;;  %v657_v46 = vpop.f32.mrf.mxu1 }
 0x123   :  { %v897_v47 = vmax.f32 %v833_v43, 0.0  ;;  %v929_v48 = vmax.f32 %v865_v44, 0.0  ;;  %v763_v49 = vmul.f32 %v1686_v19, %v497_v45  ;;  %v795_v50 = vmul.f32 %v1686_v19, %v657_v46 }
 0x124   :  { %v499_v51 = vpop.f32.mrf.mxu0  ;;  %v659_v52 = vpop.f32.mrf.mxu1 }
 0x125   :  { %962 = vst.msk [vmem:[%s2081_s4 + $0x70] sm:$0xff] %vm947_vm1, %v897_v47  ;;  %994 = vst.msk [vmem:[%s2081_s4 + $0x170] sm:$0xff] %vm947_vm1, %v929_v48  ;;  %v834_v53 = vadd.f32 %v1691_v21, %v763_v49  ;;  %v866_v54 = vadd.f32 %v1691_v21, %v795_v50 }
 0x126   :  { %v502_v55 = vpop.f32.mrf.mxu0  ;;  %v662_v56 = vpop.f32.mrf.mxu1 }
 0x127   :  { %v898_v57 = vmax.f32 %v834_v53, 0.0  ;;  %v930_v58 = vmax.f32 %v866_v54, 0.0  ;;  %v764_v59 = vmul.f32 %v1686_v19, %v502_v55  ;;  %v796_v60 = vmul.f32 %v1686_v19, %v662_v56 }
 0x128   :  { %v504_v61 = vpop.f32.mrf.mxu0  ;;  %v664_v62 = vpop.f32.mrf.mxu1 }
 0x129   :  { %963 = vst.msk [vmem:[%s2081_s4 + $0x78] sm:$0xff] %vm947_vm1, %v898_v57  ;;  %995 = vst.msk [vmem:[%s2081_s4 + $0x178] sm:$0xff] %vm947_vm1, %v930_v58  ;;  %v835_v63 = vadd.f32 %v1691_v21, %v764_v59  ;;  %v867_v0 = vadd.f32 %v1691_v21, %v796_v60 }
 0x12a   :  { %v507_v1 = vpop.f32.mrf.mxu0  ;;  %v667_v2 = vpop.f32.mrf.mxu1 }
 0x12b   :  { %v899_v3 = vmax.f32 %v835_v63, 0.0  ;;  %v931_v4 = vmax.f32 %v867_v0, 0.0  ;;  %v765_v5 = vmul.f32 %v1686_v19, %v507_v1  ;;  %v797_v6 = vmul.f32 %v1686_v19, %v667_v2 }
 0x12c   :  { %v509_v7 = vpop.f32.mrf.mxu0  ;;  %v669_v8 = vpop.f32.mrf.mxu1 }
 0x12d   :  { %964 = vst.msk [vmem:[%s2081_s4 + $0x80] sm:$0xff] %vm947_vm1, %v899_v3  ;;  %996 = vst.msk [vmem:[%s2081_s4 + $0x180] sm:$0xff] %vm947_vm1, %v931_v4  ;;  %v836_v9 = vadd.f32 %v1691_v21, %v765_v5  ;;  %v868_v10 = vadd.f32 %v1691_v21, %v797_v6 }
 0x12e   :  { %v512_v11 = vpop.f32.mrf.mxu0  ;;  %v672_v12 = vpop.f32.mrf.mxu1 }
 0x12f   :  { %v900_v13 = vmax.f32 %v836_v9, 0.0  ;;  %v932_v14 = vmax.f32 %v868_v10, 0.0  ;;  %v766_v15 = vmul.f32 %v1686_v19, %v512_v11  ;;  %v798_v16 = vmul.f32 %v1686_v19, %v672_v12 }
 0x130   :  { %v514_v17 = vpop.f32.mrf.mxu0  ;;  %v674_v18 = vpop.f32.mrf.mxu1 }
 0x131   :  { %965 = vst.msk [vmem:[%s2081_s4 + $0x88] sm:$0xff] %vm947_vm1, %v900_v13  ;;  %997 = vst.msk [vmem:[%s2081_s4 + $0x188] sm:$0xff] %vm947_vm1, %v932_v14  ;;  %v837_v20 = vadd.f32 %v1691_v21, %v766_v15  ;;  %v869_v22 = vadd.f32 %v1691_v21, %v798_v16 }
 0x132   :  { %v517_v23 = vpop.f32.mrf.mxu0  ;;  %v677_v24 = vpop.f32.mrf.mxu1 }
 0x133   :  { %v901_v25 = vmax.f32 %v837_v20, 0.0  ;;  %v933_v26 = vmax.f32 %v869_v22, 0.0  ;;  %v767_v27 = vmul.f32 %v1686_v19, %v517_v23  ;;  %v799_v28 = vmul.f32 %v1686_v19, %v677_v24 }
 0x134   :  { %v519_v29 = vpop.f32.mrf.mxu0  ;;  %v679_v30 = vpop.f32.mrf.mxu1 }
 0x135   :  { %966 = vst.msk [vmem:[%s2081_s4 + $0x90] sm:$0xff] %vm947_vm1, %v901_v25  ;;  %998 = vst.msk [vmem:[%s2081_s4 + $0x190] sm:$0xff] %vm947_vm1, %v933_v26  ;;  %v838_v31 = vadd.f32 %v1691_v21, %v767_v27  ;;  %v870_v32 = vadd.f32 %v1691_v21, %v799_v28 }
 0x136   :  { %v522_v33 = vpop.f32.mrf.mxu0  ;;  %v682_v34 = vpop.f32.mrf.mxu1 }
 0x137   :  { %v902_v35 = vmax.f32 %v838_v31, 0.0  ;;  %v934_v36 = vmax.f32 %v870_v32, 0.0  ;;  %v768_v37 = vmul.f32 %v1686_v19, %v522_v33  ;;  %v800_v38 = vmul.f32 %v1686_v19, %v682_v34 }
 0x138   :  { %v524_v39 = vpop.f32.mrf.mxu0  ;;  %v684_v40 = vpop.f32.mrf.mxu1 }
 0x139   :  { %967 = vst.msk [vmem:[%s2081_s4 + $0x98] sm:$0xff] %vm947_vm1, %v902_v35  ;;  %999 = vst.msk [vmem:[%s2081_s4 + $0x198] sm:$0xff] %vm947_vm1, %v934_v36  ;;  %v839_v41 = vadd.f32 %v1691_v21, %v768_v37  ;;  %v871_v42 = vadd.f32 %v1691_v21, %v800_v38 }
 0x13a   :  { %v527_v43 = vpop.f32.mrf.mxu0  ;;  %v687_v44 = vpop.f32.mrf.mxu1 }
 0x13b   :  { %v903_v45 = vmax.f32 %v839_v41, 0.0  ;;  %v935_v46 = vmax.f32 %v871_v42, 0.0  ;;  %v769_v47 = vmul.f32 %v1686_v19, %v527_v43  ;;  %v801_v48 = vmul.f32 %v1686_v19, %v687_v44 }
 0x13c   :  { %v529_v49 = vpop.f32.mrf.mxu0  ;;  %v689_v50 = vpop.f32.mrf.mxu1 }
 0x13d   :  { %968 = vst.msk [vmem:[%s2081_s4 + $0xa0] sm:$0xff] %vm947_vm1, %v903_v45  ;;  %1000 = vst.msk [vmem:[%s2081_s4 + $0x1a0] sm:$0xff] %vm947_vm1, %v935_v46  ;;  %v840_v51 = vadd.f32 %v1691_v21, %v769_v47  ;;  %v872_v52 = vadd.f32 %v1691_v21, %v801_v48 }
 0x13e   :  { %v532_v53 = vpop.f32.mrf.mxu0  ;;  %v692_v54 = vpop.f32.mrf.mxu1 }
 0x13f   :  { %v904_v55 = vmax.f32 %v840_v51, 0.0  ;;  %v936_v56 = vmax.f32 %v872_v52, 0.0  ;;  %v770_v57 = vmul.f32 %v1686_v19, %v532_v53  ;;  %v802_v58 = vmul.f32 %v1686_v19, %v692_v54 }
 0x140   :  { %v534_v59 = vpop.f32.mrf.mxu0  ;;  %v694_v60 = vpop.f32.mrf.mxu1 }
 0x141   :  { %969 = vst.msk [vmem:[%s2081_s4 + $0xa8] sm:$0xff] %vm947_vm1, %v904_v55  ;;  %1001 = vst.msk [vmem:[%s2081_s4 + $0x1a8] sm:$0xff] %vm947_vm1, %v936_v56  ;;  %v841_v61 = vadd.f32 %v1691_v21, %v770_v57  ;;  %v873_v62 = vadd.f32 %v1691_v21, %v802_v58 }
 0x142   :  { %v537_v63 = vpop.f32.mrf.mxu0  ;;  %v697_v0 = vpop.f32.mrf.mxu1 }
 0x143   :  { %v905_v1 = vmax.f32 %v841_v61, 0.0  ;;  %v937_v2 = vmax.f32 %v873_v62, 0.0  ;;  %v771_v3 = vmul.f32 %v1686_v19, %v537_v63  ;;  %v803_v4 = vmul.f32 %v1686_v19, %v697_v0 }
 0x144   :  { %v539_v5 = vpop.f32.mrf.mxu0  ;;  %v699_v6 = vpop.f32.mrf.mxu1 }
 0x145   :  { %970 = vst.msk [vmem:[%s2081_s4 + $0xb0] sm:$0xff] %vm947_vm1, %v905_v1  ;;  %1002 = vst.msk [vmem:[%s2081_s4 + $0x1b0] sm:$0xff] %vm947_vm1, %v937_v2  ;;  %v842_v7 = vadd.f32 %v1691_v21, %v771_v3  ;;  %v874_v8 = vadd.f32 %v1691_v21, %v803_v4 }
 0x146   :  { %v542_v9 = vpop.f32.mrf.mxu0  ;;  %v702_v10 = vpop.f32.mrf.mxu1 }
 0x147   :  { %v906_v11 = vmax.f32 %v842_v7, 0.0  ;;  %v938_v12 = vmax.f32 %v874_v8, 0.0  ;;  %v772_v13 = vmul.f32 %v1686_v19, %v542_v9  ;;  %v804_v14 = vmul.f32 %v1686_v19, %v702_v10 }
 0x148   :  { %v544_v15 = vpop.f32.mrf.mxu0  ;;  %v704_v16 = vpop.f32.mrf.mxu1 }
 0x149   :  { %971 = vst.msk [vmem:[%s2081_s4 + $0xb8] sm:$0xff] %vm947_vm1, %v906_v11  ;;  %1003 = vst.msk [vmem:[%s2081_s4 + $0x1b8] sm:$0xff] %vm947_vm1, %v938_v12  ;;  %v843_v17 = vadd.f32 %v1691_v21, %v772_v13  ;;  %v875_v18 = vadd.f32 %v1691_v21, %v804_v14 }
 0x14a   :  { %v547_v20 = vpop.f32.mrf.mxu0  ;;  %v707_v22 = vpop.f32.mrf.mxu1 }
 0x14b   :  { %v907_v23 = vmax.f32 %v843_v17, 0.0  ;;  %v939_v24 = vmax.f32 %v875_v18, 0.0  ;;  %v773_v25 = vmul.f32 %v1686_v19, %v547_v20  ;;  %v805_v26 = vmul.f32 %v1686_v19, %v707_v22 }
 0x14c   :  { %v549_v27 = vpop.f32.mrf.mxu0  ;;  %v709_v28 = vpop.f32.mrf.mxu1 }
 0x14d   :  { %972 = vst.msk [vmem:[%s2081_s4 + $0xc0] sm:$0xff] %vm947_vm1, %v907_v23  ;;  %1004 = vst.msk [vmem:[%s2081_s4 + $0x1c0] sm:$0xff] %vm947_vm1, %v939_v24  ;;  %v844_v29 = vadd.f32 %v1691_v21, %v773_v25  ;;  %v876_v30 = vadd.f32 %v1691_v21, %v805_v26 }
 0x14e   :  { %v552_v31 = vpop.f32.mrf.mxu0  ;;  %v712_v32 = vpop.f32.mrf.mxu1 }
 0x14f   :  { %v908_v33 = vmax.f32 %v844_v29, 0.0  ;;  %v940_v34 = vmax.f32 %v876_v30, 0.0  ;;  %v774_v35 = vmul.f32 %v1686_v19, %v552_v31  ;;  %v806_v36 = vmul.f32 %v1686_v19, %v712_v32 }
 0x150   :  { %v554_v37 = vpop.f32.mrf.mxu0  ;;  %v714_v38 = vpop.f32.mrf.mxu1 }
 0x151   :  { %973 = vst.msk [vmem:[%s2081_s4 + $0xc8] sm:$0xff] %vm947_vm1, %v908_v33  ;;  %1005 = vst.msk [vmem:[%s2081_s4 + $0x1c8] sm:$0xff] %vm947_vm1, %v940_v34  ;;  %v845_v39 = vadd.f32 %v1691_v21, %v774_v35  ;;  %v877_v40 = vadd.f32 %v1691_v21, %v806_v36 }
 0x152   :  { %v557_v41 = vpop.f32.mrf.mxu0  ;;  %v717_v42 = vpop.f32.mrf.mxu1 }
 0x153   :  { %v909_v43 = vmax.f32 %v845_v39, 0.0  ;;  %v941_v44 = vmax.f32 %v877_v40, 0.0  ;;  %v775_v45 = vmul.f32 %v1686_v19, %v557_v41  ;;  %v807_v46 = vmul.f32 %v1686_v19, %v717_v42 }
 0x154   :  { %v559_v47 = vpop.f32.mrf.mxu0  ;;  %v719_v48 = vpop.f32.mrf.mxu1 }
 0x155   :  { %974 = vst.msk [vmem:[%s2081_s4 + $0xd0] sm:$0xff] %vm947_vm1, %v909_v43  ;;  %1006 = vst.msk [vmem:[%s2081_s4 + $0x1d0] sm:$0xff] %vm947_vm1, %v941_v44  ;;  %v846_v49 = vadd.f32 %v1691_v21, %v775_v45  ;;  %v878_v50 = vadd.f32 %v1691_v21, %v807_v46 }
 0x156   :  { %v562_v51 = vpop.f32.mrf.mxu0  ;;  %v722_v52 = vpop.f32.mrf.mxu1 }
 0x157   :  { %v910_v53 = vmax.f32 %v846_v49, 0.0  ;;  %v942_v54 = vmax.f32 %v878_v50, 0.0  ;;  %v776_v55 = vmul.f32 %v1686_v19, %v562_v51  ;;  %v808_v56 = vmul.f32 %v1686_v19, %v722_v52 }
 0x158   :  { %v564_v57 = vpop.f32.mrf.mxu0  ;;  %v724_v58 = vpop.f32.mrf.mxu1 }
 0x159   :  { %975 = vst.msk [vmem:[%s2081_s4 + $0xd8] sm:$0xff] %vm947_vm1, %v910_v53  ;;  %1007 = vst.msk [vmem:[%s2081_s4 + $0x1d8] sm:$0xff] %vm947_vm1, %v942_v54  ;;  %v847_v59 = vadd.f32 %v1691_v21, %v776_v55  ;;  %v879_v60 = vadd.f32 %v1691_v21, %v808_v56 }
 0x15a   :  { %v567_v61 = vpop.f32.mrf.mxu0  ;;  %v727_v62 = vpop.f32.mrf.mxu1 }
 0x15b   :  { %v911_v63 = vmax.f32 %v847_v59, 0.0  ;;  %v943_v0 = vmax.f32 %v879_v60, 0.0  ;;  %v777_v1 = vmul.f32 %v1686_v19, %v567_v61  ;;  %v809_v2 = vmul.f32 %v1686_v19, %v727_v62 }
 0x15c   :  { %v569_v3 = vpop.f32.mrf.mxu0  ;;  %v729_v4 = vpop.f32.mrf.mxu1 }
 0x15d   :  { %976 = vst.msk [vmem:[%s2081_s4 + $0xe0] sm:$0xff] %vm947_vm1, %v911_v63  ;;  %1008 = vst.msk [vmem:[%s2081_s4 + $0x1e0] sm:$0xff] %vm947_vm1, %v943_v0  ;;  %v848_v5 = vadd.f32 %v1691_v21, %v777_v1  ;;  %v880_v6 = vadd.f32 %v1691_v21, %v809_v2 }
 0x15e   :  { %v572_v7 = vpop.f32.mrf.mxu0  ;;  %v732_v8 = vpop.f32.mrf.mxu1 }
 0x15f   :  { %v912_v9 = vmax.f32 %v848_v5, 0.0  ;;  %v944_v10 = vmax.f32 %v880_v6, 0.0  ;;  %v778_v11 = vmul.f32 %v1686_v19, %v572_v7  ;;  %v810_v12 = vmul.f32 %v1686_v19, %v732_v8 }
 0x160   :  { %v574_v13 = vpop.f32.mrf.mxu0  ;;  %v734_v14 = vpop.f32.mrf.mxu1 }
 0x161   :  { %977 = vst.msk [vmem:[%s2081_s4 + $0xe8] sm:$0xff] %vm947_vm1, %v912_v9  ;;  %1009 = vst.msk [vmem:[%s2081_s4 + $0x1e8] sm:$0xff] %vm947_vm1, %v944_v10  ;;  %v849_v15 = vadd.f32 %v1691_v21, %v778_v11  ;;  %v881_v16 = vadd.f32 %v1691_v21, %v810_v12 }
 0x162   :  { %v577_v17 = vpop.f32.mrf.mxu0  ;;  %v737_v18 = vpop.f32.mrf.mxu1 }
 0x163   :  { %v913_v20 = vmax.f32 %v849_v15, 0.0  ;;  %v945_v22 = vmax.f32 %v881_v16, 0.0  ;;  %v779_v23 = vmul.f32 %v1686_v19, %v577_v17  ;;  %v811_v24 = vmul.f32 %v1686_v19, %v737_v18 }
 0x164   :  { %v579_v25 = vpop.f32.mrf.mxu0  ;;  %v739_v26 = vpop.f32.mrf.mxu1 }
 0x165   :  { %978 = vst.msk [vmem:[%s2081_s4 + $0xf0] sm:$0xff] %vm947_vm1, %v913_v20  ;;  %1010 = vst.msk [vmem:[%s2081_s4 + $0x1f0] sm:$0xff] %vm947_vm1, %v945_v22  ;;  %v850_v27 = vadd.f32 %v1691_v21, %v779_v23  ;;  %v882_v28 = vadd.f32 %v1691_v21, %v811_v24 }
 0x167   :  { %v914_v29 = vmax.f32 %v850_v27, 0.0  ;;  %v946_v30 = vmax.f32 %v882_v28, 0.0 }
 0x169   :  { %979 = vst.msk [vmem:[%s2081_s4 + $0xf8] sm:$0xff] %vm947_vm1, %v914_v29  ;;  %1011 = vst.msk [vmem:[%s2081_s4 + $0x1f8] sm:$0xff] %vm947_vm1, %v946_v30 }

// kernel: simple_rsn_forward.9
= control target key start
LH: loop header
LB: loop body
LE: loop exit
PB: predicated region body
PF: predicated region fallthrough
CT: control target
= control target key end

     0   :  { %vm86_vm0 = vcmask 261120   ;;  %vm295_vm1 = vcmask 521216   ;;  %v1389_v48 = vmov 0.0   ;;  %vm301_vm2 = vcmask 516096   ;;  %s1390_s15 = smov 64   ;;  %s2216_s1 = inlined_call_operand.vmem [shape: f32[288,64], index: 1, kind: input, shape index: {}]   ;;  %s2217_s0 = inlined_call_operand.vmem [shape: f32[32,288], index: 0, kind: input, shape index: {}]   ;;  %s2218_s4 = inlined_call_operand.vmem [shape: f32[576,64], index: 4, kind: input, shape index: {}]   ;;  %s2219_s2 = inlined_call_operand.vmem [shape: f32[1,64], index: 2, kind: input, shape index: {}]   ;;  %s2220_s3 = inlined_call_operand.vmem [shape: f32[1,64], index: 3, kind: input, shape index: {}]   ;;  %s2221_s8 = inlined_call_operand.vmem [shape: f32[32,64], index: 8, kind: input, shape index: {}]   ;;  %s2222_s7 = inlined_call_operand.vmem [shape: f32[32,32], index: 7, kind: input, shape index: {}]   ;;  %s2223_s5 = inlined_call_operand.vmem [shape: f32[1,64], index: 5, kind: input, shape index: {}]   ;;  %s2224_s9 = inlined_call_operand.vmem [shape: f32[1,64], index: 9, kind: input, shape index: {}]   ;;  %s2225_s6 = inlined_call_operand.vmem [shape: f32[1,64], index: 6, kind: input, shape index: {}]   ;;  %s2226_s10 = inlined_call_operand.vmem [shape: f32[1,64], index: 10, kind: input, shape index: {}]   ;;  %s2227_s11 = inlined_call_operand.vmem [shape: f32[32,64], index: 11, kind: output, shape index: {}]  }
   0x1   :  { %v81_v0 = vld [vmem:[%s2216_s1 + $0xf8] sm:$0xff]  ;;  %v80_v2 = vld [vmem:[%s2216_s1 + $0xf0] sm:$0xff]  ;;  %v79_v4 = vld [vmem:[%s2216_s1 + $0xe8] sm:$0xff]  ;;  %296 = vst.msk [vmem:[#allocation2] sm:$0x3f] %vm295_vm1, %v1389_v48  ;;  %vm339_vm3 = vcmask 519168  }
   0x2   :  { %v65_v1 = vld [vmem:[%s2216_s1 + $0x78] sm:$0xff]  ;;  %1129 = vmatprep.subr.mxu0 %v81_v0  ;;  %v64_v3 = vld [vmem:[%s2216_s1 + $0x70] sm:$0xff]  ;;  %v63_v5 = vld [vmem:[%s2216_s1 + $0x68] sm:$0xff]  ;;  %297 = vst.msk [vmem:[#allocation2 + $0x30] sm:$0x3f] %vm295_vm1, %v1389_v48  ;;  %vm376_vm4 = vcmask 1042432  }
   0x3   :  { %1130 = vmatpush3.msra.mxu0 %v65_v1  ;;  %v78_v6 = vld [vmem:[%s2216_s1 + $0xe0] sm:$0xff]  ;;  %v77_v8 = vld [vmem:[%s2216_s1 + $0xd8] sm:$0xff]  ;;  %v76_v10 = vld [vmem:[%s2216_s1 + $0xd0] sm:$0xff]  ;;  %299 = vst.msk [vmem:[#allocation2 + $0x28] sm:$0x3f] %vm295_vm1, %v1389_v48  ;;  %vm377_vm5 = vcmask 1046532  }
   0x4   :  { %1131 = vmatprep.subr.mxu0 %v80_v2  ;;  %v62_v7 = vld [vmem:[%s2216_s1 + $0x60] sm:$0xff]  ;;  %v61_v9 = vld [vmem:[%s2216_s1 + $0x58] sm:$0xff]  ;;  %v60_v12 = vld [vmem:[%s2216_s1 + $0x50] sm:$0xff]  ;;  %300 = vst.msk [vmem:[#allocation2 + $0x58] sm:$0x3f] %vm295_vm1, %v1389_v48  ;;  %vm411_vm6 = vcmask 1041408  }
   0x5   :  { %1132 = vmatpush3.msra.mxu0 %v64_v3  ;;  %v85_v11 = vld [vmem:[%s2216_s1 + $0x118] sm:$0xff]  ;;  %v84_v13 = vld [vmem:[%s2216_s1 + $0x110] sm:$0xff]  ;;  %v75_v14 = vld [vmem:[%s2216_s1 + $0xc8] sm:$0xff]  ;;  %302 = vst.msk [vmem:[#allocation2] sm:$0x1] %vm301_vm2, %v1389_v48  ;;  %vm412_vm7 = vcmask 1045508  }
   0x6   :  { %1133 = vmatprep.subr.mxu0 %v79_v4  ;;  %1289 = vmatprep.subr.mxu1 %v85_v11  ;;  %v83_v15 = vld [vmem:[%s2216_s1 + $0x108] sm:$0xff]  ;;  %v74_v17 = vld [vmem:[%s2216_s1 + $0xc0] sm:$0xff]  ;;  %v73_v21 = vld [vmem:[%s2216_s1 + $0xb8] sm:$0xff]  ;;  %303 = vst.msk [vmem:[#allocation2 + $0x8] sm:$0x1] %vm301_vm2, %v1389_v48  ;;  %vm572_vm10 = vcmask 523264  }
   0x7   :  { %1134 = vmatpush3.msra.mxu0 %v63_v5  ;;  %1290 = vmatpush3.msra.mxu1 %v85_v11  ;;  %v59_v16 = vld [vmem:[%s2216_s1 + $0x48] sm:$0xff]  ;;  %v58_v19 = vld [vmem:[%s2216_s1 + $0x40] sm:$0xff]  ;;  %v57_v22 = vld [vmem:[%s2216_s1 + $0x38] sm:$0xff]  ;;  %304 = vst.msk [vmem:[#allocation2 + $0x10] sm:$0x1] %vm301_vm2, %v1389_v48 }
   0x8   :  { %1135 = vmatprep.subr.mxu0 %v78_v6  ;;  %1291 = vmatprep.subr.mxu1 %v84_v13  ;;  %v39_v18 = vld [vmem:[%s2217_s0 + $0x8] sm:$0xff]  ;;  %v82_v20 = vld [vmem:[%s2216_s1 + $0x100] sm:$0xff]  ;;  %v40_v23 = vld [vmem:[%s2217_s0 + $0x10] sm:$0xff]  ;;  %314 = vst.msk [vmem:[#allocation2 + $0x5] sm:$0x1] %vm301_vm2, %v1389_v48 }
   0x9   :  { %1136 = vmatpush3.msra.mxu0 %v62_v7  ;;  %1292 = vmatpush3.msra.mxu1 %v84_v13  ;;  %v72_v24 = vld [vmem:[%s2216_s1 + $0xb0] sm:$0xff]  ;;  %v43_v25 = vld [vmem:[%s2217_s0 + $0x28] sm:$0xff]  ;;  %v46_v27 = vld [vmem:[%s2217_s0 + $0x40] sm:$0xff]  ;;  %315 = vst.msk [vmem:[#allocation2 + $0xd] sm:$0x1] %vm301_vm2, %v1389_v48 }
   0xa   :  { %1137 = vmatprep.subr.mxu0 %v77_v8  ;;  %1293 = vmatprep.subr.mxu1 %v83_v15  ;;  %v56_v26 = vld [vmem:[%s2216_s1 + $0x30] sm:$0xff]  ;;  %v71_v28 = vld [vmem:[%s2216_s1 + $0xa8] sm:$0xff]  ;;  %v70_v30 = vld [vmem:[%s2216_s1 + $0xa0] sm:$0xff]  ;;  %316 = vst.msk [vmem:[#allocation2 + $0x15] sm:$0x1] %vm301_vm2, %v1389_v48 }
   0xb   :  { %1138 = vmatpush3.msra.mxu0 %v61_v9  ;;  %1294 = vmatpush3.msra.mxu1 %v83_v15  ;;  %v55_v29 = vld [vmem:[%s2216_s1 + $0x28] sm:$0xff]  ;;  %v49_v31 = vld [vmem:[%s2217_s0 + $0x58] sm:$0xff]  ;;  %v54_v32 = vld [vmem:[%s2216_s1 + $0x20] sm:$0xff]  ;;  %305 = vst.msk [vmem:[#allocation2 + $0x18] sm:$0x1] %vm301_vm2, %v1389_v48 }
   0xc   :  { %1139 = vmatprep.subr.mxu0 %v76_v10  ;;  %163 = vmatprep.mubr.f32.mxu0 %v39_v18  ;;  %v69_v33 = vld [vmem:[%s2216_s1 + $0x98] sm:$0xff]  ;;  %v68_v35 = vld [vmem:[%s2216_s1 + $0x90] sm:$0xff]  ;;  %v67_v37 = vld [vmem:[%s2216_s1 + $0x88] sm:$0xff]  ;;  %306 = vst.msk [vmem:[#allocation2 + $0x20] sm:$0x1] %vm301_vm2, %v1389_v48 }
   0xd   :  { %1140 = vmatpush3.msra.mxu0 %v60_v12  ;;  %1295 = vmatprep.subr.mxu1 %v82_v20  ;;  %v53_v34 = vld [vmem:[%s2216_s1 + $0x18] sm:$0xff]  ;;  %v52_v36 = vld [vmem:[%s2216_s1 + $0x10] sm:$0xff]  ;;  %v51_v38 = vld [vmem:[%s2216_s1 + $0x8] sm:$0xff]  ;;  %309 = vst.msk [vmem:[#allocation2 + $0x38] sm:$0x1] %vm301_vm2, %v1389_v48 }
   0xe   :  { %1141 = vmatprep.subr.mxu0 %v75_v14  ;;  %1296 = vmatpush3.msra.mxu1 %v82_v20  ;;  %v66_v39 = vld [vmem:[%s2216_s1 + $0x80] sm:$0xff]  ;;  %v41_v43 = vld [vmem:[%s2217_s0 + $0x18] sm:$0xff]  ;;  %v44_v45 = vld [vmem:[%s2217_s0 + $0x30] sm:$0xff]  ;;  %310 = vst.msk [vmem:[#allocation2 + $0x40] sm:$0x1] %vm301_vm2, %v1389_v48 }
   0xf   :  { %1142 = vmatpush3.msra.mxu0 %v59_v16  ;;  %1297 = vmatprep.mubr.msk.f32.mxu1 %vm86_vm0, %v40_v23  ;;  %v50_v40 = vld [vmem:[%s2216_s1] sm:$0xff]  ;;  %v45_v44 = vld [vmem:[%s2217_s0 + $0x38] sm:$0xff]  ;;  %v48_v46 = vld [vmem:[%s2217_s0 + $0x50] sm:$0xff]  ;;  %311 = vst.msk [vmem:[#allocation2 + $0x48] sm:$0x1] %vm301_vm2, %v1389_v48 }
  0x10   :  { %1143 = vmatprep.subr.mxu0 %v74_v17  ;;  %1298 = vmatmul.mubr.msk.f32.vlgmr.msra.gmra.mxu1 %vm86_vm0, %v43_v25  ;;  %v38_v41 = vld [vmem:[%s2217_s0] sm:$0xff]  ;;  %v47_v47 = vld [vmem:[%s2217_s0 + $0x48] sm:$0xff]  ;;  %312 = vst.msk [vmem:[#allocation2 + $0x50] sm:$0x1] %vm301_vm2, %v1389_v48  ;;  %317 = vst.msk [vmem:[#allocation2 + $0x1d] sm:$0x1] %vm301_vm2, %v1389_v48 }
  0x11   :  { %1144 = vmatpush3.msra.mxu0 %v58_v19  ;;  %1300 = vmatprep.mubr.msk.f32.mxu1 %vm86_vm0, %v46_v27  ;;  %v42_v42 = vld [vmem:[%s2217_s0 + $0x20] sm:$0xff]  ;;  %318 = vst.msk [vmem:[#allocation2 + $0x25] sm:$0x1] %vm301_vm2, %v1389_v48  ;;  %321 = vst.msk [vmem:[#allocation2 + $0x3d] sm:$0x1] %vm301_vm2, %v1389_v48  ;;  %v618_v49 = vld [vmem:[%s2218_s4 + $0xf8] sm:$0xff] }
  0x12   :  { %1145 = vmatprep.subr.mxu0 %v73_v21  ;;  %322 = vst.msk [vmem:[#allocation2 + $0x45] sm:$0x1] %vm301_vm2, %v1389_v48  ;;  %323 = vst.msk [vmem:[#allocation2 + $0x4d] sm:$0x1] %vm301_vm2, %v1389_v48  ;;  %v602_v50 = vld [vmem:[%s2218_s4 + $0x78] sm:$0xff]  ;;  %v617_v51 = vld [vmem:[%s2218_s4 + $0xf0] sm:$0xff]  ;;  %1181 = vmatprep.subr.mxu1 %v618_v49 }
  0x13   :  { %1146 = vmatpush3.msra.mxu0 %v57_v22  ;;  %324 = vst.msk [vmem:[#allocation2 + $0x55] sm:$0x1] %vm301_vm2, %v1389_v48  ;;  %307 = vst.msk [vmem:[#allocation2 + $0x28] sm:$0x1] %vm301_vm2, %v1389_v48  ;;  %v601_v52 = vld [vmem:[%s2218_s4 + $0x70] sm:$0xff]  ;;  %1182 = vmatpush3.msra.mxu1 %v602_v50  ;;  %v616_v53 = vld [vmem:[%s2218_s4 + $0xe8] sm:$0xff] }
  0x14   :  { %1147 = vmatprep.subr.mxu0 %v72_v24  ;;  %1301 = vmatmul.mubr.msk.f32.gmra.mxu1 %vm86_vm0, %v49_v31  ;;  %308 = vst.msk [vmem:[#allocation2 + $0x30] sm:$0x1] %vm301_vm2, %v1389_v48  ;;  %313 = vst.msk [vmem:[#allocation2 + $0x58] sm:$0x1] %vm301_vm2, %v1389_v48  ;;  %v600_v54 = vld [vmem:[%s2218_s4 + $0x68] sm:$0xff]  ;;  %v615_v55 = vld [vmem:[%s2218_s4 + $0xe0] sm:$0xff] }
  0x15   :  { %1148 = vmatpush3.msra.mxu0 %v56_v26  ;;  %319 = vst.msk [vmem:[#allocation2 + $0x2d] sm:$0x1] %vm301_vm2, %v1389_v48  ;;  %320 = vst.msk [vmem:[#allocation2 + $0x35] sm:$0x1] %vm301_vm2, %v1389_v48  ;;  %1183 = vmatprep.subr.mxu1 %v617_v51  ;;  %v650_v56 = vld [vmem:[%s2218_s4 + $0x1f8] sm:$0xff]  ;;  %v599_v58 = vld [vmem:[%s2218_s4 + $0x60] sm:$0xff] }
  0x16   :  { %1149 = vmatprep.subr.mxu0 %v71_v28  ;;  %325 = vst.msk [vmem:[#allocation2 + $0x5d] sm:$0x1] %vm301_vm2, %v1389_v48  ;;  %1184 = vmatpush3.msra.mxu1 %v601_v52  ;;  %v634_v57 = vld [vmem:[%s2218_s4 + $0x178] sm:$0xff]  ;;  %v649_v59 = vld [vmem:[%s2218_s4 + $0x1f0] sm:$0xff]  ;;  %v648_v62 = vld [vmem:[%s2218_s4 + $0x1e8] sm:$0xff] }
  0x17   :  { %1150 = vmatpush3.msra.mxu0 %v55_v29  ;;  %1185 = vmatprep.subr.mxu1 %v616_v53  ;;  %v614_v60 = vld [vmem:[%s2218_s4 + $0xd8] sm:$0xff]  ;;  %v633_v61 = vld [vmem:[%s2218_s4 + $0x170] sm:$0xff]  ;;  %v632_v0 = vld [vmem:[%s2218_s4 + $0x168] sm:$0xff] }
  0x18   :  { %1151 = vmatprep.subr.mxu0 %v70_v30  ;;  %1186 = vmatpush3.msra.mxu1 %v600_v54  ;;  %v598_v63 = vld [vmem:[%s2218_s4 + $0x58] sm:$0xff]  ;;  %v613_v1 = vld [vmem:[%s2218_s4 + $0xd0] sm:$0xff]  ;;  %v647_v2 = vld [vmem:[%s2218_s4 + $0x1e0] sm:$0xff] }
  0x19   :  { %1152 = vmatpush3.msra.mxu0 %v54_v32  ;;  %1187 = vmatprep.subr.mxu1 %v615_v55  ;;  %v597_v3 = vld [vmem:[%s2218_s4 + $0x50] sm:$0xff]  ;;  %v631_v4 = vld [vmem:[%s2218_s4 + $0x160] sm:$0xff]  ;;  %v612_v5 = vld [vmem:[%s2218_s4 + $0xc8] sm:$0xff] }
  0x1a   :  { %1153 = vmatprep.subr.mxu0 %v69_v33  ;;  %1188 = vmatpush3.msra.mxu1 %v599_v58  ;;  %v646_v6 = vld [vmem:[%s2218_s4 + $0x1d8] sm:$0xff]  ;;  %v596_v7 = vld [vmem:[%s2218_s4 + $0x48] sm:$0xff]  ;;  %v611_v9 = vld [vmem:[%s2218_s4 + $0xc0] sm:$0xff] }
  0x1b   :  { %1154 = vmatpush3.msra.mxu0 %v53_v34  ;;  %1189 = vmatprep.subr.mxu1 %v614_v60  ;;  %v630_v8 = vld [vmem:[%s2218_s4 + $0x158] sm:$0xff]  ;;  %v645_v10 = vld [vmem:[%s2218_s4 + $0x1d0] sm:$0xff]  ;;  %v595_v11 = vld [vmem:[%s2218_s4 + $0x40] sm:$0xff] }
  0x1c   :  { %1155 = vmatprep.subr.mxu0 %v68_v35  ;;  %1190 = vmatpush3.msra.mxu1 %v598_v63  ;;  %v629_v12 = vld [vmem:[%s2218_s4 + $0x150] sm:$0xff]  ;;  %v610_v13 = vld [vmem:[%s2218_s4 + $0xb8] sm:$0xff]  ;;  %v644_v14 = vld [vmem:[%s2218_s4 + $0x1c8] sm:$0xff] }
  0x1d   :  { %1156 = vmatpush3.msra.mxu0 %v52_v36  ;;  %1191 = vmatprep.subr.mxu1 %v613_v1  ;;  %v594_v15 = vld [vmem:[%s2218_s4 + $0x38] sm:$0xff]  ;;  %v628_v16 = vld [vmem:[%s2218_s4 + $0x148] sm:$0xff]  ;;  %v609_v17 = vld [vmem:[%s2218_s4 + $0xb0] sm:$0xff] }
  0x1e   :  { %1157 = vmatprep.subr.mxu0 %v67_v37  ;;  %1192 = vmatpush3.msra.mxu1 %v597_v3  ;;  %v643_v18 = vld [vmem:[%s2218_s4 + $0x1c0] sm:$0xff]  ;;  %v593_v19 = vld [vmem:[%s2218_s4 + $0x30] sm:$0xff]  ;;  %v608_v21 = vld [vmem:[%s2218_s4 + $0xa8] sm:$0xff] }
  0x1f   :  { %1158 = vmatpush3.msra.mxu0 %v51_v38  ;;  %1193 = vmatprep.subr.mxu1 %v612_v5  ;;  %v627_v20 = vld [vmem:[%s2218_s4 + $0x140] sm:$0xff]  ;;  %v642_v22 = vld [vmem:[%s2218_s4 + $0x1b8] sm:$0xff]  ;;  %v592_v23 = vld [vmem:[%s2218_s4 + $0x28] sm:$0xff] }
  0x20   :  { %1159 = vmatprep.subr.mxu0 %v66_v39  ;;  %1194 = vmatpush3.msra.mxu1 %v596_v7  ;;  %v607_v24 = vld [vmem:[%s2218_s4 + $0xa0] sm:$0xff]  ;;  %v606_v26 = vld [vmem:[%s2218_s4 + $0x98] sm:$0xff]  ;;  %v605_v28 = vld [vmem:[%s2218_s4 + $0x90] sm:$0xff] }
  0x21   :  { %1160 = vmatpush3.msra.mxu0 %v50_v40  ;;  %1195 = vmatprep.subr.mxu1 %v611_v9  ;;  %v591_v25 = vld [vmem:[%s2218_s4 + $0x20] sm:$0xff]  ;;  %v590_v27 = vld [vmem:[%s2218_s4 + $0x18] sm:$0xff]  ;;  %v589_v29 = vld [vmem:[%s2218_s4 + $0x10] sm:$0xff] }
  0x22   :  { %164 = vmatmul.mubr.f32.vlgmr.msra.gmra.mxu0 %v38_v41  ;;  %1225 = vmatprep.subr.mxu0 %v650_v56  ;;  %v1761_v35 = vld [vmem:[%s2219_s2] ss:$0 sm:$0xff]  ;;  %v1778_v49 = vld [vmem:[#allocation2 + $0x30] sm:$0x3f]  ;;  %v1785_v55 = vld [vmem:[#allocation2 + $0x58] sm:$0x3f] }
  0x23   :  { %168 = vmatprep.mubr.f32.mxu0 %v42_v42  ;;  %1226 = vmatpush3.msra.mxu0 %v634_v57  ;;  %v1763_v38 = vld [vmem:[#allocation2] sm:$0x3f]  ;;  %v1791_v60 = vcombine.high %v1778_v49, %v1778_v49  ;;  %v1799_v3 = vcombine.high %v1785_v55, %v1785_v55  ;;  %vm1806_vm8 = vmor %vm376_vm4, %vm377_vm5 }
  0x24   :  { %1227 = vmatprep.subr.mxu0 %v649_v59  ;;  %1196 = vmatpush3.msra.mxu1 %v595_v11  ;;  %v1768_v39 = vld [vmem:[%s2220_s3] ss:$0 sm:$0xff]  ;;  %v1093_v58 = vrot.slane %v1763_v38, 9  ;;  %vm1814_vm9 = vmor %vm411_vm6, %vm412_vm7 }
  0x25   :  { %1228 = vmatpush3.msra.mxu0 %v633_v61  ;;  %1197 = vmatprep.subr.mxu1 %v610_v13  ;;  %v397_v11 = vrot.slane %v1791_v60, 5 }
  0x26   :  { %169 = vmatmul.mubr.f32.gmra.mxu0 %v41_v43  ;;  %1229 = vmatprep.subr.mxu0 %v648_v62  ;;  %v1771_v43 = vld [vmem:[#allocation2 + $0x28] sm:$0x3f] }
  0x27   :  { %173 = vmatprep.mubr.f32.mxu0 %v45_v44  ;;  %1230 = vmatpush3.msra.mxu0 %v632_v0  ;;  %v1782_v51 = vcombine.high %v1771_v43, %v1771_v43  ;;  %v1113_v1 = vrot.slane %v1771_v43, 9  ;;  %v1115_v13 = vrot.slane %v1771_v43, 10 }
  0x28   :  { %1231 = vmatprep.subr.mxu0 %v647_v2  ;;  %1198 = vmatpush3.msra.mxu1 %v594_v15 }
  0x29   :  { %1232 = vmatpush3.msra.mxu0 %v631_v4  ;;  %1199 = vmatprep.subr.mxu1 %v609_v17  ;;  %v472_v2 = vrot.slane %v1782_v51, 5  ;;  %v1101_v4 = vrot.slane %v1763_v38, 10 }
  0x2a   :  { %174 = vmatmul.mubr.f32.gmra.mxu0 %v44_v45  ;;  %1233 = vmatprep.subr.mxu0 %v646_v6 }
  0x2b   :  { %178 = vmatprep.mubr.f32.mxu0 %v48_v46  ;;  %1234 = vmatpush3.msra.mxu0 %v630_v8  ;;  %v1775_v46 = vcombine.high %v1763_v38, %v1763_v38 }
  0x2c   :  { %1235 = vmatprep.subr.mxu0 %v645_v10  ;;  %1200 = vmatpush3.msra.mxu1 %v593_v19  ;;  %v1097_v10 = vrot.slane %v1778_v49, 9  ;;  %v604_v19 = vld [vmem:[%s2218_s4 + $0x88] sm:$0xff] }
  0x2d   :  { %1236 = vmatpush3.msra.mxu0 %v629_v12  ;;  %1201 = vmatprep.subr.mxu1 %v608_v21  ;;  %v381_v59 = vrot.slane %v1775_v46, 5  ;;  %v416_v9 = vrot.slane %v1775_v46, 6  ;;  %v588_v21 = vld [vmem:[%s2218_s4 + $0x8] sm:$0xff]  ;;  %v1882_v46 = vld [vmem:[%s2218_s4 + $0x238] sm:$0xff] }
  0x2e   :  { %179 = vmatmul.mubr.f32.gmra.mxu0 %v47_v47  ;;  %1237 = vmatprep.subr.mxu0 %v644_v14  ;;  %v480_v14 = vrot.slane %v1782_v51, 6 }
  0x2f   :  { %1238 = vmatpush3.msra.mxu0 %v628_v16  ;;  %1202 = vmatpush3.msra.mxu1 %v592_v23  ;;  %v1114_v23 = vrot.slane %v1785_v55, 9 }
  0x30   :  { %1239 = vmatprep.subr.mxu0 %v643_v18  ;;  %1203 = vmatprep.subr.mxu1 %v607_v24  ;;  %v1105_v18 = vrot.slane %v1778_v49, 10  ;;  %v476_v24 = vrot.slane %v1799_v3, 5 }
  0x31   :  { %1240 = vmatpush3.msra.mxu0 %v627_v20  ;;  %1204 = vmatpush3.msra.mxu1 %v591_v25  ;;  %v626_v20 = vld [vmem:[%s2218_s4 + $0x138] sm:$0xff]  ;;  %v641_v25 = vld [vmem:[%s2218_s4 + $0x1b0] sm:$0xff] }
  0x32   :  { %1241 = vmatprep.subr.mxu0 %v642_v22  ;;  %1205 = vmatprep.subr.mxu1 %v606_v26  ;;  %v432_v22 = vrot.slane %v1791_v60, 6  ;;  %v603_v26 = vld [vmem:[%s2218_s4 + $0x80] sm:$0xff]  ;;  %v1899_v51 = vsel %vm1806_vm8, %v1114_v23, %v476_v24  ;;  %v636_v23 = vld [vmem:[%s2218_s4 + $0x188] sm:$0xff] }
  0x33   :  { %1206 = vmatpush3.msra.mxu1 %v590_v27  ;;  %1242 = vmatpush3.msra.mxu0 %v626_v20  ;;  %v625_v27 = vld [vmem:[%s2218_s4 + $0x130] sm:$0xff] }
  0x34   :  { %1207 = vmatprep.subr.mxu1 %v605_v28  ;;  %1243 = vmatprep.subr.mxu0 %v641_v25 }
  0x35   :  { %1208 = vmatpush3.msra.mxu1 %v589_v29  ;;  %1244 = vmatpush3.msra.mxu0 %v625_v27 }
  0x36   :  { %1209 = vmatprep.subr.mxu1 %v604_v19 }
  0x37   :  { %1210 = vmatpush3.msra.mxu1 %v588_v21 }
  0x38   :  { %1211 = vmatprep.subr.mxu1 %v603_v26 }
  0xd0   :  { %v1299_v30 = vpop.f32.mrf.mxu1 }
  0xd2   :  { %v250_v33 = vpop.f32.mrf.mxu1 }
  0xd4   :  { %v1302_v45 = vpop.f32.mrf.mxu1 }
  0xd6   :  { %v260_v56 = vpop.f32.mrf.mxu1 }
  0xe2   :  { %v1161_v31 = vpop.f32.mrf.mxu0 }
  0xe4   :  { %v1162_v32 = vpop.f32.mrf.mxu0 }
  0xe5   :  { %v1163_v34 = vadd.f32 %v1162_v32, %v1161_v31  ;;  %v1852_v31 = vsel %vm1806_vm8, %v1113_v1, %v472_v2  ;;  %v587_v32 = vld [vmem:[%s2218_s4] sm:$0xff] }
  0xe6   :  { %v1164_v36 = vpop.f32.mrf.mxu0  ;;  %1212 = vmatpush3.msra.mxu1 %v587_v32 }
  0xe7   :  { %v251_v37 = vadd.f32 %v1163_v34, %v250_v33  ;;  %v1861_v34 = vsel %vm1806_vm8, %v1097_v10, %v397_v11  ;;  %1303 = vmatprep.subr.mxu1 %v1882_v46  ;;  %v622_v10 = vld [vmem:[%s2218_s4 + $0x118] sm:$0xff] }
  0xe8   :  { %v1165_v40 = vpop.f32.mrf.mxu0 }
  0xe9   :  { %v276_v41 = vmul.f32 %v1761_v35, %v251_v37  ;;  %v1166_v42 = vadd.f32 %v1165_v40, %v1164_v36  ;;  %v640_v36 = vld [vmem:[%s2218_s4 + $0x1a8] sm:$0xff]  ;;  %v1116_v37 = vrot.slane %v1785_v55, 10  ;;  %v484_v40 = vrot.slane %v1799_v3, 6 }
  0xea   :  { %v1167_v44 = vpop.f32.mrf.mxu0  ;;  %1245 = vmatprep.subr.mxu0 %v640_v36 }
  0xeb   :  { %v287_v47 = vadd.f32 %v1768_v39, %v276_v41  ;;  %v256_v48 = vadd.f32 %v1299_v30, %v1166_v42  ;;  %v1848_v30 = vsel %vm1806_vm8, %v1093_v58, %v381_v59  ;;  %v638_v58 = vld [vmem:[%s2218_s4 + $0x198] sm:$0xff] }
  0xec   :  { %v1168_v50 = vpop.f32.mrf.mxu0 }
  0xed   :  { %v291_v52 = vmax.f32 %v287_v47, 0.0  ;;  %v277_v53 = vmul.f32 %v1761_v35, %v256_v48  ;;  %v1169_v54 = vadd.f32 %v1168_v50, %v1167_v44  ;;  %v639_v47 = vld [vmem:[%s2218_s4 + $0x1a0] sm:$0xff]  ;;  %v1895_v50 = vsel %vm1814_vm9, %v1105_v18, %v432_v22 }
  0xee   :  { %v1170_v57 = vpop.f32.mrf.mxu0 }
  0xef   :  { %v330_v61 = vcombine.high %v291_v52, %v291_v52  ;;  %340 = vst.msk [vmem:[#allocation2 + $0x9] sm:$0xf] %vm339_vm3, %v291_v52  ;;  %v288_v62 = vadd.f32 %v1768_v39, %v277_v53  ;;  %v261_v63 = vadd.f32 %v1169_v54, %v260_v56  ;;  %v623_v52 = vld [vmem:[%s2218_s4 + $0x120] sm:$0xff] }
  0xf0   :  { %v1171_v0 = vpop.f32.mrf.mxu0 }
  0xf1   :  { %341 = vst.msk [vmem:[#allocation2 + $0x11] sm:$0xf] %vm339_vm3, %v330_v61  ;;  %v292_v5 = vmax.f32 %v288_v62, 0.0  ;;  %v278_v6 = vmul.f32 %v1761_v35, %v261_v63  ;;  %v1172_v7 = vadd.f32 %v1171_v0, %v1170_v57  ;;  %v1918_v63 = vsel %vm1814_vm9, %v1116_v37, %v484_v40  ;;  %v620_v37 = vld [vmem:[%s2218_s4 + $0x108] sm:$0xff] }
  0xf3   :  { %v331_v15 = vcombine.high %v292_v5, %v292_v5  ;;  %342 = vst.msk [vmem:[#allocation2 + $0x19] sm:$0xf] %vm339_vm3, %v292_v5  ;;  %v289_v16 = vadd.f32 %v1768_v39, %v278_v6  ;;  %v266_v17 = vadd.f32 %v1302_v45, %v1172_v7  ;;  %v624_v45 = vld [vmem:[%s2218_s4 + $0x128] sm:$0xff] }
  0xf4   :  { %1246 = vmatpush3.msra.mxu0 %v624_v45  ;;  %v635_v45 = vld [vmem:[%s2218_s4 + $0x180] sm:$0xff] }
  0xf5   :  { %343 = vst.msk [vmem:[#allocation2 + $0x21] sm:$0xf] %vm339_vm3, %v331_v15  ;;  %v293_v28 = vmax.f32 %v289_v16, 0.0  ;;  %v279_v29 = vmul.f32 %v1761_v35, %v266_v17  ;;  %v1865_v35 = vsel %vm1814_vm9, %v1101_v4, %v416_v9  ;;  %1247 = vmatprep.subr.mxu0 %v639_v47  ;;  %v637_v16 = vld [vmem:[%s2218_s4 + $0x190] sm:$0xff]  ;;  %v619_v47 = vld [vmem:[%s2218_s4 + $0x100] sm:$0xff] }
  0xf6   :  { %v1857_v33 = vld [vmem:[#allocation2 + $0x8] sm:$0x3f]  ;;  %1248 = vmatpush3.msra.mxu0 %v623_v52  ;;  %v621_v17 = vld [vmem:[%s2218_s4 + $0x110] sm:$0xff] }
  0xf7   :  { %v332_v41 = vcombine.high %v293_v28, %v293_v28  ;;  %344 = vst.msk [vmem:[#allocation2 + $0x39] sm:$0xf] %vm339_vm3, %v293_v28  ;;  %v290_v42 = vadd.f32 %v1768_v39, %v279_v29  ;;  %v369_v44 = vcombine.high %v1857_v33, %v1857_v33  ;;  %v1891_v39 = vsel %vm1814_vm9, %v1115_v13, %v480_v14 }
  0xf8   :  { %v1887_v48 = vld [vmem:[#allocation2 + $0x10] sm:$0x3f]  ;;  %v1094_v54 = vrot.slane %v1857_v33, 9  ;;  %v1102_v61 = vrot.slane %v1857_v33, 10  ;;  %1249 = vmatprep.subr.mxu0 %v638_v58 }
  0xf9   :  { %345 = vst.msk [vmem:[#allocation2 + $0x41] sm:$0xf] %vm339_vm3, %v332_v41  ;;  %v294_v53 = vmax.f32 %v290_v42, 0.0  ;;  %v385_v56 = vrot.slane %v369_v44, 5  ;;  %v370_v57 = vcombine.high %v1887_v48, %v1887_v48  ;;  %v1095_v59 = vrot.slane %v1887_v48, 9  ;;  %1250 = vmatpush3.msra.mxu0 %v622_v10 }
  0xfa   :  { %v1913_v60 = vld [vmem:[#allocation2 + $0x18] sm:$0x3f]  ;;  %v420_v62 = vrot.slane %v369_v44, 6  ;;  %v518_v5 = vcombine.low %v1857_v33, %v1887_v48  ;;  %v1103_v7 = vrot.slane %v1887_v48, 10  ;;  %1251 = vmatprep.subr.mxu0 %v637_v16 }
  0xfb   :  { %v333_v0 = vcombine.high %v294_v53, %v294_v53  ;;  %346 = vst.msk [vmem:[#allocation2 + $0x49] sm:$0xf] %vm339_vm3, %v294_v53  ;;  %v1923_v1 = vsel %vm1806_vm8, %v1094_v54, %v385_v56  ;;  %v389_v2 = vrot.slane %v370_v57, 5  ;;  %v371_v3 = vcombine.high %v1913_v60, %v1913_v60  ;;  %1252 = vmatpush3.msra.mxu0 %v621_v17 }
  0xfc   :  { %v494_v4 = vcombine.low %v1848_v30, %v1923_v1  ;;  %v1931_v6 = vld [vmem:[#allocation2 + $0x20] sm:$0x3f]  ;;  %v424_v9 = vrot.slane %v370_v57, 6  ;;  %v1096_v13 = vrot.slane %v1913_v60, 9  ;;  %v1959_v22 = vsel %vm1814_vm9, %v1102_v61, %v420_v62  ;;  %1253 = vmatprep.subr.mxu0 %v636_v23 }
  0xfd   :  { %347 = vst.msk [vmem:[#allocation2 + $0x51] sm:$0xf] %vm339_vm3, %v333_v0  ;;  %v1940_v11 = vsel %vm1806_vm8, %v1095_v59, %v389_v2  ;;  %v393_v14 = vrot.slane %v371_v3, 5  ;;  %v448_v15 = vcombine.high %v1931_v6, %v1931_v6  ;;  %v519_v20 = vcombine.low %v1913_v60, %v1931_v6  ;;  %1254 = vmatpush3.msra.mxu0 %v620_v37 }
  0xfe   :  { %v1341_v18 = vpack.i.bf16 %v494_v4, %v518_v5  ;;  %v534_v19 = vcombine.low %v1923_v1, %v1940_v11  ;;  %v1955_v21 = vld [vmem:[#allocation2 + $0x38] sm:$0x3f]  ;;  %v425_v26 = vsel %vm1814_vm9, %v1103_v7, %v424_v9  ;;  %v1109_v27 = vrot.slane %v1931_v6, 9  ;;  %1255 = vmatprep.subr.mxu0 %v635_v45  ;;  %v651_v1 = vld [vmem:[%s2218_s4 + $0x200] sm:$0xff] }
  0xff   :  { %v1966_v24 = vsel %vm1806_vm8, %v1096_v13, %v393_v14  ;;  %v373_v25 = vcombine.high %v1955_v21, %v1955_v21  ;;  %v452_v30 = vrot.slane %v448_v15, 5  ;;  %v1104_v32 = vrot.slane %v1913_v60, 10  ;;  %1256 = vmatpush3.msra.mxu0 %v619_v47 }
 0x100   :  { %1342 = vrot.lane.b32.xlu0 %v1341_v18, %s1390_s15  ;;  %v495_v28 = vcombine.low %v1940_v11, %v1966_v24  ;;  %v1976_v29 = vld [vmem:[#allocation2 + $0x40] sm:$0x3f]  ;;  %v428_v36 = vrot.slane %v371_v3, 6  ;;  %v1098_v40 = vrot.slane %v1955_v21, 9  ;;  %v1111_v62 = vrot.slane %v1931_v6, 10 }
 0x101   :  { %v401_v41 = vrot.slane %v373_v25, 5  ;;  %v520_v42 = vcombine.low %v1955_v21, %v1976_v29  ;;  %v374_v44 = vcombine.high %v1976_v29, %v1976_v29  ;;  %v1099_v53 = vrot.slane %v1976_v29, 9 }
 0x102   :  { %v1346_v52 = vpack.i.bf16 %v495_v28, %v519_v20  ;;  %v1994_v54 = vld [vmem:[#allocation2 + $0x48] sm:$0x3f]  ;;  %v1998_v56 = vsel %vm1806_vm8, %v1109_v27, %v452_v30  ;;  %v429_v57 = vsel %vm1814_vm9, %v1104_v32, %v428_v36  ;;  %v460_v4 = vrot.slane %v448_v15, 6 }
 0x103   :  { %v2004_v58 = vsel %vm1806_vm8, %v1098_v40, %v401_v41  ;;  %v405_v59 = vrot.slane %v374_v44, 5  ;;  %v375_v61 = vcombine.high %v1994_v54, %v1994_v54  ;;  %v1100_v3 = vrot.slane %v1994_v54, 9 }
 0x104   :  { %1347 = vrot.lane.b32.xlu0 %v1346_v52, %s1390_s15  ;;  %v496_v0 = vcombine.low %v1861_v34, %v2004_v58  ;;  %v2012_v2 = vld [vmem:[#allocation2 + $0x50] sm:$0x3f]  ;;  %v2015_v5 = vcombine.low %v425_v26, %v429_v57  ;;  %v1106_v13 = vrot.slane %v1955_v21, 10  ;;  %v2028_v16 = vsel %vm1814_vm9, %v1111_v62, %v460_v4 }
 0x105   :  { %v2019_v7 = vsel %vm1806_vm8, %v1099_v53, %v405_v59  ;;  %v521_v9 = vcombine.low %v1994_v54, %v2012_v2  ;;  %v409_v10 = vrot.slane %v375_v61, 5  ;;  %v436_v15 = vrot.slane %v373_v25, 6 }
 0x106   :  { %v1351_v14 = vpack.i.bf16 %v496_v0, %v520_v42  ;;  %v536_v34 = vcombine.low %v2004_v58, %v2019_v7  ;;  %v542_v17 = vcombine.low %v1959_v22, %v425_v26  ;;  %v562_v20 = vcombine.low %v1998_v56, %v1852_v31 }
 0x107   :  { %v2033_v18 = vsel %vm1806_vm8, %v1100_v3, %v409_v10  ;;  %v570_v23 = vcombine.low %v2028_v16, %v1891_v39  ;;  %v2044_v25 = vsel %vm1814_vm9, %v1106_v13, %v436_v15  ;;  %v1107_v26 = vrot.slane %v1976_v29, 10  ;;  %v922_v39 = vld [vmem:[%s2222_s7] sm:$0xff] }
 0x108   :  { %1352 = vrot.lane.b32.xlu1 %v1351_v14, %s1390_s15  ;;  %v497_v27 = vcombine.low %v2019_v7, %v2033_v18  ;;  %v440_v28 = vrot.slane %v374_v44, 6  ;;  %v1108_v30 = vrot.slane %v1994_v54, 10  ;;  %v444_v32 = vrot.slane %v375_v61, 6  ;;  %v657_v14 = vld [vmem:[%s2218_s4 + $0x230] sm:$0xff]  ;;  %v923_v7 = vld [vmem:[%s2222_s7 + $0x8] sm:$0xff] }
 0x109   :  { %v512_v31 = vcombine.low %v1895_v50, %v2044_v25  ;;  %v449_v36 = vcombine.high %v2012_v2, %v2012_v2  ;;  %v1356_v37 = vpack.i.bf16 %v521_v9, %v542_v17  ;;  %v1110_v42 = vrot.slane %v2012_v2, 9 }
 0x10a   :  { %v1361_v40 = vpack.i.bf16 %v562_v20, %v497_v27  ;;  %v441_v41 = vsel %vm1814_vm9, %v1107_v26, %v440_v28  ;;  %v445_v45 = vsel %vm1814_vm9, %v1108_v30, %v444_v32  ;;  %v1112_v47 = vrot.slane %v2012_v2, 10 }
 0x10b   :  { %v456_v44 = vrot.slane %v449_v36, 5  ;;  %v464_v52 = vrot.slane %v449_v36, 6  ;;  %v2060_v50 = vcombine.low %v441_v41, %v445_v45  ;;  %v510_v53 = vcombine.low %v1865_v35, %v1959_v22  ;;  %v654_v36 = vld [vmem:[%s2218_s4 + $0x218] sm:$0xff] }
 0x10c   :  { %1357 = vrot.lane.b32.xlu1 %v1356_v37, %s1390_s15  ;;  %1362 = vrot.lane.b32.xlu0 %v1361_v40, %s1390_s15  ;;  %v487_v59 = vcombine.low %v1887_v48, %v1913_v60  ;;  %v543_v61 = vcombine.low %v429_v57, %v2028_v16  ;;  %v489_v3 = vcombine.low %v1976_v29, %v1994_v54  ;;  %v926_v16 = vld [vmem:[%s2221_s8] sm:$0xff] }
 0x10d   :  { %v2069_v62 = vsel %vm1806_vm8, %v1110_v42, %v456_v44  ;;  %v2073_v0 = vsel %vm1814_vm9, %v1112_v47, %v464_v52  ;;  %v544_v4 = vcombine.low %v2044_v25, %v441_v41  ;;  %v535_v60 = vcombine.low %v1966_v24, %v1998_v56 }
 0x10e   :  { %v545_v35 = vcombine.low %v445_v45, %v2073_v0  ;;  %v563_v48 = vcombine.low %v2069_v62, %v1899_v51  ;;  %v571_v8 = vcombine.low %v2073_v0, %v1918_v63  ;;  %v537_v12 = vcombine.low %v2033_v18, %v2069_v62  ;;  %v924_v63 = vld [vmem:[%s2222_s7 + $0x10] sm:$0xff] }
 0x10f   :  { %v486_v57 = vcombine.low %v1763_v38, %v1857_v33  ;;  %v656_v33 = vld [vmem:[%s2218_s4 + $0x228] sm:$0xff]  ;;  %v488_v28 = vcombine.low %v1778_v49, %v1955_v21  ;;  %v558_v41 = vcombine.low %v1931_v6, %v1771_v43 }
 0x110   :  { %548 = vrot.lane.b32.xlu1 %v543_v61, %s1390_s15  ;;  %550 = vrot.lane.b32.xlu0 %v544_v4, %s1390_s15  ;;  %v1366_v22 = vpack.i.bf16 %v545_v35, %v563_v48  ;;  %v559_v4 = vcombine.low %v2012_v2, %v1785_v55  ;;  %v927_v2 = vld [vmem:[%s2221_s8 + $0x8] sm:$0xff] }
 0x114   :  { %1367 = vrot.lane.b32.xlu1 %v1366_v22, %s1390_s15 }
 0x172   :  { %v1343_v29 = vpop.permute.xlu0 %1342 }
 0x173   :  { %v1345_v54 = vunpack.i.h.bf16 %v1343_v29  ;;  %v1344_v51 = vunpack.i.l.bf16 %v1343_v29 }
 0x175   :  { %v577_v9 = vsel %vm572_vm10, %v510_v53, %v1344_v51  ;;  %v573_v10 = vsel %vm572_vm10, %v486_v57, %v1345_v54  ;;  %v652_v53 = vld [vmem:[%s2218_s4 + $0x208] sm:$0xff] }
 0x176   :  { %731 = vmatprep.mubr.f32.mxu1 %v577_v9  ;;  %v1348_v13 = vpop.permute.xlu0 %1347 }
 0x177   :  { %v1350_v15 = vunpack.i.h.bf16 %v1348_v13  ;;  %v1349_v17 = vunpack.i.l.bf16 %v1348_v13  ;;  %732 = vmatmul.mubr.f32.vlgmr.msra.gmra.mxu1 %v573_v10 }
 0x178   :  { %1304 = vmatpush3.msra.mxu1 %v1882_v46  ;;  %v655_v46 = vld [vmem:[%s2218_s4 + $0x220] sm:$0xff] }
 0x179   :  { %1305 = vmatprep.subr.mxu1 %v657_v14  ;;  %v578_v20 = vsel %vm572_vm10, %v2015_v5, %v1349_v17  ;;  %v574_v38 = vsel %vm572_vm10, %v487_v59, %v1350_v15  ;;  %v929_v59 = vld [vmem:[%s2221_s8 + $0x18] sm:$0xff] }
 0x17a   :  { %v1353_v27 = vpop.permute.xlu1 %1352  ;;  %736 = vmatprep.mubr.f32.mxu1 %v578_v20  ;;  %816 = vmatprep.mubr.f32.mxu0 %v574_v38 }
 0x17b   :  { %v1355_v25 = vunpack.i.h.bf16 %v1353_v27  ;;  %v1354_v26 = vunpack.i.l.bf16 %v1353_v27  ;;  %1306 = vmatpush3.msra.mxu1 %v657_v14 }
 0x17c   :  { %737 = vmatmul.mubr.f32.gmra.mxu1 %v574_v38  ;;  %1307 = vmatprep.subr.mxu1 %v656_v33 }
 0x17d   :  { %1308 = vmatpush3.msra.mxu1 %v656_v33  ;;  %v579_v30 = vsel %vm572_vm10, %v512_v31, %v1354_v26  ;;  %v575_v32 = vsel %vm572_vm10, %v488_v28, %v1355_v25  ;;  %v653_v31 = vld [vmem:[%s2218_s4 + $0x210] sm:$0xff]  ;;  %v1127_v26 = vld [vmem:[%s2223_s5] ss:$0 sm:$0xff] }
 0x17e   :  { %1309 = vmatprep.subr.mxu1 %v655_v46  ;;  %v1358_v37 = vpop.permute.xlu1 %1357  ;;  %v1363_v40 = vpop.permute.xlu0 %1362  ;;  %741 = vmatprep.mubr.f32.mxu1 %v579_v30 }
 0x17f   :  { %1310 = vmatpush3.msra.mxu1 %v655_v46  ;;  %v1360_v49 = vunpack.i.h.bf16 %v1358_v37  ;;  %v1359_v21 = vunpack.i.l.bf16 %v1358_v37  ;;  %v1365_v42 = vunpack.i.h.bf16 %v1363_v40  ;;  %v1364_v45 = vunpack.i.l.bf16 %v1363_v40 }
 0x180   :  { %742 = vmatmul.mubr.f32.gmra.mxu1 %v575_v32  ;;  %1311 = vmatprep.subr.mxu1 %v654_v36  ;;  %v1125_v32 = vld [vmem:[%s2224_s9] ss:$0 sm:$0xff] }
 0x181   :  { %1312 = vmatpush3.msra.mxu1 %v654_v36  ;;  %v580_v44 = vsel %vm572_vm10, %v2060_v50, %v1360_v49  ;;  %v581_v43 = vsel %vm572_vm10, %v534_v19, %v1359_v21  ;;  %v576_v6 = vsel %vm572_vm10, %v489_v3, %v1364_v45  ;;  %v585_v47 = vsel %vm572_vm10, %v558_v41, %v1365_v42  ;;  %v1128_v49 = vld [vmem:[%s2225_s6] ss:$0 sm:$0xff] }
 0x182   :  { %1313 = vmatprep.subr.mxu1 %v653_v31  ;;  %v549_v52 = vpop.permute.xlu1 %548  ;;  %746 = vmatprep.mubr.f32.mxu1 %v580_v44  ;;  %v551_v61 = vpop.permute.xlu0 %550  ;;  %v1126_v42 = vld [vmem:[%s2226_s10] ss:$0 sm:$0xff] }
 0x183   :  { %1314 = vmatpush3.msra.mxu1 %v653_v31  ;;  %817 = vmatmul.mubr.f32.vlgmr.msra.gmra.mxu0 %v581_v43  ;;  %v582_v19 = vsel %vm572_vm10, %v535_v60, %v549_v52  ;;  %v583_v55 = vsel %vm572_vm10, %v536_v34, %v551_v61  ;;  %v925_v34 = vld [vmem:[%s2222_s7 + $0x18] sm:$0xff] }
 0x184   :  { %747 = vmatmul.mubr.f32.gmra.mxu1 %v576_v6  ;;  %821 = vmatprep.mubr.f32.mxu0 %v585_v47 }
 0x185   :  { %1315 = vmatprep.subr.mxu1 %v652_v53  ;;  %1319 = vmatprep.mubr.msk.f32.mxu1 %vm572_vm10, %v2015_v5  ;;  %v928_v5 = vld [vmem:[%s2221_s8 + $0x10] sm:$0xff] }
 0x186   :  { %1316 = vmatpush3.msra.mxu1 %v652_v53  ;;  %v1368_v11 = vpop.permute.xlu1 %1367 }
 0x187   :  { %1317 = vmatprep.subr.mxu1 %v651_v1  ;;  %v1369_v3 = vunpack.i.l.bf16 %v1368_v11  ;;  %822 = vmatmul.mubr.f32.gmra.mxu0 %v582_v19  ;;  %v1370_v56 = vunpack.i.h.bf16 %v1368_v11 }
 0x188   :  { %1318 = vmatpush3.msra.mxu1 %v651_v1  ;;  %826 = vmatprep.mubr.f32.mxu0 %v576_v6 }
 0x189   :  { %1320 = vmatmul.mubr.msk.f32.vlgmr.msra.gmra.mxu1 %vm572_vm10, %v570_v23  ;;  %1325 = vmatprep.subr.mxu1 %v929_v59  ;;  %v586_v24 = vsel %vm572_vm10, %v559_v4, %v1369_v3  ;;  %v584_v58 = vsel %vm572_vm10, %v537_v12, %v1370_v56 }
 0x18a   :  { %1322 = vmatprep.mubr.msk.f32.mxu1 %vm572_vm10, %v2060_v50  ;;  %1326 = vmatpush3.msra.mxu1 %v929_v59 }
 0x18b   :  { %1327 = vmatprep.subr.mxu1 %v928_v5  ;;  %827 = vmatmul.mubr.f32.gmra.mxu0 %v583_v55 }
 0x18c   :  { %1328 = vmatpush3.msra.mxu1 %v928_v5  ;;  %831 = vmatprep.mubr.f32.mxu0 %v586_v24 }
 0x18d   :  { %1323 = vmatmul.mubr.msk.f32.gmra.mxu1 %vm572_vm10, %v571_v8  ;;  %1329 = vmatprep.subr.mxu1 %v927_v2 }
 0x18e   :  { %1330 = vmatpush3.msra.mxu1 %v927_v2  ;;  %1333 = vmatprep.mubr.msk.f32.mxu1 %vm86_vm0, %v922_v39 }
 0x18f   :  { %1331 = vmatprep.subr.mxu1 %v926_v16  ;;  %832 = vmatmul.mubr.f32.gmra.mxu0 %v584_v58 }
 0x190   :  { %1332 = vmatpush3.msra.mxu1 %v926_v16 }
 0x191   :  { %1334 = vmatmul.mubr.msk.f32.vlgmr.msra.gmra.mxu1 %vm86_vm0, %v923_v7 }
 0x192   :  { %1336 = vmatprep.mubr.msk.f32.mxu1 %vm86_vm0, %v924_v63 }
 0x195   :  { %1337 = vmatmul.mubr.msk.f32.gmra.mxu1 %vm86_vm0, %v925_v34 }
 0x237   :  { %v1213_v18 = vpop.f32.mrf.mxu1 }
 0x239   :  { %v1214_v23 = vpop.f32.mrf.mxu1 }
 0x23a   :  { %v1215_v29 = vadd.f32 %v1214_v23, %v1213_v18 }
 0x23c   :  { %v1216_v50 = vpop.f32.mrf.mxu1 }
 0x23e   :  { %v1217_v62 = vpop.f32.mrf.mxu1 }
 0x23f   :  { %v1218_v10 = vadd.f32 %v1217_v62, %v1216_v50 }
 0x240   :  { %v1219_v0 = vpop.f32.mrf.mxu1 }
 0x242   :  { %v1220_v35 = vpop.f32.mrf.mxu1 }
 0x243   :  { %v1257_v48 = vpop.f32.mrf.mxu0  ;;  %v1221_v27 = vadd.f32 %v1220_v35, %v1219_v0 }
 0x244   :  { %v1222_v60 = vpop.f32.mrf.mxu1 }
 0x245   :  { %v1258_v8 = vpop.f32.mrf.mxu0 }
 0x246   :  { %v1259_v12 = vadd.f32 %v1258_v8, %v1257_v48  ;;  %v1223_v22 = vpop.f32.mrf.mxu1 }
 0x247   :  { %v1260_v54 = vpop.f32.mrf.mxu0  ;;  %v1224_v40 = vadd.f32 %v1223_v22, %v1222_v60 }
 0x248   :  { %v819_v9 = vadd.f32 %v1259_v12, %v1215_v29 }
 0x249   :  { %v1321_v51 = vpop.f32.mrf.mxu1  ;;  %v1261_v57 = vpop.f32.mrf.mxu0 }
 0x24a   :  { %v1262_v13 = vadd.f32 %v1261_v57, %v1260_v54 }
 0x24b   :  { %v903_v14 = vpop.f32.mrf.mxu1  ;;  %v1263_v15 = vpop.f32.mrf.mxu0 }
 0x24c   :  { %v824_v17 = vadd.f32 %v1262_v13, %v1218_v10  ;;  %v904_v20 = vadd.f32 %v903_v14, %v819_v9 }
 0x24d   :  { %v1324_v38 = vpop.f32.mrf.mxu1  ;;  %v1264_v33 = vpop.f32.mrf.mxu0 }
 0x24e   :  { %v909_v25 = vadd.f32 %v1321_v51, %v824_v17  ;;  %v1265_v46 = vadd.f32 %v1264_v33, %v1263_v15  ;;  %v1056_v41 = vmul.f32 %v1127_v26, %v904_v20 }
 0x24f   :  { %v913_v28 = vpop.f32.mrf.mxu1  ;;  %v1266_v30 = vpop.f32.mrf.mxu0 }
 0x250   :  { %v1057_v36 = vmul.f32 %v1127_v26, %v909_v25  ;;  %v829_v37 = vadd.f32 %v1265_v46, %v1221_v27  ;;  %v1067_v59 = vadd.f32 %v1128_v49, %v1056_v41 }
 0x251   :  { %v1335_v21 = vpop.f32.mrf.mxu1  ;;  %v1267_v45 = vpop.f32.mrf.mxu0 }
 0x252   :  { %v914_v31 = vadd.f32 %v913_v28, %v829_v37  ;;  %v1035_v44 = vmul.f32 %v1335_v21, %v1125_v32  ;;  %v1068_v43 = vadd.f32 %v1128_v49, %v1057_v36  ;;  %v1268_v6 = vadd.f32 %v1267_v45, %v1266_v30 }
 0x253   :  { %v1008_v47 = vpop.f32.mrf.mxu1 }
 0x254   :  { %v1046_v52 = vadd.f32 %v1126_v42, %v1035_v44  ;;  %v834_v53 = vadd.f32 %v1268_v6, %v1224_v40  ;;  %v1034_v1 = vmul.f32 %v1125_v32, %v1008_v47  ;;  %v1058_v11 = vmul.f32 %v1127_v26, %v914_v31 }
 0x255   :  { %v1338_v19 = vpop.f32.mrf.mxu1 }
 0x256   :  { %v1072_v61 = vadd.f32 %v1068_v43, %v1046_v52  ;;  %v919_v3 = vadd.f32 %v1324_v38, %v834_v53  ;;  %v1045_v4 = vadd.f32 %v1126_v42, %v1034_v1  ;;  %v1037_v5 = vmul.f32 %v1338_v19, %v1125_v32 }
 0x257   :  { %v1018_v24 = vpop.f32.mrf.mxu1  ;;  %v1069_v16 = vadd.f32 %v1128_v49, %v1058_v11 }
 0x258   :  { %v1076_v56 = vmax.f32 %v1072_v61, 0.0  ;;  %v1059_v55 = vmul.f32 %v1127_v26, %v919_v3  ;;  %v1071_v2 = vadd.f32 %v1067_v59, %v1045_v4  ;;  %v1036_v39 = vmul.f32 %v1125_v32, %v1018_v24 }
 0x259   :  { %v1048_v7 = vadd.f32 %v1126_v42, %v1037_v5 }
 0x25a   :  { %1080 = vst.msk [vmem:[%s2227_s11 + $0x8] sm:$0xff] %vm572_vm10, %v1076_v56  ;;  %v1075_v58 = vmax.f32 %v1071_v2, 0.0  ;;  %v1070_v63 = vadd.f32 %v1128_v49, %v1059_v55  ;;  %v1047_v34 = vadd.f32 %v1126_v42, %v1036_v39 }
 0x25c   :  { %1079 = vst.msk [vmem:[%s2227_s11] sm:$0xff] %vm572_vm10, %v1075_v58  ;;  %v1074_v18 = vadd.f32 %v1070_v63, %v1048_v7  ;;  %v1073_v23 = vadd.f32 %v1069_v16, %v1047_v34 }
 0x25e   :  { %v1078_v50 = vmax.f32 %v1074_v18, 0.0  ;;  %v1077_v62 = vmax.f32 %v1073_v23, 0.0 }
 0x260   :  { %1082 = vst.msk [vmem:[%s2227_s11 + $0x18] sm:$0xff] %vm572_vm10, %v1078_v50  ;;  %1081 = vst.msk [vmem:[%s2227_s11 + $0x10] sm:$0xff] %vm572_vm10, %v1077_v62 }

// kernel: simple_rsn_forward.8
= control target key start
LH: loop header
LB: loop body
LE: loop exit
PB: predicated region body
PF: predicated region fallthrough
CT: control target
= control target key end

     0   :  { %vm122_vm0 = vcmask 261120   ;;  %vm524_vm1 = vcmask 254976   ;;  %vm533_vm2 = vcmask 253952   ;;  %vm663_vm3 = vcmask 1046528   ;;  %s2534_s19 = smov 96   ;;  %s2535_s20 = smov 64   ;;  %s3918_s1 = inlined_call_operand.vmem [shape: f32[288,32], index: 1, kind: input, shape index: {}]   ;;  %s3919_s0 = inlined_call_operand.vmem [shape: f32[128,288], index: 0, kind: input, shape index: {}]   ;;  %s3920_s4 = inlined_call_operand.vmem [shape: f32[288,32], index: 4, kind: input, shape index: {}]   ;;  %s3921_s2 = inlined_call_operand.vmem [shape: f32[1,32], index: 2, kind: input, shape index: {}]   ;;  %s3922_s3 = inlined_call_operand.vmem [shape: f32[1,32], index: 3, kind: input, shape index: {}]   ;;  %s3923_s8 = inlined_call_operand.vmem [shape: f32[32,32], index: 8, kind: input, shape index: {}]   ;;  %s3924_s7 = inlined_call_operand.vmem [shape: f32[128,32], index: 7, kind: input, shape index: {}]   ;;  %s3925_s9 = inlined_call_operand.vmem [shape: f32[1,32], index: 9, kind: input, shape index: {}]   ;;  %s3926_s5 = inlined_call_operand.vmem [shape: f32[1,32], index: 5, kind: input, shape index: {}]   ;;  %s3927_s10 = inlined_call_operand.vmem [shape: f32[1,32], index: 10, kind: input, shape index: {}]   ;;  %s3928_s6 = inlined_call_operand.vmem [shape: f32[1,32], index: 6, kind: input, shape index: {}]   ;;  %s3929_s11 = inlined_call_operand.vmem [shape: f32[128,32], index: 11, kind: output, shape index: {}]  }
   0x1   :  { %v117_v0 = vld [vmem:[%s3918_s1 + $0xf8] sm:$0xff]  ;;  %v116_v2 = vld [vmem:[%s3918_s1 + $0xf0] sm:$0xff]  ;;  %v115_v4 = vld [vmem:[%s3918_s1 + $0xe8] sm:$0xff]  ;;  %vm712_vm4 = vcmask 1045504   ;;  %vm1113_vm5 = vcmask 523264   ;;  %vm1130_vm6 = vcmask 785408  }
   0x2   :  { %v101_v1 = vld [vmem:[%s3918_s1 + $0x78] sm:$0xff]  ;;  %1964 = vmatprep.subr.mxu0 %v117_v0  ;;  %v100_v3 = vld [vmem:[%s3918_s1 + $0x70] sm:$0xff]  ;;  %v99_v5 = vld [vmem:[%s3918_s1 + $0x68] sm:$0xff] }
   0x3   :  { %1965 = vmatpush3.msra.mxu0 %v101_v1  ;;  %v114_v6 = vld [vmem:[%s3918_s1 + $0xe0] sm:$0xff]  ;;  %v113_v8 = vld [vmem:[%s3918_s1 + $0xd8] sm:$0xff]  ;;  %v112_v10 = vld [vmem:[%s3918_s1 + $0xd0] sm:$0xff] }
   0x4   :  { %1966 = vmatprep.subr.mxu0 %v116_v2  ;;  %v98_v7 = vld [vmem:[%s3918_s1 + $0x60] sm:$0xff]  ;;  %v97_v9 = vld [vmem:[%s3918_s1 + $0x58] sm:$0xff]  ;;  %v96_v11 = vld [vmem:[%s3918_s1 + $0x50] sm:$0xff] }
   0x5   :  { %1967 = vmatpush3.msra.mxu0 %v100_v3  ;;  %v121_v12 = vld [vmem:[%s3918_s1 + $0x118] sm:$0xff]  ;;  %v111_v13 = vld [vmem:[%s3918_s1 + $0xc8] sm:$0xff]  ;;  %v120_v14 = vld [vmem:[%s3918_s1 + $0x110] sm:$0xff] }
   0x6   :  { %1968 = vmatprep.subr.mxu0 %v115_v4  ;;  %2184 = vmatprep.subr.mxu1 %v121_v12  ;;  %v95_v15 = vld [vmem:[%s3918_s1 + $0x48] sm:$0xff]  ;;  %v110_v17 = vld [vmem:[%s3918_s1 + $0xc0] sm:$0xff]  ;;  %v109_v20 = vld [vmem:[%s3918_s1 + $0xb8] sm:$0xff] }
   0x7   :  { %1969 = vmatpush3.msra.mxu0 %v99_v5  ;;  %2185 = vmatpush3.msra.mxu1 %v121_v12  ;;  %v119_v16 = vld [vmem:[%s3918_s1 + $0x108] sm:$0xff]  ;;  %v94_v19 = vld [vmem:[%s3918_s1 + $0x40] sm:$0xff]  ;;  %v93_v22 = vld [vmem:[%s3918_s1 + $0x38] sm:$0xff] }
   0x8   :  { %1970 = vmatprep.subr.mxu0 %v114_v6  ;;  %2186 = vmatprep.subr.mxu1 %v120_v14  ;;  %v39_v18 = vld [vmem:[%s3919_s0 + $0x8] sm:$0xff]  ;;  %v118_v21 = vld [vmem:[%s3918_s1 + $0x100] sm:$0xff]  ;;  %v108_v23 = vld [vmem:[%s3918_s1 + $0xb0] sm:$0xff] }
   0x9   :  { %1971 = vmatpush3.msra.mxu0 %v98_v7  ;;  %2187 = vmatpush3.msra.mxu1 %v120_v14  ;;  %v40_v24 = vld [vmem:[%s3919_s0 + $0x10] sm:$0xff]  ;;  %v43_v26 = vld [vmem:[%s3919_s0 + $0x28] sm:$0xff]  ;;  %v46_v28 = vld [vmem:[%s3919_s0 + $0x40] sm:$0xff] }
   0xa   :  { %1972 = vmatprep.subr.mxu0 %v113_v8  ;;  %2188 = vmatprep.subr.mxu1 %v119_v16  ;;  %v92_v25 = vld [vmem:[%s3918_s1 + $0x30] sm:$0xff]  ;;  %v107_v27 = vld [vmem:[%s3918_s1 + $0xa8] sm:$0xff]  ;;  %v106_v30 = vld [vmem:[%s3918_s1 + $0xa0] sm:$0xff] }
   0xb   :  { %1973 = vmatpush3.msra.mxu0 %v97_v9  ;;  %235 = vmatprep.mubr.f32.mxu0 %v39_v18  ;;  %v91_v29 = vld [vmem:[%s3918_s1 + $0x28] sm:$0xff]  ;;  %v90_v31 = vld [vmem:[%s3918_s1 + $0x20] sm:$0xff]  ;;  %v49_v32 = vld [vmem:[%s3919_s0 + $0x58] sm:$0xff] }
   0xc   :  { %1974 = vmatprep.subr.mxu0 %v112_v10  ;;  %2189 = vmatpush3.msra.mxu1 %v119_v16  ;;  %v105_v33 = vld [vmem:[%s3918_s1 + $0x98] sm:$0xff]  ;;  %v52_v34 = vld [vmem:[%s3919_s0 + $0x70] sm:$0xff]  ;;  %v55_v38 = vld [vmem:[%s3919_s0 + $0x88] sm:$0xff] }
   0xd   :  { %1975 = vmatpush3.msra.mxu0 %v96_v11  ;;  %2190 = vmatprep.subr.mxu1 %v118_v21  ;;  %v89_v35 = vld [vmem:[%s3918_s1 + $0x18] sm:$0xff]  ;;  %v104_v36 = vld [vmem:[%s3918_s1 + $0x90] sm:$0xff]  ;;  %v103_v39 = vld [vmem:[%s3918_s1 + $0x88] sm:$0xff] }
   0xe   :  { %1976 = vmatprep.subr.mxu0 %v111_v13  ;;  %2191 = vmatpush3.msra.mxu1 %v118_v21  ;;  %v88_v37 = vld [vmem:[%s3918_s1 + $0x10] sm:$0xff]  ;;  %v58_v40 = vld [vmem:[%s3919_s0 + $0xa0] sm:$0xff]  ;;  %v87_v41 = vld [vmem:[%s3918_s1 + $0x8] sm:$0xff] }
   0xf   :  { %1977 = vmatpush3.msra.mxu0 %v95_v15  ;;  %2192 = vmatprep.mubr.msk.f32.mxu1 %vm122_vm0, %v40_v24  ;;  %v102_v42 = vld [vmem:[%s3918_s1 + $0x80] sm:$0xff]  ;;  %v61_v44 = vld [vmem:[%s3919_s0 + $0xb8] sm:$0xff]  ;;  %v64_v46 = vld [vmem:[%s3919_s0 + $0xd0] sm:$0xff] }
  0x10   :  { %1978 = vmatprep.subr.mxu0 %v110_v17  ;;  %2193 = vmatmul.mubr.msk.f32.vlgmr.msra.gmra.mxu1 %vm122_vm0, %v43_v26  ;;  %v86_v43 = vld [vmem:[%s3918_s1] sm:$0xff]  ;;  %v67_v48 = vld [vmem:[%s3919_s0 + $0xe8] sm:$0xff]  ;;  %v41_v49 = vld [vmem:[%s3919_s0 + $0x18] sm:$0xff] }
  0x11   :  { %1979 = vmatpush3.msra.mxu0 %v94_v19  ;;  %2195 = vmatprep.mubr.msk.f32.mxu1 %vm122_vm0, %v46_v28  ;;  %v38_v45 = vld [vmem:[%s3919_s0] sm:$0xff]  ;;  %v45_v51 = vld [vmem:[%s3919_s0 + $0x38] sm:$0xff]  ;;  %v44_v53 = vld [vmem:[%s3919_s0 + $0x30] sm:$0xff] }
  0x12   :  { %1980 = vmatprep.subr.mxu0 %v109_v20  ;;  %v42_v47 = vld [vmem:[%s3919_s0 + $0x20] sm:$0xff]  ;;  %v73_v52 = vld [vmem:[%s3919_s0 + $0x118] sm:$0xff]  ;;  %v76_v54 = vld [vmem:[%s3919_s0 + $0x130] sm:$0xff]  ;;  %v2532_v20 = vmov 0.0  }
  0x13   :  { %1981 = vmatpush3.msra.mxu0 %v93_v22  ;;  %v70_v50 = vld [vmem:[%s3919_s0 + $0x100] sm:$0xff]  ;;  %v48_v55 = vld [vmem:[%s3919_s0 + $0x50] sm:$0xff]  ;;  %v79_v56 = vld [vmem:[%s3919_s0 + $0x148] sm:$0xff]  ;;  %523 = vst.msk [vmem:[#allocation2] sm:$0xff] %vm122_vm0, %v2532_v20 }
  0x14   :  { %1982 = vmatprep.subr.mxu0 %v108_v23  ;;  %2196 = vmatmul.mubr.msk.f32.gmra.mxu1 %vm122_vm0, %v49_v32  ;;  %v47_v57 = vld [vmem:[%s3919_s0 + $0x48] sm:$0xff]  ;;  %v82_v58 = vld [vmem:[%s3919_s0 + $0x160] sm:$0xff]  ;;  %v85_v60 = vld [vmem:[%s3919_s0 + $0x178] sm:$0xff]  ;;  %525 = vst.msk [vmem:[#allocation2 + $0x8] sm:$0x3] %vm524_vm1, %v2532_v20 }
  0x15   :  { %1983 = vmatpush3.msra.mxu0 %v92_v25  ;;  %2198 = vmatprep.mubr.msk.f32.mxu1 %vm122_vm0, %v52_v34  ;;  %v51_v59 = vld [vmem:[%s3919_s0 + $0x68] sm:$0xff]  ;;  %v50_v61 = vld [vmem:[%s3919_s0 + $0x60] sm:$0xff]  ;;  %v53_v63 = vld [vmem:[%s3919_s0 + $0x78] sm:$0xff]  ;;  %526 = vst.msk [vmem:[#allocation2 + $0xa0] sm:$0xff] %vm122_vm0, %v2532_v20 }
  0x16   :  { %1984 = vmatprep.subr.mxu0 %v107_v27  ;;  %v54_v62 = vld [vmem:[%s3919_s0 + $0x80] sm:$0xff]  ;;  %v57_v0 = vld [vmem:[%s3919_s0 + $0x98] sm:$0xff]  ;;  %v56_v1 = vld [vmem:[%s3919_s0 + $0x90] sm:$0xff]  ;;  %527 = vst.msk [vmem:[#allocation2 + $0xa8] sm:$0x3] %vm524_vm1, %v2532_v20 }
  0x17   :  { %1985 = vmatpush3.msra.mxu0 %v91_v29  ;;  %v60_v2 = vld [vmem:[%s3919_s0 + $0xb0] sm:$0xff]  ;;  %v59_v3 = vld [vmem:[%s3919_s0 + $0xa8] sm:$0xff]  ;;  %v62_v5 = vld [vmem:[%s3919_s0 + $0xc0] sm:$0xff]  ;;  %529 = vst.msk [vmem:[#allocation2 + $0x90] sm:$0xff] %vm122_vm0, %v2532_v20 }
  0x18   :  { %1986 = vmatprep.subr.mxu0 %v106_v30  ;;  %2199 = vmatmul.mubr.msk.f32.gmra.mxu1 %vm122_vm0, %v55_v38  ;;  %v63_v4 = vld [vmem:[%s3919_s0 + $0xc8] sm:$0xff]  ;;  %v66_v6 = vld [vmem:[%s3919_s0 + $0xe0] sm:$0xff]  ;;  %v65_v7 = vld [vmem:[%s3919_s0 + $0xd8] sm:$0xff]  ;;  %530 = vst.msk [vmem:[#allocation2 + $0x98] sm:$0x3] %vm524_vm1, %v2532_v20 }
  0x19   :  { %1987 = vmatpush3.msra.mxu0 %v90_v31  ;;  %2201 = vmatprep.mubr.msk.f32.mxu1 %vm122_vm0, %v58_v40  ;;  %v69_v8 = vld [vmem:[%s3919_s0 + $0xf8] sm:$0xff]  ;;  %v68_v9 = vld [vmem:[%s3919_s0 + $0xf0] sm:$0xff]  ;;  %v71_v11 = vld [vmem:[%s3919_s0 + $0x108] sm:$0xff]  ;;  %531 = vst.msk [vmem:[#allocation2 + $0x130] sm:$0xff] %vm122_vm0, %v2532_v20 }
  0x1a   :  { %1988 = vmatprep.subr.mxu0 %v105_v33  ;;  %v72_v10 = vld [vmem:[%s3919_s0 + $0x110] sm:$0xff]  ;;  %v75_v12 = vld [vmem:[%s3919_s0 + $0x128] sm:$0xff]  ;;  %v74_v13 = vld [vmem:[%s3919_s0 + $0x120] sm:$0xff]  ;;  %532 = vst.msk [vmem:[#allocation2 + $0x138] sm:$0x3] %vm524_vm1, %v2532_v20 }
  0x1b   :  { %1989 = vmatpush3.msra.mxu0 %v89_v35  ;;  %v78_v14 = vld [vmem:[%s3919_s0 + $0x140] sm:$0xff]  ;;  %v77_v15 = vld [vmem:[%s3919_s0 + $0x138] sm:$0xff]  ;;  %v80_v17 = vld [vmem:[%s3919_s0 + $0x150] sm:$0xff]  ;;  %534 = vst.msk [vmem:[#allocation2] sm:$0x1] %vm533_vm2, %v2532_v20 }
  0x1c   :  { %1990 = vmatprep.subr.mxu0 %v104_v36  ;;  %2202 = vmatmul.mubr.msk.f32.gmra.mxu1 %vm122_vm0, %v61_v44  ;;  %v81_v16 = vld [vmem:[%s3919_s0 + $0x158] sm:$0xff]  ;;  %v84_v18 = vld [vmem:[%s3919_s0 + $0x170] sm:$0xff]  ;;  %v83_v19 = vld [vmem:[%s3919_s0 + $0x168] sm:$0xff]  ;;  %535 = vst.msk [vmem:[#allocation2 + $0x10] sm:$0x1] %vm533_vm2, %v2532_v20 }
  0x1d   :  { %1991 = vmatpush3.msra.mxu0 %v88_v37  ;;  %2204 = vmatprep.mubr.msk.f32.mxu1 %vm122_vm0, %v64_v46  ;;  %537 = vst.msk [vmem:[#allocation2 + $0x30] sm:$0x1] %vm533_vm2, %v2532_v20  ;;  %554 = vst.msk [vmem:[#allocation2 + $0x9] sm:$0x1] %vm533_vm2, %v2532_v20  ;;  %v1230_v21 = vld [vmem:[%s3920_s4 + $0x118] sm:$0xff]  ;;  %v1229_v22 = vld [vmem:[%s3920_s4 + $0x110] sm:$0xff] }
  0x1e   :  { %1992 = vmatprep.subr.mxu0 %v103_v39  ;;  %555 = vst.msk [vmem:[#allocation2 + $0x19] sm:$0x1] %vm533_vm2, %v2532_v20  ;;  %536 = vst.msk [vmem:[#allocation2 + $0x20] sm:$0x1] %vm533_vm2, %v2532_v20  ;;  %v1228_v23 = vld [vmem:[%s3920_s4 + $0x108] sm:$0xff]  ;;  %v1227_v24 = vld [vmem:[%s3920_s4 + $0x100] sm:$0xff] }
  0x1f   :  { %1993 = vmatpush3.msra.mxu0 %v87_v41  ;;  %538 = vst.msk [vmem:[#allocation2 + $0x40] sm:$0x1] %vm533_vm2, %v2532_v20  ;;  %539 = vst.msk [vmem:[#allocation2 + $0x50] sm:$0x1] %vm533_vm2, %v2532_v20  ;;  %v1226_v25 = vld [vmem:[%s3920_s4 + $0xf8] sm:$0xff]  ;;  %v1225_v27 = vld [vmem:[%s3920_s4 + $0xf0] sm:$0xff] }
  0x20   :  { %1994 = vmatprep.subr.mxu0 %v102_v42  ;;  %2205 = vmatmul.mubr.msk.f32.gmra.mxu1 %vm122_vm0, %v67_v48  ;;  %540 = vst.msk [vmem:[#allocation2 + $0x60] sm:$0x1] %vm533_vm2, %v2532_v20  ;;  %541 = vst.msk [vmem:[#allocation2 + $0x70] sm:$0x1] %vm533_vm2, %v2532_v20  ;;  %v1210_v26 = vld [vmem:[%s3920_s4 + $0x78] sm:$0xff]  ;;  %v1209_v28 = vld [vmem:[%s3920_s4 + $0x70] sm:$0xff] }
  0x21   :  { %1995 = vmatpush3.msra.mxu0 %v86_v43  ;;  %2207 = vmatprep.mubr.msk.f32.mxu1 %vm122_vm0, %v70_v50  ;;  %542 = vst.msk [vmem:[#allocation2 + $0x80] sm:$0x1] %vm533_vm2, %v2532_v20  ;;  %545 = vst.msk [vmem:[#allocation2 + $0xb0] sm:$0x1] %vm533_vm2, %v2532_v20  ;;  %v1224_v29 = vld [vmem:[%s3920_s4 + $0xe8] sm:$0xff]  ;;  %v1223_v31 = vld [vmem:[%s3920_s4 + $0xe0] sm:$0xff] }
  0x22   :  { %236 = vmatmul.mubr.f32.vlgmr.msra.gmra.mxu0 %v38_v45  ;;  %546 = vst.msk [vmem:[#allocation2 + $0xc0] sm:$0x1] %vm533_vm2, %v2532_v20  ;;  %547 = vst.msk [vmem:[#allocation2 + $0xd0] sm:$0x1] %vm533_vm2, %v2532_v20  ;;  %2216 = vmatprep.subr.mxu0 %v1230_v21  ;;  %v1208_v30 = vld [vmem:[%s3920_s4 + $0x68] sm:$0xff]  ;;  %v1207_v32 = vld [vmem:[%s3920_s4 + $0x60] sm:$0xff] }
  0x23   :  { %240 = vmatprep.mubr.f32.mxu0 %v42_v47  ;;  %548 = vst.msk [vmem:[#allocation2 + $0xe0] sm:$0x1] %vm533_vm2, %v2532_v20  ;;  %549 = vst.msk [vmem:[#allocation2 + $0xf0] sm:$0x1] %vm533_vm2, %v2532_v20  ;;  %2217 = vmatpush3.msra.mxu0 %v1230_v21  ;;  %v1222_v33 = vld [vmem:[%s3920_s4 + $0xd8] sm:$0xff]  ;;  %v1221_v36 = vld [vmem:[%s3920_s4 + $0xd0] sm:$0xff] }
  0x24   :  { %2208 = vmatmul.mubr.msk.f32.gmra.mxu1 %vm122_vm0, %v73_v52  ;;  %550 = vst.msk [vmem:[#allocation2 + $0x100] sm:$0x1] %vm533_vm2, %v2532_v20  ;;  %551 = vst.msk [vmem:[#allocation2 + $0x110] sm:$0x1] %vm533_vm2, %v2532_v20  ;;  %2218 = vmatprep.subr.mxu0 %v1229_v22  ;;  %v1206_v34 = vld [vmem:[%s3920_s4 + $0x58] sm:$0xff]  ;;  %v1205_v37 = vld [vmem:[%s3920_s4 + $0x50] sm:$0xff] }
  0x25   :  { %2210 = vmatprep.mubr.msk.f32.mxu1 %vm122_vm0, %v76_v54  ;;  %552 = vst.msk [vmem:[#allocation2 + $0x120] sm:$0x1] %vm533_vm2, %v2532_v20  ;;  %556 = vst.msk [vmem:[#allocation2 + $0x29] sm:$0x1] %vm533_vm2, %v2532_v20  ;;  %2219 = vmatpush3.msra.mxu0 %v1229_v22  ;;  %v1220_v39 = vld [vmem:[%s3920_s4 + $0xc8] sm:$0xff]  ;;  %v1219_v43 = vld [vmem:[%s3920_s4 + $0xc0] sm:$0xff] }
  0x26   :  { %241 = vmatmul.mubr.f32.gmra.mxu0 %v41_v49  ;;  %557 = vst.msk [vmem:[#allocation2 + $0x39] sm:$0x1] %vm533_vm2, %v2532_v20  ;;  %558 = vst.msk [vmem:[#allocation2 + $0x49] sm:$0x1] %vm533_vm2, %v2532_v20  ;;  %2220 = vmatprep.subr.mxu0 %v1228_v23  ;;  %v1204_v40 = vld [vmem:[%s3920_s4 + $0x48] sm:$0xff]  ;;  %v1203_v45 = vld [vmem:[%s3920_s4 + $0x40] sm:$0xff] }
  0x27   :  { %245 = vmatprep.mubr.f32.mxu0 %v45_v51  ;;  %559 = vst.msk [vmem:[#allocation2 + $0x59] sm:$0x1] %vm533_vm2, %v2532_v20  ;;  %560 = vst.msk [vmem:[#allocation2 + $0x69] sm:$0x1] %vm533_vm2, %v2532_v20  ;;  %2221 = vmatpush3.msra.mxu0 %v1228_v23  ;;  %v2971_v47 = vld [vmem:[%s3921_s2] ss:$0 sm:$0xff] }
  0x28   :  { %2211 = vmatmul.mubr.msk.f32.gmra.mxu1 %vm122_vm0, %v79_v56  ;;  %561 = vst.msk [vmem:[#allocation2 + $0x79] sm:$0x1] %vm533_vm2, %v2532_v20  ;;  %562 = vst.msk [vmem:[#allocation2 + $0x89] sm:$0x1] %vm533_vm2, %v2532_v20  ;;  %2222 = vmatprep.subr.mxu0 %v1227_v24  ;;  %v1218_v48 = vld [vmem:[%s3920_s4 + $0xb8] sm:$0xff]  ;;  %v1217_v54 = vld [vmem:[%s3920_s4 + $0xb0] sm:$0xff] }
  0x29   :  { %2213 = vmatprep.mubr.msk.f32.mxu1 %vm122_vm0, %v82_v58  ;;  %565 = vst.msk [vmem:[#allocation2 + $0xb9] sm:$0x1] %vm533_vm2, %v2532_v20  ;;  %566 = vst.msk [vmem:[#allocation2 + $0xc9] sm:$0x1] %vm533_vm2, %v2532_v20  ;;  %2223 = vmatpush3.msra.mxu0 %v1227_v24  ;;  %v1202_v50 = vld [vmem:[%s3920_s4 + $0x38] sm:$0xff]  ;;  %v1213_v21 = vld [vmem:[%s3920_s4 + $0x90] sm:$0xff] }
  0x2a   :  { %246 = vmatmul.mubr.f32.gmra.mxu0 %v44_v53  ;;  %567 = vst.msk [vmem:[#allocation2 + $0xd9] sm:$0x1] %vm533_vm2, %v2532_v20  ;;  %568 = vst.msk [vmem:[#allocation2 + $0xe9] sm:$0x1] %vm533_vm2, %v2532_v20  ;;  %2064 = vmatprep.subr.mxu1 %v1226_v25  ;;  %v2982_v51 = vld [vmem:[%s3922_s3] ss:$0 sm:$0xff] }
  0x2b   :  { %250 = vmatprep.mubr.f32.mxu0 %v48_v55  ;;  %569 = vst.msk [vmem:[#allocation2 + $0xf9] sm:$0x1] %vm533_vm2, %v2532_v20  ;;  %570 = vst.msk [vmem:[#allocation2 + $0x109] sm:$0x1] %vm533_vm2, %v2532_v20  ;;  %2065 = vmatpush3.msra.mxu1 %v1210_v26 }
  0x2c   :  { %2214 = vmatmul.mubr.msk.f32.gmra.mxu1 %vm122_vm0, %v85_v60  ;;  %571 = vst.msk [vmem:[#allocation2 + $0x119] sm:$0x1] %vm533_vm2, %v2532_v20  ;;  %572 = vst.msk [vmem:[#allocation2 + $0x129] sm:$0x1] %vm533_vm2, %v2532_v20  ;;  %2066 = vmatprep.subr.mxu1 %v1225_v27 }
  0x2d   :  { %543 = vst.msk [vmem:[#allocation2 + $0x90] sm:$0x1] %vm533_vm2, %v2532_v20  ;;  %544 = vst.msk [vmem:[#allocation2 + $0xa0] sm:$0x1] %vm533_vm2, %v2532_v20  ;;  %2067 = vmatpush3.msra.mxu1 %v1209_v28 }
  0x2e   :  { %251 = vmatmul.mubr.f32.gmra.mxu0 %v47_v57  ;;  %553 = vst.msk [vmem:[#allocation2 + $0x130] sm:$0x1] %vm533_vm2, %v2532_v20  ;;  %563 = vst.msk [vmem:[#allocation2 + $0x99] sm:$0x1] %vm533_vm2, %v2532_v20  ;;  %2068 = vmatprep.subr.mxu1 %v1224_v29  ;;  %v1201_v57 = vld [vmem:[%s3920_s4 + $0x30] sm:$0xff] }
  0x2f   :  { %255 = vmatprep.mubr.f32.mxu0 %v51_v59  ;;  %564 = vst.msk [vmem:[#allocation2 + $0xa9] sm:$0x1] %vm533_vm2, %v2532_v20  ;;  %573 = vst.msk [vmem:[#allocation2 + $0x139] sm:$0x1] %vm533_vm2, %v2532_v20  ;;  %2069 = vmatpush3.msra.mxu1 %v1208_v30  ;;  %v1216_v59 = vld [vmem:[%s3920_s4 + $0xa8] sm:$0xff] }
  0x30   :  { %2070 = vmatprep.subr.mxu1 %v1223_v31 }
  0x31   :  { %2071 = vmatpush3.msra.mxu1 %v1207_v32 }
  0x32   :  { %256 = vmatmul.mubr.f32.gmra.mxu0 %v50_v61  ;;  %2072 = vmatprep.subr.mxu1 %v1222_v33 }
  0x33   :  { %260 = vmatprep.mubr.f32.mxu0 %v54_v62  ;;  %2073 = vmatpush3.msra.mxu1 %v1206_v34  ;;  %v1200_v62 = vld [vmem:[%s3920_s4 + $0x28] sm:$0xff]  ;;  %v1197_v34 = vld [vmem:[%s3920_s4 + $0x10] sm:$0xff] }
  0x34   :  { %2074 = vmatprep.subr.mxu1 %v1221_v36 }
  0x35   :  { %2075 = vmatpush3.msra.mxu1 %v1205_v37 }
  0x36   :  { %261 = vmatmul.mubr.f32.gmra.mxu0 %v53_v63  ;;  %2076 = vmatprep.subr.mxu1 %v1220_v39  ;;  %v3042_v39 = vld [vmem:[%s3923_s8 + $0x18] sm:$0xff] }
  0x37   :  { %265 = vmatprep.mubr.f32.mxu0 %v57_v0  ;;  %2077 = vmatpush3.msra.mxu1 %v1204_v40  ;;  %v1196_v40 = vld [vmem:[%s3920_s4 + $0x8] sm:$0xff] }
  0x38   :  { %2078 = vmatprep.subr.mxu1 %v1219_v43  ;;  %2248 = vmatprep.subr.mxu0 %v3042_v39 }
  0x39   :  { %2079 = vmatpush3.msra.mxu1 %v1203_v45  ;;  %v1211_v45 = vld [vmem:[%s3920_s4 + $0x80] sm:$0xff] }
  0x3a   :  { %266 = vmatmul.mubr.f32.gmra.mxu0 %v56_v1  ;;  %2080 = vmatprep.subr.mxu1 %v1218_v48  ;;  %v1215_v1 = vld [vmem:[%s3920_s4 + $0xa0] sm:$0xff] }
  0x3b   :  { %270 = vmatprep.mubr.f32.mxu0 %v60_v2  ;;  %2081 = vmatpush3.msra.mxu1 %v1202_v50 }
  0x3c   :  { %2082 = vmatprep.subr.mxu1 %v1217_v54 }
  0x3d   :  { %2083 = vmatpush3.msra.mxu1 %v1201_v57 }
  0x3e   :  { %271 = vmatmul.mubr.f32.gmra.mxu0 %v59_v3  ;;  %2084 = vmatprep.subr.mxu1 %v1216_v59 }
  0x3f   :  { %275 = vmatprep.mubr.f32.mxu0 %v63_v4  ;;  %2085 = vmatpush3.msra.mxu1 %v1200_v62 }
  0x40   :  { %2086 = vmatprep.subr.mxu1 %v1215_v1 }
  0x42   :  { %276 = vmatmul.mubr.f32.gmra.mxu0 %v62_v5 }
  0x43   :  { %280 = vmatprep.mubr.f32.mxu0 %v66_v6 }
  0x46   :  { %281 = vmatmul.mubr.f32.gmra.mxu0 %v65_v7 }
  0x47   :  { %285 = vmatprep.mubr.f32.mxu0 %v69_v8 }
  0x4a   :  { %286 = vmatmul.mubr.f32.gmra.mxu0 %v68_v9 }
  0x4b   :  { %290 = vmatprep.mubr.f32.mxu0 %v72_v10 }
  0x4e   :  { %291 = vmatmul.mubr.f32.gmra.mxu0 %v71_v11 }
  0x4f   :  { %295 = vmatprep.mubr.f32.mxu0 %v75_v12 }
  0x52   :  { %296 = vmatmul.mubr.f32.gmra.mxu0 %v74_v13  ;;  %v3007_v13 = vld [vmem:[#allocation2] sm:$0xff] }
  0x53   :  { %300 = vmatprep.mubr.f32.mxu0 %v78_v14  ;;  %v592_v14 = vld [vmem:[#allocation2 + $0x8] sm:$0x3]  ;;  %v664_v24 = vrot.slane %v3007_v13, 1  ;;  %v713_v33 = vrot.slane %v3007_v13, 2 }
  0x54   :  { %v665_v25 = vrot.slane %v592_v14, 1  ;;  %v714_v32 = vrot.slane %v592_v14, 2 }
  0x56   :  { %301 = vmatmul.mubr.f32.gmra.mxu0 %v77_v15  ;;  %v666_v43 = vsel %vm663_vm3, %v664_v24, %v665_v25  ;;  %v715_v57 = vsel %vm712_vm4, %v713_v33, %v714_v32 }
  0x57   :  { %305 = vmatprep.mubr.f32.mxu0 %v81_v16  ;;  %v1199_v16 = vld [vmem:[%s3920_s4 + $0x20] sm:$0xff] }
  0x58   :  { %2087 = vmatpush3.msra.mxu1 %v1199_v16 }
  0x5a   :  { %306 = vmatmul.mubr.f32.gmra.mxu0 %v80_v17  ;;  %v1214_v17 = vld [vmem:[%s3920_s4 + $0x98] sm:$0xff] }
  0x5b   :  { %310 = vmatprep.mubr.f32.mxu0 %v84_v18  ;;  %v1198_v18 = vld [vmem:[%s3920_s4 + $0x18] sm:$0xff]  ;;  %2088 = vmatprep.subr.mxu1 %v1214_v17 }
  0x5c   :  { %2089 = vmatpush3.msra.mxu1 %v1198_v18 }
  0x5d   :  { %2090 = vmatprep.subr.mxu1 %v1213_v21 }
  0x5e   :  { %311 = vmatmul.mubr.f32.gmra.mxu0 %v83_v19  ;;  %2091 = vmatpush3.msra.mxu1 %v1197_v34 }
  0xd0   :  { %v2194_v35 = vpop.f32.mrf.mxu1 }
  0xd2   :  { %v382_v42 = vpop.f32.mrf.mxu1 }
  0xd4   :  { %v2197_v53 = vpop.f32.mrf.mxu1 }
  0xd6   :  { %v392_v0 = vpop.f32.mrf.mxu1 }
  0xd8   :  { %v3004_v9 = vpop.f32.mrf.mxu1 }
  0xda   :  { %v402_v23 = vpop.f32.mrf.mxu1 }
  0xe2   :  { %v1996_v38 = vpop.f32.mrf.mxu0 }
  0xe4   :  { %v1997_v41 = vpop.f32.mrf.mxu0 }
  0xe5   :  { %v1998_v44 = vadd.f32 %v1997_v41, %v1996_v38  ;;  %v1212_v38 = vld [vmem:[%s3920_s4 + $0x88] sm:$0xff] }
  0xe6   :  { %v1999_v46 = vpop.f32.mrf.mxu0  ;;  %2092 = vmatprep.subr.mxu1 %v1212_v38  ;;  %v3119_v38 = vld [vmem:[%s3923_s8 + $0x10] sm:$0xff] }
  0xe7   :  { %v383_v49 = vadd.f32 %v1998_v44, %v382_v42  ;;  %v3047_v42 = vpop.f32.mrf.mxu1  ;;  %2093 = vmatpush3.msra.mxu1 %v1196_v40 }
  0xe8   :  { %v2000_v52 = vpop.f32.mrf.mxu0  ;;  %2094 = vmatprep.subr.mxu1 %v1211_v45 }
  0xe9   :  { %v468_v55 = vmul.f32 %v2971_v47, %v383_v49  ;;  %v2001_v56 = vadd.f32 %v2000_v52, %v1999_v46  ;;  %v1195_v46 = vld [vmem:[%s3920_s4] sm:$0xff]  ;;  %s2533_s4 = smov 32  }
  0xea   :  { %v2002_v58 = vpop.f32.mrf.mxu0  ;;  %2095 = vmatpush3.msra.mxu1 %v1195_v46 }
  0xeb   :  { %v491_v60 = vadd.f32 %v2982_v51, %v468_v55  ;;  %v388_v61 = vadd.f32 %v2194_v35, %v2001_v56  ;;  %2280 = vmatprep.subr.mxu1 %v3042_v39 }
  0xec   :  { %v2003_v63 = vpop.f32.mrf.mxu0 }
  0xed   :  { %v507_v2 = vmax.f32 %v491_v60, 0.0  ;;  %v469_v3 = vmul.f32 %v2971_v47, %v388_v61  ;;  %v2004_v4 = vadd.f32 %v2003_v63, %v2002_v58  ;;  %v412_v63 = vpop.f32.mrf.mxu1 }
  0xee   :  { %v2005_v5 = vpop.f32.mrf.mxu0 }
  0xef   :  { %575 = vst.msk [vmem:[#allocation2 + $0x11] sm:$0xff] %vm122_vm0, %v507_v2  ;;  %v492_v6 = vadd.f32 %v2982_v51, %v469_v3  ;;  %v393_v7 = vadd.f32 %v2004_v4, %v392_v0 }
  0xf0   :  { %v2006_v8 = vpop.f32.mrf.mxu0 }
  0xf1   :  { %v508_v10 = vmax.f32 %v492_v6, 0.0  ;;  %v470_v11 = vmul.f32 %v2971_v47, %v393_v7  ;;  %v2007_v12 = vadd.f32 %v2006_v8, %v2005_v5 }
  0xf2   :  { %v2008_v15 = vpop.f32.mrf.mxu0 }
  0xf3   :  { %576 = vst.msk [vmem:[#allocation2 + $0x21] sm:$0xff] %vm122_vm0, %v508_v10  ;;  %v493_v19 = vadd.f32 %v2982_v51, %v470_v11  ;;  %v398_v20 = vadd.f32 %v2197_v53, %v2007_v12 }
  0xf4   :  { %v2009_v22 = vpop.f32.mrf.mxu0 }
  0xf5   :  { %v509_v26 = vmax.f32 %v493_v19, 0.0  ;;  %v471_v27 = vmul.f32 %v2971_v47, %v398_v20  ;;  %v2010_v28 = vadd.f32 %v2009_v22, %v2008_v15  ;;  %v3096_v22 = vpop.f32.mrf.mxu1 }
  0xf6   :  { %v2011_v29 = vpop.f32.mrf.mxu0  ;;  %v3025_v30 = vld [vmem:[#allocation2 + $0x10] sm:$0xff]  ;;  %v3027_v31 = vld [vmem:[#allocation2 + $0x18] sm:$0x3] }
  0xf7   :  { %577 = vst.msk [vmem:[#allocation2 + $0x31] sm:$0xff] %vm122_vm0, %v509_v26  ;;  %v494_v35 = vadd.f32 %v2982_v51, %v471_v27  ;;  %v403_v36 = vadd.f32 %v2010_v28, %v402_v23  ;;  %v716_v37 = vrot.slane %v3025_v30, 2  ;;  %v717_v44 = vrot.slane %v3027_v31, 2  ;;  %v422_v45 = vpop.f32.mrf.mxu1 }
  0xf8   :  { %v2012_v41 = vpop.f32.mrf.mxu0  ;;  %v668_v53 = vrot.slane %v3027_v31, 1  ;;  %v667_v3 = vrot.slane %v3025_v30, 1 }
  0xf9   :  { %v510_v48 = vmax.f32 %v494_v35, 0.0  ;;  %v472_v49 = vmul.f32 %v2971_v47, %v403_v36  ;;  %v2013_v50 = vadd.f32 %v2012_v41, %v2011_v29  ;;  %v3061_v54 = vsel %vm712_vm4, %v716_v37, %v717_v44 }
  0xfa   :  { %v2014_v52 = vpop.f32.mrf.mxu0  ;;  %v3063_v55 = vld [vmem:[#allocation2 + $0x20] sm:$0xff]  ;;  %v596_v56 = vld [vmem:[#allocation2 + $0x28] sm:$0x3]  ;;  %v2292_v60 = vpack.i.bf16 %v666_v43, %v3061_v54  ;;  %v3093_v20 = vsel %vm663_vm3, %v667_v3, %v668_v53 }
  0xfb   :  { %578 = vst.msk [vmem:[#allocation2 + $0x41] sm:$0xff] %vm122_vm0, %v510_v48  ;;  %v495_v58 = vadd.f32 %v2982_v51, %v472_v49  ;;  %v408_v59 = vadd.f32 %v3004_v9, %v2013_v50  ;;  %v719_v61 = vrot.slane %v3063_v55, 2  ;;  %v720_v0 = vrot.slane %v596_v56, 2  ;;  %v3132_v49 = vld [vmem:[%s3923_s8 + $0x8] sm:$0xff] }
  0xfc   :  { %v2015_v62 = vpop.f32.mrf.mxu0  ;;  %v670_v1 = vrot.slane %v3063_v55, 1  ;;  %v671_v2 = vrot.slane %v596_v56, 1  ;;  %2293 = vrot.lane.b32.xlu0 %v2292_v60, %s2533_s4  ;;  %v2297_v16 = vpack.i.bf16 %v715_v57, %v3063_v55 }
  0xfd   :  { %v511_v4 = vmax.f32 %v495_v58, 0.0  ;;  %v473_v5 = vmul.f32 %v2971_v47, %v408_v59  ;;  %v2016_v6 = vadd.f32 %v2015_v62, %v2014_v52  ;;  %v3079_v9 = vsel %vm712_vm4, %v719_v61, %v720_v0  ;;  %v3153_v0 = vpop.f32.mrf.mxu1 }
  0xfe   :  { %v3076_v7 = vld [vmem:[#allocation2 + $0x30] sm:$0xff]  ;;  %v2017_v8 = vpop.f32.mrf.mxu0  ;;  %v3082_v10 = vsel %vm663_vm3, %v670_v1, %v671_v2  ;;  %v598_v11 = vld [vmem:[#allocation2 + $0x38] sm:$0x3]  ;;  %2224 = vmatprep.mubr.msk.f32.mxu0 %vm122_vm0, %v3079_v9  ;;  %v2307_v29 = vpack.i.bf16 %v3093_v20, %v3079_v9  ;;  %v3159_v1 = vld [vmem:[%s3923_s8] sm:$0xff] }
  0xff   :  { %579 = vst.msk [vmem:[#allocation2 + $0x51] sm:$0xff] %vm122_vm0, %v511_v4  ;;  %v496_v12 = vadd.f32 %v2982_v51, %v473_v5  ;;  %v413_v14 = vadd.f32 %v2016_v6, %v412_v63  ;;  %v2302_v15 = vpack.i.bf16 %v3025_v30, %v3082_v10  ;;  %v722_v18 = vrot.slane %v3076_v7, 2 }
 0x100   :  { %v2018_v17 = vpop.f32.mrf.mxu0  ;;  %v723_v19 = vrot.slane %v598_v11, 2  ;;  %v673_v21 = vrot.slane %v3076_v7, 1  ;;  %2298 = vrot.lane.b32.xlu0 %v2297_v16, %s2535_s20  ;;  %v674_v26 = vrot.slane %v598_v11, 1  ;;  %v2312_v27 = vpack.i.bf16 %v3061_v54, %v3076_v7 }
 0x101   :  { %v512_v23 = vmax.f32 %v496_v12, 0.0  ;;  %v474_v24 = vmul.f32 %v2971_v47, %v413_v14  ;;  %v2019_v25 = vadd.f32 %v2018_v17, %v2017_v8  ;;  %2303 = vrot.lane.b32.xlu1 %v2302_v15, %s2534_s19 }
 0x102   :  { %v3104_v28 = vsel %vm712_vm4, %v722_v18, %v723_v19  ;;  %v3108_v31 = vld [vmem:[#allocation2 + $0x40] sm:$0xff]  ;;  %v600_v32 = vld [vmem:[#allocation2 + $0x48] sm:$0x3]  ;;  %v2020_v33 = vpop.f32.mrf.mxu0  ;;  %v3122_v41 = vsel %vm663_vm3, %v673_v21, %v674_v26  ;;  %v3189_v26 = vld [vmem:[#allocation2 + $0x90] sm:$0xff] }
 0x103   :  { %580 = vst.msk [vmem:[#allocation2 + $0x61] sm:$0xff] %vm122_vm0, %v512_v23  ;;  %v497_v34 = vadd.f32 %v2982_v51, %v474_v24  ;;  %v418_v35 = vadd.f32 %v3047_v42, %v2019_v25  ;;  %2225 = vmatmul.mubr.msk.f32.vlgmr.msra.gmra.mxu0 %vm122_vm0, %v3104_v28  ;;  %v677_v36 = vrot.slane %v600_v32, 1  ;;  %v725_v37 = vrot.slane %v3108_v31, 2  ;;  %v432_v23 = vpop.f32.mrf.mxu1 }
 0x104   :  { %v726_v40 = vrot.slane %v600_v32, 2  ;;  %v2021_v43 = vpop.f32.mrf.mxu0  ;;  %v676_v44 = vrot.slane %v3108_v31, 1  ;;  %2249 = vmatpush3.msra.mxu0 %v3042_v39  ;;  %2313 = vrot.lane.b32.xlu0 %v2312_v27, %s2535_s20  ;;  %v2322_v52 = vpack.i.bf16 %v3082_v10, %v3104_v28  ;;  %v2317_v58 = vpack.i.bf16 %v3063_v55, %v3122_v41  ;;  %v3191_v27 = vld [vmem:[#allocation2 + $0x98] sm:$0x3] }
 0x105   :  { %v513_v42 = vmax.f32 %v497_v34, 0.0  ;;  %v475_v46 = vmul.f32 %v2971_v47, %v418_v35  ;;  %2308 = vrot.lane.b32.xlu1 %v2307_v29, %s2533_s4  ;;  %v2022_v48 = vadd.f32 %v2021_v43, %v2020_v33  ;;  %2250 = vmatprep.subr.mxu0 %v3119_v38  ;;  %v2327_v3 = vpack.i.bf16 %v3079_v9, %v3108_v31 }
 0x106   :  { %v3135_v50 = vsel %vm712_vm4, %v725_v37, %v726_v40  ;;  %v2023_v53 = vpop.f32.mrf.mxu0  ;;  %v3139_v54 = vld [vmem:[#allocation2 + $0x50] sm:$0xff]  ;;  %v602_v56 = vld [vmem:[#allocation2 + $0x58] sm:$0x3]  ;;  %v3149_v59 = vsel %vm663_vm3, %v676_v44, %v677_v36  ;;  %2251 = vmatpush3.msra.mxu0 %v3119_v38  ;;  %v803_v36 = vrot.slane %v3189_v26, 2  ;;  %v804_v37 = vrot.slane %v3191_v27, 2 }
 0x107   :  { %581 = vst.msk [vmem:[#allocation2 + $0x71] sm:$0xff] %vm122_vm0, %v513_v42  ;;  %v498_v57 = vadd.f32 %v2982_v51, %v475_v46  ;;  %2227 = vmatprep.mubr.msk.f32.mxu0 %vm122_vm0, %v3135_v50  ;;  %v728_v60 = vrot.slane %v3139_v54, 2  ;;  %v729_v62 = vrot.slane %v602_v56, 2  ;;  %v423_v63 = vadd.f32 %v2022_v48, %v422_v45  ;;  %2252 = vmatprep.subr.mxu0 %v3132_v49 }
 0x108   :  { %v2024_v61 = vpop.f32.mrf.mxu0  ;;  %2323 = vrot.lane.b32.xlu0 %v2322_v52, %s2533_s4  ;;  %v2332_v5 = vpack.i.bf16 %v3076_v7, %v3149_v59  ;;  %v680_v6 = vrot.slane %v602_v56, 1  ;;  %2253 = vmatpush3.msra.mxu0 %v3132_v49  ;;  %v679_v18 = vrot.slane %v3139_v54, 1  ;;  %v2342_v32 = vpack.i.bf16 %v3104_v28, %v3139_v54 }
 0x109   :  { %v514_v2 = vmax.f32 %v498_v57, 0.0  ;;  %2318 = vrot.lane.b32.xlu1 %v2317_v58, %s2534_s19  ;;  %v2025_v4 = vadd.f32 %v2024_v61, %v2023_v53  ;;  %v3168_v8 = vsel %vm712_vm4, %v728_v60, %v729_v62  ;;  %v476_v12 = vmul.f32 %v2971_v47, %v423_v63  ;;  %2254 = vmatprep.subr.mxu0 %v3159_v1  ;;  %v2212_v53 = vpop.f32.mrf.mxu1 }
 0x10a   :  { %v2026_v11 = vpop.f32.mrf.mxu0  ;;  %v3171_v14 = vld [vmem:[#allocation2 + $0x60] sm:$0xff]  ;;  %v604_v15 = vld [vmem:[#allocation2 + $0x68] sm:$0x3]  ;;  %2228 = vmatmul.mubr.msk.f32.gmra.mxu0 %vm122_vm0, %v3168_v8  ;;  %v2337_v43 = vpack.i.bf16 %v3122_v41, %v3135_v50  ;;  %v3207_v45 = vsel %vm663_vm3, %v679_v18, %v680_v6  ;;  %v2352_v60 = vpack.i.bf16 %v3149_v59, %v3168_v8 }
 0x10b   :  { %582 = vst.msk [vmem:[#allocation2 + $0x81] sm:$0xff] %vm122_vm0, %v514_v2  ;;  %v428_v9 = vadd.f32 %v3096_v22, %v2025_v4  ;;  %v731_v16 = vrot.slane %v3171_v14, 2  ;;  %v732_v17 = vrot.slane %v604_v15, 2  ;;  %v499_v19 = vadd.f32 %v2982_v51, %v476_v12  ;;  %2255 = vmatpush3.msra.mxu0 %v3159_v1 }
 0x10c   :  { %v2027_v21 = vpop.f32.mrf.mxu0  ;;  %2333 = vrot.lane.b32.xlu0 %v2332_v5, %s2534_s19  ;;  %v683_v28 = vrot.slane %v604_v15, 1  ;;  %v682_v46 = vrot.slane %v3171_v14, 1  ;;  %v2347_v61 = vpack.i.bf16 %v3108_v31, %v3207_v45 }
 0x10d   :  { %2328 = vrot.lane.b32.xlu1 %v2327_v3, %s2535_s20  ;;  %v477_v22 = vmul.f32 %v2971_v47, %v428_v9  ;;  %v3187_v24 = vsel %vm712_vm4, %v731_v16, %v732_v17  ;;  %v2028_v25 = vadd.f32 %v2027_v21, %v2026_v11  ;;  %v515_v29 = vmax.f32 %v499_v19, 0.0  ;;  %v442_v9 = vpop.f32.mrf.mxu1 }
 0x10e   :  { %2230 = vmatprep.mubr.msk.f32.mxu0 %vm122_vm0, %v3187_v24  ;;  %v2029_v33 = vpop.f32.mrf.mxu0  ;;  %v3197_v34 = vld [vmem:[#allocation2 + $0x70] sm:$0xff]  ;;  %v3199_v35 = vld [vmem:[#allocation2 + $0x78] sm:$0x3]  ;;  %v3235_v12 = vsel %vm663_vm3, %v682_v46, %v683_v28  ;;  %v805_v16 = vsel %vm712_vm4, %v803_v36, %v804_v37 }
 0x10f   :  { %v500_v40 = vadd.f32 %v2982_v51, %v477_v22  ;;  %v433_v44 = vadd.f32 %v2028_v25, %v432_v23  ;;  %583 = vst.msk [vmem:[#allocation2 + $0xb1] sm:$0xff] %vm122_vm0, %v515_v29  ;;  %v734_v48 = vrot.slane %v3197_v34, 2  ;;  %v735_v52 = vrot.slane %v3199_v35, 2  ;;  %v2215_v37 = vpop.f32.mrf.mxu1 }
 0x110   :  { %v2030_v42 = vpop.f32.mrf.mxu0  ;;  %2343 = vrot.lane.b32.xlu0 %v2342_v32, %s2535_s20  ;;  %v2362_v22 = vpack.i.bf16 %v3139_v54, %v3235_v12  ;;  %v2357_v25 = vpack.i.bf16 %v3135_v50, %v3171_v14  ;;  %v686_v32 = vrot.slane %v3199_v35, 1  ;;  %v2372_v50 = vpack.i.bf16 %v3168_v8, %v3197_v34 }
 0x111   :  { %v516_v56 = vmax.f32 %v500_v40, 0.0  ;;  %2338 = vrot.lane.b32.xlu1 %v2337_v43, %s2533_s4  ;;  %v478_v57 = vmul.f32 %v2971_v47, %v433_v44  ;;  %v2031_v58 = vadd.f32 %v2030_v42, %v2029_v33  ;;  %v3221_v63 = vsel %vm712_vm4, %v734_v48, %v735_v52  ;;  %v452_v8 = vpop.f32.mrf.mxu1 }
 0x112   :  { %v2032_v62 = vpop.f32.mrf.mxu0  ;;  %v3223_v2 = vld [vmem:[#allocation2 + $0x80] sm:$0xff]  ;;  %v3225_v3 = vld [vmem:[#allocation2 + $0x88] sm:$0x3]  ;;  %2231 = vmatmul.mubr.msk.f32.gmra.mxu0 %vm122_vm0, %v3221_v63  ;;  %v685_v33 = vrot.slane %v3197_v34, 1  ;;  %v2367_v35 = vpack.i.bf16 %v3207_v45, %v3187_v24 }
 0x113   :  { %584 = vst.msk [vmem:[#allocation2 + $0xc1] sm:$0xff] %vm122_vm0, %v516_v56  ;;  %v501_v4 = vadd.f32 %v2982_v51, %v478_v57  ;;  %v438_v5 = vadd.f32 %v3153_v0, %v2031_v58  ;;  %v787_v6 = vrot.slane %v3223_v2, 2  ;;  %v788_v11 = vrot.slane %v3225_v3, 2 }
 0x114   :  { %v2033_v15 = vpop.f32.mrf.mxu0  ;;  %2353 = vrot.lane.b32.xlu0 %v2352_v60, %s2533_s4  ;;  %v3270_v57 = vsel %vm663_vm3, %v685_v33, %v686_v32  ;;  %v612_v32 = vld [vmem:[#allocation2 + $0xa8] sm:$0x3] }
 0x115   :  { %v517_v17 = vmax.f32 %v501_v4, 0.0  ;;  %2348 = vrot.lane.b32.xlu1 %v2347_v61, %s2534_s19  ;;  %v479_v0 = vmul.f32 %v2971_v47, %v438_v5  ;;  %v2034_v18 = vadd.f32 %v2033_v15, %v2032_v62  ;;  %v3242_v19 = vsel %vm712_vm4, %v787_v6, %v788_v11 }
 0x116   :  { %2233 = vmatprep.mubr.msk.f32.mxu0 %vm122_vm0, %v3242_v19  ;;  %v2035_v21 = vpop.f32.mrf.mxu0  ;;  %v797_v5 = vrot.slane %v3189_v26, 1  ;;  %v798_v6 = vrot.slane %v3191_v27, 1  ;;  %v3294_v27 = vld [vmem:[#allocation2 + $0xb8] sm:$0x3] }
 0x117   :  { %585 = vst.msk [vmem:[#allocation2 + $0xd1] sm:$0xff] %vm122_vm0, %v517_v17  ;;  %v502_v23 = vadd.f32 %v2982_v51, %v479_v0  ;;  %v443_v29 = vadd.f32 %v2034_v18, %v442_v9  ;;  %2234 = vmatmul.mubr.msk.f32.gmra.mxu0 %vm122_vm0, %v805_v16  ;;  %v3283_v9 = vld [vmem:[#allocation2 + $0xb0] sm:$0xff]  ;;  %v2382_v17 = vpack.i.bf16 %v3235_v12, %v3221_v63 }
 0x118   :  { %v2036_v36 = vpop.f32.mrf.mxu0  ;;  %2363 = vrot.lane.b32.xlu0 %v2362_v22, %s2534_s19  ;;  %v2377_v0 = vpack.i.bf16 %v3171_v14, %v3270_v57 }
 0x119   :  { %v518_v40 = vmax.f32 %v502_v23, 0.0  ;;  %2358 = vrot.lane.b32.xlu1 %v2357_v25, %s2535_s20  ;;  %v480_v43 = vmul.f32 %v2971_v47, %v443_v29  ;;  %v2037_v44 = vadd.f32 %v2036_v36, %v2035_v21  ;;  %v765_v25 = vrot.slane %v3223_v2, 1 }
 0x11a   :  { %v2038_v28 = vpop.f32.mrf.mxu0  ;;  %v3260_v42 = vld [vmem:[#allocation2 + $0xc0] sm:$0xff]  ;;  %v3266_v52 = vld [vmem:[#allocation2 + $0xc8] sm:$0x3]  ;;  %v766_v29 = vrot.slane %v3225_v3, 1  ;;  %v740_v3 = vrot.slane %v3283_v9, 2 }
 0x11b   :  { %586 = vst.msk [vmem:[#allocation2 + $0xe1] sm:$0xff] %vm122_vm0, %v518_v40  ;;  %v503_v46 = vadd.f32 %v2982_v51, %v480_v43  ;;  %v448_v48 = vadd.f32 %v2212_v53, %v2037_v44  ;;  %v743_v56 = vrot.slane %v3260_v42, 2  ;;  %v744_v60 = vrot.slane %v3266_v52, 2  ;;  %v3276_v53 = vld [vmem:[#allocation2 + $0xa0] sm:$0xff] }
 0x11c   :  { %v2039_v58 = vpop.f32.mrf.mxu0  ;;  %2373 = vrot.lane.b32.xlu0 %v2372_v50, %s2535_s20  ;;  %v688_v16 = vrot.slane %v3276_v53, 1  ;;  %v689_v50 = vrot.slane %v612_v32, 1 }
 0x11d   :  { %2368 = vrot.lane.b32.xlu1 %v2367_v35, %s2533_s4  ;;  %v519_v61 = vmax.f32 %v503_v46, 0.0  ;;  %v481_v62 = vmul.f32 %v2971_v47, %v448_v48  ;;  %v2040_v4 = vadd.f32 %v2039_v58, %v2038_v28  ;;  %v3281_v15 = vsel %vm712_vm4, %v743_v56, %v744_v60 }
 0x11e   :  { %v2041_v11 = vpop.f32.mrf.mxu0  ;;  %2236 = vmatprep.mubr.msk.f32.mxu0 %vm122_vm0, %v3281_v15  ;;  %v3296_v23 = vld [vmem:[#allocation2 + $0xd0] sm:$0xff]  ;;  %v3298_v22 = vld [vmem:[#allocation2 + $0xd8] sm:$0x3]  ;;  %v2387_v35 = vpack.i.bf16 %v3221_v63, %v3189_v26  ;;  %v741_v46 = vrot.slane %v3294_v27, 2  ;;  %v2392_v58 = vpack.i.bf16 %v3187_v24, %v3223_v2 }
 0x11f   :  { %587 = vst.msk [vmem:[#allocation2 + $0xf1] sm:$0xff] %vm122_vm0, %v519_v61  ;;  %v504_v18 = vadd.f32 %v2982_v51, %v481_v62  ;;  %v453_v21 = vadd.f32 %v2040_v4, %v452_v8  ;;  %v746_v36 = vrot.slane %v3296_v23, 2  ;;  %v747_v40 = vrot.slane %v3298_v22, 2 }
 0x120   :  { %v2042_v33 = vpop.f32.mrf.mxu0  ;;  %2383 = vrot.lane.b32.xlu0 %v2382_v17, %s2533_s4  ;;  %v3326_v61 = vsel %vm663_vm3, %v765_v25, %v766_v29  ;;  %v799_v62 = vsel %vm663_vm3, %v797_v5, %v798_v6  ;;  %v3335_v17 = vsel %vm712_vm4, %v740_v3, %v741_v46  ;;  %v695_v29 = vrot.slane %v3266_v52, 1 }
 0x121   :  { %2378 = vrot.lane.b32.xlu1 %v2377_v0, %s2534_s19  ;;  %v520_v43 = vmax.f32 %v504_v18, 0.0  ;;  %v482_v44 = vmul.f32 %v2971_v47, %v453_v21  ;;  %v2043_v28 = vadd.f32 %v2042_v33, %v2041_v11  ;;  %v3312_v48 = vsel %vm712_vm4, %v746_v36, %v747_v40 }
 0x122   :  { %v3314_v56 = vld [vmem:[#allocation2 + $0xe0] sm:$0xff]  ;;  %2237 = vmatmul.mubr.msk.f32.gmra.mxu0 %vm122_vm0, %v3312_v48  ;;  %v3322_v26 = vld [vmem:[#allocation2 + $0xe8] sm:$0x3]  ;;  %v690_v11 = vsel %vm663_vm3, %v688_v16, %v689_v50  ;;  %v737_v0 = vrot.slane %v3276_v53, 2  ;;  %v2402_v6 = vpack.i.bf16 %v3197_v34, %v3326_v61  ;;  %v2397_v21 = vpack.i.bf16 %v3223_v2, %v799_v62 }
 0x123   :  { %588 = vst.msk [vmem:[#allocation2 + $0x101] sm:$0xff] %vm122_vm0, %v520_v43  ;;  %v505_v8 = vadd.f32 %v2982_v51, %v482_v44  ;;  %v458_v60 = vadd.f32 %v2215_v37, %v2043_v28  ;;  %v749_v63 = vrot.slane %v3314_v56, 2  ;;  %v750_v4 = vrot.slane %v3322_v26, 2 }
 0x124   :  { %2388 = vrot.lane.b32.xlu0 %v2387_v35, %s2535_s20  ;;  %v694_v33 = vrot.slane %v3260_v42, 1  ;;  %v738_v36 = vrot.slane %v612_v32, 2  ;;  %v2407_v52 = vpack.i.bf16 %v3270_v57, %v3242_v19  ;;  %v691_v46 = vrot.slane %v3283_v9, 1 }
 0x125   :  { %2393 = vrot.lane.b32.xlu1 %v2392_v58, %s2535_s20  ;;  %v521_v24 = vmax.f32 %v505_v8, 0.0  ;;  %v483_v37 = vmul.f32 %v2971_v47, %v458_v60  ;;  %v3339_v18 = vsel %vm712_vm4, %v749_v63, %v750_v4  ;;  %v692_v58 = vrot.slane %v3294_v27, 1  ;;  %v3384_v8 = vld [vmem:[#allocation2 + $0x130] sm:$0xff] }
 0x126   :  { %v3341_v5 = vld [vmem:[#allocation2 + $0xf0] sm:$0xff]  ;;  %2239 = vmatprep.mubr.msk.f32.mxu0 %vm122_vm0, %v3339_v18  ;;  %v3350_v16 = vld [vmem:[#allocation2 + $0xf8] sm:$0x3]  ;;  %v3374_v35 = vsel %vm663_vm3, %v694_v33, %v695_v29  ;;  %v739_v3 = vsel %vm712_vm4, %v737_v0, %v738_v36  ;;  %v806_v62 = vrot.slane %v3384_v8, 2  ;;  %v698_v0 = vrot.slane %v3298_v22, 1 }
 0x127   :  { %589 = vst.msk [vmem:[#allocation2 + $0x111] sm:$0xff] %vm122_vm0, %v521_v24  ;;  %v506_v47 = vadd.f32 %v2982_v51, %v483_v37  ;;  %v752_v25 = vrot.slane %v3341_v5, 2  ;;  %v753_v40 = vrot.slane %v3350_v16, 2  ;;  %v2412_v51 = vpack.i.bf16 %v690_v11, %v3335_v17  ;;  %v3398_v11 = vld [vmem:[#allocation2 + $0x138] sm:$0x3] }
 0x128   :  { %2403 = vrot.lane.b32.xlu0 %v2402_v6, %s2534_s19  ;;  %v2422_v27 = vpack.i.bf16 %v3283_v9, %v3374_v35  ;;  %v2417_v4 = vpack.i.bf16 %v739_v3, %v3260_v42  ;;  %v3402_v6 = vsel %vm663_vm3, %v691_v46, %v692_v58  ;;  %v2432_v33 = vpack.i.bf16 %v3335_v17, %v3296_v23  ;;  %v1553_v3 = vld [vmem:[%s3924_s7] sm:$0xff] }
 0x129   :  { %2398 = vrot.lane.b32.xlu1 %v2397_v21, %s2534_s19  ;;  %v522_v2 = vmax.f32 %v506_v47, 0.0  ;;  %v3360_v43 = vsel %vm712_vm4, %v752_v25, %v753_v40  ;;  %v697_v21 = vrot.slane %v3296_v23, 1  ;;  %v807_v47 = vrot.slane %v3398_v11, 2 }
 0x12a   :  { %v3362_v44 = vld [vmem:[#allocation2 + $0x100] sm:$0xff]  ;;  %v3364_v50 = vld [vmem:[#allocation2 + $0x108] sm:$0x3]  ;;  %2240 = vmatmul.mubr.msk.f32.gmra.mxu0 %vm122_vm0, %v3360_v43  ;;  %v2427_v36 = vpack.i.bf16 %v3402_v6, %v3281_v15 }
 0x12b   :  { %590 = vst.msk [vmem:[#allocation2 + $0x121] sm:$0xff] %vm122_vm0, %v522_v2  ;;  %v755_v32 = vrot.slane %v3362_v44, 2  ;;  %v756_v28 = vrot.slane %v3364_v50, 2  ;;  %v701_v2 = vrot.slane %v3322_v26, 1  ;;  %v2442_v26 = vpack.i.bf16 %v3374_v35, %v3312_v48 }
 0x12c   :  { %2413 = vrot.lane.b32.xlu0 %v2412_v51, %s2533_s4 }
 0x12d   :  { %2408 = vrot.lane.b32.xlu1 %v2407_v52, %s2533_s4  ;;  %v3382_v19 = vsel %vm712_vm4, %v755_v32, %v756_v28  ;;  %v3422_v52 = vsel %vm663_vm3, %v697_v21, %v698_v0  ;;  %v700_v32 = vrot.slane %v3314_v56, 1  ;;  %v808_v28 = vsel %vm712_vm4, %v806_v62, %v807_v47  ;;  %v1554_v62 = vld [vmem:[%s3924_s7 + $0x8] sm:$0xff] }
 0x12e   :  { %2242 = vmatprep.mubr.msk.f32.mxu0 %vm122_vm0, %v3382_v19  ;;  %v3388_v60 = vld [vmem:[#allocation2 + $0x110] sm:$0xff]  ;;  %v3390_v63 = vld [vmem:[#allocation2 + $0x118] sm:$0x3]  ;;  %v2437_v46 = vpack.i.bf16 %v3260_v42, %v3422_v52  ;;  %v2462_v0 = vpack.i.bf16 %v3312_v48, %v3341_v5  ;;  %v2457_v21 = vpack.i.bf16 %v3422_v52, %v3339_v18  ;;  %v707_v47 = vrot.slane %v3364_v50, 1 }
 0x12f   :  { %v758_v24 = vrot.slane %v3388_v60, 2  ;;  %v759_v37 = vrot.slane %v3390_v63, 2  ;;  %v3439_v58 = vsel %vm663_vm3, %v700_v32, %v701_v2  ;;  %v709_v2 = vrot.slane %v3388_v60, 1 }
 0x130   :  { %2423 = vrot.lane.b32.xlu0 %v2422_v27, %s2534_s19  ;;  %v2452_v27 = vpack.i.bf16 %v3296_v23, %v3439_v58  ;;  %v2492_v32 = vpack.i.bf16 %v3360_v43, %v3388_v60 }
 0x131   :  { %2418 = vrot.lane.b32.xlu1 %v2417_v4, %s2535_s20  ;;  %v3409_v25 = vsel %vm712_vm4, %v758_v24, %v759_v37  ;;  %v2447_v4 = vpack.i.bf16 %v3281_v15, %v3314_v56  ;;  %v704_v24 = vrot.slane %v3350_v16, 1  ;;  %v703_v37 = vrot.slane %v3341_v5, 1 }
 0x132   :  { %2243 = vmatmul.mubr.msk.f32.gmra.mxu0 %vm122_vm0, %v3409_v25  ;;  %v3413_v29 = vld [vmem:[#allocation2 + $0x120] sm:$0xff]  ;;  %v628_v22 = vld [vmem:[#allocation2 + $0x128] sm:$0x3]  ;;  %v2472_v16 = vpack.i.bf16 %v3439_v58, %v3360_v43 }
 0x133   :  { %v790_v40 = vrot.slane %v3413_v29, 2  ;;  %v791_v51 = vrot.slane %v628_v22, 2  ;;  %v3462_v15 = vsel %vm663_vm3, %v703_v37, %v704_v24  ;;  %v2522_v24 = vpack.i.bf16 %v3409_v25, %v3384_v8 }
 0x134   :  { %2433 = vrot.lane.b32.xlu0 %v2432_v33, %s2535_s20  ;;  %v706_v33 = vrot.slane %v3362_v44, 1  ;;  %v2467_v48 = vpack.i.bf16 %v3314_v56, %v3462_v15 }
 0x135   :  { %2428 = vrot.lane.b32.xlu1 %v2427_v36, %s2533_s4  ;;  %v792_v17 = vsel %vm712_vm4, %v790_v40, %v791_v51  ;;  %v2477_v40 = vpack.i.bf16 %v3339_v18, %v3362_v44  ;;  %v710_v51 = vrot.slane %v3390_v63, 1  ;;  %v769_v18 = vrot.slane %v628_v22, 1 }
 0x136   :  { %2245 = vmatprep.mubr.msk.f32.mxu0 %vm122_vm0, %v792_v17  ;;  %v3472_v36 = vsel %vm663_vm3, %v706_v33, %v707_v47 }
 0x137   :  { %2246 = vmatmul.mubr.msk.f32.gmra.mxu0 %vm122_vm0, %v808_v28  ;;  %v2482_v50 = vpack.i.bf16 %v3341_v5, %v3472_v36  ;;  %v2487_v28 = vpack.i.bf16 %v3462_v15, %v3382_v19  ;;  %v2502_v63 = vpack.i.bf16 %v3472_v36, %v3409_v25 }
 0x138   :  { %2256 = vmatprep.mubr.msk.f32.mxu0 %vm122_vm0, %v1553_v3  ;;  %2443 = vrot.lane.b32.xlu0 %v2442_v26, %s2533_s4  ;;  %v3489_v3 = vsel %vm663_vm3, %v709_v2, %v710_v51  ;;  %v768_v26 = vrot.slane %v3413_v29, 1 }
 0x139   :  { %2438 = vrot.lane.b32.xlu1 %v2437_v46, %s2534_s19  ;;  %v2497_v46 = vpack.i.bf16 %v3362_v44, %v3489_v3  ;;  %v2517_v37 = vpack.i.bf16 %v3489_v3, %v792_v17 }
 0x13a   :  { %v3499_v43 = vsel %vm663_vm3, %v768_v26, %v769_v18 }
 0x13b   :  { %2257 = vmatmul.mubr.msk.f32.vlgmr.msra.gmra.mxu0 %vm122_vm0, %v1554_v62  ;;  %v2512_v22 = vpack.i.bf16 %v3388_v60, %v3499_v43  ;;  %v2507_v62 = vpack.i.bf16 %v3382_v19, %v3413_v29 }
 0x13c   :  { %2453 = vrot.lane.b32.xlu0 %v2452_v27, %s2534_s19  ;;  %v800_v27 = vrot.slane %v3384_v8, 1 }
 0x13d   :  { %2448 = vrot.lane.b32.xlu1 %v2447_v4, %s2535_s20  ;;  %v801_v4 = vrot.slane %v3398_v11, 1 }
 0x140   :  { %2463 = vrot.lane.b32.xlu0 %v2462_v0, %s2535_s20  ;;  %v802_v0 = vsel %vm663_vm3, %v800_v27, %v801_v4 }
 0x141   :  { %2458 = vrot.lane.b32.xlu1 %v2457_v21, %s2533_s4  ;;  %v2527_v19 = vpack.i.bf16 %v3413_v29, %v802_v0 }
 0x144   :  { %2473 = vrot.lane.b32.xlu0 %v2472_v16, %s2533_s4 }
 0x145   :  { %2468 = vrot.lane.b32.xlu1 %v2467_v48, %s2534_s19 }
 0x148   :  { %2483 = vrot.lane.b32.xlu0 %v2482_v50, %s2534_s19 }
 0x149   :  { %2478 = vrot.lane.b32.xlu1 %v2477_v40, %s2535_s20 }
 0x14c   :  { %2493 = vrot.lane.b32.xlu0 %v2492_v32, %s2535_s20 }
 0x14d   :  { %2488 = vrot.lane.b32.xlu1 %v2487_v28, %s2533_s4 }
 0x150   :  { %2503 = vrot.lane.b32.xlu0 %v2502_v63, %s2533_s4 }
 0x151   :  { %2498 = vrot.lane.b32.xlu1 %v2497_v46, %s2534_s19 }
 0x154   :  { %2513 = vrot.lane.b32.xlu0 %v2512_v22, %s2534_s19 }
 0x155   :  { %2508 = vrot.lane.b32.xlu1 %v2507_v62, %s2535_s20 }
 0x158   :  { %2523 = vrot.lane.b32.xlu0 %v2522_v24, %s2535_s20 }
 0x159   :  { %2518 = vrot.lane.b32.xlu1 %v2517_v37, %s2533_s4 }
 0x15d   :  { %2528 = vrot.lane.b32.xlu1 %v2527_v19, %s2534_s19 }
 0x16e   :  { %v2294_v11 = vpop.permute.xlu0 %2293 }
 0x16f   :  { %v2296_v21 = vunpack.i.h.bf16 %v2294_v11  ;;  %v2295_v47 = vunpack.i.l.bf16 %v2294_v11 }
 0x171   :  { %v1097_v50 = vsel %vm122_vm0, %v3007_v13, %v2296_v21  ;;  %v1147_v40 = vsel %vm122_vm0, %v3093_v20, %v2295_v47 }
 0x172   :  { %v2299_v16 = vpop.permute.xlu0 %2298 }
 0x173   :  { %v2304_v33 = vpop.permute.xlu1 %2303  ;;  %v2301_v17 = vunpack.i.h.bf16 %v2299_v16  ;;  %v2300_v48 = vunpack.i.l.bf16 %v2299_v16 }
 0x174   :  { %v2306_v8 = vunpack.i.h.bf16 %v2304_v33  ;;  %v2305_v25 = vunpack.i.l.bf16 %v2304_v33 }
 0x175   :  { %v1114_v29 = vsel %vm1113_vm5, %v1097_v50, %v2301_v17  ;;  %v1163_v51 = vsel %vm1113_vm5, %v1147_v40, %v2300_v48 }
 0x176   :  { %v2314_v2 = vpop.permute.xlu0 %2313  ;;  %v1179_v28 = vsel %vm1130_vm6, %v1163_v51, %v2305_v25  ;;  %v1131_v26 = vsel %vm1130_vm6, %v1114_v29, %v2306_v8 }
 0x177   :  { %v2309_v32 = vpop.permute.xlu1 %2308  ;;  %1327 = vmatprep.mubr.f32.mxu1 %v1179_v28  ;;  %v2316_v46 = vunpack.i.h.bf16 %v2314_v2  ;;  %v2315_v22 = vunpack.i.l.bf16 %v2314_v2 }
 0x178   :  { %v2311_v18 = vunpack.i.h.bf16 %v2309_v32  ;;  %v2310_v63 = vunpack.i.l.bf16 %v2309_v32  ;;  %1328 = vmatmul.mubr.f32.vlgmr.msra.gmra.mxu1 %v1131_v26 }
 0x179   :  { %2284 = vmatpush3.msra.mxu1 %v3042_v39 }
 0x17a   :  { %v1148_v13 = vsel %vm122_vm0, %v3082_v10, %v2310_v63  ;;  %v1098_v20 = vsel %vm122_vm0, %v3025_v30, %v2311_v18  ;;  %v2324_v62 = vpop.permute.xlu0 %2323  ;;  %2281 = vmatprep.subr.mxu1 %v3119_v38 }
 0x17b   :  { %v2319_v27 = vpop.permute.xlu1 %2318  ;;  %2285 = vmatpush3.msra.mxu1 %v3119_v38  ;;  %v2326_v37 = vunpack.i.h.bf16 %v2324_v62  ;;  %v2325_v0 = vunpack.i.l.bf16 %v2324_v62  ;;  %v1164_v19 = vsel %vm1113_vm5, %v1148_v13, %v2315_v22  ;;  %v1115_v11 = vsel %vm1113_vm5, %v1098_v20, %v2316_v46 }
 0x17c   :  { %v2321_v4 = vunpack.i.h.bf16 %v2319_v27  ;;  %v2320_v24 = vunpack.i.l.bf16 %v2319_v27  ;;  %2282 = vmatprep.subr.mxu1 %v3132_v49 }
 0x17d   :  { %2286 = vmatpush3.msra.mxu1 %v3132_v49  ;;  %v1149_v8 = vsel %vm122_vm0, %v3122_v41, %v2325_v0  ;;  %v1099_v25 = vsel %vm122_vm0, %v3063_v55, %v2326_v37 }
 0x17e   :  { %v1180_v30 = vsel %vm1130_vm6, %v1164_v19, %v2320_v24  ;;  %v1132_v39 = vsel %vm1130_vm6, %v1115_v11, %v2321_v4  ;;  %v2334_v10 = vpop.permute.xlu0 %2333  ;;  %2283 = vmatprep.subr.mxu1 %v3159_v1 }
 0x17f   :  { %v2329_v21 = vpop.permute.xlu1 %2328  ;;  %1332 = vmatprep.mubr.f32.mxu1 %v1180_v30  ;;  %v2336_v38 = vunpack.i.h.bf16 %v2334_v10  ;;  %v2335_v47 = vunpack.i.l.bf16 %v2334_v10  ;;  %2287 = vmatpush3.msra.mxu1 %v3159_v1 }
 0x180   :  { %v2331_v33 = vunpack.i.h.bf16 %v2329_v21  ;;  %v2330_v16 = vunpack.i.l.bf16 %v2329_v21  ;;  %1333 = vmatmul.mubr.f32.gmra.mxu1 %v1132_v39 }
 0x182   :  { %v1165_v49 = vsel %vm1113_vm5, %v1149_v8, %v2330_v16  ;;  %v1116_v17 = vsel %vm1113_vm5, %v1099_v25, %v2331_v33  ;;  %v2344_v48 = vpop.permute.xlu0 %2343 }
 0x183   :  { %v2339_v50 = vpop.permute.xlu1 %2338  ;;  %v1181_v40 = vsel %vm1130_vm6, %v1165_v49, %v2335_v47  ;;  %v1133_v29 = vsel %vm1130_vm6, %v1116_v17, %v2336_v38  ;;  %v2346_v32 = vunpack.i.h.bf16 %v2344_v48  ;;  %v2345_v41 = vunpack.i.l.bf16 %v2344_v48 }
 0x184   :  { %v2341_v51 = vunpack.i.h.bf16 %v2339_v50  ;;  %v2340_v2 = vunpack.i.l.bf16 %v2339_v50  ;;  %1337 = vmatprep.mubr.f32.mxu1 %v1181_v40 }
 0x185   :  { %1338 = vmatmul.mubr.f32.gmra.mxu1 %v1133_v29 }
 0x186   :  { %v1150_v55 = vsel %vm122_vm0, %v3149_v59, %v2340_v2  ;;  %v1100_v1 = vsel %vm122_vm0, %v3076_v7, %v2341_v51  ;;  %v2354_v28 = vpop.permute.xlu0 %2353 }
 0x187   :  { %v2349_v26 = vpop.permute.xlu1 %2348  ;;  %v2356_v46 = vunpack.i.h.bf16 %v2354_v28  ;;  %v2355_v22 = vunpack.i.l.bf16 %v2354_v28  ;;  %v1166_v13 = vsel %vm1113_vm5, %v1150_v55, %v2345_v41  ;;  %v1117_v20 = vsel %vm1113_vm5, %v1100_v1, %v2346_v32 }
 0x188   :  { %v2351_v18 = vunpack.i.h.bf16 %v2349_v26  ;;  %v2350_v63 = vunpack.i.l.bf16 %v2349_v26 }
 0x189   :  { %v1151_v19 = vsel %vm122_vm0, %v3207_v45, %v2355_v22  ;;  %v1101_v11 = vsel %vm122_vm0, %v3108_v31, %v2356_v46 }
 0x18a   :  { %v1182_v62 = vsel %vm1130_vm6, %v1166_v13, %v2350_v63  ;;  %v1134_v27 = vsel %vm1130_vm6, %v1117_v20, %v2351_v18  ;;  %v2364_v4 = vpop.permute.xlu0 %2363 }
 0x18b   :  { %v2359_v24 = vpop.permute.xlu1 %2358  ;;  %1342 = vmatprep.mubr.f32.mxu1 %v1182_v62  ;;  %v2366_v59 = vunpack.i.h.bf16 %v2364_v4  ;;  %v2365_v37 = vunpack.i.l.bf16 %v2364_v4 }
 0x18c   :  { %v2361_v7 = vunpack.i.h.bf16 %v2359_v24  ;;  %v2360_v0 = vunpack.i.l.bf16 %v2359_v24  ;;  %1343 = vmatmul.mubr.f32.gmra.mxu1 %v1134_v27 }
 0x18e   :  { %v1167_v30 = vsel %vm1113_vm5, %v1151_v19, %v2360_v0  ;;  %v1118_v39 = vsel %vm1113_vm5, %v1101_v11, %v2361_v7  ;;  %v2374_v10 = vpop.permute.xlu0 %2373 }
 0x18f   :  { %v2369_v21 = vpop.permute.xlu1 %2368  ;;  %v1183_v38 = vsel %vm1130_vm6, %v1167_v30, %v2365_v37  ;;  %v1135_v47 = vsel %vm1130_vm6, %v1118_v39, %v2366_v59  ;;  %v2376_v8 = vunpack.i.h.bf16 %v2374_v10  ;;  %v2375_v25 = vunpack.i.l.bf16 %v2374_v10 }
 0x190   :  { %v2371_v33 = vunpack.i.h.bf16 %v2369_v21  ;;  %v2370_v16 = vunpack.i.l.bf16 %v2369_v21  ;;  %1347 = vmatprep.mubr.f32.mxu1 %v1183_v38 }
 0x191   :  { %1348 = vmatmul.mubr.f32.gmra.mxu1 %v1135_v47 }
 0x192   :  { %v1152_v45 = vsel %vm122_vm0, %v3235_v12, %v2370_v16  ;;  %v1102_v31 = vsel %vm122_vm0, %v3139_v54, %v2371_v33  ;;  %v2384_v49 = vpop.permute.xlu0 %2383 }
 0x193   :  { %v2379_v17 = vpop.permute.xlu1 %2378  ;;  %v1168_v40 = vsel %vm1113_vm5, %v1152_v45, %v2375_v25  ;;  %v1119_v29 = vsel %vm1113_vm5, %v1102_v31, %v2376_v8  ;;  %v2386_v55 = vunpack.i.h.bf16 %v2384_v49  ;;  %v2385_v12 = vunpack.i.l.bf16 %v2384_v49 }
 0x194   :  { %v2381_v48 = vunpack.i.h.bf16 %v2379_v17  ;;  %v2380_v50 = vunpack.i.l.bf16 %v2379_v17 }
 0x195   :  { %v1153_v46 = vsel %vm122_vm0, %v3270_v57, %v2385_v12  ;;  %v1103_v22 = vsel %vm122_vm0, %v3171_v14, %v2386_v55 }
 0x196   :  { %v1184_v51 = vsel %vm1130_vm6, %v1168_v40, %v2380_v50  ;;  %v1136_v2 = vsel %vm1130_vm6, %v1119_v29, %v2381_v48  ;;  %v2389_v32 = vpop.permute.xlu0 %2388 }
 0x197   :  { %v2394_v41 = vpop.permute.xlu1 %2393  ;;  %1352 = vmatprep.mubr.f32.mxu1 %v1184_v51  ;;  %v2391_v7 = vunpack.i.h.bf16 %v2389_v32  ;;  %v2390_v0 = vunpack.i.l.bf16 %v2389_v32 }
 0x198   :  { %1353 = vmatmul.mubr.f32.gmra.mxu1 %v1136_v2  ;;  %v2396_v1 = vunpack.i.h.bf16 %v2394_v41  ;;  %v2395_v54 = vunpack.i.l.bf16 %v2394_v41 }
 0x19a   :  { %v2404_v28 = vpop.permute.xlu0 %2403  ;;  %v1169_v13 = vsel %vm1113_vm5, %v1153_v46, %v2395_v54  ;;  %v1120_v20 = vsel %vm1113_vm5, %v1103_v22, %v2396_v1 }
 0x19b   :  { %v2399_v26 = vpop.permute.xlu1 %2398  ;;  %v2406_v18 = vunpack.i.h.bf16 %v2404_v28  ;;  %v2405_v63 = vunpack.i.l.bf16 %v2404_v28 }
 0x19c   :  { %v2401_v30 = vunpack.i.h.bf16 %v2399_v26  ;;  %v2400_v39 = vunpack.i.l.bf16 %v2399_v26 }
 0x19d   :  { %v1185_v62 = vsel %vm1130_vm6, %v1169_v13, %v2405_v63  ;;  %v1137_v27 = vsel %vm1130_vm6, %v1120_v20, %v2406_v18 }
 0x19e   :  { %v2414_v4 = vpop.permute.xlu0 %2413  ;;  %1357 = vmatprep.mubr.f32.mxu1 %v1185_v62 }
 0x19f   :  { %v2409_v24 = vpop.permute.xlu1 %2408  ;;  %1358 = vmatmul.mubr.f32.gmra.mxu1 %v1137_v27  ;;  %v2415_v57 = vunpack.i.l.bf16 %v2414_v4  ;;  %v2416_v19 = vunpack.i.h.bf16 %v2414_v4 }
 0x1a0   :  { %v2411_v59 = vunpack.i.h.bf16 %v2409_v24  ;;  %v2410_v37 = vunpack.i.l.bf16 %v2409_v24 }
 0x1a1   :  { %v1105_v49 = vsel %vm122_vm0, %v3276_v53, %v2416_v19 }
 0x1a2   :  { %v1154_v14 = vsel %vm122_vm0, %v3326_v61, %v2410_v37  ;;  %v1104_v11 = vsel %vm122_vm0, %v3197_v34, %v2411_v59  ;;  %v2424_v10 = vpop.permute.xlu0 %2423  ;;  %v1155_v61 = vsel %vm122_vm0, %v3402_v6, %v2415_v57 }
 0x1a3   :  { %v2419_v21 = vpop.permute.xlu1 %2418  ;;  %v1170_v38 = vsel %vm1113_vm5, %v1154_v14, %v2390_v0  ;;  %v1121_v47 = vsel %vm1113_vm5, %v1104_v11, %v2391_v7  ;;  %v2425_v33 = vunpack.i.l.bf16 %v2424_v10  ;;  %v2426_v31 = vunpack.i.h.bf16 %v2424_v10 }
 0x1a4   :  { %v2421_v16 = vunpack.i.h.bf16 %v2419_v21  ;;  %v2420_v8 = vunpack.i.l.bf16 %v2419_v21  ;;  %v1186_v25 = vsel %vm1130_vm6, %v1170_v38, %v2400_v39  ;;  %v1138_v45 = vsel %vm1130_vm6, %v1121_v47, %v2401_v30 }
 0x1a5   :  { %1362 = vmatprep.mubr.f32.mxu1 %v1186_v25 }
 0x1a6   :  { %v1171_v34 = vsel %vm1113_vm5, %v1155_v61, %v2420_v8  ;;  %1363 = vmatmul.mubr.f32.gmra.mxu1 %v1138_v45  ;;  %v2434_v17 = vpop.permute.xlu0 %2433  ;;  %v1122_v40 = vsel %vm1113_vm5, %v1105_v49, %v2421_v16 }
 0x1a7   :  { %v2429_v48 = vpop.permute.xlu1 %2428  ;;  %v1187_v50 = vsel %vm1130_vm6, %v1171_v34, %v2425_v33  ;;  %v2436_v2 = vunpack.i.h.bf16 %v2434_v17  ;;  %v2435_v32 = vunpack.i.l.bf16 %v2434_v17  ;;  %v1139_v6 = vsel %vm1130_vm6, %v1122_v40, %v2426_v31 }
 0x1a8   :  { %v2431_v29 = vunpack.i.h.bf16 %v2429_v48  ;;  %v2430_v51 = vunpack.i.l.bf16 %v2429_v48  ;;  %1367 = vmatprep.mubr.f32.mxu1 %v1187_v50 }
 0x1aa   :  { %v1156_v41 = vsel %vm122_vm0, %v3374_v35, %v2430_v51  ;;  %v1106_v53 = vsel %vm122_vm0, %v3283_v9, %v2431_v29  ;;  %1368 = vmatmul.mubr.f32.gmra.mxu1 %v1139_v6  ;;  %v2444_v55 = vpop.permute.xlu0 %2443 }
 0x1ab   :  { %v2439_v12 = vpop.permute.xlu1 %2438  ;;  %v2446_v28 = vunpack.i.h.bf16 %v2444_v55  ;;  %v2445_v26 = vunpack.i.l.bf16 %v2444_v55  ;;  %v1172_v18 = vsel %vm1113_vm5, %v1156_v41, %v2435_v32  ;;  %v1123_v63 = vsel %vm1113_vm5, %v1106_v53, %v2436_v2 }
 0x1ac   :  { %v2441_v1 = vunpack.i.h.bf16 %v2439_v12  ;;  %v2440_v54 = vunpack.i.l.bf16 %v2439_v12 }
 0x1ad   :  { %v1157_v4 = vsel %vm122_vm0, %v3422_v52, %v2445_v26  ;;  %v1107_v24 = vsel %vm122_vm0, %v3260_v42, %v2446_v28 }
 0x1ae   :  { %v1188_v46 = vsel %vm1130_vm6, %v1172_v18, %v2440_v54  ;;  %v1140_v22 = vsel %vm1130_vm6, %v1123_v63, %v2441_v1  ;;  %v2454_v13 = vpop.permute.xlu0 %2453 }
 0x1af   :  { %v2449_v35 = vpop.permute.xlu1 %2448  ;;  %1372 = vmatprep.mubr.f32.mxu1 %v1188_v46  ;;  %v2456_v20 = vunpack.i.h.bf16 %v2454_v13  ;;  %v2455_v9 = vunpack.i.l.bf16 %v2454_v13 }
 0x1b0   :  { %v2451_v62 = vunpack.i.h.bf16 %v2449_v35  ;;  %v2450_v27 = vunpack.i.l.bf16 %v2449_v35  ;;  %1373 = vmatmul.mubr.f32.gmra.mxu1 %v1140_v22 }
 0x1b2   :  { %v1173_v59 = vsel %vm1113_vm5, %v1157_v4, %v2450_v27  ;;  %v1124_v37 = vsel %vm1113_vm5, %v1107_v24, %v2451_v62  ;;  %v2464_v7 = vpop.permute.xlu0 %2463 }
 0x1b3   :  { %v2459_v0 = vpop.permute.xlu1 %2458  ;;  %v1189_v57 = vsel %vm1130_vm6, %v1173_v59, %v2455_v9  ;;  %v1141_v19 = vsel %vm1130_vm6, %v1124_v37, %v2456_v20  ;;  %v2466_v30 = vunpack.i.h.bf16 %v2464_v7  ;;  %v2465_v39 = vunpack.i.l.bf16 %v2464_v7 }
 0x1b4   :  { %v2461_v14 = vunpack.i.h.bf16 %v2459_v0  ;;  %v2460_v11 = vunpack.i.l.bf16 %v2459_v0  ;;  %1377 = vmatprep.mubr.f32.mxu1 %v1189_v57 }
 0x1b5   :  { %1378 = vmatmul.mubr.f32.gmra.mxu1 %v1141_v19 }
 0x1b6   :  { %v1158_v52 = vsel %vm122_vm0, %v3439_v58, %v2460_v11  ;;  %v1108_v42 = vsel %vm122_vm0, %v3296_v23, %v2461_v14  ;;  %v2474_v10 = vpop.permute.xlu0 %2473 }
 0x1b7   :  { %v2469_v21 = vpop.permute.xlu1 %2468  ;;  %v2476_v33 = vunpack.i.h.bf16 %v2474_v10  ;;  %v2475_v16 = vunpack.i.l.bf16 %v2474_v10  ;;  %v1174_v8 = vsel %vm1113_vm5, %v1158_v52, %v2465_v39  ;;  %v1125_v25 = vsel %vm1113_vm5, %v1108_v42, %v2466_v30 }
 0x1b8   :  { %v2471_v38 = vunpack.i.h.bf16 %v2469_v21  ;;  %v2470_v47 = vunpack.i.l.bf16 %v2469_v21 }
 0x1b9   :  { %v1159_v48 = vsel %vm122_vm0, %v3462_v15, %v2475_v16  ;;  %v1109_v50 = vsel %vm122_vm0, %v3314_v56, %v2476_v33  ;;  %v1555_v16 = vld [vmem:[%s3924_s7 + $0x10] sm:$0xff] }
 0x1ba   :  { %v1190_v45 = vsel %vm1130_vm6, %v1174_v8, %v2470_v47  ;;  %v1142_v61 = vsel %vm1130_vm6, %v1125_v25, %v2471_v38  ;;  %v2484_v31 = vpop.permute.xlu0 %2483  ;;  %v1558_v8 = vld [vmem:[%s3924_s7 + $0x28] sm:$0xff]  ;;  %v1559_v25 = vld [vmem:[%s3924_s7 + $0x30] sm:$0xff] }
 0x1bb   :  { %v2479_v34 = vpop.permute.xlu1 %2478  ;;  %1382 = vmatprep.mubr.f32.mxu1 %v1190_v45  ;;  %v2486_v58 = vunpack.i.h.bf16 %v2484_v31  ;;  %v2485_v49 = vunpack.i.l.bf16 %v2484_v31  ;;  %v1560_v45 = vld [vmem:[%s3924_s7 + $0x38] sm:$0xff]  ;;  %v1562_v31 = vld [vmem:[%s3924_s7 + $0x48] sm:$0xff] }
 0x1bc   :  { %v2481_v23 = vunpack.i.h.bf16 %v2479_v34  ;;  %v2480_v17 = vunpack.i.l.bf16 %v2479_v34  ;;  %1383 = vmatmul.mubr.f32.gmra.mxu1 %v1142_v61  ;;  %v1561_v61 = vld [vmem:[%s3924_s7 + $0x40] sm:$0xff]  ;;  %v1563_v34 = vld [vmem:[%s3924_s7 + $0x50] sm:$0xff] }
 0x1be   :  { %v1175_v40 = vsel %vm1113_vm5, %v1159_v48, %v2480_v17  ;;  %v1126_v29 = vsel %vm1113_vm5, %v1109_v50, %v2481_v23  ;;  %v2494_v51 = vpop.permute.xlu0 %2493  ;;  %v1566_v23 = vld [vmem:[%s3924_s7 + $0x68] sm:$0xff]  ;;  %v1567_v17 = vld [vmem:[%s3924_s7 + $0x70] sm:$0xff]  ;;  %v1568_v48 = vld [vmem:[%s3924_s7 + $0x78] sm:$0xff] }
 0x1bf   :  { %v2489_v2 = vpop.permute.xlu1 %2488  ;;  %v1191_v32 = vsel %vm1130_vm6, %v1175_v40, %v2485_v49  ;;  %v1143_v6 = vsel %vm1130_vm6, %v1126_v29, %v2486_v58  ;;  %v2496_v55 = vunpack.i.h.bf16 %v2494_v51  ;;  %v2495_v12 = vunpack.i.l.bf16 %v2494_v51  ;;  %v1564_v58 = vld [vmem:[%s3924_s7 + $0x58] sm:$0xff]  ;;  %v1565_v49 = vld [vmem:[%s3924_s7 + $0x60] sm:$0xff] }
 0x1c0   :  { %v2491_v41 = vunpack.i.h.bf16 %v2489_v2  ;;  %v2490_v53 = vunpack.i.l.bf16 %v2489_v2  ;;  %1387 = vmatprep.mubr.f32.mxu1 %v1191_v32 }
 0x1c1   :  { %1388 = vmatmul.mubr.f32.gmra.mxu1 %v1143_v6 }
 0x1c2   :  { %v2504_v15 = vpop.permute.xlu0 %2503  ;;  %v1160_v56 = vsel %vm122_vm0, %v3472_v36, %v2490_v53  ;;  %v1110_v1 = vsel %vm122_vm0, %v3341_v5, %v2491_v41 }
 0x1c3   :  { %v2499_v54 = vpop.permute.xlu1 %2498  ;;  %v2506_v18 = vunpack.i.h.bf16 %v2504_v15  ;;  %v2505_v63 = vunpack.i.l.bf16 %v2504_v15  ;;  %v1176_v46 = vsel %vm1113_vm5, %v1160_v56, %v2495_v12  ;;  %v1127_v22 = vsel %vm1113_vm5, %v1110_v1, %v2496_v55  ;;  %v2226_v50 = vpop.f32.mrf.mxu0 }
 0x1c4   :  { %v2501_v28 = vunpack.i.h.bf16 %v2499_v54  ;;  %v2500_v26 = vunpack.i.l.bf16 %v2499_v54 }
 0x1c5   :  { %v1161_v4 = vsel %vm122_vm0, %v3489_v3, %v2505_v63  ;;  %v1111_v24 = vsel %vm122_vm0, %v3362_v44, %v2506_v18  ;;  %v1474_v40 = vpop.f32.mrf.mxu0  ;;  %v3741_v63 = vld [vmem:[%s3925_s9] ss:$0 sm:$0xff] }
 0x1c6   :  { %v2514_v13 = vpop.permute.xlu0 %2513  ;;  %v1192_v35 = vsel %vm1130_vm6, %v1176_v46, %v2500_v26  ;;  %v1144_v20 = vsel %vm1130_vm6, %v1127_v22, %v2501_v28 }
 0x1c7   :  { %v2516_v9 = vunpack.i.h.bf16 %v2514_v13  ;;  %v2515_v62 = vunpack.i.l.bf16 %v2514_v13  ;;  %v2509_v36 = vpop.permute.xlu1 %2508  ;;  %1392 = vmatprep.mubr.f32.mxu1 %v1192_v35 }
 0x1c8   :  { %v2511_v27 = vunpack.i.h.bf16 %v2509_v36  ;;  %v2510_v5 = vunpack.i.l.bf16 %v2509_v36  ;;  %1393 = vmatmul.mubr.f32.gmra.mxu1 %v1144_v20  ;;  %v3747_v20 = vld [vmem:[%s3926_s5] ss:$0 sm:$0xff] }
 0x1c9   :  { %v3757_v36 = vld [vmem:[%s3928_s6] ss:$0 sm:$0xff] }
 0x1ca   :  { %v2524_v59 = vpop.permute.xlu0 %2523  ;;  %v1177_v37 = vsel %vm1113_vm5, %v1161_v4, %v2510_v5  ;;  %v1128_v7 = vsel %vm1113_vm5, %v1111_v24, %v2511_v27  ;;  %v3710_v29 = vpop.f32.mrf.mxu0 }
 0x1cb   :  { %v2519_v0 = vpop.permute.xlu1 %2518  ;;  %v1193_v57 = vsel %vm1130_vm6, %v1177_v37, %v2515_v62  ;;  %v1145_v19 = vsel %vm1130_vm6, %v1128_v7, %v2516_v9  ;;  %v2526_v30 = vunpack.i.h.bf16 %v2524_v59  ;;  %v2525_v39 = vunpack.i.l.bf16 %v2524_v59  ;;  %v3752_v9 = vld [vmem:[%s3927_s10] ss:$0 sm:$0xff] }
 0x1cc   :  { %v2521_v14 = vunpack.i.h.bf16 %v2519_v0  ;;  %v2520_v11 = vunpack.i.l.bf16 %v2519_v0  ;;  %1397 = vmatprep.mubr.f32.mxu1 %v1193_v57  ;;  %v3712_v51 = vpop.f32.mrf.mxu0 }
 0x1cd   :  { %1398 = vmatmul.mubr.f32.gmra.mxu1 %v1145_v19 }
 0x1ce   :  { %v1162_v3 = vsel %vm122_vm0, %v3499_v43, %v2520_v11  ;;  %v1112_v44 = vsel %vm122_vm0, %v3388_v60, %v2521_v14  ;;  %v1556_v60 = vld [vmem:[%s3924_s7 + $0x18] sm:$0xff]  ;;  %v1557_v43 = vld [vmem:[%s3924_s7 + $0x20] sm:$0xff] }
 0x1cf   :  { %v2529_v52 = vpop.permute.xlu1 %2528  ;;  %v1178_v21 = vsel %vm1113_vm5, %v1162_v3, %v2525_v39  ;;  %v1129_v38 = vsel %vm1113_vm5, %v1112_v44, %v2526_v30 }
 0x1d0   :  { %v2531_v42 = vunpack.i.h.bf16 %v2529_v52  ;;  %v2530_v10 = vunpack.i.l.bf16 %v2529_v52 }
 0x1d2   :  { %v1194_v47 = vsel %vm1130_vm6, %v1178_v21, %v2530_v10  ;;  %v1146_v33 = vsel %vm1130_vm6, %v1129_v38, %v2531_v42  ;;  %v3714_v2 = vpop.f32.mrf.mxu0 }
 0x1d3   :  { %1402 = vmatprep.mubr.f32.mxu1 %v1194_v47 }
 0x1d4   :  { %1403 = vmatmul.mubr.f32.gmra.mxu1 %v1146_v33  ;;  %v3716_v32 = vpop.f32.mrf.mxu0 }
 0x1d5   :  { %2259 = vmatprep.mubr.msk.f32.mxu1 %vm122_vm0, %v1555_v16 }
 0x1d7   :  { %v3718_v6 = vpop.f32.mrf.mxu0 }
 0x1d8   :  { %2260 = vmatmul.mubr.msk.f32.vlgmr.msra.gmra.mxu1 %vm122_vm0, %v1556_v60 }
 0x1d9   :  { %2262 = vmatprep.mubr.msk.f32.mxu1 %vm122_vm0, %v1557_v43  ;;  %v3720_v41 = vpop.f32.mrf.mxu0 }
 0x1dc   :  { %2263 = vmatmul.mubr.msk.f32.gmra.mxu1 %vm122_vm0, %v1558_v8 }
 0x1dd   :  { %2265 = vmatprep.mubr.msk.f32.mxu1 %vm122_vm0, %v1559_v25 }
 0x1e0   :  { %2266 = vmatmul.mubr.msk.f32.gmra.mxu1 %vm122_vm0, %v1560_v45 }
 0x1e1   :  { %2268 = vmatprep.mubr.msk.f32.mxu1 %vm122_vm0, %v1561_v61 }
 0x1e2   :  { %v3722_v53 = vpop.f32.mrf.mxu0 }
 0x1e4   :  { %2269 = vmatmul.mubr.msk.f32.gmra.mxu1 %vm122_vm0, %v1562_v31  ;;  %v3724_v55 = vpop.f32.mrf.mxu0 }
 0x1e5   :  { %2271 = vmatprep.mubr.msk.f32.mxu1 %vm122_vm0, %v1563_v34 }
 0x1e8   :  { %2272 = vmatmul.mubr.msk.f32.gmra.mxu1 %vm122_vm0, %v1564_v58 }
 0x1e9   :  { %2274 = vmatprep.mubr.msk.f32.mxu1 %vm122_vm0, %v1565_v49 }
 0x1ea   :  { %v3726_v12 = vpop.f32.mrf.mxu0 }
 0x1ec   :  { %2275 = vmatmul.mubr.msk.f32.gmra.mxu1 %vm122_vm0, %v1566_v23  ;;  %v3728_v15 = vpop.f32.mrf.mxu0 }
 0x1ed   :  { %2277 = vmatprep.mubr.msk.f32.mxu1 %vm122_vm0, %v1567_v17 }
 0x1f0   :  { %2278 = vmatmul.mubr.msk.f32.gmra.mxu1 %vm122_vm0, %v1568_v48 }
 0x1f2   :  { %v3730_v56 = vpop.f32.mrf.mxu0 }
 0x1f4   :  { %v3732_v1 = vpop.f32.mrf.mxu0 }
 0x1f7   :  { %v3734_v54 = vpop.f32.mrf.mxu0 }
 0x1f9   :  { %v3736_v28 = vpop.f32.mrf.mxu0 }
 0x1fb   :  { %v2258_v26 = vpop.f32.mrf.mxu0 }
 0x1fc   :  { %v1774_v37 = vmul.f32 %v2258_v26, %v3741_v63 }
 0x1fd   :  { %v1687_v46 = vpop.f32.mrf.mxu0 }
 0x1fe   :  { %v1773_v35 = vmul.f32 %v3741_v63, %v1687_v46  ;;  %v1797_v14 = vadd.f32 %v3752_v9, %v1774_v37 }
 0x200   :  { %v1796_v5 = vadd.f32 %v3752_v9, %v1773_v35 }
 0x238   :  { %v2096_v18 = vpop.f32.mrf.mxu1 }
 0x23a   :  { %v2097_v22 = vpop.f32.mrf.mxu1 }
 0x23b   :  { %v2098_v13 = vadd.f32 %v2097_v22, %v2096_v18 }
 0x23d   :  { %v1475_v62 = vadd.f32 %v2098_v13, %v1474_v40 }
 0x23f   :  { %v1819_v27 = vmul.f32 %v3747_v20, %v1475_v62 }
 0x240   :  { %v2099_v4 = vpop.f32.mrf.mxu1 }
 0x241   :  { %v1842_v24 = vadd.f32 %v3757_v36, %v1819_v27 }
 0x242   :  { %v2100_v59 = vpop.f32.mrf.mxu1 }
 0x243   :  { %v2101_v7 = vadd.f32 %v2100_v59, %v2099_v4  ;;  %v1858_v0 = vadd.f32 %v1842_v24, %v1796_v5 }
 0x245   :  { %v1480_v57 = vadd.f32 %v2226_v50, %v2101_v7  ;;  %v1874_v19 = vmax.f32 %v1858_v0, 0.0  ;;  %v2102_v30 = vpop.f32.mrf.mxu1 }
 0x247   :  { %v1820_v11 = vmul.f32 %v3747_v20, %v1480_v57  ;;  %1890 = vst.msk [vmem:[%s3929_s11] sm:$0xff] %vm122_vm0, %v1874_v19  ;;  %v2103_v44 = vpop.f32.mrf.mxu1 }
 0x248   :  { %v2104_v46 = vadd.f32 %v2103_v44, %v2102_v30 }
 0x249   :  { %v1843_v39 = vadd.f32 %v3757_v36, %v1820_v11 }
 0x24a   :  { %v1485_v5 = vadd.f32 %v2104_v46, %v3712_v51 }
 0x24b   :  { %v1859_v3 = vadd.f32 %v1843_v39, %v1797_v14 }
 0x24c   :  { %v2105_v42 = vpop.f32.mrf.mxu1  ;;  %v1821_v19 = vmul.f32 %v3747_v20, %v1485_v5 }
 0x24d   :  { %v1875_v52 = vmax.f32 %v1859_v3, 0.0 }
 0x24e   :  { %v2106_v10 = vpop.f32.mrf.mxu1 }
 0x24f   :  { %1891 = vst.msk [vmem:[%s3929_s11 + $0x8] sm:$0xff] %vm122_vm0, %v1875_v52  ;;  %v2107_v18 = vadd.f32 %v2106_v10, %v2105_v42 }
 0x251   :  { %v2108_v21 = vpop.f32.mrf.mxu1  ;;  %v1490_v35 = vadd.f32 %v3710_v29, %v2107_v18 }
 0x253   :  { %v2109_v38 = vpop.f32.mrf.mxu1  ;;  %v1822_v37 = vmul.f32 %v3747_v20, %v1490_v35 }
 0x254   :  { %v2110_v62 = vadd.f32 %v2109_v38, %v2108_v21  ;;  %v1844_v38 = vadd.f32 %v3757_v36, %v1821_v19 }
 0x255   :  { %v1845_v39 = vadd.f32 %v3757_v36, %v1822_v37 }
 0x256   :  { %v1495_v7 = vadd.f32 %v2110_v62, %v3716_v32 }
 0x258   :  { %v2111_v47 = vpop.f32.mrf.mxu1  ;;  %v1823_v32 = vmul.f32 %v3747_v20, %v1495_v7 }
 0x25a   :  { %v2112_v33 = vpop.f32.mrf.mxu1  ;;  %v1846_v46 = vadd.f32 %v3757_v36, %v1823_v32 }
 0x25b   :  { %v2113_v22 = vadd.f32 %v2112_v33, %v2111_v47 }
 0x25d   :  { %v1500_v4 = vadd.f32 %v3714_v2, %v2113_v22 }
 0x25f   :  { %v2114_v16 = vpop.f32.mrf.mxu1  ;;  %v1824_v14 = vmul.f32 %v3747_v20, %v1500_v4 }
 0x261   :  { %v2115_v60 = vpop.f32.mrf.mxu1 }
 0x262   :  { %v2116_v0 = vadd.f32 %v2115_v60, %v2114_v16  ;;  %v1847_v60 = vadd.f32 %v3757_v36, %v1824_v14 }
 0x264   :  { %v1505_v44 = vadd.f32 %v2116_v0, %v3720_v41 }
 0x266   :  { %v2117_v43 = vpop.f32.mrf.mxu1 }
 0x268   :  { %v2118_v8 = vpop.f32.mrf.mxu1 }
 0x269   :  { %v2119_v24 = vadd.f32 %v2118_v8, %v2117_v43 }
 0x26a   :  { %v2120_v25 = vpop.f32.mrf.mxu1 }
 0x26b   :  { %v1510_v11 = vadd.f32 %v3718_v6, %v2119_v24 }
 0x26c   :  { %v2121_v45 = vpop.f32.mrf.mxu1 }
 0x26d   :  { %v2122_v52 = vadd.f32 %v2121_v45, %v2120_v25  ;;  %v1826_v47 = vmul.f32 %v3747_v20, %v1510_v11  ;;  %v1825_v45 = vmul.f32 %v3747_v20, %v1505_v44 }
 0x270   :  { %v2123_v61 = vpop.f32.mrf.mxu1 }
 0x272   :  { %v2124_v31 = vpop.f32.mrf.mxu1 }
 0x273   :  { %v2125_v51 = vadd.f32 %v2124_v31, %v2123_v61  ;;  %v1515_v31 = vadd.f32 %v2122_v52, %v3724_v55 }
 0x275   :  { %v2126_v34 = vpop.f32.mrf.mxu1  ;;  %v1520_v33 = vadd.f32 %v3722_v53, %v2125_v51  ;;  %v1827_v0 = vmul.f32 %v3747_v20, %v1515_v31 }
 0x277   :  { %v2127_v58 = vpop.f32.mrf.mxu1  ;;  %v1828_v62 = vmul.f32 %v3747_v20, %v1520_v33 }
 0x278   :  { %v2128_v18 = vadd.f32 %v2127_v58, %v2126_v34  ;;  %v1849_v34 = vadd.f32 %v3757_v36, %v1826_v47 }
 0x27c   :  { %v2129_v49 = vpop.f32.mrf.mxu1 }
 0x27e   :  { %v2130_v23 = vpop.f32.mrf.mxu1 }
 0x27f   :  { %v2131_v16 = vadd.f32 %v2130_v23, %v2129_v49 }
 0x281   :  { %v3774_v17 = vpop.f32.mrf.mxu1  ;;  %v1530_v5 = vadd.f32 %v3726_v12, %v2131_v16 }
 0x283   :  { %v3776_v48 = vpop.f32.mrf.mxu1  ;;  %v1830_v51 = vmul.f32 %v3747_v20, %v1530_v5 }
 0x284   :  { %v2134_v12 = vadd.f32 %v3776_v48, %v3774_v17  ;;  %v1851_v48 = vadd.f32 %v3757_v36, %v1828_v62 }
 0x288   :  { %v2135_v50 = vpop.f32.mrf.mxu1 }
 0x28a   :  { %v2136_v40 = vpop.f32.mrf.mxu1 }
 0x28b   :  { %v2137_v55 = vadd.f32 %v2136_v40, %v2135_v50  ;;  %v1848_v50 = vadd.f32 %v3757_v36, %v1825_v45 }
 0x28d   :  { %v3778_v26 = vpop.f32.mrf.mxu1 }
 0x28f   :  { %v3780_v13 = vpop.f32.mrf.mxu1 }
 0x294   :  { %v3783_v27 = vpop.f32.mrf.mxu1 }
 0x296   :  { %v3787_v59 = vpop.f32.mrf.mxu1 }
 0x297   :  { %v2143_v17 = vadd.f32 %v3787_v59, %v3783_v27  ;;  %v2140_v27 = vadd.f32 %v3780_v13, %v3778_v26  ;;  %v1850_v59 = vadd.f32 %v3757_v36, %v1827_v0  ;;  %v1853_v26 = vadd.f32 %v3757_v36, %v1830_v51 }
 0x298   :  { %v2261_v57 = vpop.f32.mrf.mxu1 }
 0x299   :  { %v1776_v29 = vmul.f32 %v2261_v57, %v3741_v63  ;;  %v1525_v57 = vadd.f32 %v2128_v18, %v3728_v15  ;;  %v1540_v15 = vadd.f32 %v3730_v56, %v2137_v55  ;;  %v1535_v56 = vadd.f32 %v2134_v12, %v3732_v1 }
 0x29a   :  { %v1697_v30 = vpop.f32.mrf.mxu1  ;;  %v1550_v1 = vadd.f32 %v3734_v54, %v2143_v17 }
 0x29b   :  { %v1799_v2 = vadd.f32 %v3752_v9, %v1776_v29  ;;  %v1775_v3 = vmul.f32 %v3741_v63, %v1697_v30  ;;  %v1829_v44 = vmul.f32 %v3747_v20, %v1525_v57 }
 0x29c   :  { %v2264_v42 = vpop.f32.mrf.mxu1  ;;  %v1834_v18 = vmul.f32 %v3747_v20, %v1550_v1 }
 0x29d   :  { %v1861_v10 = vadd.f32 %v1845_v39, %v1799_v2  ;;  %v1798_v21 = vadd.f32 %v3752_v9, %v1775_v3  ;;  %v1778_v6 = vmul.f32 %v2264_v42, %v3741_v63  ;;  %v1852_v54 = vadd.f32 %v3757_v36, %v1829_v44 }
 0x29e   :  { %v1707_v43 = vpop.f32.mrf.mxu1 }
 0x29f   :  { %v1877_v8 = vmax.f32 %v1861_v10, 0.0  ;;  %v1860_v61 = vadd.f32 %v1844_v38, %v1798_v21  ;;  %v1801_v41 = vadd.f32 %v3752_v9, %v1778_v6  ;;  %v1777_v25 = vmul.f32 %v3741_v63, %v1707_v43 }
 0x2a0   :  { %v2267_v22 = vpop.f32.mrf.mxu1  ;;  %v1832_v6 = vmul.f32 %v3747_v20, %v1540_v15  ;;  %v1831_v43 = vmul.f32 %v3747_v20, %v1535_v56 }
 0x2a1   :  { %1893 = vst.msk [vmem:[%s3929_s11 + $0x18] sm:$0xff] %vm122_vm0, %v1877_v8  ;;  %v1876_v53 = vmax.f32 %v1860_v61, 0.0  ;;  %v1863_v49 = vadd.f32 %v1847_v60, %v1801_v41  ;;  %v1800_v23 = vadd.f32 %v3752_v9, %v1777_v25  ;;  %v1780_v35 = vmul.f32 %v2267_v22, %v3741_v63 }
 0x2a2   :  { %v1717_v58 = vpop.f32.mrf.mxu1  ;;  %v1545_v8 = vadd.f32 %v2140_v27, %v3736_v28  ;;  %v1854_v62 = vadd.f32 %v3757_v36, %v1831_v43 }
 0x2a3   :  { %1892 = vst.msk [vmem:[%s3929_s11 + $0x10] sm:$0xff] %vm122_vm0, %v1876_v53  ;;  %v1879_v4 = vmax.f32 %v1863_v49, 0.0  ;;  %v1862_v24 = vadd.f32 %v1846_v46, %v1800_v23  ;;  %v1803_v37 = vadd.f32 %v3752_v9, %v1780_v35  ;;  %v1779_v7 = vmul.f32 %v3741_v63, %v1717_v58 }
 0x2a4   :  { %v2270_v40 = vpop.f32.mrf.mxu1  ;;  %v1855_v46 = vadd.f32 %v3757_v36, %v1832_v6  ;;  %v1833_v35 = vmul.f32 %v3747_v20, %v1545_v8 }
 0x2a5   :  { %1895 = vst.msk [vmem:[%s3929_s11 + $0x28] sm:$0xff] %vm122_vm0, %v1879_v4  ;;  %v1878_v19 = vmax.f32 %v1862_v24, 0.0  ;;  %v1865_v29 = vadd.f32 %v1849_v34, %v1803_v37  ;;  %v1802_v14 = vadd.f32 %v3752_v9, %v1779_v7  ;;  %v1782_v11 = vmul.f32 %v2270_v40, %v3741_v63 }
 0x2a6   :  { %v1727_v30 = vpop.f32.mrf.mxu1  ;;  %v1857_v24 = vadd.f32 %v3757_v36, %v1834_v18 }
 0x2a7   :  { %1894 = vst.msk [vmem:[%s3929_s11 + $0x20] sm:$0xff] %vm122_vm0, %v1878_v19  ;;  %v1881_v2 = vmax.f32 %v1865_v29, 0.0  ;;  %v1864_v39 = vadd.f32 %v1848_v50, %v1802_v14  ;;  %v1805_v3 = vadd.f32 %v3752_v9, %v1782_v11  ;;  %v1781_v32 = vmul.f32 %v3741_v63, %v1727_v30 }
 0x2a8   :  { %v2273_v52 = vpop.f32.mrf.mxu1  ;;  %v1856_v19 = vadd.f32 %v3757_v36, %v1833_v35 }
 0x2a9   :  { %1897 = vst.msk [vmem:[%s3929_s11 + $0x38] sm:$0xff] %vm122_vm0, %v1881_v2  ;;  %v1880_v42 = vmax.f32 %v1864_v39, 0.0  ;;  %v1867_v10 = vadd.f32 %v1851_v48, %v1805_v3  ;;  %v1804_v21 = vadd.f32 %v3752_v9, %v1781_v32  ;;  %v1784_v38 = vmul.f32 %v2273_v52, %v3741_v63 }
 0x2aa   :  { %v1737_v13 = vpop.f32.mrf.mxu1 }
 0x2ab   :  { %1896 = vst.msk [vmem:[%s3929_s11 + $0x30] sm:$0xff] %vm122_vm0, %v1880_v42  ;;  %v1883_v47 = vmax.f32 %v1867_v10, 0.0  ;;  %v1866_v33 = vadd.f32 %v1850_v59, %v1804_v21  ;;  %v1807_v16 = vadd.f32 %v3752_v9, %v1784_v38  ;;  %v1783_v60 = vmul.f32 %v3741_v63, %v1737_v13 }
 0x2ac   :  { %v2276_v61 = vpop.f32.mrf.mxu1 }
 0x2ad   :  { %1899 = vst.msk [vmem:[%s3929_s11 + $0x48] sm:$0xff] %vm122_vm0, %v1883_v47  ;;  %v1882_v41 = vmax.f32 %v1866_v33, 0.0  ;;  %v1869_v25 = vadd.f32 %v1853_v26, %v1807_v16  ;;  %v1806_v45 = vadd.f32 %v3752_v9, %v1783_v60  ;;  %v1786_v31 = vmul.f32 %v2276_v61, %v3741_v63 }
 0x2ae   :  { %v1747_v22 = vpop.f32.mrf.mxu1 }
 0x2af   :  { %1898 = vst.msk [vmem:[%s3929_s11 + $0x40] sm:$0xff] %vm122_vm0, %v1882_v41  ;;  %v1885_v28 = vmax.f32 %v1869_v25, 0.0  ;;  %v1868_v53 = vadd.f32 %v1852_v54, %v1806_v45  ;;  %v1809_v49 = vadd.f32 %v3752_v9, %v1786_v31  ;;  %v1785_v23 = vmul.f32 %v3741_v63, %v1747_v22 }
 0x2b0   :  { %v2279_v5 = vpop.f32.mrf.mxu1 }
 0x2b1   :  { %1901 = vst.msk [vmem:[%s3929_s11 + $0x58] sm:$0xff] %vm122_vm0, %v1885_v28  ;;  %v1884_v55 = vmax.f32 %v1868_v53, 0.0  ;;  %v1871_v34 = vadd.f32 %v1855_v46, %v1809_v49  ;;  %v1808_v58 = vadd.f32 %v3752_v9, %v1785_v23  ;;  %v1788_v4 = vmul.f32 %v2279_v5, %v3741_v63 }
 0x2b2   :  { %v1757_v37 = vpop.f32.mrf.mxu1 }
 0x2b3   :  { %1900 = vst.msk [vmem:[%s3929_s11 + $0x50] sm:$0xff] %vm122_vm0, %v1884_v55  ;;  %v1887_v20 = vmax.f32 %v1871_v34, 0.0  ;;  %v1870_v7 = vadd.f32 %v1854_v62, %v1808_v58  ;;  %v1811_v0 = vadd.f32 %v3752_v9, %v1788_v4  ;;  %v1787_v57 = vmul.f32 %v3741_v63, %v1757_v37 }
 0x2b5   :  { %1903 = vst.msk [vmem:[%s3929_s11 + $0x68] sm:$0xff] %vm122_vm0, %v1887_v20  ;;  %v1886_v12 = vmax.f32 %v1870_v7, 0.0  ;;  %v1873_v50 = vadd.f32 %v1857_v24, %v1811_v0  ;;  %v1810_v40 = vadd.f32 %v3752_v9, %v1787_v57 }
 0x2b7   :  { %1902 = vst.msk [vmem:[%s3929_s11 + $0x60] sm:$0xff] %vm122_vm0, %v1886_v12  ;;  %v1889_v29 = vmax.f32 %v1873_v50, 0.0  ;;  %v1872_v14 = vadd.f32 %v1856_v19, %v1810_v40 }
 0x2b9   :  { %1905 = vst.msk [vmem:[%s3929_s11 + $0x78] sm:$0xff] %vm122_vm0, %v1889_v29  ;;  %v1888_v63 = vmax.f32 %v1872_v14, 0.0 }
 0x2bb   :  { %1904 = vst.msk [vmem:[%s3929_s11 + $0x70] sm:$0xff] %vm122_vm0, %v1888_v63 }

// kernel: simple_rsn_forward.11
= control target key start
LH: loop header
LB: loop body
LE: loop exit
PB: predicated region body
PF: predicated region fallthrough
CT: control target
= control target key end

     0   :  { %v502_v0 = vmov 0.0   ;;  %vm503_vm0 = vmmov 0   ;;  %vm310_vm1 = vcmask 15360   ;;  %s769_s1 = inlined_call_operand.vmem [shape: f32[128,128], index: 1, kind: input, shape index: {}]   ;;  %s770_s3 = inlined_call_operand.vmem [shape: f32[128,128], index: 3, kind: input, shape index: {}]   ;;  %s771_s0 = inlined_call_operand.vmem [shape: f32[8,128], index: 0, kind: input, shape index: {}]   ;;  %s772_s5 = inlined_call_operand.vmem [shape: f32[128,2], index: 5, kind: input, shape index: {}]   ;;  %s773_s2 = inlined_call_operand.vmem [shape: f32[1,128], index: 2, kind: input, shape index: {}]   ;;  %s774_s4 = inlined_call_operand.vmem [shape: f32[1,128], index: 4, kind: input, shape index: {}]   ;;  %s775_s6 = inlined_call_operand.vmem [shape: f32[1,2], index: 6, kind: input, shape index: {}]   ;;  %s776_s8 = inlined_call_operand.vmem [shape: f32[8,2], index: 8, kind: output, shape index: {1}]   ;;  %s777_s7 = inlined_call_operand.vmem [shape: f32[8,2], index: 7, kind: output, shape index: {0}]  }
   0x1   :  { %389 = vmatprep.subr.mxu0 %v502_v0  ;;  %v44_v1 = vld [vmem:[%s769_s1 + $0x78] sm:$0xff]  ;;  %v43_v2 = vld [vmem:[%s769_s1 + $0x70] sm:$0xff]  ;;  %421 = vmatprep.mubr.msk.f32.mxu0 %vm503_vm0, %v502_v0  ;;  %v42_v3 = vld [vmem:[%s769_s1 + $0x68] sm:$0xff] }
   0x2   :  { %390 = vmatpush3.msra.mxu0 %v44_v1  ;;  %424 = vmatprep.subr.mxu1 %v502_v0  ;;  %v41_v4 = vld [vmem:[%s769_s1 + $0x60] sm:$0xff]  ;;  %v138_v5 = vld [vmem:[%s770_s3 + $0x78] sm:$0xff]  ;;  %v137_v7 = vld [vmem:[%s770_s3 + $0x70] sm:$0xff] }
   0x3   :  { %391 = vmatprep.subr.mxu0 %v502_v0  ;;  %456 = vmatprep.mubr.msk.f32.mxu1 %vm503_vm0, %v502_v0  ;;  %v40_v6 = vld [vmem:[%s769_s1 + $0x58] sm:$0xff]  ;;  %v136_v8 = vld [vmem:[%s770_s3 + $0x68] sm:$0xff]  ;;  %v39_v9 = vld [vmem:[%s769_s1 + $0x50] sm:$0xff] }
   0x4   :  { %392 = vmatpush3.msra.mxu0 %v43_v2  ;;  %425 = vmatpush3.msra.mxu1 %v138_v5  ;;  %v135_v10 = vld [vmem:[%s770_s3 + $0x60] sm:$0xff]  ;;  %v38_v11 = vld [vmem:[%s769_s1 + $0x48] sm:$0xff]  ;;  %v134_v12 = vld [vmem:[%s770_s3 + $0x58] sm:$0xff] }
   0x5   :  { %393 = vmatprep.subr.mxu0 %v502_v0  ;;  %426 = vmatprep.subr.mxu1 %v502_v0  ;;  %v37_v13 = vld [vmem:[%s769_s1 + $0x40] sm:$0xff]  ;;  %v133_v14 = vld [vmem:[%s770_s3 + $0x50] sm:$0xff]  ;;  %v36_v15 = vld [vmem:[%s769_s1 + $0x38] sm:$0xff] }
   0x6   :  { %394 = vmatpush3.msra.mxu0 %v42_v3  ;;  %427 = vmatpush3.msra.mxu1 %v137_v7  ;;  %v132_v16 = vld [vmem:[%s770_s3 + $0x48] sm:$0xff]  ;;  %v35_v17 = vld [vmem:[%s769_s1 + $0x30] sm:$0xff]  ;;  %v131_v18 = vld [vmem:[%s770_s3 + $0x40] sm:$0xff] }
   0x7   :  { %395 = vmatprep.subr.mxu0 %v502_v0  ;;  %428 = vmatprep.subr.mxu1 %v502_v0  ;;  %v34_v19 = vld [vmem:[%s769_s1 + $0x28] sm:$0xff]  ;;  %v130_v20 = vld [vmem:[%s770_s3 + $0x38] sm:$0xff]  ;;  %v33_v21 = vld [vmem:[%s769_s1 + $0x20] sm:$0xff] }
   0x8   :  { %396 = vmatpush3.msra.mxu0 %v41_v4  ;;  %429 = vmatpush3.msra.mxu1 %v136_v8  ;;  %v129_v22 = vld [vmem:[%s770_s3 + $0x30] sm:$0xff]  ;;  %v32_v23 = vld [vmem:[%s769_s1 + $0x18] sm:$0xff]  ;;  %v128_v24 = vld [vmem:[%s770_s3 + $0x28] sm:$0xff] }
   0x9   :  { %397 = vmatprep.subr.mxu0 %v502_v0  ;;  %430 = vmatprep.subr.mxu1 %v502_v0  ;;  %v31_v25 = vld [vmem:[%s769_s1 + $0x10] sm:$0xff]  ;;  %v127_v26 = vld [vmem:[%s770_s3 + $0x20] sm:$0xff]  ;;  %v30_v27 = vld [vmem:[%s769_s1 + $0x8] sm:$0xff] }
   0xa   :  { %398 = vmatpush3.msra.mxu0 %v40_v6  ;;  %431 = vmatpush3.msra.mxu1 %v135_v10  ;;  %v126_v28 = vld [vmem:[%s770_s3 + $0x18] sm:$0xff]  ;;  %v29_v29 = vld [vmem:[%s769_s1] sm:$0xff]  ;;  %v125_v31 = vld [vmem:[%s770_s3 + $0x10] sm:$0xff] }
   0xb   :  { %399 = vmatprep.subr.mxu0 %v502_v0  ;;  %432 = vmatprep.subr.mxu1 %v502_v0  ;;  %v28_v30 = vld [vmem:[%s771_s0] sm:$0xff]  ;;  %v124_v32 = vld [vmem:[%s770_s3 + $0x8] sm:$0xff]  ;;  %v232_v34 = vld [vmem:[%s772_s5 + $0x78] sm:$0xff] }
   0xc   :  { %400 = vmatpush3.msra.mxu0 %v39_v9  ;;  %433 = vmatpush3.msra.mxu1 %v134_v12  ;;  %v123_v33 = vld [vmem:[%s770_s3] sm:$0xff]  ;;  %v231_v35 = vld [vmem:[%s772_s5 + $0x70] sm:$0xff]  ;;  %v230_v36 = vld [vmem:[%s772_s5 + $0x68] sm:$0xff] }
   0xd   :  { %401 = vmatprep.subr.mxu0 %v502_v0  ;;  %434 = vmatprep.subr.mxu1 %v502_v0  ;;  %v229_v37 = vld [vmem:[%s772_s5 + $0x60] sm:$0xff]  ;;  %v228_v38 = vld [vmem:[%s772_s5 + $0x58] sm:$0xff]  ;;  %v227_v39 = vld [vmem:[%s772_s5 + $0x50] sm:$0xff] }
   0xe   :  { %402 = vmatpush3.msra.mxu0 %v38_v11  ;;  %435 = vmatpush3.msra.mxu1 %v133_v14  ;;  %v226_v40 = vld [vmem:[%s772_s5 + $0x48] sm:$0xff]  ;;  %v225_v41 = vld [vmem:[%s772_s5 + $0x40] sm:$0xff]  ;;  %v224_v42 = vld [vmem:[%s772_s5 + $0x38] sm:$0xff] }
   0xf   :  { %403 = vmatprep.subr.mxu0 %v502_v0  ;;  %436 = vmatprep.subr.mxu1 %v502_v0  ;;  %v223_v43 = vld [vmem:[%s772_s5 + $0x30] sm:$0xff]  ;;  %v222_v44 = vld [vmem:[%s772_s5 + $0x28] sm:$0xff]  ;;  %v221_v45 = vld [vmem:[%s772_s5 + $0x20] sm:$0xff] }
  0x10   :  { %404 = vmatpush3.msra.mxu0 %v37_v13  ;;  %437 = vmatpush3.msra.mxu1 %v132_v16  ;;  %v220_v46 = vld [vmem:[%s772_s5 + $0x18] sm:$0xff]  ;;  %v335_v47 = vld [vmem:[%s773_s2] ss:$0 sm:$0xff]  ;;  %v219_v52 = vld [vmem:[%s772_s5 + $0x10] sm:$0xff] }
  0x11   :  { %405 = vmatprep.subr.mxu0 %v502_v0  ;;  %438 = vmatprep.subr.mxu1 %v502_v0  ;;  %v218_v53 = vld [vmem:[%s772_s5 + $0x8] sm:$0xff]  ;;  %v217_v54 = vld [vmem:[%s772_s5] sm:$0xff] }
  0x12   :  { %406 = vmatpush3.msra.mxu0 %v36_v15  ;;  %439 = vmatpush3.msra.mxu1 %v131_v18  ;;  %v336_v55 = vld [vmem:[%s774_s4] ss:$0 sm:$0xff] }
  0x13   :  { %407 = vmatprep.subr.mxu0 %v502_v0  ;;  %440 = vmatprep.subr.mxu1 %v502_v0  ;;  %v337_v60 = vld [vmem:[%s775_s6] ss:$0 sm:$0xff] }
  0x14   :  { %408 = vmatpush3.msra.mxu0 %v35_v17  ;;  %441 = vmatpush3.msra.mxu1 %v130_v20 }
  0x15   :  { %409 = vmatprep.subr.mxu0 %v502_v0  ;;  %442 = vmatprep.subr.mxu1 %v502_v0 }
  0x16   :  { %410 = vmatpush3.msra.mxu0 %v34_v19  ;;  %443 = vmatpush3.msra.mxu1 %v129_v22 }
  0x17   :  { %411 = vmatprep.subr.mxu0 %v502_v0  ;;  %444 = vmatprep.subr.mxu1 %v502_v0 }
  0x18   :  { %412 = vmatpush3.msra.mxu0 %v33_v21  ;;  %445 = vmatpush3.msra.mxu1 %v128_v24 }
  0x19   :  { %413 = vmatprep.subr.mxu0 %v502_v0  ;;  %446 = vmatprep.subr.mxu1 %v502_v0 }
  0x1a   :  { %414 = vmatpush3.msra.mxu0 %v32_v23  ;;  %447 = vmatpush3.msra.mxu1 %v127_v26 }
  0x1b   :  { %415 = vmatprep.subr.mxu0 %v502_v0  ;;  %448 = vmatprep.subr.mxu1 %v502_v0 }
  0x1c   :  { %416 = vmatpush3.msra.mxu0 %v31_v25  ;;  %449 = vmatpush3.msra.mxu1 %v126_v28 }
  0x1d   :  { %417 = vmatprep.subr.mxu0 %v502_v0  ;;  %450 = vmatprep.subr.mxu1 %v502_v0 }
  0x1e   :  { %418 = vmatpush3.msra.mxu0 %v30_v27  ;;  %451 = vmatpush3.msra.mxu1 %v125_v31 }
  0x1f   :  { %419 = vmatprep.subr.mxu0 %v502_v0  ;;  %452 = vmatprep.subr.mxu1 %v502_v0 }
  0x20   :  { %420 = vmatpush3.msra.mxu0 %v29_v29  ;;  %453 = vmatpush3.msra.mxu1 %v124_v32 }
  0x21   :  { %422 = vmatmul.mubr.f32.vlgmr.msra.gmra.mxu0 %v28_v30  ;;  %459 = vmatprep.subr.mxu0 %v502_v0 }
  0x22   :  { %491 = vmatprep.mubr.msk.f32.mxu0 %vm503_vm0, %v502_v0  ;;  %454 = vmatprep.subr.mxu1 %v502_v0 }
  0x23   :  { %455 = vmatpush3.msra.mxu1 %v123_v33  ;;  %460 = vmatpush3.msra.mxu0 %v232_v34 }
  0x24   :  { %461 = vmatprep.subr.mxu0 %v502_v0 }
  0x25   :  { %462 = vmatpush3.msra.mxu0 %v231_v35 }
  0x26   :  { %463 = vmatprep.subr.mxu0 %v502_v0 }
  0x27   :  { %464 = vmatpush3.msra.mxu0 %v230_v36 }
  0x28   :  { %465 = vmatprep.subr.mxu0 %v502_v0 }
  0x29   :  { %466 = vmatpush3.msra.mxu0 %v229_v37 }
  0x2a   :  { %467 = vmatprep.subr.mxu0 %v502_v0 }
  0x2b   :  { %468 = vmatpush3.msra.mxu0 %v228_v38 }
  0x2c   :  { %469 = vmatprep.subr.mxu0 %v502_v0 }
  0x2d   :  { %470 = vmatpush3.msra.mxu0 %v227_v39 }
  0x2e   :  { %471 = vmatprep.subr.mxu0 %v502_v0 }
  0x2f   :  { %472 = vmatpush3.msra.mxu0 %v226_v40 }
  0x30   :  { %473 = vmatprep.subr.mxu0 %v502_v0 }
  0x31   :  { %474 = vmatpush3.msra.mxu0 %v225_v41 }
  0x32   :  { %475 = vmatprep.subr.mxu0 %v502_v0 }
  0x33   :  { %476 = vmatpush3.msra.mxu0 %v224_v42 }
  0x34   :  { %477 = vmatprep.subr.mxu0 %v502_v0 }
  0x35   :  { %478 = vmatpush3.msra.mxu0 %v223_v43 }
  0x36   :  { %479 = vmatprep.subr.mxu0 %v502_v0 }
  0x37   :  { %480 = vmatpush3.msra.mxu0 %v222_v44 }
  0x38   :  { %481 = vmatprep.subr.mxu0 %v502_v0 }
  0x39   :  { %482 = vmatpush3.msra.mxu0 %v221_v45 }
  0x3a   :  { %483 = vmatprep.subr.mxu0 %v502_v0 }
  0x3b   :  { %484 = vmatpush3.msra.mxu0 %v220_v46 }
  0x3c   :  { %485 = vmatprep.subr.mxu0 %v502_v0 }
  0x3d   :  { %486 = vmatpush3.msra.mxu0 %v219_v52 }
  0x3e   :  { %487 = vmatprep.subr.mxu0 %v502_v0 }
  0x3f   :  { %488 = vmatpush3.msra.mxu0 %v218_v53 }
  0x40   :  { %489 = vmatprep.subr.mxu0 %v502_v0 }
  0x41   :  { %490 = vmatpush3.msra.mxu0 %v217_v54 }
  0xe1   :  { %v118_v48 = vpop.f32.mrf.mxu0 }
  0xe2   :  { %v119_v49 = vadd.f32 %v335_v47, %v118_v48 }
  0xe3   :  { %v423_v50 = vpop.f32.mrf.mxu0 }
  0xe4   :  { %v122_v51 = vmax.f32 %v119_v49, 0.0 }
  0xe6   :  { %457 = vmatmul.mubr.f32.vlgmr.msra.gmra.mxu1 %v122_v51 }
 0x1a6   :  { %v212_v56 = vpop.f32.mrf.mxu1 }
 0x1a7   :  { %v213_v57 = vadd.f32 %v336_v55, %v212_v56 }
 0x1a8   :  { %v458_v58 = vpop.f32.mrf.mxu1 }
 0x1a9   :  { %v216_v59 = vmax.f32 %v213_v57, 0.0 }
 0x1ab   :  { %492 = vmatmul.mubr.f32.vlgmr.msra.gmra.mxu0 %v216_v59 }
 0x26b   :  { %v306_v61 = vpop.f32.mrf.mxu0 }
 0x26c   :  { %v307_v62 = vadd.f32 %v337_v60, %v306_v61 }
 0x26d   :  { %v493_v63 = vpop.f32.mrf.mxu0 }
 0x26e   :  { %v311_v0 = vsel %vm310_vm1, %v307_v62, -inf }
 0x26f   :  { %312 = vmax.xlane.f32.xlu0 %v311_v0 }
 0x2f8   :  { %v313_v1 = vpop.xlane.xlu0 %312 }
 0x2f9   :  { %v314_v2 = vsub.f32 %v307_v62, %v313_v1 }
 0x2fb   :  { %v315_v3 = vmul.f32 1.442695, %v314_v2 }
 0x2fd   :  { %496 = vpow2.f32 %v315_v3 }
 0x30a   :  { %v497_v4 = vpop.eup %496 }
 0x30b   :  { %v317_v5 = vsel %vm310_vm1, %v497_v4, 0.0 }
 0x30c   :  { %318 = vadd.xlane.f32.xlu0 %v317_v5 }
 0x395   :  { %v319_v6 = vpop.xlane.xlu0 %318 }
 0x396   :  { %498 = vlog2.f32 %v319_v6 }
 0x397   :  { %500 = vrcp.f32 %v319_v6 }
 0x3a3   :  { %v499_v7 = vpop.eup %498 }
 0x3a4   :  { %v501_v8 = vpop.eup %500  ;;  %v321_v9 = vmul.f32 0.6931472, %v499_v7 }
 0x3a5   :  { %v325_v10 = vmul.f32 %v501_v8, %v497_v4 }
 0x3a6   :  { %v322_v11 = vsub.f32 %v314_v2, %v321_v9 }
 0x3a7   :  { %326 = vst.msk [vmem:[%s776_s8] sm:$0xff] %vm310_vm1, %v325_v10 }
 0x3a8   :  { %323 = vst.msk [vmem:[%s777_s7] sm:$0xff] %vm310_vm1, %v322_v11 }

// kernel: simple_rsn_forward.10
= control target key start
LH: loop header
LB: loop body
LE: loop exit
PB: predicated region body
PF: predicated region fallthrough
CT: control target
= control target key end

     0   :  { %v1641_v3 = vmov 0.0   ;;  %vm1642_vm0 = vmmov 0   ;;  %vm115_vm1 = vcmask 523264   ;;  %vm438_vm2 = vcmask 1040384   ;;  %s2594_s1 = inlined_call_operand.vmem [shape: f32[576,128], index: 1, kind: input, shape index: {}]   ;;  %s2595_s0 = inlined_call_operand.vmem [shape: f32[8,576], index: 0, kind: input, shape index: {}]   ;;  %s2596_s4 = inlined_call_operand.vmem [shape: f32[1152,128], index: 4, kind: input, shape index: {}]   ;;  %s2597_s2 = inlined_call_operand.vmem [shape: f32[1,128], index: 2, kind: input, shape index: {}]   ;;  %s2598_s3 = inlined_call_operand.vmem [shape: f32[1,128], index: 3, kind: input, shape index: {}]   ;;  %s2599_s8 = inlined_call_operand.vmem [shape: f32[64,128], index: 8, kind: input, shape index: {}]   ;;  %s2600_s7 = inlined_call_operand.vmem [shape: f32[8,64], index: 7, kind: input, shape index: {}]   ;;  %s2601_s9 = inlined_call_operand.vmem [shape: f32[1,128], index: 9, kind: input, shape index: {}]   ;;  %s2602_s5 = inlined_call_operand.vmem [shape: f32[1,128], index: 5, kind: input, shape index: {}]   ;;  %s2603_s10 = inlined_call_operand.vmem [shape: f32[1,128], index: 10, kind: input, shape index: {}]   ;;  %s2604_s6 = inlined_call_operand.vmem [shape: f32[1,128], index: 6, kind: input, shape index: {}]   ;;  %s2605_s11 = inlined_call_operand.vmem [shape: f32[8,128], index: 11, kind: output, shape index: {}]  }
   0x1   :  { %v74_v0 = vld [vmem:[%s2594_s1 + $0xf8] sm:$0xff]  ;;  %346 = vst [vmem:[#allocation2] sm:$0xf] %v1641_v3  ;;  %347 = vst [vmem:[#allocation2 + $0x10] sm:$0xf] %v1641_v3  ;;  %v73_v5 = vld [vmem:[%s2594_s1 + $0xf0] sm:$0xff] }
   0x2   :  { %v106_v1 = vld [vmem:[%s2594_s1 + $0x1f8] sm:$0xff]  ;;  %349 = vst [vmem:[#allocation2 + $0xc] sm:$0xf] %v1641_v3  ;;  %350 = vst [vmem:[#allocation2 + $0x1c] sm:$0xf] %v1641_v3  ;;  %1314 = vmatprep.subr.mxu0 %v74_v0  ;;  %v105_v6 = vld [vmem:[%s2594_s1 + $0x1f0] sm:$0xff] }
   0x3   :  { %v58_v2 = vld [vmem:[%s2594_s1 + $0x78] sm:$0xff]  ;;  %352 = vst [vmem:[#allocation2 + $0x4] sm:$0x1] %v1641_v3  ;;  %353 = vst [vmem:[#allocation2 + $0x8] sm:$0x1] %v1641_v3  ;;  %1349 = vmatprep.subr.mxu1 %v106_v1  ;;  %v57_v7 = vld [vmem:[%s2594_s1 + $0x70] sm:$0xff] }
   0x4   :  { %356 = vst [vmem:[#allocation2 + $0x14] sm:$0x1] %v1641_v3  ;;  %357 = vst [vmem:[#allocation2 + $0x18] sm:$0x1] %v1641_v3  ;;  %v90_v4 = vld [vmem:[%s2594_s1 + $0x178] sm:$0xff]  ;;  %1315 = vmatpush3.msra.mxu0 %v58_v2  ;;  %v89_v8 = vld [vmem:[%s2594_s1 + $0x170] sm:$0xff] }
   0x5   :  { %360 = vst [vmem:[#allocation2 + $0x7] sm:$0x1] %v1641_v3  ;;  %361 = vst [vmem:[#allocation2 + $0xb] sm:$0x1] %v1641_v3  ;;  %1350 = vmatpush3.msra.mxu1 %v90_v4  ;;  %v72_v9 = vld [vmem:[%s2594_s1 + $0xe8] sm:$0xff]  ;;  %1316 = vmatprep.subr.mxu0 %v73_v5  ;;  %v71_v13 = vld [vmem:[%s2594_s1 + $0xe0] sm:$0xff] }
   0x6   :  { %364 = vst [vmem:[#allocation2 + $0x17] sm:$0x1] %v1641_v3  ;;  %365 = vst [vmem:[#allocation2 + $0x1b] sm:$0x1] %v1641_v3  ;;  %1351 = vmatprep.subr.mxu1 %v105_v6  ;;  %v104_v10 = vld [vmem:[%s2594_s1 + $0x1e8] sm:$0xff]  ;;  %1317 = vmatpush3.msra.mxu0 %v57_v7  ;;  %v103_v14 = vld [vmem:[%s2594_s1 + $0x1e0] sm:$0xff] }
   0x7   :  { %351 = vst [vmem:[#allocation2] sm:$0x1] %v1641_v3  ;;  %354 = vst [vmem:[#allocation2 + $0xc] sm:$0x1] %v1641_v3  ;;  %v56_v11 = vld [vmem:[%s2594_s1 + $0x68] sm:$0xff]  ;;  %1352 = vmatpush3.msra.mxu1 %v89_v8  ;;  %1318 = vmatprep.subr.mxu0 %v72_v9  ;;  %v55_v15 = vld [vmem:[%s2594_s1 + $0x60] sm:$0xff] }
   0x8   :  { %355 = vst [vmem:[#allocation2 + $0x10] sm:$0x1] %v1641_v3  ;;  %358 = vst [vmem:[#allocation2 + $0x1c] sm:$0x1] %v1641_v3  ;;  %v88_v12 = vld [vmem:[%s2594_s1 + $0x168] sm:$0xff]  ;;  %1353 = vmatprep.subr.mxu1 %v104_v10  ;;  %v87_v16 = vld [vmem:[%s2594_s1 + $0x160] sm:$0xff]  ;;  %1319 = vmatpush3.msra.mxu0 %v56_v11 }
   0x9   :  { %359 = vst [vmem:[#allocation2 + $0x3] sm:$0x1] %v1641_v3  ;;  %362 = vst [vmem:[#allocation2 + $0xf] sm:$0x1] %v1641_v3  ;;  %1354 = vmatpush3.msra.mxu1 %v88_v12  ;;  %v70_v17 = vld [vmem:[%s2594_s1 + $0xd8] sm:$0xff]  ;;  %1320 = vmatprep.subr.mxu0 %v71_v13  ;;  %v69_v21 = vld [vmem:[%s2594_s1 + $0xd0] sm:$0xff] }
   0xa   :  { %363 = vst [vmem:[#allocation2 + $0x13] sm:$0x1] %v1641_v3  ;;  %366 = vst [vmem:[#allocation2 + $0x1f] sm:$0x1] %v1641_v3  ;;  %v102_v18 = vld [vmem:[%s2594_s1 + $0x1d8] sm:$0xff]  ;;  %1355 = vmatprep.subr.mxu1 %v103_v14  ;;  %1321 = vmatpush3.msra.mxu0 %v55_v15  ;;  %v101_v22 = vld [vmem:[%s2594_s1 + $0x1d0] sm:$0xff] }
   0xb   :  { %v54_v19 = vld [vmem:[%s2594_s1 + $0x58] sm:$0xff]  ;;  %1356 = vmatpush3.msra.mxu1 %v87_v16  ;;  %1322 = vmatprep.subr.mxu0 %v70_v17  ;;  %v53_v23 = vld [vmem:[%s2594_s1 + $0x50] sm:$0xff]  ;;  %v68_v25 = vld [vmem:[%s2594_s1 + $0xc8] sm:$0xff]  ;;  %vm439_vm3 = vcmask 1042434   ;;  %vm441_vm5 = vcmask 1044484   ;;  %vm443_vm7 = vcmask 1046534  }
   0xc   :  { %v86_v20 = vld [vmem:[%s2594_s1 + $0x158] sm:$0xff]  ;;  %1357 = vmatprep.subr.mxu1 %v102_v18  ;;  %v85_v24 = vld [vmem:[%s2594_s1 + $0x150] sm:$0xff]  ;;  %1323 = vmatpush3.msra.mxu0 %v54_v19  ;;  %v100_v26 = vld [vmem:[%s2594_s1 + $0x1c8] sm:$0xff] }
   0xd   :  { %1358 = vmatpush3.msra.mxu1 %v86_v20  ;;  %1324 = vmatprep.subr.mxu0 %v69_v21  ;;  %v52_v27 = vld [vmem:[%s2594_s1 + $0x48] sm:$0xff]  ;;  %v67_v29 = vld [vmem:[%s2594_s1 + $0xc0] sm:$0xff]  ;;  %v66_v33 = vld [vmem:[%s2594_s1 + $0xb8] sm:$0xff] }
   0xe   :  { %1359 = vmatprep.subr.mxu1 %v101_v22  ;;  %v84_v28 = vld [vmem:[%s2594_s1 + $0x148] sm:$0xff]  ;;  %1325 = vmatpush3.msra.mxu0 %v53_v23  ;;  %v99_v30 = vld [vmem:[%s2594_s1 + $0x1c0] sm:$0xff]  ;;  %v98_v34 = vld [vmem:[%s2594_s1 + $0x1b8] sm:$0xff] }
   0xf   :  { %1360 = vmatpush3.msra.mxu1 %v85_v24  ;;  %1326 = vmatprep.subr.mxu0 %v68_v25  ;;  %v51_v31 = vld [vmem:[%s2594_s1 + $0x40] sm:$0xff]  ;;  %v50_v35 = vld [vmem:[%s2594_s1 + $0x38] sm:$0xff]  ;;  %v65_v37 = vld [vmem:[%s2594_s1 + $0xb0] sm:$0xff] }
  0x10   :  { %1361 = vmatprep.subr.mxu1 %v100_v26  ;;  %v83_v32 = vld [vmem:[%s2594_s1 + $0x140] sm:$0xff]  ;;  %1327 = vmatpush3.msra.mxu0 %v52_v27  ;;  %v82_v36 = vld [vmem:[%s2594_s1 + $0x138] sm:$0xff]  ;;  %v97_v38 = vld [vmem:[%s2594_s1 + $0x1b0] sm:$0xff] }
  0x11   :  { %1362 = vmatpush3.msra.mxu1 %v84_v28  ;;  %1328 = vmatprep.subr.mxu0 %v67_v29  ;;  %v49_v39 = vld [vmem:[%s2594_s1 + $0x30] sm:$0xff]  ;;  %v64_v41 = vld [vmem:[%s2594_s1 + $0xa8] sm:$0xff]  ;;  %v63_v45 = vld [vmem:[%s2594_s1 + $0xa0] sm:$0xff] }
  0x12   :  { %1363 = vmatprep.subr.mxu1 %v99_v30  ;;  %1329 = vmatpush3.msra.mxu0 %v51_v31  ;;  %v81_v40 = vld [vmem:[%s2594_s1 + $0x130] sm:$0xff]  ;;  %v96_v42 = vld [vmem:[%s2594_s1 + $0x1a8] sm:$0xff]  ;;  %v95_v46 = vld [vmem:[%s2594_s1 + $0x1a0] sm:$0xff] }
  0x13   :  { %1364 = vmatpush3.msra.mxu1 %v83_v32  ;;  %1330 = vmatprep.subr.mxu0 %v66_v33  ;;  %v48_v43 = vld [vmem:[%s2594_s1 + $0x28] sm:$0xff]  ;;  %v47_v47 = vld [vmem:[%s2594_s1 + $0x20] sm:$0xff]  ;;  %v62_v49 = vld [vmem:[%s2594_s1 + $0x98] sm:$0xff] }
  0x14   :  { %1365 = vmatprep.subr.mxu1 %v98_v34  ;;  %1331 = vmatpush3.msra.mxu0 %v50_v35  ;;  %v80_v44 = vld [vmem:[%s2594_s1 + $0x128] sm:$0xff]  ;;  %v79_v48 = vld [vmem:[%s2594_s1 + $0x120] sm:$0xff]  ;;  %v94_v50 = vld [vmem:[%s2594_s1 + $0x198] sm:$0xff] }
  0x15   :  { %1366 = vmatpush3.msra.mxu1 %v82_v36  ;;  %1332 = vmatprep.subr.mxu0 %v65_v37  ;;  %v46_v51 = vld [vmem:[%s2594_s1 + $0x18] sm:$0xff]  ;;  %v61_v53 = vld [vmem:[%s2594_s1 + $0x90] sm:$0xff]  ;;  %v60_v57 = vld [vmem:[%s2594_s1 + $0x88] sm:$0xff] }
  0x16   :  { %1367 = vmatprep.subr.mxu1 %v97_v38  ;;  %1333 = vmatpush3.msra.mxu0 %v49_v39  ;;  %v78_v52 = vld [vmem:[%s2594_s1 + $0x118] sm:$0xff]  ;;  %v93_v54 = vld [vmem:[%s2594_s1 + $0x190] sm:$0xff]  ;;  %v92_v58 = vld [vmem:[%s2594_s1 + $0x188] sm:$0xff] }
  0x17   :  { %1368 = vmatpush3.msra.mxu1 %v81_v40  ;;  %1334 = vmatprep.subr.mxu0 %v64_v41  ;;  %v45_v55 = vld [vmem:[%s2594_s1 + $0x10] sm:$0xff]  ;;  %v44_v59 = vld [vmem:[%s2594_s1 + $0x8] sm:$0xff]  ;;  %v59_v61 = vld [vmem:[%s2594_s1 + $0x80] sm:$0xff] }
  0x18   :  { %1369 = vmatprep.subr.mxu1 %v96_v42  ;;  %1335 = vmatpush3.msra.mxu0 %v48_v43  ;;  %v77_v56 = vld [vmem:[%s2594_s1 + $0x110] sm:$0xff]  ;;  %v76_v60 = vld [vmem:[%s2594_s1 + $0x108] sm:$0xff]  ;;  %v91_v62 = vld [vmem:[%s2594_s1 + $0x180] sm:$0xff] }
  0x19   :  { %1370 = vmatpush3.msra.mxu1 %v80_v44  ;;  %1336 = vmatprep.subr.mxu0 %v63_v45  ;;  %v43_v63 = vld [vmem:[%s2594_s1] sm:$0xff]  ;;  %v39_v0 = vld [vmem:[%s2595_s0 + $0x8] sm:$0xff]  ;;  %v41_v2 = vld [vmem:[%s2595_s0 + $0x18] sm:$0xff] }
  0x1a   :  { %1371 = vmatprep.subr.mxu1 %v95_v46  ;;  %1337 = vmatpush3.msra.mxu0 %v47_v47  ;;  %v75_v1 = vld [vmem:[%s2594_s1 + $0x100] sm:$0xff]  ;;  %v40_v5 = vld [vmem:[%s2595_s0 + $0x10] sm:$0xff]  ;;  %v114_v6 = vld [vmem:[%s2594_s1 + $0x238] sm:$0xff] }
  0x1b   :  { %1372 = vmatpush3.msra.mxu1 %v79_v48  ;;  %1338 = vmatprep.subr.mxu0 %v62_v49  ;;  %v38_v4 = vld [vmem:[%s2595_s0] sm:$0xff]  ;;  %v113_v7 = vld [vmem:[%s2594_s1 + $0x230] sm:$0xff]  ;;  %v112_v8 = vld [vmem:[%s2594_s1 + $0x228] sm:$0xff] }
  0x1c   :  { %1373 = vmatprep.subr.mxu1 %v94_v50  ;;  %1339 = vmatpush3.msra.mxu0 %v46_v51  ;;  %v111_v9 = vld [vmem:[%s2594_s1 + $0x220] sm:$0xff]  ;;  %v110_v10 = vld [vmem:[%s2594_s1 + $0x218] sm:$0xff]  ;;  %v109_v11 = vld [vmem:[%s2594_s1 + $0x210] sm:$0xff] }
  0x1d   :  { %1374 = vmatpush3.msra.mxu1 %v78_v52  ;;  %1340 = vmatprep.subr.mxu0 %v61_v53  ;;  %v108_v12 = vld [vmem:[%s2594_s1 + $0x208] sm:$0xff]  ;;  %v107_v13 = vld [vmem:[%s2594_s1 + $0x200] sm:$0xff]  ;;  %v738_v15 = vld [vmem:[%s2596_s4 + $0x1f8] sm:$0xff] }
  0x1e   :  { %1375 = vmatprep.subr.mxu1 %v93_v54  ;;  %1341 = vmatpush3.msra.mxu0 %v45_v55  ;;  %v42_v14 = vld [vmem:[%s2595_s0 + $0x20] sm:$0xff]  ;;  %v722_v16 = vld [vmem:[%s2596_s4 + $0x178] sm:$0xff]  ;;  %v737_v17 = vld [vmem:[%s2596_s4 + $0x1f0] sm:$0xff] }
  0x1f   :  { %1376 = vmatpush3.msra.mxu1 %v77_v56  ;;  %1342 = vmatprep.subr.mxu0 %v60_v57  ;;  %v706_v18 = vld [vmem:[%s2596_s4 + $0xf8] sm:$0xff]  ;;  %v721_v19 = vld [vmem:[%s2596_s4 + $0x170] sm:$0xff]  ;;  %v736_v21 = vld [vmem:[%s2596_s4 + $0x1e8] sm:$0xff] }
  0x20   :  { %1377 = vmatprep.subr.mxu1 %v92_v58  ;;  %1343 = vmatpush3.msra.mxu0 %v44_v59  ;;  %v690_v20 = vld [vmem:[%s2596_s4 + $0x78] sm:$0xff]  ;;  %v705_v22 = vld [vmem:[%s2596_s4 + $0xf0] sm:$0xff]  ;;  %v720_v23 = vld [vmem:[%s2596_s4 + $0x168] sm:$0xff] }
  0x21   :  { %1378 = vmatpush3.msra.mxu1 %v76_v60  ;;  %1344 = vmatprep.subr.mxu0 %v59_v61  ;;  %v689_v24 = vld [vmem:[%s2596_s4 + $0x70] sm:$0xff]  ;;  %v735_v25 = vld [vmem:[%s2596_s4 + $0x1e0] sm:$0xff]  ;;  %v704_v26 = vld [vmem:[%s2596_s4 + $0xe8] sm:$0xff] }
  0x22   :  { %1379 = vmatprep.subr.mxu1 %v91_v62  ;;  %1345 = vmatpush3.msra.mxu0 %v43_v63  ;;  %v719_v27 = vld [vmem:[%s2596_s4 + $0x160] sm:$0xff]  ;;  %v688_v28 = vld [vmem:[%s2596_s4 + $0x68] sm:$0xff]  ;;  %v734_v29 = vld [vmem:[%s2596_s4 + $0x1d8] sm:$0xff] }
  0x23   :  { %183 = vmatprep.mubr.f32.mxu0 %v39_v0  ;;  %1380 = vmatpush3.msra.mxu1 %v75_v1  ;;  %v703_v30 = vld [vmem:[%s2596_s4 + $0xe0] sm:$0xff]  ;;  %v718_v31 = vld [vmem:[%s2596_s4 + $0x158] sm:$0xff]  ;;  %v733_v33 = vld [vmem:[%s2596_s4 + $0x1d0] sm:$0xff] }
  0x24   :  { %253 = vmatprep.mubr.f32.mxu1 %v41_v2  ;;  %184 = vmatmul.mubr.f32.vlgmr.msra.gmra.mxu0 %v38_v4  ;;  %v687_v32 = vld [vmem:[%s2596_s4 + $0x60] sm:$0xff]  ;;  %v702_v34 = vld [vmem:[%s2596_s4 + $0xd8] sm:$0xff]  ;;  %v717_v35 = vld [vmem:[%s2596_s4 + $0x150] sm:$0xff] }
  0x25   :  { %254 = vmatmul.mubr.f32.vlgmr.msra.gmra.mxu1 %v40_v5  ;;  %1559 = vmatprep.subr.mxu0 %v1641_v3  ;;  %v686_v36 = vld [vmem:[%s2596_s4 + $0x58] sm:$0xff]  ;;  %v732_v37 = vld [vmem:[%s2596_s4 + $0x1c8] sm:$0xff]  ;;  %v701_v38 = vld [vmem:[%s2596_s4 + $0xd0] sm:$0xff] }
  0x26   :  { %1575 = vmatprep.mubr.msk.f32.mxu0 %vm1642_vm0, %v1641_v3  ;;  %1560 = vmatpush3.msra.mxu0 %v114_v6  ;;  %v716_v39 = vld [vmem:[%s2596_s4 + $0x148] sm:$0xff]  ;;  %v685_v40 = vld [vmem:[%s2596_s4 + $0x50] sm:$0xff]  ;;  %v731_v41 = vld [vmem:[%s2596_s4 + $0x1c0] sm:$0xff] }
  0x27   :  { %1561 = vmatprep.subr.mxu0 %v1641_v3  ;;  %1393 = vmatprep.subr.mxu1 %v706_v18  ;;  %v700_v42 = vld [vmem:[%s2596_s4 + $0xc8] sm:$0xff]  ;;  %v715_v43 = vld [vmem:[%s2596_s4 + $0x140] sm:$0xff]  ;;  %v730_v45 = vld [vmem:[%s2596_s4 + $0x1b8] sm:$0xff] }
  0x28   :  { %1562 = vmatpush3.msra.mxu0 %v113_v7  ;;  %1394 = vmatpush3.msra.mxu1 %v690_v20  ;;  %v684_v44 = vld [vmem:[%s2596_s4 + $0x48] sm:$0xff]  ;;  %v699_v46 = vld [vmem:[%s2596_s4 + $0xc0] sm:$0xff]  ;;  %v714_v47 = vld [vmem:[%s2596_s4 + $0x138] sm:$0xff] }
  0x29   :  { %1563 = vmatprep.subr.mxu0 %v1641_v3  ;;  %1395 = vmatprep.subr.mxu1 %v705_v22  ;;  %v683_v48 = vld [vmem:[%s2596_s4 + $0x40] sm:$0xff]  ;;  %v729_v49 = vld [vmem:[%s2596_s4 + $0x1b0] sm:$0xff]  ;;  %v698_v50 = vld [vmem:[%s2596_s4 + $0xb8] sm:$0xff] }
  0x2a   :  { %1564 = vmatpush3.msra.mxu0 %v112_v8  ;;  %1396 = vmatpush3.msra.mxu1 %v689_v24  ;;  %v713_v51 = vld [vmem:[%s2596_s4 + $0x130] sm:$0xff]  ;;  %v682_v52 = vld [vmem:[%s2596_s4 + $0x38] sm:$0xff]  ;;  %v728_v53 = vld [vmem:[%s2596_s4 + $0x1a8] sm:$0xff]  ;;  %v1643_v24 = vmov 1983009808  }
  0x2b   :  { %1565 = vmatprep.subr.mxu0 %v1641_v3  ;;  %1397 = vmatprep.subr.mxu1 %v704_v26  ;;  %v697_v54 = vld [vmem:[%s2596_s4 + $0xb0] sm:$0xff]  ;;  %v712_v55 = vld [vmem:[%s2596_s4 + $0x128] sm:$0xff]  ;;  %v727_v57 = vld [vmem:[%s2596_s4 + $0x1a0] sm:$0xff]  ;;  %v372_v26 = vlaneseq }
  0x2c   :  { %1566 = vmatpush3.msra.mxu0 %v111_v9  ;;  %1398 = vmatpush3.msra.mxu1 %v688_v28  ;;  %v681_v56 = vld [vmem:[%s2596_s4 + $0x30] sm:$0xff]  ;;  %v696_v58 = vld [vmem:[%s2596_s4 + $0xa8] sm:$0xff]  ;;  %v711_v59 = vld [vmem:[%s2596_s4 + $0x120] sm:$0xff] }
  0x2d   :  { %1567 = vmatprep.subr.mxu0 %v1641_v3  ;;  %1399 = vmatprep.subr.mxu1 %v703_v30  ;;  %v680_v60 = vld [vmem:[%s2596_s4 + $0x28] sm:$0xff]  ;;  %v726_v61 = vld [vmem:[%s2596_s4 + $0x198] sm:$0xff]  ;;  %v695_v62 = vld [vmem:[%s2596_s4 + $0xa0] sm:$0xff] }
  0x2e   :  { %1568 = vmatpush3.msra.mxu0 %v110_v10  ;;  %1400 = vmatpush3.msra.mxu1 %v687_v32  ;;  %v710_v63 = vld [vmem:[%s2596_s4 + $0x118] sm:$0xff]  ;;  %v679_v0 = vld [vmem:[%s2596_s4 + $0x20] sm:$0xff]  ;;  %v725_v1 = vld [vmem:[%s2596_s4 + $0x190] sm:$0xff]  ;;  %v373_v32 = vshrl.u32 %v372_v26, 7 }
  0x2f   :  { %1569 = vmatprep.subr.mxu0 %v1641_v3  ;;  %1401 = vmatprep.subr.mxu1 %v702_v34  ;;  %v694_v2 = vld [vmem:[%s2596_s4 + $0x98] sm:$0xff]  ;;  %v709_v4 = vld [vmem:[%s2596_s4 + $0x110] sm:$0xff]  ;;  %v724_v6 = vld [vmem:[%s2596_s4 + $0x188] sm:$0xff] }
  0x30   :  { %1570 = vmatpush3.msra.mxu0 %v109_v11  ;;  %1402 = vmatpush3.msra.mxu1 %v686_v36  ;;  %v678_v5 = vld [vmem:[%s2596_s4 + $0x18] sm:$0xff]  ;;  %v693_v7 = vld [vmem:[%s2596_s4 + $0x90] sm:$0xff]  ;;  %v708_v8 = vld [vmem:[%s2596_s4 + $0x108] sm:$0xff] }
  0x31   :  { %1571 = vmatprep.subr.mxu0 %v1641_v3  ;;  %1403 = vmatprep.subr.mxu1 %v701_v38  ;;  %v677_v9 = vld [vmem:[%s2596_s4 + $0x10] sm:$0xff]  ;;  %v723_v10 = vld [vmem:[%s2596_s4 + $0x180] sm:$0xff]  ;;  %v692_v11 = vld [vmem:[%s2596_s4 + $0x88] sm:$0xff] }
  0x32   :  { %1572 = vmatpush3.msra.mxu0 %v108_v12  ;;  %1404 = vmatpush3.msra.mxu1 %v685_v40  ;;  %v707_v12 = vld [vmem:[%s2596_s4 + $0x100] sm:$0xff]  ;;  %v2176_v40 = vld [vmem:[#allocation2 + $0xc] sm:$0xf]  ;;  %vm440_vm4 = vmor %vm438_vm2, %vm439_vm3 }
  0x33   :  { %1573 = vmatprep.subr.mxu0 %v1641_v3  ;;  %1405 = vmatprep.subr.mxu1 %v700_v42  ;;  %v2172_v38 = vld [vmem:[#allocation2] sm:$0xf]  ;;  %vm442_vm6 = vmor %vm440_vm4, %vm441_vm5 }
  0x34   :  { %1574 = vmatpush3.msra.mxu0 %v107_v13  ;;  %1406 = vmatpush3.msra.mxu1 %v684_v44  ;;  %v676_v13 = vld [vmem:[%s2596_s4 + $0x8] sm:$0xff]  ;;  %vm2200_vm8 = vmor %vm442_vm6, %vm443_vm7 }
  0x35   :  { %1576 = vmatmul.mubr.msk.f32.vlgmr.msra.gmra.mxu0 %vm115_vm1, %v42_v14  ;;  %1428 = vmatprep.subr.mxu0 %v738_v15  ;;  %v802_v14 = vld [vmem:[%s2596_s4 + $0x3f8] sm:$0xff]  ;;  %v691_v15 = vld [vmem:[%s2596_s4 + $0x80] sm:$0xff] }
  0x36   :  { %1429 = vmatpush3.msra.mxu0 %v722_v16  ;;  %1407 = vmatprep.subr.mxu1 %v699_v46  ;;  %v675_v16 = vld [vmem:[%s2596_s4] sm:$0xff] }
  0x37   :  { %1430 = vmatprep.subr.mxu0 %v737_v17  ;;  %1408 = vmatpush3.msra.mxu1 %v683_v48  ;;  %v770_v17 = vld [vmem:[%s2596_s4 + $0x2f8] sm:$0xff] }
  0x38   :  { %1431 = vmatpush3.msra.mxu0 %v721_v19  ;;  %1409 = vmatprep.subr.mxu1 %v698_v50 }
  0x39   :  { %1432 = vmatprep.subr.mxu0 %v736_v21  ;;  %1410 = vmatpush3.msra.mxu1 %v682_v52 }
  0x3a   :  { %1433 = vmatpush3.msra.mxu0 %v720_v23  ;;  %1411 = vmatprep.subr.mxu1 %v697_v54 }
  0x3b   :  { %1434 = vmatprep.subr.mxu0 %v735_v25  ;;  %1412 = vmatpush3.msra.mxu1 %v681_v56  ;;  %v370_v25 = vunpack.c.l.s4 %v1643_v24 }
  0x3c   :  { %1435 = vmatpush3.msra.mxu0 %v719_v27  ;;  %1413 = vmatprep.subr.mxu1 %v696_v58 }
  0x3d   :  { %1436 = vmatprep.subr.mxu0 %v734_v29  ;;  %1414 = vmatpush3.msra.mxu1 %v680_v60  ;;  %v1291_v29 = vld [vmem:[%s2597_s2] ss:$0 sm:$0xff] }
  0x3e   :  { %1437 = vmatpush3.msra.mxu0 %v718_v31  ;;  %1415 = vmatprep.subr.mxu1 %v695_v62  ;;  %v371_v31 = vunpack.c.0.s8 %v370_v25 }
  0x3f   :  { %1438 = vmatprep.subr.mxu0 %v733_v33  ;;  %1416 = vmatpush3.msra.mxu1 %v679_v0  ;;  %v1292_v33 = vld [vmem:[%s2598_s3] ss:$0 sm:$0xff]  ;;  %v754_v0 = vld [vmem:[%s2596_s4 + $0x278] sm:$0xff] }
  0x40   :  { %1439 = vmatpush3.msra.mxu0 %v717_v35  ;;  %1417 = vmatprep.subr.mxu1 %v694_v2 }
  0x41   :  { %1440 = vmatprep.subr.mxu0 %v732_v37  ;;  %1418 = vmatpush3.msra.mxu1 %v678_v5  ;;  %v2170_v37 = vsub.s32 %v371_v31, %v373_v32 }
  0x42   :  { %1441 = vmatpush3.msra.mxu0 %v716_v39  ;;  %1419 = vmatprep.subr.mxu1 %v693_v7  ;;  %v2174_v39 = vld [vmem:[#allocation2 + $0x10] sm:$0xf] }
  0x43   :  { %1442 = vmatprep.subr.mxu0 %v731_v41  ;;  %1420 = vmatpush3.msra.mxu1 %v677_v9  ;;  %v2178_v41 = vld [vmem:[#allocation2 + $0x1c] sm:$0xf]  ;;  %v428_v44 = vrot.slane %v2174_v39, %v2170_v37 }
  0x44   :  { %1443 = vmatpush3.msra.mxu0 %v715_v43  ;;  %1421 = vmatprep.subr.mxu1 %v692_v11  ;;  %v412_v43 = vrot.slane %v2172_v38, %v2170_v37  ;;  %v2191_v48 = vrot.slane %v2178_v41, %v2170_v37 }
  0x45   :  { %1444 = vmatprep.subr.mxu0 %v730_v45  ;;  %1422 = vmatpush3.msra.mxu1 %v676_v13  ;;  %v2186_v45 = vrot.slane %v2176_v40, %v2170_v37  ;;  %v429_v52 = vcombine.high %v428_v44, %v428_v44 }
  0x46   :  { %1445 = vmatpush3.msra.mxu0 %v714_v47  ;;  %1423 = vmatprep.subr.mxu1 %v691_v15  ;;  %v1295_v56 = vrot.slane %v412_v43, 9 }
  0x47   :  { %1446 = vmatprep.subr.mxu0 %v729_v49  ;;  %1424 = vmatpush3.msra.mxu1 %v675_v16  ;;  %v455_v60 = vrot.slane %v429_v52, 7 }
  0x48   :  { %1447 = vmatpush3.msra.mxu0 %v713_v51  ;;  %1463 = vmatprep.subr.mxu1 %v770_v17  ;;  %v413_v51 = vcombine.high %v412_v43, %v412_v43 }
  0x49   :  { %1448 = vmatprep.subr.mxu0 %v728_v53  ;;  %v496_v53 = vcombine.high %v2186_v45, %v2186_v45 }
  0x4a   :  { %1449 = vmatpush3.msra.mxu0 %v712_v55  ;;  %v504_v55 = vcombine.high %v2191_v48, %v2191_v48 }
  0x4b   :  { %1450 = vmatprep.subr.mxu0 %v727_v57  ;;  %v1297_v57 = vrot.slane %v428_v44, 9  ;;  %v507_v62 = vrot.slane %v496_v53, 7 }
  0x4c   :  { %1451 = vmatpush3.msra.mxu0 %v711_v59  ;;  %v447_v59 = vrot.slane %v413_v51, 7  ;;  %v511_v2 = vrot.slane %v504_v55, 7  ;;  %v801_v51 = vld [vmem:[%s2596_s4 + $0x3f0] sm:$0xff] }
  0x4d   :  { %1452 = vmatprep.subr.mxu0 %v726_v61  ;;  %v1301_v61 = vrot.slane %v2186_v45, 9 }
  0x4e   :  { %1453 = vmatpush3.msra.mxu0 %v710_v63  ;;  %v448_v9 = vsel %vm2200_vm8, %v1295_v56, %v447_v59  ;;  %v785_v56 = vld [vmem:[%s2596_s4 + $0x370] sm:$0xff] }
  0x4f   :  { %1454 = vmatprep.subr.mxu0 %v725_v1  ;;  %v1302_v1 = vrot.slane %v2191_v48, 9  ;;  %v2214_v11 = vsel %vm2200_vm8, %v1301_v61, %v507_v62  ;;  %v800_v62 = vld [vmem:[%s2596_s4 + $0x3e8] sm:$0xff] }
  0x50   :  { %1455 = vmatpush3.msra.mxu0 %v709_v4 }
  0x51   :  { %1456 = vmatprep.subr.mxu0 %v724_v6  ;;  %v2219_v15 = vsel %vm2200_vm8, %v1302_v1, %v511_v2 }
  0x52   :  { %1457 = vmatpush3.msra.mxu0 %v708_v8 }
  0x53   :  { %1458 = vmatprep.subr.mxu0 %v723_v10  ;;  %v456_v10 = vsel %vm2200_vm8, %v1297_v57, %v455_v60 }
  0x54   :  { %1459 = vmatpush3.msra.mxu0 %v707_v12 }
  0x55   :  { %1498 = vmatprep.subr.mxu0 %v802_v14 }
  0xe4   :  { %v1346_v18 = vpop.f32.mrf.mxu0 }
  0xe5   :  { %v1381_v19 = vpop.f32.mrf.mxu1 }
  0xe6   :  { %v1347_v20 = vpop.f32.mrf.mxu0 }
  0xe7   :  { %v1382_v21 = vpop.f32.mrf.mxu1  ;;  %v1348_v22 = vadd.f32 %v1347_v20, %v1346_v18 }
  0xe8   :  { %v1383_v23 = vadd.f32 %v1382_v21, %v1381_v19 }
  0xea   :  { %v256_v27 = vadd.f32 %v1383_v23, %v1348_v22 }
  0xf5   :  { %v325_v28 = vpop.f32.mrf.mxu0 }
  0xf6   :  { %v326_v30 = vadd.f32 %v325_v28, %v256_v27 }
  0xf7   :  { %v1577_v34 = vpop.f32.mrf.mxu0 }
  0xf8   :  { %v336_v35 = vmul.f32 %v1291_v29, %v326_v30 }
  0xfa   :  { %v344_v36 = vadd.f32 %v1292_v33, %v336_v35 }
  0xfc   :  { %v345_v42 = vmax.f32 %v344_v36, 0.0 }
  0xfe   :  { %v368_v46 = vcombine.high %v345_v42, %v345_v42  ;;  %v375_v47 = vrot.slane %v345_v42, %v2170_v37  ;;  %1293 = vst.sshfl [vmem:[#allocation2 + $0x5] sm:$0x3 pattern:$0x76325410] %v345_v42 }
 0x100   :  { %v382_v49 = vrot.slane %v368_v46, %v2170_v37  ;;  %v383_v50 = vcombine.high %v375_v47, %v375_v47  ;;  %1294 = vst.sshfl [vmem:[#allocation2 + $0x15] sm:$0x3 pattern:$0x76325410] %v368_v46 }
 0x102   :  { %v384_v54 = vcombine.high %v382_v49, %v382_v49  ;;  %391 = vst [vmem:[#allocation2 + $0x9] sm:$0x3] %v383_v50 }
 0x104   :  { %393 = vst [vmem:[#allocation2 + $0x19] sm:$0x3] %v384_v54 }
 0x105   :  { %v395_v58 = vld [vmem:[#allocation2 + $0x4] sm:$0xf] }
 0x106   :  { %v420_v63 = vrot.slane %v395_v58, %v2170_v37  ;;  %v513_v24 = vcombine.low %v2172_v38, %v395_v58 }
 0x107   :  { %v399_v4 = vld [vmem:[#allocation2 + $0x14] sm:$0xf] }
 0x108   :  { %v436_v5 = vrot.slane %v399_v4, %v2170_v37  ;;  %v421_v6 = vcombine.high %v420_v63, %v420_v63  ;;  %v1303_v8 = vcombine.high %v412_v43, %v420_v63  ;;  %v1296_v14 = vrot.slane %v420_v63, 9 }
 0x109   :  { %v2206_v7 = vld [vmem:[#allocation2 + $0x8] sm:$0xf]  ;;  %v514_v20 = vcombine.low %v2174_v39, %v399_v4  ;;  %v521_v54 = vrot.slane %v513_v24, %v2170_v37  ;;  %v766_v24 = vld [vmem:[%s2596_s4 + $0x2d8] sm:$0xff] }
 0x10a   :  { %v567_v12 = vcombine.low %v395_v58, %v2206_v7  ;;  %v1304_v13 = vcombine.high %v428_v44, %v436_v5  ;;  %v469_v17 = vrot.slane %v2206_v7, %v2170_v37  ;;  %v437_v18 = vcombine.high %v436_v5, %v436_v5  ;;  %v786_v44 = vld [vmem:[%s2596_s4 + $0x378] sm:$0xff] }
 0x10b   :  { %v2221_v16 = vld [vmem:[#allocation2 + $0x18] sm:$0xf]  ;;  %v451_v19 = vrot.slane %v421_v6, 7  ;;  %v557_v25 = vrot.slane %v1303_v8, %v2170_v37  ;;  %v1298_v27 = vrot.slane %v436_v5, 9  ;;  %v528_v34 = vrot.slane %v514_v20, %v2170_v37  ;;  %v753_v8 = vld [vmem:[%s2596_s4 + $0x270] sm:$0xff]  ;;  %v767_v20 = vld [vmem:[%s2596_s4 + $0x2e0] sm:$0xff] }
 0x10c   :  { %v477_v21 = vrot.slane %v2221_v16, %v2170_v37  ;;  %v568_v22 = vcombine.low %v399_v4, %v2221_v16  ;;  %v564_v23 = vrot.slane %v1304_v13, %v2170_v37  ;;  %v459_v28 = vrot.slane %v437_v18, 7  ;;  %v768_v13 = vld [vmem:[%s2596_s4 + $0x2e8] sm:$0xff] }
 0x10d   :  { %v2234_v26 = vsel %vm2200_vm8, %v1296_v14, %v451_v19  ;;  %v575_v29 = vrot.slane %v567_v12, %v2170_v37  ;;  %v470_v35 = vcombine.high %v469_v17, %v469_v17  ;;  %v1305_v43 = vcombine.high %v420_v63, %v469_v17  ;;  %v783_v14 = vld [vmem:[%s2596_s4 + $0x360] sm:$0xff]  ;;  %v798_v19 = vld [vmem:[%s2596_s4 + $0x3d8] sm:$0xff] }
 0x10e   :  { %v582_v30 = vrot.slane %v568_v22, %v2170_v37  ;;  %v531_v31 = vcombine.low %v448_v9, %v2234_v26  ;;  %v1306_v32 = vcombine.high %v436_v5, %v477_v21  ;;  %v2241_v33 = vsel %vm2200_vm8, %v1298_v27, %v459_v28  ;;  %v784_v5 = vld [vmem:[%s2596_s4 + $0x368] sm:$0xff]  ;;  %v799_v9 = vld [vmem:[%s2596_s4 + $0x3e0] sm:$0xff]  ;;  %v750_v27 = vld [vmem:[%s2596_s4 + $0x258] sm:$0xff] }
 0x10f   :  { %v478_v36 = vcombine.high %v477_v21, %v477_v21  ;;  %v565_v39 = vcombine.low %v557_v25, %v564_v23  ;;  %v532_v42 = vcombine.low %v456_v10, %v2241_v33  ;;  %v1299_v46 = vrot.slane %v469_v17, 9  ;;  %v751_v22 = vld [vmem:[%s2596_s4 + $0x260] sm:$0xff]  ;;  %v797_v23 = vld [vmem:[%s2596_s4 + $0x3d0] sm:$0xff]  ;;  %v796_v28 = vld [vmem:[%s2596_s4 + $0x3c8] sm:$0xff] }
 0x110   :  { %v583_v38 = vcombine.low %v575_v29, %v582_v30  ;;  %v481_v47 = vrot.slane %v470_v35, 7  ;;  %v1300_v49 = vrot.slane %v477_v21, 9  ;;  %v539_v52 = vrot.slane %v531_v31, %v2170_v37  ;;  %v781_v25 = vld [vmem:[%s2596_s4 + $0x350] sm:$0xff]  ;;  %v780_v30 = vld [vmem:[%s2596_s4 + $0x348] sm:$0xff]  ;;  %v779_v35 = vld [vmem:[%s2596_s4 + $0x340] sm:$0xff] }
 0x111   :  { %v485_v50 = vrot.slane %v478_v36, 7  ;;  %v546_v53 = vrot.slane %v532_v42, %v2170_v37  ;;  %v618_v55 = vrot.slane %v1306_v32, %v2170_v37  ;;  %v1307_v59 = vcombine.high %v469_v17, %v2186_v45  ;;  %v752_v17 = vld [vmem:[%s2596_s4 + $0x268] sm:$0xff]  ;;  %v765_v29 = vld [vmem:[%s2596_s4 + $0x2d0] sm:$0xff]  ;;  %v795_v32 = vld [vmem:[%s2596_s4 + $0x3c0] sm:$0xff] }
 0x112   :  { %953 = vmatprep.mubr.f32.mxu0 %v583_v38  ;;  %v2260_v57 = vsel %vm2200_vm8, %v1299_v46, %v481_v47  ;;  %v1308_v60 = vcombine.high %v477_v21, %v2191_v48  ;;  %v611_v63 = vrot.slane %v1305_v43, %v2170_v37  ;;  %v529_v2 = vcombine.low %v521_v54, %v528_v34  ;;  %v769_v48 = vld [vmem:[%s2596_s4 + $0x2f0] sm:$0xff]  ;;  %v782_v21 = vld [vmem:[%s2596_s4 + $0x358] sm:$0xff]  ;;  %v764_v34 = vld [vmem:[%s2596_s4 + $0x2c8] sm:$0xff] }
 0x113   :  { %954 = vmatmul.mubr.f32.vlgmr.msra.gmra.mxu0 %v565_v39  ;;  %v2264_v58 = vsel %vm2200_vm8, %v1300_v49, %v485_v50  ;;  %v547_v61 = vcombine.low %v539_v52, %v546_v53  ;;  %v639_v1 = vcombine.low %v2260_v57, %v2214_v11  ;;  %v2286_v6 = vrot.slane %v1307_v59, %v2170_v37  ;;  %v749_v31 = vld [vmem:[%s2596_s4 + $0x250] sm:$0xff]  ;;  %v748_v36 = vld [vmem:[%s2596_s4 + $0x248] sm:$0xff]  ;;  %v794_v38 = vld [vmem:[%s2596_s4 + $0x3b8] sm:$0xff] }
 0x114   :  { %1499 = vmatpush3.msra.mxu0 %v786_v44  ;;  %v640_v45 = vcombine.low %v2264_v58, %v2219_v15  ;;  %v619_v4 = vcombine.low %v611_v63, %v618_v55  ;;  %v2297_v12 = vrot.slane %v1308_v60, %v2170_v37  ;;  %v763_v39 = vld [vmem:[%s2596_s4 + $0x2c0] sm:$0xff]  ;;  %v778_v42 = vld [vmem:[%s2596_s4 + $0x338] sm:$0xff]  ;;  %v793_v44 = vld [vmem:[%s2596_s4 + $0x3b0] sm:$0xff] }
 0x115   :  { %1500 = vmatprep.subr.mxu0 %v801_v51  ;;  %883 = vmatprep.mubr.f32.mxu1 %v547_v61  ;;  %v647_v10 = vrot.slane %v639_v1, %v2170_v37  ;;  %v747_v43 = vld [vmem:[%s2596_s4 + $0x240] sm:$0xff]  ;;  %v762_v46 = vld [vmem:[%s2596_s4 + $0x2b8] sm:$0xff]  ;;  %v777_v47 = vld [vmem:[%s2596_s4 + $0x330] sm:$0xff]  ;;  %v622_v1 = vcombine.low %v2221_v16, %v2178_v41  ;;  %v621_v16 = vcombine.low %v2206_v7, %v2176_v40 }
 0x116   :  { %1501 = vmatpush3.msra.mxu0 %v785_v56  ;;  %884 = vmatmul.mubr.f32.vlgmr.msra.gmra.mxu1 %v529_v2  ;;  %v654_v11 = vrot.slane %v640_v45, %v2170_v37  ;;  %v673_v18 = vcombine.low %v2286_v6, %v2297_v12  ;;  %v746_v49 = vld [vmem:[%s2596_s4 + $0x238] sm:$0xff]  ;;  %v792_v50 = vld [vmem:[%s2596_s4 + $0x3a8] sm:$0xff]  ;;  %v761_v51 = vld [vmem:[%s2596_s4 + $0x2b0] sm:$0xff]  ;;  %v586_v45 = vcombine.low %v2241_v33, %v2264_v58 }
 0x117   :  { %1502 = vmatprep.subr.mxu0 %v800_v62  ;;  %1464 = vmatpush3.msra.mxu1 %v754_v0  ;;  %v776_v52 = vld [vmem:[%s2596_s4 + $0x328] sm:$0xff]  ;;  %v745_v53 = vld [vmem:[%s2596_s4 + $0x230] sm:$0xff]  ;;  %v791_v54 = vld [vmem:[%s2596_s4 + $0x3a0] sm:$0xff]  ;;  %v585_v58 = vcombine.low %v2234_v26, %v2260_v57  ;;  %v636_v7 = vrot.slane %v622_v1, %v2170_v37 }
 0x118   :  { %1023 = vmatprep.mubr.f32.mxu1 %v619_v4  ;;  %1465 = vmatprep.subr.mxu1 %v769_v48  ;;  %v655_v15 = vcombine.low %v647_v10, %v654_v11  ;;  %v760_v55 = vld [vmem:[%s2596_s4 + $0x2a8] sm:$0xff]  ;;  %v775_v56 = vld [vmem:[%s2596_s4 + $0x320] sm:$0xff]  ;;  %v790_v60 = vld [vmem:[%s2596_s4 + $0x398] sm:$0xff]  ;;  %v629_v10 = vrot.slane %v621_v16, %v2170_v37  ;;  %v600_v11 = vrot.slane %v586_v45, %v2170_v37 }
 0x119   :  { %1503 = vmatpush3.msra.mxu0 %v784_v5  ;;  %1466 = vmatpush3.msra.mxu1 %v753_v8  ;;  %v744_v59 = vld [vmem:[%s2596_s4 + $0x228] sm:$0xff]  ;;  %v759_v61 = vld [vmem:[%s2596_s4 + $0x2a0] sm:$0xff]  ;;  %v774_v62 = vld [vmem:[%s2596_s4 + $0x318] sm:$0xff] }
 0x11a   :  { %1504 = vmatprep.subr.mxu0 %v799_v9  ;;  %1467 = vmatprep.subr.mxu1 %v768_v13  ;;  %v743_v63 = vld [vmem:[%s2596_s4 + $0x220] sm:$0xff]  ;;  %v789_v2 = vld [vmem:[%s2596_s4 + $0x390] sm:$0xff]  ;;  %v758_v0 = vld [vmem:[%s2596_s4 + $0x298] sm:$0xff] }
 0x11b   :  { %1505 = vmatpush3.msra.mxu0 %v783_v14  ;;  %1093 = vmatprep.mubr.f32.mxu0 %v655_v15  ;;  %v773_v48 = vld [vmem:[%s2596_s4 + $0x310] sm:$0xff]  ;;  %v742_v41 = vld [vmem:[%s2596_s4 + $0x218] sm:$0xff]  ;;  %v788_v4 = vld [vmem:[%s2596_s4 + $0x388] sm:$0xff]  ;;  %v637_v14 = vcombine.low %v629_v10, %v636_v7 }
 0x11c   :  { %1468 = vmatpush3.msra.mxu1 %v752_v17  ;;  %1506 = vmatprep.subr.mxu0 %v798_v19  ;;  %v757_v33 = vld [vmem:[%s2596_s4 + $0x290] sm:$0xff]  ;;  %v772_v5 = vld [vmem:[%s2596_s4 + $0x308] sm:$0xff]  ;;  %v787_v8 = vld [vmem:[%s2596_s4 + $0x380] sm:$0xff]  ;;  %v593_v17 = vrot.slane %v585_v58, %v2170_v37 }
 0x11d   :  { %1469 = vmatprep.subr.mxu1 %v767_v20  ;;  %1507 = vmatpush3.msra.mxu0 %v782_v21  ;;  %v741_v40 = vld [vmem:[%s2596_s4 + $0x210] sm:$0xff]  ;;  %v756_v26 = vld [vmem:[%s2596_s4 + $0x288] sm:$0xff]  ;;  %v771_v57 = vld [vmem:[%s2596_s4 + $0x300] sm:$0xff] }
 0x11e   :  { %1470 = vmatpush3.msra.mxu1 %v751_v22  ;;  %1508 = vmatprep.subr.mxu0 %v797_v23  ;;  %v740_v9 = vld [vmem:[%s2596_s4 + $0x208] sm:$0xff]  ;;  %v755_v13 = vld [vmem:[%s2596_s4 + $0x280] sm:$0xff]  ;;  %v601_v19 = vcombine.low %v593_v17, %v600_v11  ;;  %v818_v20 = vld [vmem:[%s2596_s4 + $0x478] sm:$0xff] }
 0x11f   :  { %1471 = vmatprep.subr.mxu1 %v766_v24  ;;  %1509 = vmatpush3.msra.mxu0 %v781_v25  ;;  %v739_v15 = vld [vmem:[%s2596_s4 + $0x200] sm:$0xff]  ;;  %v1177_v21 = vld [vmem:[%s2599_s8 + $0x38] sm:$0xff]  ;;  %v817_v37 = vld [vmem:[%s2596_s4 + $0x470] sm:$0xff] }
 0x120   :  { %1472 = vmatpush3.msra.mxu1 %v750_v27  ;;  %1510 = vmatprep.subr.mxu0 %v796_v28  ;;  %v1176_v22 = vld [vmem:[%s2599_s8 + $0x30] sm:$0xff]  ;;  %v816_v23 = vld [vmem:[%s2596_s4 + $0x468] sm:$0xff]  ;;  %v815_v25 = vld [vmem:[%s2596_s4 + $0x460] sm:$0xff] }
 0x121   :  { %1473 = vmatprep.subr.mxu1 %v765_v29  ;;  %1511 = vmatpush3.msra.mxu0 %v780_v30  ;;  %v1175_v24 = vld [vmem:[%s2599_s8 + $0x28] sm:$0xff]  ;;  %v1174_v27 = vld [vmem:[%s2599_s8 + $0x20] sm:$0xff]  ;;  %v814_v28 = vld [vmem:[%s2596_s4 + $0x458] sm:$0xff] }
 0x122   :  { %1474 = vmatpush3.msra.mxu1 %v749_v31  ;;  %1512 = vmatprep.subr.mxu0 %v795_v32  ;;  %v1173_v29 = vld [vmem:[%s2599_s8 + $0x18] sm:$0xff]  ;;  %v813_v30 = vld [vmem:[%s2596_s4 + $0x450] sm:$0xff]  ;;  %v812_v32 = vld [vmem:[%s2596_s4 + $0x448] sm:$0xff] }
 0x123   :  { %1475 = vmatprep.subr.mxu1 %v764_v34  ;;  %1513 = vmatpush3.msra.mxu0 %v779_v35  ;;  %v1172_v31 = vld [vmem:[%s2599_s8 + $0x10] sm:$0xff]  ;;  %v1171_v34 = vld [vmem:[%s2599_s8 + $0x8] sm:$0xff]  ;;  %v811_v35 = vld [vmem:[%s2596_s4 + $0x440] sm:$0xff] }
 0x124   :  { %1476 = vmatpush3.msra.mxu1 %v748_v36  ;;  %1514 = vmatprep.subr.mxu0 %v794_v38  ;;  %v1170_v36 = vld [vmem:[%s2599_s8] sm:$0xff]  ;;  %v810_v38 = vld [vmem:[%s2596_s4 + $0x438] sm:$0xff] }
 0x125   :  { %1477 = vmatprep.subr.mxu1 %v763_v39  ;;  %1515 = vmatpush3.msra.mxu0 %v778_v42  ;;  %v1169_v39 = vld [vmem:[%s2600_s7] sm:$0xff]  ;;  %v809_v42 = vld [vmem:[%s2596_s4 + $0x430] sm:$0xff] }
 0x126   :  { %1478 = vmatpush3.msra.mxu1 %v747_v43  ;;  %1516 = vmatprep.subr.mxu0 %v793_v44  ;;  %v808_v43 = vld [vmem:[%s2596_s4 + $0x428] sm:$0xff]  ;;  %v807_v44 = vld [vmem:[%s2596_s4 + $0x420] sm:$0xff] }
 0x127   :  { %1479 = vmatprep.subr.mxu1 %v762_v46  ;;  %1517 = vmatpush3.msra.mxu0 %v777_v47  ;;  %v806_v46 = vld [vmem:[%s2596_s4 + $0x418] sm:$0xff]  ;;  %v805_v47 = vld [vmem:[%s2596_s4 + $0x410] sm:$0xff]  ;;  %v1310_v6 = vld [vmem:[%s2601_s9] ss:$0 sm:$0xff] }
 0x128   :  { %1480 = vmatpush3.msra.mxu1 %v746_v49  ;;  %1518 = vmatprep.subr.mxu0 %v792_v50  ;;  %v804_v49 = vld [vmem:[%s2596_s4 + $0x408] sm:$0xff]  ;;  %v803_v50 = vld [vmem:[%s2596_s4 + $0x400] sm:$0xff] }
 0x129   :  { %1481 = vmatprep.subr.mxu1 %v761_v51  ;;  %1519 = vmatpush3.msra.mxu0 %v776_v52  ;;  %v1311_v16 = vld [vmem:[%s2603_s10] ss:$0 sm:$0xff] }
 0x12a   :  { %1482 = vmatpush3.msra.mxu1 %v745_v53  ;;  %1520 = vmatprep.subr.mxu0 %v791_v54 }
 0x12b   :  { %1483 = vmatprep.subr.mxu1 %v760_v55  ;;  %1521 = vmatpush3.msra.mxu0 %v775_v56 }
 0x12c   :  { %1484 = vmatpush3.msra.mxu1 %v744_v59  ;;  %1522 = vmatprep.subr.mxu0 %v790_v60 }
 0x12d   :  { %1485 = vmatprep.subr.mxu1 %v759_v61  ;;  %1523 = vmatpush3.msra.mxu0 %v774_v62 }
 0x12e   :  { %1486 = vmatpush3.msra.mxu1 %v743_v63  ;;  %1524 = vmatprep.subr.mxu0 %v789_v2 }
 0x12f   :  { %1487 = vmatprep.subr.mxu1 %v758_v0  ;;  %1525 = vmatpush3.msra.mxu0 %v773_v48 }
 0x130   :  { %1488 = vmatpush3.msra.mxu1 %v742_v41  ;;  %1526 = vmatprep.subr.mxu0 %v788_v4  ;;  %v1312_v41 = vld [vmem:[%s2602_s5] ss:$0 sm:$0xff] }
 0x131   :  { %1489 = vmatprep.subr.mxu1 %v757_v33  ;;  %1527 = vmatpush3.msra.mxu0 %v772_v5  ;;  %v1313_v33 = vld [vmem:[%s2604_s6] ss:$0 sm:$0xff] }
 0x132   :  { %1490 = vmatpush3.msra.mxu1 %v741_v40  ;;  %1528 = vmatprep.subr.mxu0 %v787_v8 }
 0x133   :  { %1491 = vmatprep.subr.mxu1 %v756_v26  ;;  %1529 = vmatpush3.msra.mxu0 %v771_v57 }
 0x134   :  { %1492 = vmatpush3.msra.mxu1 %v740_v9  ;;  %1094 = vmatmul.mubr.f32.vlgmr.msra.gmra.mxu0 %v637_v14 }
 0x135   :  { %1493 = vmatprep.subr.mxu1 %v755_v13  ;;  %1613 = vmatprep.subr.mxu0 %v1641_v3 }
 0x136   :  { %1494 = vmatpush3.msra.mxu1 %v739_v15  ;;  %1614 = vmatpush3.msra.mxu0 %v1177_v21 }
 0x137   :  { %1024 = vmatmul.mubr.f32.vlgmr.msra.gmra.mxu1 %v601_v19  ;;  %1578 = vmatprep.subr.mxu1 %v1641_v3 }
 0x138   :  { %1579 = vmatpush3.msra.mxu1 %v818_v20  ;;  %1615 = vmatprep.subr.mxu0 %v1641_v3 }
 0x139   :  { %1580 = vmatprep.subr.mxu1 %v1641_v3  ;;  %1616 = vmatpush3.msra.mxu0 %v1176_v22 }
 0x13a   :  { %1581 = vmatpush3.msra.mxu1 %v817_v37  ;;  %1617 = vmatprep.subr.mxu0 %v1641_v3 }
 0x13b   :  { %1582 = vmatprep.subr.mxu1 %v1641_v3  ;;  %1618 = vmatpush3.msra.mxu0 %v1175_v24 }
 0x13c   :  { %1583 = vmatpush3.msra.mxu1 %v816_v23  ;;  %1619 = vmatprep.subr.mxu0 %v1641_v3 }
 0x13d   :  { %1584 = vmatprep.subr.mxu1 %v1641_v3  ;;  %1620 = vmatpush3.msra.mxu0 %v1174_v27 }
 0x13e   :  { %1585 = vmatpush3.msra.mxu1 %v815_v25  ;;  %1621 = vmatprep.subr.mxu0 %v1641_v3 }
 0x13f   :  { %1586 = vmatprep.subr.mxu1 %v1641_v3  ;;  %1622 = vmatpush3.msra.mxu0 %v1173_v29 }
 0x140   :  { %1587 = vmatpush3.msra.mxu1 %v814_v28  ;;  %1623 = vmatprep.subr.mxu0 %v1641_v3 }
 0x141   :  { %1588 = vmatprep.subr.mxu1 %v1641_v3  ;;  %1624 = vmatpush3.msra.mxu0 %v1172_v31 }
 0x142   :  { %1589 = vmatpush3.msra.mxu1 %v813_v30  ;;  %1625 = vmatprep.subr.mxu0 %v1641_v3 }
 0x143   :  { %1590 = vmatprep.subr.mxu1 %v1641_v3  ;;  %1626 = vmatpush3.msra.mxu0 %v1171_v34 }
 0x144   :  { %1591 = vmatpush3.msra.mxu1 %v812_v32  ;;  %1627 = vmatprep.subr.mxu0 %v1641_v3 }
 0x145   :  { %1592 = vmatprep.subr.mxu1 %v1641_v3  ;;  %1610 = vmatprep.mubr.msk.f32.mxu1 %vm1642_vm0, %v1641_v3 }
 0x146   :  { %1593 = vmatpush3.msra.mxu1 %v811_v35  ;;  %1628 = vmatpush3.msra.mxu0 %v1170_v36 }
 0x147   :  { %1594 = vmatprep.subr.mxu1 %v1641_v3  ;;  %1629 = vmatprep.mubr.msk.f32.mxu0 %vm1642_vm0, %v1641_v3 }
 0x148   :  { %1595 = vmatpush3.msra.mxu1 %v810_v38  ;;  %1630 = vmatmul.mubr.msk.f32.vlgmr.msra.gmra.mxu0 %vm115_vm1, %v1169_v39 }
 0x149   :  { %1596 = vmatprep.subr.mxu1 %v1641_v3 }
 0x14a   :  { %1597 = vmatpush3.msra.mxu1 %v809_v42 }
 0x14b   :  { %1598 = vmatprep.subr.mxu1 %v1641_v3 }
 0x14c   :  { %1599 = vmatpush3.msra.mxu1 %v808_v43 }
 0x14d   :  { %1600 = vmatprep.subr.mxu1 %v1641_v3 }
 0x14e   :  { %1601 = vmatpush3.msra.mxu1 %v807_v44 }
 0x14f   :  { %1602 = vmatprep.subr.mxu1 %v1641_v3 }
 0x150   :  { %1603 = vmatpush3.msra.mxu1 %v806_v46 }
 0x151   :  { %1604 = vmatprep.subr.mxu1 %v1641_v3 }
 0x152   :  { %1605 = vmatpush3.msra.mxu1 %v805_v47 }
 0x153   :  { %1606 = vmatprep.subr.mxu1 %v1641_v3 }
 0x154   :  { %1607 = vmatpush3.msra.mxu1 %v804_v49 }
 0x155   :  { %1608 = vmatprep.subr.mxu1 %v1641_v3 }
 0x156   :  { %1609 = vmatpush3.msra.mxu1 %v803_v50 }
 0x157   :  { %1611 = vmatmul.mubr.f32.vlgmr.msra.gmra.mxu1 %v673_v18 }
 0x1d3   :  { %v1460_v51 = vpop.f32.mrf.mxu0 }
 0x1d5   :  { %v1461_v52 = vpop.f32.mrf.mxu0 }
 0x1d6   :  { %v1425_v53 = vpop.f32.mrf.mxu1  ;;  %v1462_v1 = vadd.f32 %v1461_v52, %v1460_v51 }
 0x1d8   :  { %v1426_v55 = vpop.f32.mrf.mxu1 }
 0x1d9   :  { %v1427_v63 = vadd.f32 %v1426_v55, %v1425_v53 }
 0x1db   :  { %v956_v0 = vadd.f32 %v1462_v1, %v1427_v63 }
 0x1f4   :  { %v1530_v54 = vpop.f32.mrf.mxu0 }
 0x1f6   :  { %v1531_v56 = vpop.f32.mrf.mxu0 }
 0x1f7   :  { %v1495_v59 = vpop.f32.mrf.mxu1  ;;  %v1532_v12 = vadd.f32 %v1531_v56, %v1530_v54 }
 0x1f9   :  { %v1496_v61 = vpop.f32.mrf.mxu1 }
 0x1fa   :  { %v1497_v2 = vadd.f32 %v1496_v61, %v1495_v59 }
 0x1fc   :  { %v1026_v3 = vadd.f32 %v1497_v2, %v956_v0 }
 0x1fe   :  { %v1096_v18 = vadd.f32 %v1532_v12, %v1026_v3 }
 0x208   :  { %v1247_v60 = vpop.f32.mrf.mxu0 }
 0x209   :  { %v1258_v45 = vmul.f32 %v1310_v6, %v1247_v60 }
 0x20a   :  { %v1631_v62 = vpop.f32.mrf.mxu0 }
 0x20b   :  { %v1266_v40 = vadd.f32 %v1311_v16, %v1258_v45 }
 0x217   :  { %v1165_v48 = vpop.f32.mrf.mxu1 }
 0x218   :  { %v1166_v4 = vadd.f32 %v1165_v48, %v1096_v18 }
 0x219   :  { %v1612_v58 = vpop.f32.mrf.mxu1 }
 0x21a   :  { %v1274_v5 = vmul.f32 %v1312_v41, %v1166_v4 }
 0x21c   :  { %v1282_v7 = vadd.f32 %v1313_v33, %v1274_v5 }
 0x21e   :  { %v1283_v8 = vadd.f32 %v1282_v7, %v1266_v40 }
 0x220   :  { %v1284_v26 = vmax.f32 %v1283_v8, 0.0 }
 0x222   :  { %1285 = vst [vmem:[%s2605_s11] sm:$0xff] %v1284_v26 }

</bundles_post_ra>
